<compile_context>
chip_gen: v7x
topology: tpu7x:2x2x1
jax: 0.10.0
libtpu: 0.0.40
codegen_flags: <defaults>
</compile_context>

<pallas_src>
import functools

import jax
import jax.numpy as jnp
from jax.experimental import pallas as pl
from jax.experimental.pallas import tpu as pltpu


LANES = 128  # TPU lane width; all channel dims are padded to this.


def _round_up(x, m):
    return (x + m - 1) // m * m


# ----------------------------------------------------------------------------
# Fused DownLayer kernel: [2x2 maxpool] -> conv3x3+b+ReLU -> conv3x3+b+ReLU
# ----------------------------------------------------------------------------
def _down_layer_kernel(x_ref, w1_ref, b1_ref, w2_ref, b2_ref, o_ref,
                       pad_ref, col_ref, *, pool, Hp, Wp, WR, T, C):
    """One image per grid step; everything stays VMEM resident.

    Workspace layout (pad_ref, bf16, shape (R, C)):
      rows [0, T)               zero  (top border, re-zeroed every step)
      row  [T + h*WR + w]       activation pixel (h, w) for w < Wp,
                                zeros for Wp <= w < WR   (W padding)
      rows [T + Hp*WR, R)       zero  (bottom border, re-zeroed every step)
    With this layout every conv tap (dh, dw) of every output pixel is a single
    contiguous row range of pad_ref, so the 9 taps are packed into the
    contraction dim (im2col) with contiguous copies and each conv is one MXU
    matmul of (Hp*WR, 9*C) x (9*C, C).
    """
    Mo = Hp * WR                       # oversized (W-padded) output rows
    R = pad_ref.shape[0]
    base = T - WR - 1                  # workspace row of xpad[-1, -1] for out (0, 0)

    # Border-only zeroing (interior is fully overwritten every step).  Done
    # every step: ~2*(WR+8) rows, and safe under megacore per-core scratch.
    pad_ref[0:T, :] = jnp.zeros((T, C), jnp.bfloat16)
    pad_ref[T + Mo:R, :] = jnp.zeros((R - T - Mo, C), jnp.bfloat16)

    # ---- conv1 input -> workspace data region (one dense aligned store) ----
    if pool:
        # x block: (1, Hp, 2, WR, 2*C).  H taps via integer index on dim 2,
        # W taps are the two lane-aligned 128-channel halves of the minor dim.
        hm = jnp.maximum(x_ref[0, :, 0, :, :], x_ref[0, :, 1, :, :])
        xin = jnp.maximum(hm[:, :, :C], hm[:, :, C:])            # (Hp, WR, C)
        pad_ref[T:T + Mo, :] = xin.reshape(Mo, C)
    else:
        pad_ref[T:T + Mo, :] = x_ref[0]                          # (Mo, C)

    # Columns w >= Wp of each WR-wide row block are not real outputs (their
    # taps wrap across the W border); force them to zero so they double as the
    # W padding for the following conv / layer.
    w_idx = jax.lax.broadcasted_iota(jnp.int32, (Hp, WR, C), 1).reshape(Mo, C)
    valid = w_idx < Wp

    def conv3x3_relu(w_ref, b_ref):
        # im2col: 9 contiguous row-range taps -> lane-aligned K slabs.
        for t in range(9):
            dh, dw = divmod(t, 3)
            off = base + dh * WR + dw
            col_ref[:, t * C:(t + 1) * C] = pad_ref[off:off + Mo, :]
        acc = jnp.dot(col_ref[...], w_ref[...],
                      preferred_element_type=jnp.float32)        # (Mo, C) f32
        acc = jnp.maximum(acc + b_ref[...], 0.0)                 # bias + ReLU
        return jnp.where(valid, acc, 0.0)

    h1 = conv3x3_relu(w1_ref, b1_ref)
    pad_ref[T:T + Mo, :] = h1.astype(jnp.bfloat16)   # conv2 input, cast+ReLU'd
    h2 = conv3x3_relu(w2_ref, b2_ref)
    o_ref[0] = h2.astype(o_ref.dtype)                # lane/sublane-dense store


# ----------------------------------------------------------------------------
# pallas_call wrapper for one DownLayer
# ----------------------------------------------------------------------------
def _down_layer(x_flat, w1, b1, w2, b2, *, pool, Hin, Win, WRin):
    """x_flat: (N, Hin*WRin, 128) bf16 activations in W-padded row layout."""
    N = x_flat.shape[0]
    C = LANES
    if pool:
        Hp, Wp, WR = Hin // 2, Win // 2, WRin // 2
        # Free reshape exposing the 2x2 pool taps (H taps / W taps).
        x_in = x_flat.reshape(N, Hp, 2, WR, 2 * C)
        x_spec = pl.BlockSpec((1, Hp, 2, WR, 2 * C), lambda n: (n, 0, 0, 0, 0))
    else:
        Hp, Wp, WR = Hin, Win, WRin
        x_in = x_flat
        x_spec = pl.BlockSpec((1, Hp * WR, C), lambda n: (n, 0, 0))

    T = WR + 8                       # zero rows above the data region (8-aligned)
    Mo = Hp * WR
    R = T + Mo + WR + 8              # + bottom zero rows and tap-slice margin
    K = 9 * C

    kernel = functools.partial(_down_layer_kernel, pool=pool,
                               Hp=Hp, Wp=Wp, WR=WR, T=T, C=C)

    out = pl.pallas_call(
        kernel,
        out_shape=jax.ShapeDtypeStruct((N, Mo, C), jnp.bfloat16),
        grid_spec=pltpu.PrefetchScalarGridSpec(
            num_scalar_prefetch=0,
            grid=(N,),
            in_specs=[
                x_spec,
                pl.BlockSpec((K, C), lambda n: (0, 0)),   # w1 (stays resident)
                pl.BlockSpec((1, C), lambda n: (0, 0)),   # b1
                pl.BlockSpec((K, C), lambda n: (0, 0)),   # w2 (stays resident)
                pl.BlockSpec((1, C), lambda n: (0, 0)),   # b2
            ],
            out_specs=pl.BlockSpec((1, Mo, C), lambda n: (n, 0, 0)),
            scratch_shapes=[
                pltpu.VMEM((R, C), jnp.bfloat16),    # padded conv workspace
                pltpu.VMEM((Mo, K), jnp.bfloat16),   # im2col (taps packed in K)
            ],
        ),
        compiler_params=pltpu.CompilerParams(
            dimension_semantics=("parallel",)),
    )(x_in, w1, b1, w2, b2)
    return out, Hp, Wp, WR


# ----------------------------------------------------------------------------
# Parameter packing (PyTorch layout -> MXU-friendly packed layout)
# ----------------------------------------------------------------------------
def _pack_weight(w_pt):
    """PyTorch (Cout, Cin, 3, 3) -> (9*128, 128) bf16 with taps packed along K."""
    cout, cin, kh, kw = w_pt.shape
    assert cin <= LANES and cout <= LANES  # TODO(synk): tile K/N for >128 ch
    w = jnp.transpose(w_pt, (2, 3, 1, 0))                     # (3, 3, Cin, Cout)
    w = jnp.pad(w, ((0, 0), (0, 0), (0, LANES - cin), (0, LANES - cout)))
    return w.reshape(kh * kw * LANES, LANES).astype(jnp.bfloat16)


def _pack_bias(b_pt):
    c = b_pt.shape[0]
    return jnp.pad(b_pt, (0, LANES - c)).reshape(1, LANES).astype(jnp.float32)


# ----------------------------------------------------------------------------
# VGG module: parameter init + forward
# ----------------------------------------------------------------------------
def init_vgg_params(key, input_channels, down):
    """Deterministic synthetic parameters for each DownLayer (two 3x3 convs)."""
    params = []
    dims = [input_channels] + list(down)
    for din, dout in zip(dims[:-1], dims[1:]):
        key, k1, k2 = jax.random.split(key, 3)
        params.append(dict(
            w1=0.1 * jax.random.normal(k1, (dout, din, 3, 3), jnp.float32),
            b1=jnp.zeros((dout,), jnp.float32),
            w2=0.1 * jax.random.normal(k2, (dout, dout, 3, 3), jnp.float32),
            b2=jnp.zeros((dout,), jnp.float32),
        ))
    return params


def vgg_forward(params, x_nchw):
    """Matches VGG.forward (sequential DownLayers). I/O is NCHW f32."""
    N, Cin, H, W = x_nchw.shape
    L = len(params)
    n_pools = L - 1
    assert H % (1 << n_pools) == 0 and W % (1 << n_pools) == 0

    # Stored row width for layer 0: halving it once per pool must keep every
    # layer's width a multiple of 8 with >= 2 zero W-padding columns.
    WR0 = _round_up(W + (2 << n_pools), 8 << n_pools)

    # NCHW -> NHWC, pad channels to the 128-lane width, W-pad, row-flatten.
    x = jnp.transpose(x_nchw, (0, 2, 3, 1)).astype(jnp.bfloat16)
    x = jnp.pad(x, ((0, 0), (0, 0), (0, WR0 - W), (0, LANES - Cin)))
    x = x.reshape(N, H * WR0, LANES)

    Hin, Win, WRin = H, W, WR0
    for i, p in enumerate(params):
        w1 = _pack_weight(p["w1"])
        b1 = _pack_bias(p["b1"])
        w2 = _pack_weight(p["w2"])
        b2 = _pack_bias(p["b2"])
        x, Hin, Win, WRin = _down_layer(x, w1, b1, w2, b2, pool=(i > 0),
                                        Hin=Hin, Win=Win, WRin=WRin)

    # Strip W / channel padding; back to NCHW f32 like the PyTorch module.
    cout = params[-1]["w2"].shape[0]
    out = x.reshape(N, Hin, WRin, LANES)[:, :, :Win, :cout]
    return jnp.transpose(out, (0, 3, 1, 2)).astype(jnp.float32)


if __name__ == "__main__":
    key = jax.random.PRNGKey(0)
    kx, kp = jax.random.split(key)

    # Small shapes consistent with the module: batch=2, input_channels=3,
    # 16x16 spatial, down=(8, 16) -> output (2, 16, 8, 8).
    N, Cin, H, W = 2, 3, 16, 16
    down = (8, 16)

    x = jax.random.normal(kx, (N, Cin, H, W), jnp.float32)
    params = init_vgg_params(kp, Cin, down)

    fwd = jax.jit(vgg_forward)
    out = fwd(params, x)
    jax.block_until_ready(out)

    n_pools = len(down) - 1
    assert out.shape == (N, down[-1], H >> n_pools, W >> n_pools), out.shape
    assert bool(jnp.all(out >= 0.0))             # ReLU output
    print("KERNEL_OK")
</pallas_src>

<mosaic_0001>
module attributes {stable_mosaic.version = 11 : i64} {
  func.func @_down_layer_kernel(%arg0: i32, %arg1: memref<1x512x128xbf16, #tpu.memory_space<vmem>>, %arg2: memref<1152x128xbf16, #tpu.memory_space<vmem>>, %arg3: memref<1x128xf32, #tpu.memory_space<vmem>>, %arg4: memref<1152x128xbf16, #tpu.memory_space<vmem>>, %arg5: memref<1x128xf32, #tpu.memory_space<vmem>>, %arg6: memref<1x512x128xbf16, #tpu.memory_space<vmem>>, %arg7: memref<592x128xbf16, #tpu.memory_space<vmem>>, %arg8: memref<512x1152xbf16, #tpu.memory_space<vmem>>) attributes {dimension_semantics = [#tpu.dimension_semantics<parallel>], iteration_bounds = array<i64: 2>, scalar_prefetch = 0 : i64, scratch_operands = 2 : i64, tpu.core_type = #tpu.core_type<tc>, window_params = [{transform_indices = @transform_0, window_bounds = array<i64: 1, 512, 128>}, {pipeline_mode = #tpu.pipeline_mode<synchronous>, transform_indices = @transform_1, window_bounds = array<i64: 1152, 128>}, {pipeline_mode = #tpu.pipeline_mode<synchronous>, transform_indices = @transform_2, window_bounds = array<i64: 1, 128>}, {pipeline_mode = #tpu.pipeline_mode<synchronous>, transform_indices = @transform_3, window_bounds = array<i64: 1152, 128>}, {pipeline_mode = #tpu.pipeline_mode<synchronous>, transform_indices = @transform_4, window_bounds = array<i64: 1, 128>}, {transform_indices = @transform_5, window_bounds = array<i64: 1, 512, 128>}]} {
    %cst = arith.constant 0.000000e+00 : bf16
    %0 = vector.broadcast %cst : bf16 to vector<40x128xbf16>
    %c0 = arith.constant 0 : index
    %c0_0 = arith.constant 0 : index
    %1 = vector.load %arg7[%c0, %c0_0] : memref<592x128xbf16, #tpu.memory_space<vmem>>, vector<40x128xbf16>
    tpu.vector_store %arg7[%c0, %c0_0], %0 {strides = array<i32>} : memref<592x128xbf16, #tpu.memory_space<vmem>>, vector<40x128xbf16>,
    %cst_1 = arith.constant 0.000000e+00 : bf16
    %2 = vector.broadcast %cst_1 : bf16 to vector<40x128xbf16>
    %c552 = arith.constant 552 : index
    %c0_2 = arith.constant 0 : index
    %3 = vector.load %arg7[%c552, %c0_2] : memref<592x128xbf16, #tpu.memory_space<vmem>>, vector<40x128xbf16>
    tpu.vector_store %arg7[%c552, %c0_2], %2 {strides = array<i32>} : memref<592x128xbf16, #tpu.memory_space<vmem>>, vector<40x128xbf16>,
    %c0_3 = arith.constant 0 : index
    %c0_4 = arith.constant 0 : index
    %c0_5 = arith.constant 0 : index
    %4 = vector.load %arg1[%c0_3, %c0_4, %c0_5] : memref<1x512x128xbf16, #tpu.memory_space<vmem>>, vector<1x512x128xbf16>
    %5 = vector.shape_cast %4 : vector<1x512x128xbf16> to vector<512x128xbf16>
    %c40 = arith.constant 40 : index
    %c0_6 = arith.constant 0 : index
    %6 = vector.load %arg7[%c40, %c0_6] : memref<592x128xbf16, #tpu.memory_space<vmem>>, vector<512x128xbf16>
    tpu.vector_store %arg7[%c40, %c0_6], %5 {strides = array<i32>} : memref<592x128xbf16, #tpu.memory_space<vmem>>, vector<512x128xbf16>,
    %7 = tpu.iota {dimensions = array<i32: 1>} : vector<16x32x128xi32>
    %8 = vector.shape_cast %7 : vector<16x32x128xi32> to vector<512x128xi32>
    %c16_i32 = arith.constant 16 : i32
    %9 = vector.broadcast %c16_i32 : i32 to vector<512x128xi32>
    %10 = arith.cmpi slt, %8, %9 : vector<512x128xi32>
    %c7 = arith.constant 7 : index
    %c0_7 = arith.constant 0 : index
    %11 = vector.load %arg7[%c7, %c0_7] : memref<592x128xbf16, #tpu.memory_space<vmem>>, vector<512x128xbf16>
    %c0_8 = arith.constant 0 : index
    %c0_9 = arith.constant 0 : index
    %12 = vector.load %arg8[%c0_8, %c0_9] : memref<512x1152xbf16, #tpu.memory_space<vmem>>, vector<512x128xbf16>
    tpu.vector_store %arg8[%c0_8, %c0_9], %11 {strides = array<i32>} : memref<512x1152xbf16, #tpu.memory_space<vmem>>, vector<512x128xbf16>,
    %c8 = arith.constant 8 : index
    %c0_10 = arith.constant 0 : index
    %13 = vector.load %arg7[%c8, %c0_10] : memref<592x128xbf16, #tpu.memory_space<vmem>>, vector<512x128xbf16>
    %c0_11 = arith.constant 0 : index
    %c128 = arith.constant 128 : index
    %14 = vector.load %arg8[%c0_11, %c128] : memref<512x1152xbf16, #tpu.memory_space<vmem>>, vector<512x128xbf16>
    tpu.vector_store %arg8[%c0_11, %c128], %13 {strides = array<i32>} : memref<512x1152xbf16, #tpu.memory_space<vmem>>, vector<512x128xbf16>,
    %c9 = arith.constant 9 : index
    %c0_12 = arith.constant 0 : index
    %15 = vector.load %arg7[%c9, %c0_12] : memref<592x128xbf16, #tpu.memory_space<vmem>>, vector<512x128xbf16>
    %c0_13 = arith.constant 0 : index
    %c256 = arith.constant 256 : index
    %16 = vector.load %arg8[%c0_13, %c256] : memref<512x1152xbf16, #tpu.memory_space<vmem>>, vector<512x128xbf16>
    tpu.vector_store %arg8[%c0_13, %c256], %15 {strides = array<i32>} : memref<512x1152xbf16, #tpu.memory_space<vmem>>, vector<512x128xbf16>,
    %c39 = arith.constant 39 : index
    %c0_14 = arith.constant 0 : index
    %17 = vector.load %arg7[%c39, %c0_14] : memref<592x128xbf16, #tpu.memory_space<vmem>>, vector<512x128xbf16>
    %c0_15 = arith.constant 0 : index
    %c384 = arith.constant 384 : index
    %18 = vector.load %arg8[%c0_15, %c384] : memref<512x1152xbf16, #tpu.memory_space<vmem>>, vector<512x128xbf16>
    tpu.vector_store %arg8[%c0_15, %c384], %17 {strides = array<i32>} : memref<512x1152xbf16, #tpu.memory_space<vmem>>, vector<512x128xbf16>,
    %c40_16 = arith.constant 40 : index
    %c0_17 = arith.constant 0 : index
    %19 = vector.load %arg7[%c40_16, %c0_17] : memref<592x128xbf16, #tpu.memory_space<vmem>>, vector<512x128xbf16>
    %c0_18 = arith.constant 0 : index
    %c512 = arith.constant 512 : index
    %20 = vector.load %arg8[%c0_18, %c512] : memref<512x1152xbf16, #tpu.memory_space<vmem>>, vector<512x128xbf16>
    tpu.vector_store %arg8[%c0_18, %c512], %19 {strides = array<i32>} : memref<512x1152xbf16, #tpu.memory_space<vmem>>, vector<512x128xbf16>,
    %c41 = arith.constant 41 : index
    %c0_19 = arith.constant 0 : index
    %21 = vector.load %arg7[%c41, %c0_19] : memref<592x128xbf16, #tpu.memory_space<vmem>>, vector<512x128xbf16>
    %c0_20 = arith.constant 0 : index
    %c640 = arith.constant 640 : index
    %22 = vector.load %arg8[%c0_20, %c640] : memref<512x1152xbf16, #tpu.memory_space<vmem>>, vector<512x128xbf16>
    tpu.vector_store %arg8[%c0_20, %c640], %21 {strides = array<i32>} : memref<512x1152xbf16, #tpu.memory_space<vmem>>, vector<512x128xbf16>,
    %c71 = arith.constant 71 : index
    %c0_21 = arith.constant 0 : index
    %23 = vector.load %arg7[%c71, %c0_21] : memref<592x128xbf16, #tpu.memory_space<vmem>>, vector<512x128xbf16>
    %c0_22 = arith.constant 0 : index
    %c768 = arith.constant 768 : index
    %24 = vector.load %arg8[%c0_22, %c768] : memref<512x1152xbf16, #tpu.memory_space<vmem>>, vector<512x128xbf16>
    tpu.vector_store %arg8[%c0_22, %c768], %23 {strides = array<i32>} : memref<512x1152xbf16, #tpu.memory_space<vmem>>, vector<512x128xbf16>,
    %c72 = arith.constant 72 : index
    %c0_23 = arith.constant 0 : index
    %25 = vector.load %arg7[%c72, %c0_23] : memref<592x128xbf16, #tpu.memory_space<vmem>>, vector<512x128xbf16>
    %c0_24 = arith.constant 0 : index
    %c896 = arith.constant 896 : index
    %26 = vector.load %arg8[%c0_24, %c896] : memref<512x1152xbf16, #tpu.memory_space<vmem>>, vector<512x128xbf16>
    tpu.vector_store %arg8[%c0_24, %c896], %25 {strides = array<i32>} : memref<512x1152xbf16, #tpu.memory_space<vmem>>, vector<512x128xbf16>,
    %c73 = arith.constant 73 : index
    %c0_25 = arith.constant 0 : index
    %27 = vector.load %arg7[%c73, %c0_25] : memref<592x128xbf16, #tpu.memory_space<vmem>>, vector<512x128xbf16>
    %c0_26 = arith.constant 0 : index
    %c1024 = arith.constant 1024 : index
    %28 = vector.load %arg8[%c0_26, %c1024] : memref<512x1152xbf16, #tpu.memory_space<vmem>>, vector<512x128xbf16>
    tpu.vector_store %arg8[%c0_26, %c1024], %27 {strides = array<i32>} : memref<512x1152xbf16, #tpu.memory_space<vmem>>, vector<512x128xbf16>,
    %c0_27 = arith.constant 0 : index
    %c0_28 = arith.constant 0 : index
    %29 = vector.load %arg8[%c0_27, %c0_28] : memref<512x1152xbf16, #tpu.memory_space<vmem>>, vector<512x1152xbf16>
    %c0_29 = arith.constant 0 : index
    %c0_30 = arith.constant 0 : index
    %30 = vector.load %arg2[%c0_29, %c0_30] : memref<1152x128xbf16, #tpu.memory_space<vmem>>, vector<1152x128xbf16>
    %cst_31 = arith.constant dense<0.000000e+00> : vector<512x128xf32>
    %31 = tpu.matmul %29, %30, %cst_31 {dimension_numbers = #tpu.dot_dimension_numbers<[1], [0], [0], [1], [0, 0, 1, 1], [], []>} : vector<512x1152xbf16>, vector<1152x128xbf16>, vector<512x128xf32> -> vector<512x128xf32>
    %c0_32 = arith.constant 0 : index
    %c0_33 = arith.constant 0 : index
    %32 = vector.load %arg3[%c0_32, %c0_33] : memref<1x128xf32, #tpu.memory_space<vmem>>, vector<1x128xf32>
    %33 = vector.broadcast %32 : vector<1x128xf32> to vector<512x128xf32>
    %34 = arith.addf %31, %33 : vector<512x128xf32>
    %cst_34 = arith.constant 0.000000e+00 : f32
    %35 = vector.broadcast %cst_34 : f32 to vector<512x128xf32>
    %36 = arith.maximumf %34, %35 : vector<512x128xf32>
    %cst_35 = arith.constant 0.000000e+00 : f32
    %37 = vector.broadcast %cst_35 : f32 to vector<512x128xf32>
    %38 = arith.select %10, %36, %37 : vector<512x128xi1>, vector<512x128xf32>
    %39 = arith.truncf %38 : vector<512x128xf32> to vector<512x128xbf16>
    %c40_36 = arith.constant 40 : index
    %c0_37 = arith.constant 0 : index
    %40 = vector.load %arg7[%c40_36, %c0_37] : memref<592x128xbf16, #tpu.memory_space<vmem>>, vector<512x128xbf16>
    tpu.vector_store %arg7[%c40_36, %c0_37], %39 {strides = array<i32>} : memref<592x128xbf16, #tpu.memory_space<vmem>>, vector<512x128xbf16>,
    %c7_38 = arith.constant 7 : index
    %c0_39 = arith.constant 0 : index
    %41 = vector.load %arg7[%c7_38, %c0_39] : memref<592x128xbf16, #tpu.memory_space<vmem>>, vector<512x128xbf16>
    %c0_40 = arith.constant 0 : index
    %c0_41 = arith.constant 0 : index
    %42 = vector.load %arg8[%c0_40, %c0_41] : memref<512x1152xbf16, #tpu.memory_space<vmem>>, vector<512x128xbf16>
    tpu.vector_store %arg8[%c0_40, %c0_41], %41 {strides = array<i32>} : memref<512x1152xbf16, #tpu.memory_space<vmem>>, vector<512x128xbf16>,
    %c8_42 = arith.constant 8 : index
    %c0_43 = arith.constant 0 : index
    %43 = vector.load %arg7[%c8_42, %c0_43] : memref<592x128xbf16, #tpu.memory_space<vmem>>, vector<512x128xbf16>
    %c0_44 = arith.constant 0 : index
    %c128_45 = arith.constant 128 : index
    %44 = vector.load %arg8[%c0_44, %c128_45] : memref<512x1152xbf16, #tpu.memory_space<vmem>>, vector<512x128xbf16>
    tpu.vector_store %arg8[%c0_44, %c128_45], %43 {strides = array<i32>} : memref<512x1152xbf16, #tpu.memory_space<vmem>>, vector<512x128xbf16>,
    %c9_46 = arith.constant 9 : index
    %c0_47 = arith.constant 0 : index
    %45 = vector.load %arg7[%c9_46, %c0_47] : memref<592x128xbf16, #tpu.memory_space<vmem>>, vector<512x128xbf16>
    %c0_48 = arith.constant 0 : index
    %c256_49 = arith.constant 256 : index
    %46 = vector.load %arg8[%c0_48, %c256_49] : memref<512x1152xbf16, #tpu.memory_space<vmem>>, vector<512x128xbf16>
    tpu.vector_store %arg8[%c0_48, %c256_49], %45 {strides = array<i32>} : memref<512x1152xbf16, #tpu.memory_space<vmem>>, vector<512x128xbf16>,
    %c39_50 = arith.constant 39 : index
    %c0_51 = arith.constant 0 : index
    %47 = vector.load %arg7[%c39_50, %c0_51] : memref<592x128xbf16, #tpu.memory_space<vmem>>, vector<512x128xbf16>
    %c0_52 = arith.constant 0 : index
    %c384_53 = arith.constant 384 : index
    %48 = vector.load %arg8[%c0_52, %c384_53] : memref<512x1152xbf16, #tpu.memory_space<vmem>>, vector<512x128xbf16>
    tpu.vector_store %arg8[%c0_52, %c384_53], %47 {strides = array<i32>} : memref<512x1152xbf16, #tpu.memory_space<vmem>>, vector<512x128xbf16>,
    %c40_54 = arith.constant 40 : index
    %c0_55 = arith.constant 0 : index
    %49 = vector.load %arg7[%c40_54, %c0_55] : memref<592x128xbf16, #tpu.memory_space<vmem>>, vector<512x128xbf16>
    %c0_56 = arith.constant 0 : index
    %c512_57 = arith.constant 512 : index
    %50 = vector.load %arg8[%c0_56, %c512_57] : memref<512x1152xbf16, #tpu.memory_space<vmem>>, vector<512x128xbf16>
    tpu.vector_store %arg8[%c0_56, %c512_57], %49 {strides = array<i32>} : memref<512x1152xbf16, #tpu.memory_space<vmem>>, vector<512x128xbf16>,
    %c41_58 = arith.constant 41 : index
    %c0_59 = arith.constant 0 : index
    %51 = vector.load %arg7[%c41_58, %c0_59] : memref<592x128xbf16, #tpu.memory_space<vmem>>, vector<512x128xbf16>
    %c0_60 = arith.constant 0 : index
    %c640_61 = arith.constant 640 : index
    %52 = vector.load %arg8[%c0_60, %c640_61] : memref<512x1152xbf16, #tpu.memory_space<vmem>>, vector<512x128xbf16>
    tpu.vector_store %arg8[%c0_60, %c640_61], %51 {strides = array<i32>} : memref<512x1152xbf16, #tpu.memory_space<vmem>>, vector<512x128xbf16>,
    %c71_62 = arith.constant 71 : index
    %c0_63 = arith.constant 0 : index
    %53 = vector.load %arg7[%c71_62, %c0_63] : memref<592x128xbf16, #tpu.memory_space<vmem>>, vector<512x128xbf16>
    %c0_64 = arith.constant 0 : index
    %c768_65 = arith.constant 768 : index
    %54 = vector.load %arg8[%c0_64, %c768_65] : memref<512x1152xbf16, #tpu.memory_space<vmem>>, vector<512x128xbf16>
    tpu.vector_store %arg8[%c0_64, %c768_65], %53 {strides = array<i32>} : memref<512x1152xbf16, #tpu.memory_space<vmem>>, vector<512x128xbf16>,
    %c72_66 = arith.constant 72 : index
    %c0_67 = arith.constant 0 : index
    %55 = vector.load %arg7[%c72_66, %c0_67] : memref<592x128xbf16, #tpu.memory_space<vmem>>, vector<512x128xbf16>
    %c0_68 = arith.constant 0 : index
    %c896_69 = arith.constant 896 : index
    %56 = vector.load %arg8[%c0_68, %c896_69] : memref<512x1152xbf16, #tpu.memory_space<vmem>>, vector<512x128xbf16>
    tpu.vector_store %arg8[%c0_68, %c896_69], %55 {strides = array<i32>} : memref<512x1152xbf16, #tpu.memory_space<vmem>>, vector<512x128xbf16>,
    %c73_70 = arith.constant 73 : index
    %c0_71 = arith.constant 0 : index
    %57 = vector.load %arg7[%c73_70, %c0_71] : memref<592x128xbf16, #tpu.memory_space<vmem>>, vector<512x128xbf16>
    %c0_72 = arith.constant 0 : index
    %c1024_73 = arith.constant 1024 : index
    %58 = vector.load %arg8[%c0_72, %c1024_73] : memref<512x1152xbf16, #tpu.memory_space<vmem>>, vector<512x128xbf16>
    tpu.vector_store %arg8[%c0_72, %c1024_73], %57 {strides = array<i32>} : memref<512x1152xbf16, #tpu.memory_space<vmem>>, vector<512x128xbf16>,
    %c0_74 = arith.constant 0 : index
    %c0_75 = arith.constant 0 : index
    %59 = vector.load %arg8[%c0_74, %c0_75] : memref<512x1152xbf16, #tpu.memory_space<vmem>>, vector<512x1152xbf16>
    %c0_76 = arith.constant 0 : index
    %c0_77 = arith.constant 0 : index
    %60 = vector.load %arg4[%c0_76, %c0_77] : memref<1152x128xbf16, #tpu.memory_space<vmem>>, vector<1152x128xbf16>
    %cst_78 = arith.constant dense<0.000000e+00> : vector<512x128xf32>
    %61 = tpu.matmul %59, %60, %cst_78 {dimension_numbers = #tpu.dot_dimension_numbers<[1], [0], [0], [1], [0, 0, 1, 1], [], []>} : vector<512x1152xbf16>, vector<1152x128xbf16>, vector<512x128xf32> -> vector<512x128xf32>
    %c0_79 = arith.constant 0 : index
    %c0_80 = arith.constant 0 : index
    %62 = vector.load %arg5[%c0_79, %c0_80] : memref<1x128xf32, #tpu.memory_space<vmem>>, vector<1x128xf32>
    %63 = vector.broadcast %62 : vector<1x128xf32> to vector<512x128xf32>
    %64 = arith.addf %61, %63 : vector<512x128xf32>
    %cst_81 = arith.constant 0.000000e+00 : f32
    %65 = vector.broadcast %cst_81 : f32 to vector<512x128xf32>
    %66 = arith.maximumf %64, %65 : vector<512x128xf32>
    %cst_82 = arith.constant 0.000000e+00 : f32
    %67 = vector.broadcast %cst_82 : f32 to vector<512x128xf32>
    %68 = arith.select %10, %66, %67 : vector<512x128xi1>, vector<512x128xf32>
    %69 = arith.truncf %68 : vector<512x128xf32> to vector<512x128xbf16>
    %c0_83 = arith.constant 0 : index
    %c0_84 = arith.constant 0 : index
    %c0_85 = arith.constant 0 : index
    %70 = vector.load %arg6[%c0_83, %c0_84, %c0_85] : memref<1x512x128xbf16, #tpu.memory_space<vmem>>, vector<1x512x128xbf16>
    %71 = vector.shape_cast %70 : vector<1x512x128xbf16> to vector<512x128xbf16>
    %72 = vector.shape_cast %69 : vector<512x128xbf16> to vector<1x512x128xbf16>
    tpu.vector_store %arg6[%c0_83, %c0_84, %c0_85], %72 {strides = array<i32>} : memref<1x512x128xbf16, #tpu.memory_space<vmem>>, vector<1x512x128xbf16>,
    return
  }
  func.func @transform_0(%arg0: i32) -> (i32, i32, i32) {
    %c0_i32 = arith.constant 0 : i32
    %c0_i32_0 = arith.constant 0 : i32
    %c0_i32_1 = arith.constant 0 : i32
    return %arg0, %c0_i32, %c0_i32_0 : i32, i32, i32
  }
  func.func @transform_1(%arg0: i32) -> (i32, i32) {
    %c0_i32 = arith.constant 0 : i32
    %c0_i32_0 = arith.constant 0 : i32
    %c0_i32_1 = arith.constant 0 : i32
    return %c0_i32, %c0_i32_0 : i32, i32
  }
  func.func @transform_2(%arg0: i32) -> (i32, i32) {
    %c0_i32 = arith.constant 0 : i32
    %c0_i32_0 = arith.constant 0 : i32
    %c0_i32_1 = arith.constant 0 : i32
    return %c0_i32, %c0_i32_0 : i32, i32
  }
  func.func @transform_3(%arg0: i32) -> (i32, i32) {
    %c0_i32 = arith.constant 0 : i32
    %c0_i32_0 = arith.constant 0 : i32
    %c0_i32_1 = arith.constant 0 : i32
    return %c0_i32, %c0_i32_0 : i32, i32
  }
  func.func @transform_4(%arg0: i32) -> (i32, i32) {
    %c0_i32 = arith.constant 0 : i32
    %c0_i32_0 = arith.constant 0 : i32
    %c0_i32_1 = arith.constant 0 : i32
    return %c0_i32, %c0_i32_0 : i32, i32
  }
  func.func @transform_5(%arg0: i32) -> (i32, i32, i32) {
    %c0_i32 = arith.constant 0 : i32
    %c0_i32_0 = arith.constant 0 : i32
    %c0_i32_1 = arith.constant 0 : i32
    return %arg0, %c0_i32, %c0_i32_0 : i32, i32, i32
  }
}

module attributes {stable_mosaic.version = 11 : i64} {
  func.func @_down_layer_kernel(%arg0: i32, %arg1: memref<1x8x2x16x256xbf16, #tpu.memory_space<vmem>>, %arg2: memref<1152x128xbf16, #tpu.memory_space<vmem>>, %arg3: memref<1x128xf32, #tpu.memory_space<vmem>>, %arg4: memref<1152x128xbf16, #tpu.memory_space<vmem>>, %arg5: memref<1x128xf32, #tpu.memory_space<vmem>>, %arg6: memref<1x128x128xbf16, #tpu.memory_space<vmem>>, %arg7: memref<176x128xbf16, #tpu.memory_space<vmem>>, %arg8: memref<128x1152xbf16, #tpu.memory_space<vmem>>) attributes {dimension_semantics = [#tpu.dimension_semantics<parallel>], iteration_bounds = array<i64: 2>, scalar_prefetch = 0 : i64, scratch_operands = 2 : i64, tpu.core_type = #tpu.core_type<tc>, window_params = [{transform_indices = @transform_0, window_bounds = array<i64: 1, 8, 2, 16, 256>}, {pipeline_mode = #tpu.pipeline_mode<synchronous>, transform_indices = @transform_1, window_bounds = array<i64: 1152, 128>}, {pipeline_mode = #tpu.pipeline_mode<synchronous>, transform_indices = @transform_2, window_bounds = array<i64: 1, 128>}, {pipeline_mode = #tpu.pipeline_mode<synchronous>, transform_indices = @transform_3, window_bounds = array<i64: 1152, 128>}, {pipeline_mode = #tpu.pipeline_mode<synchronous>, transform_indices = @transform_4, window_bounds = array<i64: 1, 128>}, {transform_indices = @transform_5, window_bounds = array<i64: 1, 128, 128>}]} {
    %cst = arith.constant 0.000000e+00 : bf16
    %0 = vector.broadcast %cst : bf16 to vector<24x128xbf16>
    %c0 = arith.constant 0 : index
    %c0_0 = arith.constant 0 : index
    %1 = vector.load %arg7[%c0, %c0_0] : memref<176x128xbf16, #tpu.memory_space<vmem>>, vector<24x128xbf16>
    tpu.vector_store %arg7[%c0, %c0_0], %0 {strides = array<i32>} : memref<176x128xbf16, #tpu.memory_space<vmem>>, vector<24x128xbf16>,
    %cst_1 = arith.constant 0.000000e+00 : bf16
    %2 = vector.broadcast %cst_1 : bf16 to vector<24x128xbf16>
    %c152 = arith.constant 152 : index
    %c0_2 = arith.constant 0 : index
    %3 = vector.load %arg7[%c152, %c0_2] : memref<176x128xbf16, #tpu.memory_space<vmem>>, vector<24x128xbf16>
    tpu.vector_store %arg7[%c152, %c0_2], %2 {strides = array<i32>} : memref<176x128xbf16, #tpu.memory_space<vmem>>, vector<24x128xbf16>,
    %c0_3 = arith.constant 0 : index
    %c0_4 = arith.constant 0 : index
    %c0_5 = arith.constant 0 : index
    %c0_6 = arith.constant 0 : index
    %c0_7 = arith.constant 0 : index
    %4 = vector.load %arg1[%c0_3, %c0_4, %c0_5, %c0_6, %c0_7] : memref<1x8x2x16x256xbf16, #tpu.memory_space<vmem>>, vector<1x8x1x16x256xbf16>
    %5 = vector.shape_cast %4 : vector<1x8x1x16x256xbf16> to vector<8x16x256xbf16>
    %c0_8 = arith.constant 0 : index
    %c0_9 = arith.constant 0 : index
    %c1 = arith.constant 1 : index
    %c0_10 = arith.constant 0 : index
    %c0_11 = arith.constant 0 : index
    %6 = vector.load %arg1[%c0_8, %c0_9, %c1, %c0_10, %c0_11] : memref<1x8x2x16x256xbf16, #tpu.memory_space<vmem>>, vector<1x8x1x16x256xbf16>
    %7 = vector.shape_cast %6 : vector<1x8x1x16x256xbf16> to vector<8x16x256xbf16>
    %8 = arith.maximumf %5, %7 : vector<8x16x256xbf16>
    %9 = vector.extract_strided_slice %8 {offsets = [0, 0, 0], sizes = [8, 16, 128], strides = [1, 1, 1]} : vector<8x16x256xbf16> to vector<8x16x128xbf16>
    %10 = vector.extract_strided_slice %8 {offsets = [0, 0, 128], sizes = [8, 16, 128], strides = [1, 1, 1]} : vector<8x16x256xbf16> to vector<8x16x128xbf16>
    %11 = arith.maximumf %9, %10 : vector<8x16x128xbf16>
    %12 = vector.shape_cast %11 : vector<8x16x128xbf16> to vector<128x128xbf16>
    %c24 = arith.constant 24 : index
    %c0_12 = arith.constant 0 : index
    %13 = vector.load %arg7[%c24, %c0_12] : memref<176x128xbf16, #tpu.memory_space<vmem>>, vector<128x128xbf16>
    tpu.vector_store %arg7[%c24, %c0_12], %12 {strides = array<i32>} : memref<176x128xbf16, #tpu.memory_space<vmem>>, vector<128x128xbf16>,
    %14 = tpu.iota {dimensions = array<i32: 1>} : vector<8x16x128xi32>
    %15 = vector.shape_cast %14 : vector<8x16x128xi32> to vector<128x128xi32>
    %c8_i32 = arith.constant 8 : i32
    %16 = vector.broadcast %c8_i32 : i32 to vector<128x128xi32>
    %17 = arith.cmpi slt, %15, %16 : vector<128x128xi32>
    %c7 = arith.constant 7 : index
    %c0_13 = arith.constant 0 : index
    %18 = vector.load %arg7[%c7, %c0_13] : memref<176x128xbf16, #tpu.memory_space<vmem>>, vector<128x128xbf16>
    %c0_14 = arith.constant 0 : index
    %c0_15 = arith.constant 0 : index
    %19 = vector.load %arg8[%c0_14, %c0_15] : memref<128x1152xbf16, #tpu.memory_space<vmem>>, vector<128x128xbf16>
    tpu.vector_store %arg8[%c0_14, %c0_15], %18 {strides = array<i32>} : memref<128x1152xbf16, #tpu.memory_space<vmem>>, vector<128x128xbf16>,
    %c8 = arith.constant 8 : index
    %c0_16 = arith.constant 0 : index
    %20 = vector.load %arg7[%c8, %c0_16] : memref<176x128xbf16, #tpu.memory_space<vmem>>, vector<128x128xbf16>
    %c0_17 = arith.constant 0 : index
    %c128 = arith.constant 128 : index
    %21 = vector.load %arg8[%c0_17, %c128] : memref<128x1152xbf16, #tpu.memory_space<vmem>>, vector<128x128xbf16>
    tpu.vector_store %arg8[%c0_17, %c128], %20 {strides = array<i32>} : memref<128x1152xbf16, #tpu.memory_space<vmem>>, vector<128x128xbf16>,
    %c9 = arith.constant 9 : index
    %c0_18 = arith.constant 0 : index
    %22 = vector.load %arg7[%c9, %c0_18] : memref<176x128xbf16, #tpu.memory_space<vmem>>, vector<128x128xbf16>
    %c0_19 = arith.constant 0 : index
    %c256 = arith.constant 256 : index
    %23 = vector.load %arg8[%c0_19, %c256] : memref<128x1152xbf16, #tpu.memory_space<vmem>>, vector<128x128xbf16>
    tpu.vector_store %arg8[%c0_19, %c256], %22 {strides = array<i32>} : memref<128x1152xbf16, #tpu.memory_space<vmem>>, vector<128x128xbf16>,
    %c23 = arith.constant 23 : index
    %c0_20 = arith.constant 0 : index
    %24 = vector.load %arg7[%c23, %c0_20] : memref<176x128xbf16, #tpu.memory_space<vmem>>, vector<128x128xbf16>
    %c0_21 = arith.constant 0 : index
    %c384 = arith.constant 384 : index
    %25 = vector.load %arg8[%c0_21, %c384] : memref<128x1152xbf16, #tpu.memory_space<vmem>>, vector<128x128xbf16>
    tpu.vector_store %arg8[%c0_21, %c384], %24 {strides = array<i32>} : memref<128x1152xbf16, #tpu.memory_space<vmem>>, vector<128x128xbf16>,
    %c24_22 = arith.constant 24 : index
    %c0_23 = arith.constant 0 : index
    %26 = vector.load %arg7[%c24_22, %c0_23] : memref<176x128xbf16, #tpu.memory_space<vmem>>, vector<128x128xbf16>
    %c0_24 = arith.constant 0 : index
    %c512 = arith.constant 512 : index
    %27 = vector.load %arg8[%c0_24, %c512] : memref<128x1152xbf16, #tpu.memory_space<vmem>>, vector<128x128xbf16>
    tpu.vector_store %arg8[%c0_24, %c512], %26 {strides = array<i32>} : memref<128x1152xbf16, #tpu.memory_space<vmem>>, vector<128x128xbf16>,
    %c25 = arith.constant 25 : index
    %c0_25 = arith.constant 0 : index
    %28 = vector.load %arg7[%c25, %c0_25] : memref<176x128xbf16, #tpu.memory_space<vmem>>, vector<128x128xbf16>
    %c0_26 = arith.constant 0 : index
    %c640 = arith.constant 640 : index
    %29 = vector.load %arg8[%c0_26, %c640] : memref<128x1152xbf16, #tpu.memory_space<vmem>>, vector<128x128xbf16>
    tpu.vector_store %arg8[%c0_26, %c640], %28 {strides = array<i32>} : memref<128x1152xbf16, #tpu.memory_space<vmem>>, vector<128x128xbf16>,
    %c39 = arith.constant 39 : index
    %c0_27 = arith.constant 0 : index
    %30 = vector.load %arg7[%c39, %c0_27] : memref<176x128xbf16, #tpu.memory_space<vmem>>, vector<128x128xbf16>
    %c0_28 = arith.constant 0 : index
    %c768 = arith.constant 768 : index
    %31 = vector.load %arg8[%c0_28, %c768] : memref<128x1152xbf16, #tpu.memory_space<vmem>>, vector<128x128xbf16>
    tpu.vector_store %arg8[%c0_28, %c768], %30 {strides = array<i32>} : memref<128x1152xbf16, #tpu.memory_space<vmem>>, vector<128x128xbf16>,
    %c40 = arith.constant 40 : index
    %c0_29 = arith.constant 0 : index
    %32 = vector.load %arg7[%c40, %c0_29] : memref<176x128xbf16, #tpu.memory_space<vmem>>, vector<128x128xbf16>
    %c0_30 = arith.constant 0 : index
    %c896 = arith.constant 896 : index
    %33 = vector.load %arg8[%c0_30, %c896] : memref<128x1152xbf16, #tpu.memory_space<vmem>>, vector<128x128xbf16>
    tpu.vector_store %arg8[%c0_30, %c896], %32 {strides = array<i32>} : memref<128x1152xbf16, #tpu.memory_space<vmem>>, vector<128x128xbf16>,
    %c41 = arith.constant 41 : index
    %c0_31 = arith.constant 0 : index
    %34 = vector.load %arg7[%c41, %c0_31] : memref<176x128xbf16, #tpu.memory_space<vmem>>, vector<128x128xbf16>
    %c0_32 = arith.constant 0 : index
    %c1024 = arith.constant 1024 : index
    %35 = vector.load %arg8[%c0_32, %c1024] : memref<128x1152xbf16, #tpu.memory_space<vmem>>, vector<128x128xbf16>
    tpu.vector_store %arg8[%c0_32, %c1024], %34 {strides = array<i32>} : memref<128x1152xbf16, #tpu.memory_space<vmem>>, vector<128x128xbf16>,
    %c0_33 = arith.constant 0 : index
    %c0_34 = arith.constant 0 : index
    %36 = vector.load %arg8[%c0_33, %c0_34] : memref<128x1152xbf16, #tpu.memory_space<vmem>>, vector<128x1152xbf16>
    %c0_35 = arith.constant 0 : index
    %c0_36 = arith.constant 0 : index
    %37 = vector.load %arg2[%c0_35, %c0_36] : memref<1152x128xbf16, #tpu.memory_space<vmem>>, vector<1152x128xbf16>
    %cst_37 = arith.constant dense<0.000000e+00> : vector<128x128xf32>
    %38 = tpu.matmul %36, %37, %cst_37 {dimension_numbers = #tpu.dot_dimension_numbers<[1], [0], [0], [1], [0, 0, 1, 1], [], []>} : vector<128x1152xbf16>, vector<1152x128xbf16>, vector<128x128xf32> -> vector<128x128xf32>
    %c0_38 = arith.constant 0 : index
    %c0_39 = arith.constant 0 : index
    %39 = vector.load %arg3[%c0_38, %c0_39] : memref<1x128xf32, #tpu.memory_space<vmem>>, vector<1x128xf32>
    %40 = vector.broadcast %39 : vector<1x128xf32> to vector<128x128xf32>
    %41 = arith.addf %38, %40 : vector<128x128xf32>
    %cst_40 = arith.constant 0.000000e+00 : f32
    %42 = vector.broadcast %cst_40 : f32 to vector<128x128xf32>
    %43 = arith.maximumf %41, %42 : vector<128x128xf32>
    %cst_41 = arith.constant 0.000000e+00 : f32
    %44 = vector.broadcast %cst_41 : f32 to vector<128x128xf32>
    %45 = arith.select %17, %43, %44 : vector<128x128xi1>, vector<128x128xf32>
    %46 = arith.truncf %45 : vector<128x128xf32> to vector<128x128xbf16>
    %c24_42 = arith.constant 24 : index
    %c0_43 = arith.constant 0 : index
    %47 = vector.load %arg7[%c24_42, %c0_43] : memref<176x128xbf16, #tpu.memory_space<vmem>>, vector<128x128xbf16>
    tpu.vector_store %arg7[%c24_42, %c0_43], %46 {strides = array<i32>} : memref<176x128xbf16, #tpu.memory_space<vmem>>, vector<128x128xbf16>,
    %c7_44 = arith.constant 7 : index
    %c0_45 = arith.constant 0 : index
    %48 = vector.load %arg7[%c7_44, %c0_45] : memref<176x128xbf16, #tpu.memory_space<vmem>>, vector<128x128xbf16>
    %c0_46 = arith.constant 0 : index
    %c0_47 = arith.constant 0 : index
    %49 = vector.load %arg8[%c0_46, %c0_47] : memref<128x1152xbf16, #tpu.memory_space<vmem>>, vector<128x128xbf16>
    tpu.vector_store %arg8[%c0_46, %c0_47], %48 {strides = array<i32>} : memref<128x1152xbf16, #tpu.memory_space<vmem>>, vector<128x128xbf16>,
    %c8_48 = arith.constant 8 : index
    %c0_49 = arith.constant 0 : index
    %50 = vector.load %arg7[%c8_48, %c0_49] : memref<176x128xbf16, #tpu.memory_space<vmem>>, vector<128x128xbf16>
    %c0_50 = arith.constant 0 : index
    %c128_51 = arith.constant 128 : index
    %51 = vector.load %arg8[%c0_50, %c128_51] : memref<128x1152xbf16, #tpu.memory_space<vmem>>, vector<128x128xbf16>
    tpu.vector_store %arg8[%c0_50, %c128_51], %50 {strides = array<i32>} : memref<128x1152xbf16, #tpu.memory_space<vmem>>, vector<128x128xbf16>,
    %c9_52 = arith.constant 9 : index
    %c0_53 = arith.constant 0 : index
    %52 = vector.load %arg7[%c9_52, %c0_53] : memref<176x128xbf16, #tpu.memory_space<vmem>>, vector<128x128xbf16>
    %c0_54 = arith.constant 0 : index
    %c256_55 = arith.constant 256 : index
    %53 = vector.load %arg8[%c0_54, %c256_55] : memref<128x1152xbf16, #tpu.memory_space<vmem>>, vector<128x128xbf16>
    tpu.vector_store %arg8[%c0_54, %c256_55], %52 {strides = array<i32>} : memref<128x1152xbf16, #tpu.memory_space<vmem>>, vector<128x128xbf16>,
    %c23_56 = arith.constant 23 : index
    %c0_57 = arith.constant 0 : index
    %54 = vector.load %arg7[%c23_56, %c0_57] : memref<176x128xbf16, #tpu.memory_space<vmem>>, vector<128x128xbf16>
    %c0_58 = arith.constant 0 : index
    %c384_59 = arith.constant 384 : index
    %55 = vector.load %arg8[%c0_58, %c384_59] : memref<128x1152xbf16, #tpu.memory_space<vmem>>, vector<128x128xbf16>
    tpu.vector_store %arg8[%c0_58, %c384_59], %54 {strides = array<i32>} : memref<128x1152xbf16, #tpu.memory_space<vmem>>, vector<128x128xbf16>,
    %c24_60 = arith.constant 24 : index
    %c0_61 = arith.constant 0 : index
    %56 = vector.load %arg7[%c24_60, %c0_61] : memref<176x128xbf16, #tpu.memory_space<vmem>>, vector<128x128xbf16>
    %c0_62 = arith.constant 0 : index
    %c512_63 = arith.constant 512 : index
    %57 = vector.load %arg8[%c0_62, %c512_63] : memref<128x1152xbf16, #tpu.memory_space<vmem>>, vector<128x128xbf16>
    tpu.vector_store %arg8[%c0_62, %c512_63], %56 {strides = array<i32>} : memref<128x1152xbf16, #tpu.memory_space<vmem>>, vector<128x128xbf16>,
    %c25_64 = arith.constant 25 : index
    %c0_65 = arith.constant 0 : index
    %58 = vector.load %arg7[%c25_64, %c0_65] : memref<176x128xbf16, #tpu.memory_space<vmem>>, vector<128x128xbf16>
    %c0_66 = arith.constant 0 : index
    %c640_67 = arith.constant 640 : index
    %59 = vector.load %arg8[%c0_66, %c640_67] : memref<128x1152xbf16, #tpu.memory_space<vmem>>, vector<128x128xbf16>
    tpu.vector_store %arg8[%c0_66, %c640_67], %58 {strides = array<i32>} : memref<128x1152xbf16, #tpu.memory_space<vmem>>, vector<128x128xbf16>,
    %c39_68 = arith.constant 39 : index
    %c0_69 = arith.constant 0 : index
    %60 = vector.load %arg7[%c39_68, %c0_69] : memref<176x128xbf16, #tpu.memory_space<vmem>>, vector<128x128xbf16>
    %c0_70 = arith.constant 0 : index
    %c768_71 = arith.constant 768 : index
    %61 = vector.load %arg8[%c0_70, %c768_71] : memref<128x1152xbf16, #tpu.memory_space<vmem>>, vector<128x128xbf16>
    tpu.vector_store %arg8[%c0_70, %c768_71], %60 {strides = array<i32>} : memref<128x1152xbf16, #tpu.memory_space<vmem>>, vector<128x128xbf16>,
    %c40_72 = arith.constant 40 : index
    %c0_73 = arith.constant 0 : index
    %62 = vector.load %arg7[%c40_72, %c0_73] : memref<176x128xbf16, #tpu.memory_space<vmem>>, vector<128x128xbf16>
    %c0_74 = arith.constant 0 : index
    %c896_75 = arith.constant 896 : index
    %63 = vector.load %arg8[%c0_74, %c896_75] : memref<128x1152xbf16, #tpu.memory_space<vmem>>, vector<128x128xbf16>
    tpu.vector_store %arg8[%c0_74, %c896_75], %62 {strides = array<i32>} : memref<128x1152xbf16, #tpu.memory_space<vmem>>, vector<128x128xbf16>,
    %c41_76 = arith.constant 41 : index
    %c0_77 = arith.constant 0 : index
    %64 = vector.load %arg7[%c41_76, %c0_77] : memref<176x128xbf16, #tpu.memory_space<vmem>>, vector<128x128xbf16>
    %c0_78 = arith.constant 0 : index
    %c1024_79 = arith.constant 1024 : index
    %65 = vector.load %arg8[%c0_78, %c1024_79] : memref<128x1152xbf16, #tpu.memory_space<vmem>>, vector<128x128xbf16>
    tpu.vector_store %arg8[%c0_78, %c1024_79], %64 {strides = array<i32>} : memref<128x1152xbf16, #tpu.memory_space<vmem>>, vector<128x128xbf16>,
    %c0_80 = arith.constant 0 : index
    %c0_81 = arith.constant 0 : index
    %66 = vector.load %arg8[%c0_80, %c0_81] : memref<128x1152xbf16, #tpu.memory_space<vmem>>, vector<128x1152xbf16>
    %c0_82 = arith.constant 0 : index
    %c0_83 = arith.constant 0 : index
    %67 = vector.load %arg4[%c0_82, %c0_83] : memref<1152x128xbf16, #tpu.memory_space<vmem>>, vector<1152x128xbf16>
    %cst_84 = arith.constant dense<0.000000e+00> : vector<128x128xf32>
    %68 = tpu.matmul %66, %67, %cst_84 {dimension_numbers = #tpu.dot_dimension_numbers<[1], [0], [0], [1], [0, 0, 1, 1], [], []>} : vector<128x1152xbf16>, vector<1152x128xbf16>, vector<128x128xf32> -> vector<128x128xf32>
    %c0_85 = arith.constant 0 : index
    %c0_86 = arith.constant 0 : index
    %69 = vector.load %arg5[%c0_85, %c0_86] : memref<1x128xf32, #tpu.memory_space<vmem>>, vector<1x128xf32>
    %70 = vector.broadcast %69 : vector<1x128xf32> to vector<128x128xf32>
    %71 = arith.addf %68, %70 : vector<128x128xf32>
    %cst_87 = arith.constant 0.000000e+00 : f32
    %72 = vector.broadcast %cst_87 : f32 to vector<128x128xf32>
    %73 = arith.maximumf %71, %72 : vector<128x128xf32>
    %cst_88 = arith.constant 0.000000e+00 : f32
    %74 = vector.broadcast %cst_88 : f32 to vector<128x128xf32>
    %75 = arith.select %17, %73, %74 : vector<128x128xi1>, vector<128x128xf32>
    %76 = arith.truncf %75 : vector<128x128xf32> to vector<128x128xbf16>
    %c0_89 = arith.constant 0 : index
    %c0_90 = arith.constant 0 : index
    %c0_91 = arith.constant 0 : index
    %77 = vector.load %arg6[%c0_89, %c0_90, %c0_91] : memref<1x128x128xbf16, #tpu.memory_space<vmem>>, vector<1x128x128xbf16>
    %78 = vector.shape_cast %77 : vector<1x128x128xbf16> to vector<128x128xbf16>
    %79 = vector.shape_cast %76 : vector<128x128xbf16> to vector<1x128x128xbf16>
    tpu.vector_store %arg6[%c0_89, %c0_90, %c0_91], %79 {strides = array<i32>} : memref<1x128x128xbf16, #tpu.memory_space<vmem>>, vector<1x128x128xbf16>,
    return
  }
  func.func @transform_0(%arg0: i32) -> (i32, i32, i32, i32, i32) {
    %c0_i32 = arith.constant 0 : i32
    %c0_i32_0 = arith.constant 0 : i32
    %c0_i32_1 = arith.constant 0 : i32
    %c0_i32_2 = arith.constant 0 : i32
    %c0_i32_3 = arith.constant 0 : i32
    return %arg0, %c0_i32, %c0_i32_0, %c0_i32_1, %c0_i32_2 : i32, i32, i32, i32, i32
  }
  func.func @transform_1(%arg0: i32) -> (i32, i32) {
    %c0_i32 = arith.constant 0 : i32
    %c0_i32_0 = arith.constant 0 : i32
    %c0_i32_1 = arith.constant 0 : i32
    return %c0_i32, %c0_i32_0 : i32, i32
  }
  func.func @transform_2(%arg0: i32) -> (i32, i32) {
    %c0_i32 = arith.constant 0 : i32
    %c0_i32_0 = arith.constant 0 : i32
    %c0_i32_1 = arith.constant 0 : i32
    return %c0_i32, %c0_i32_0 : i32, i32
  }
  func.func @transform_3(%arg0: i32) -> (i32, i32) {
    %c0_i32 = arith.constant 0 : i32
    %c0_i32_0 = arith.constant 0 : i32
    %c0_i32_1 = arith.constant 0 : i32
    return %c0_i32, %c0_i32_0 : i32, i32
  }
  func.func @transform_4(%arg0: i32) -> (i32, i32) {
    %c0_i32 = arith.constant 0 : i32
    %c0_i32_0 = arith.constant 0 : i32
    %c0_i32_1 = arith.constant 0 : i32
    return %c0_i32, %c0_i32_0 : i32, i32
  }
  func.func @transform_5(%arg0: i32) -> (i32, i32, i32) {
    %c0_i32 = arith.constant 0 : i32
    %c0_i32_0 = arith.constant 0 : i32
    %c0_i32_1 = arith.constant 0 : i32
    return %arg0, %c0_i32, %c0_i32_0 : i32, i32, i32
  }
}

</mosaic_0001>

<bundles_post_ra>
// kernel: vgg_forward.3
= control target key start
LH: loop header
LB: loop body
LE: loop exit
PB: predicated region body
PF: predicated region fallthrough
CT: control target
= control target key end

     0   :  { %s5561_s18 = smov 0   ;;  %s6753_s0 = inlined_call_operand.vmem [shape: bf16[2,8,2,16,256], index: 0, kind: input, shape index: {}]   ;;  %s6754_s1 = inlined_call_operand.vmem [shape: bf16[1152,128], index: 1, kind: input, shape index: {}]   ;;  %s6755_s2 = inlined_call_operand.vmem [shape: f32[1,128], index: 2, kind: input, shape index: {}]   ;;  %s6756_s3 = inlined_call_operand.vmem [shape: bf16[1152,128], index: 3, kind: input, shape index: {}]   ;;  %s6757_s4 = inlined_call_operand.vmem [shape: f32[1,128], index: 4, kind: input, shape index: {}]   ;;  %s6758_s5 = inlined_call_operand.vmem [shape: bf16[2,128,128], index: 5, kind: output, shape index: {}]  }
   0x1 LB: > { %s4504_s19 = sadd.s32 4294967295, %s5527_s18   ;;  %p4508_p0 = scmp.ge.s32.totalorder %s5527_s18, 1  ;;  %s5527_s18 = sphi %s5561_s18, %s15_s18  }
   0x2   : > { %p187_p1 = scmp.lt.s32.totalorder %s5527_s18, 3 }
   0x4   : > { %p188_p2 = pnand %p4508_p0, %p187_p1 }
   0x5   : > { %v5377_v0 = vld [vmem:[%s6754_s1 + $0x40] sm:$0xff] (!%p188_p2)   ;;  %v5529_v3 = vmov (!%p188_p2), 0   ;;  %v5381_v5 = vld [vmem:[%s6754_s1 + $0x48] sm:$0xff] (!%p188_p2)   ;;  %v5385_v9 = vld [vmem:[%s6754_s1 + $0x50] sm:$0xff] (!%p188_p2)   ;;  %p215_p3 = scmp.lt.s32.totalorder (!%p188_p2), %s4504_s19, 1  ;;  %vm531_vm0 = vcmask (!%p188_p2), 1043456  }
   0x6   : > { %191 = sbr.rel (%p188_p2) target bundleno = 778 (0x30a), region = 40  ;;  %v5378_v1 = vld [vmem:[%s6754_s1] sm:$0xff] (!%p188_p2)   ;;  %4759 = vmatprep.subr.bf16.mxu0 (!%p188_p2), %v5377_v0  ;;  %226 = vst [vmem:[#allocation2] sm:$0xff] (!%p188_p2), %v5529_v3  ;;  %227 = vst [vmem:[#allocation2 + $0x8] sm:$0xf] (!%p188_p2), %v5529_v3  ;;  %v5382_v6 = vld [vmem:[%s6754_s1 + $0x8] sm:$0xff] (!%p188_p2)  }
   0x7   : > { %v5379_v2 = vld [vmem:[%s6754_s1 + $0xc0] sm:$0xff] (!%p188_p2)   ;;  %228 = vst [vmem:[#allocation2 + $0x48] sm:$0xf0] (!%p188_p2), %v5529_v3  ;;  %229 = vst [vmem:[#allocation2 + $0x50] sm:$0xff] (!%p188_p2), %v5529_v3  ;;  %4760 = vmatpush3.bf16.msra.mxu0 (!%p188_p2), %v5378_v1  ;;  %v5383_v7 = vld [vmem:[%s6754_s1 + $0xc8] sm:$0xff] (!%p188_p2)  }
   0x8   : > { %v5380_v4 = vld [vmem:[%s6754_s1 + $0x80] sm:$0xff] (!%p188_p2)   ;;  %4823 = vmatprep.subr.bf16.mxu1 (!%p188_p2), %v5379_v2  ;;  %4761 = vmatprep.subr.bf16.mxu0 (!%p188_p2), %v5381_v5  ;;  %v5384_v8 = vld [vmem:[%s6754_s1 + $0x88] sm:$0xff] (!%p188_p2)   ;;  %v5386_v10 = vld [vmem:[%s6754_s1 + $0x10] sm:$0xff] (!%p188_p2)   ;;  %vm416_vm1 = vsmask.f32 (!%p188_p2), 4352 }
   0x9   : > { %4824 = vmatpush3.bf16.msra.mxu1 (!%p188_p2), %v5380_v4  ;;  %v5387_v11 = vld [vmem:[%s6754_s1 + $0xd0] sm:$0xff] (!%p188_p2)   ;;  %v5389_v13 = vld [vmem:[%s6754_s1 + $0x58] sm:$0xff] (!%p188_p2)   ;;  %v5393_v17 = vld [vmem:[%s6754_s1 + $0x60] sm:$0xff] (!%p188_p2)   ;;  %vm574_vm2 = vsmask.f32 (!%p188_p2), 3328 }
   0xa   : > { %4825 = vmatprep.subr.bf16.mxu1 (!%p188_p2), %v5383_v7  ;;  %v5388_v12 = vld [vmem:[%s6754_s1 + $0x90] sm:$0xff] (!%p188_p2)   ;;  %v5390_v14 = vld [vmem:[%s6754_s1 + $0x18] sm:$0xff] (!%p188_p2)   ;;  %v5394_v18 = vld [vmem:[%s6754_s1 + $0x20] sm:$0xff] (!%p188_p2)  }
   0xb   : > { %4762 = vmatpush3.bf16.msra.mxu0 (!%p188_p2), %v5382_v6  ;;  %v5391_v15 = vld [vmem:[%s6754_s1 + $0xd8] sm:$0xff] (!%p188_p2)   ;;  %v5395_v19 = vld [vmem:[%s6754_s1 + $0xe0] sm:$0xff] (!%p188_p2)   ;;  %v5397_v21 = vld [vmem:[%s6754_s1 + $0x68] sm:$0xff] (!%p188_p2)  }
   0xc   : > { %4763 = vmatprep.subr.bf16.mxu0 (!%p188_p2), %v5385_v9  ;;  %v5392_v16 = vld [vmem:[%s6754_s1 + $0x98] sm:$0xff] (!%p188_p2)   ;;  %v5396_v20 = vld [vmem:[%s6754_s1 + $0xa0] sm:$0xff] (!%p188_p2)   ;;  %v5398_v22 = vld [vmem:[%s6754_s1 + $0x28] sm:$0xff] (!%p188_p2)  }
   0xd   : > { %4826 = vmatpush3.bf16.msra.mxu1 %v5384_v8  ;;  %s6760_s19 = smov (!%p215_p3, %s4504_s19), 1  ;;  %v5399_v23 = vld [vmem:[%s6754_s1 + $0xe8] sm:$0xff]   ;;  %v5401_v25 = vld [vmem:[%s6754_s1 + $0x70] sm:$0xff]   ;;  %v5405_v29 = vld [vmem:[%s6754_s1 + $0x78] sm:$0xff]  }
   0xe   : > { %4827 = vmatprep.subr.bf16.mxu1 %v5387_v11  ;;  %v5400_v24 = vld [vmem:[%s6754_s1 + $0xa8] sm:$0xff]   ;;  %v5402_v26 = vld [vmem:[%s6754_s1 + $0x30] sm:$0xff]   ;;  %s4702_s26 = sshll.u32 %s6760_s19, 8  ;;  %v5406_v30 = vld [vmem:[%s6754_s1 + $0x38] sm:$0xff]   ;;  %s4703_s17 = sshll.u32 %s6760_s19, 6 }
   0xf   : > { %4764 = vmatpush3.bf16.msra.mxu0 %v5386_v10  ;;  %v5403_v27 = vld [vmem:[%s6754_s1 + $0xf0] sm:$0xff]   ;;  %s5666_s10 = scalar_lea.vmem %s6753_s0, %s4702_s26  ;;  %v5407_v31 = vld [vmem:[%s6754_s1 + $0xf8] sm:$0xff]   ;;  %v407_v36 = vld [vmem:[#allocation2] sm:$0xf8]  ;;  %s6729_s22 = scalar_lea.vmem %s6758_s5, %s4703_s17 }
  0x10   : > { %4765 = vmatprep.subr.bf16.mxu0 %v5389_v13  ;;  %v5404_v28 = vld [vmem:[%s6754_s1 + $0xb0] sm:$0xff]   ;;  %v230_v32 = vld [vmem:[%s5666_s10] sm:$0xff]  ;;  %v5408_v35 = vld [vmem:[%s6754_s1 + $0xb8] sm:$0xff]   ;;  %v418_v44 = vshrl.u32 %v407_v36, 16  ;;  %v421_v45 = vshll.u32 %v407_v36, 16 }
  0x11   : > { %4828 = vmatpush3.bf16.msra.mxu1 %v5388_v12  ;;  %v4513_v33 = vld [vmem:[%s5666_s10 + $0x10] sm:$0xff]  ;;  %v5409_v38 = vld [vmem:[%s6754_s1 + $0x140] sm:$0xff]   ;;  %v231_v39 = vld [vmem:[%s5666_s10 + $0x8] sm:$0xff] }
  0x12   : > { %4829 = vmatprep.subr.bf16.mxu1 %v5391_v15  ;;  %v263_v34 = vmax.bf16 %v4513_v33, %v230_v32  ;;  %v232_v40 = vld [vmem:[%s5666_s10 + $0x20] sm:$0xff]  ;;  %v4514_v41 = vld [vmem:[%s5666_s10 + $0x18] sm:$0xff]  ;;  %v4515_v42 = vld [vmem:[%s5666_s10 + $0x30] sm:$0xff]  ;;  %v5690_v59 = vrot.slane %v418_v44, 3  ;;  %v5692_v63 = vrot.slane %v421_v45, 4 }
  0x13   : > { %4766 = vmatpush3.bf16.msra.mxu0 %v5390_v14  ;;  %v264_v46 = vmax.bf16 %v4514_v41, %v231_v39  ;;  %v265_v47 = vmax.bf16 %v4515_v42, %v232_v40  ;;  %v565_v48 = vld [vmem:[#allocation2] sm:$0xf0]  ;;  %v233_v52 = vld [vmem:[%s5666_s10 + $0x28] sm:$0xff]  ;;  %v4516_v54 = vld [vmem:[%s5666_s10 + $0x38] sm:$0xff] }
  0x14   : > { %4767 = vmatprep.subr.bf16.mxu0 %v5393_v17  ;;  %v295_v37 = vrot.slane %v263_v34, 4  ;;  %v576_v51 = vshrl.u32 %v565_v48, 16  ;;  %v234_v53 = vld [vmem:[%s5666_s10 + $0x40] sm:$0xff]  ;;  %v579_v56 = vshll.u32 %v565_v48, 16  ;;  %v4517_v57 = vld [vmem:[%s5666_s10 + $0x50] sm:$0xff]  ;;  %v266_v58 = vmax.bf16 %v4516_v54, %v233_v52  ;;  %v235_v2 = vld [vmem:[%s5666_s10 + $0x48] sm:$0xff] }
  0x15   : > { %4830 = vmatpush3.bf16.msra.mxu1 %v5392_v16  ;;  %v296_v50 = vrot.slane %v264_v46, 4  ;;  %v297_v55 = vrot.slane %v265_v47, 4  ;;  %v267_v61 = vmax.bf16 %v4517_v57, %v234_v53  ;;  %v513_v62 = vld [vmem:[#allocation2] sm:$0xf0]  ;;  %v4518_v6 = vld [vmem:[%s5666_s10 + $0x58] sm:$0xff]  ;;  %v4519_v7 = vld [vmem:[%s5666_s10 + $0x70] sm:$0xff] }
  0x16   : > { %4831 = vmatprep.subr.bf16.mxu1 %v5395_v19  ;;  %v327_v43 = vmax.bf16 %v295_v37, %v263_v34  ;;  %v298_v1 = vrot.slane %v266_v58, 4  ;;  %v236_v3 = vld [vmem:[%s5666_s10 + $0x60] sm:$0xff]  ;;  %v5696_v4 = vrot.slane %v576_v51, 4  ;;  %v5700_v9 = vrot.slane %v579_v56, 5  ;;  %v237_v44 = vld [vmem:[%s5666_s10 + $0x68] sm:$0xff]  ;;  %v4520_v45 = vld [vmem:[%s5666_s10 + $0x78] sm:$0xff] }
  0x17   : > { %4768 = vmatpush3.bf16.msra.mxu0 %v5394_v18  ;;  %v328_v60 = vmax.bf16 %v296_v50, %v264_v46  ;;  %v329_v0 = vmax.bf16 %v297_v55, %v265_v47  ;;  %v299_v5 = vrot.slane %v267_v61, 4  ;;  %v268_v11 = vmax.bf16 %v4518_v6, %v235_v2  ;;  %v5410_v41 = vld [vmem:[%s6754_s1 + $0x100] sm:$0xff]   ;;  %v5411_v47 = vld [vmem:[%s6754_s1 + $0x148] sm:$0xff]   ;;  %v4521_v52 = vld [vmem:[%s5666_s10 + $0x90] sm:$0xff] }
  0x18   : > { %4769 = vmatprep.subr.bf16.mxu0 %v5397_v21  ;;  %v4529_v49 = vcombine.low %v327_v43, %v327_v43  ;;  %v330_v10 = vmax.bf16 %v298_v1, %v266_v58  ;;  %v269_v13 = vmax.bf16 %v4519_v7, %v236_v3  ;;  %v532_v17 = vrot.slane %v513_v62, 4  ;;  %v238_v51 = vld [vmem:[%s5666_s10 + $0x80] sm:$0xff]  ;;  %v239_v58 = vld [vmem:[%s5666_s10 + $0x88] sm:$0xff] }
  0x19   : > { %4832 = vmatpush3.bf16.msra.mxu1 %v5396_v20  ;;  %v4530_v8 = vcombine.low %v328_v60, %v329_v0  ;;  %v331_v12 = vmax.bf16 %v299_v5, %v267_v61  ;;  %v300_v16 = vrot.slane %v268_v11, 4  ;;  %v424_v18 = vor.u32 %v5692_v63, %v5690_v59  ;;  %v5419_v53 = vld [vmem:[%s6754_s1 + $0x1c0] sm:$0xff]   ;;  %v4522_v60 = vld [vmem:[%s5666_s10 + $0x98] sm:$0xff]  ;;  %v4523_v61 = vld [vmem:[%s5666_s10 + $0xb0] sm:$0xff] }
  0x1a   : > { %4833 = vmatprep.subr.bf16.mxu1 %v5399_v23  ;;  %393 = vst [vmem:[#allocation2 + $0x8] sm:$0xf0] %v4529_v49  ;;  %v240_v59 = vld [vmem:[%s5666_s10 + $0xa0] sm:$0xff]  ;;  %v5412_v1 = vld [vmem:[%s6754_s1 + $0x108] sm:$0xff]   ;;  %v270_v2 = vmax.bf16 %v4520_v45, %v237_v44  ;;  %v5425_v45 = vld [vmem:[%s6754_s1 + $0x1d0] sm:$0xff]  }
  0x1b   : > { %4770 = vmatpush3.bf16.msra.mxu0 %v5398_v22  ;;  %394 = vst [vmem:[#allocation2 + $0x10] sm:$0xff] %v4530_v8  ;;  %v689_v14 = vshrl.u32 %v4530_v8, 16  ;;  %v692_v15 = vshll.u32 %v4530_v8, 16  ;;  %v5704_v19 = vrot.slane %v4530_v8, 4  ;;  %v5706_v20 = vcombine.low %v330_v10, %v331_v12  ;;  %v5420_v6 = vld [vmem:[%s6754_s1 + $0x180] sm:$0xff]   ;;  %v5413_v10 = vld [vmem:[%s6754_s1 + $0x150] sm:$0xff]  }
  0x1c   : > { %4771 = vmatprep.subr.bf16.mxu0 %v5401_v25  ;;  %v582_v25 = vor.u32 %v5700_v9, %v5696_v4  ;;  %v332_v34 = vmax.bf16 %v300_v16, %v268_v11  ;;  %v5421_v9 = vld [vmem:[%s6754_s1 + $0x1c8] sm:$0xff]   ;;  %v302_v16 = vrot.slane %v270_v2, 4 }
  0x1d   : > { %4834 = vmatpush3.bf16.msra.mxu1 %v5400_v24  ;;  %v691_v23 = vrot.slane %v689_v14, 3  ;;  %v694_v24 = vrot.slane %v692_v15, 4  ;;  %395 = vst [vmem:[#allocation2 + $0x18] sm:$0xff] %v5706_v20  ;;  %v698_v32 = vshrl.u32 %v5706_v20, 16  ;;  %v701_v33 = vshll.u32 %v5706_v20, 16 }
  0x1e   : > { %4835 = vmatprep.subr.bf16.mxu1 %v5403_v27  ;;  %v595_v50 = vrot.slane %v689_v14, 4  ;;  %v598_v56 = vrot.slane %v692_v15, 5  ;;  %v5755_v8 = vrot.slane %v5706_v20, 4  ;;  %v5414_v15 = vld [vmem:[%s6754_s1 + $0x110] sm:$0xff]  }
  0x1f   : > { %4772 = vmatpush3.bf16.msra.mxu0 %v5402_v26  ;;  %v301_v26 = vrot.slane %v269_v13, 4  ;;  %v695_v40 = vor.u32 %v694_v24, %v691_v23  ;;  %v700_v48 = vrot.slane %v698_v32, 3  ;;  %v703_v49 = vrot.slane %v701_v33, 4 }
  0x20   : > { %4773 = vmatprep.subr.bf16.mxu0 %v5405_v29  ;;  %v5767_v14 = vor.u32 %v598_v56, %v595_v50 }
  0x21   : > { %4836 = vmatpush3.bf16.msra.mxu1 %v5404_v28  ;;  %v514_v21 = vld [vmem:[#allocation2 + $0x8] sm:$0xff]  ;;  %v333_v57 = vmax.bf16 %v301_v26, %v269_v13  ;;  %v5738_v0 = vor.u32 %v703_v49, %v700_v48  ;;  %v271_v13 = vmax.bf16 %v4521_v52, %v238_v51  ;;  %v242_v26 = vld [vmem:[%s5666_s10 + $0xc0] sm:$0xff] }
  0x22   : > { %4837 = vmatprep.subr.bf16.mxu1 %v5407_v31  ;;  %v671_v22 = vld [vmem:[#allocation2 + $0x8] sm:$0xf8]  ;;  %v533_v27 = vrot.slane %v514_v21, 4  ;;  %v426_v28 = vshrl.u32 %v514_v21, 16  ;;  %v429_v29 = vshll.u32 %v514_v21, 16  ;;  %v5417_v52 = vld [vmem:[%s6754_s1 + $0x160] sm:$0xff]  }
  0x23   : > { %4774 = vmatpush3.bf16.msra.mxu0 %v5406_v30  ;;  %v681_v30 = vshrl.u32 %v671_v22, 16  ;;  %v684_v31 = vshll.u32 %v671_v22, 16  ;;  %v5745_v5 = vcombine.low %v332_v34, %v333_v57  ;;  %v5752_v7 = vsel %vm416_vm1, %v695_v40, %v5738_v0  ;;  %v241_v21 = vld [vmem:[%s5666_s10 + $0xa8] sm:$0xff]  ;;  %v5426_v57 = vld [vmem:[%s6754_s1 + $0x190] sm:$0xff]  }
  0x24   : > { %4887 = vmatprep.subr.bf16.mxu0 %v5409_v38  ;;  %v428_v36 = vrot.slane %v426_v28, 3  ;;  %v431_v37 = vrot.slane %v429_v29, 4  ;;  %v586_v42 = vrot.slane %v426_v28, 4  ;;  %v589_v43 = vrot.slane %v429_v29, 5  ;;  %v4525_v28 = vld [vmem:[%s5666_s10 + $0xd0] sm:$0xff] }
  0x25   : > { %4838 = vmatpush3.bf16.msra.mxu1 %v5408_v35  ;;  %v534_v35 = vsel %vm531_vm0, %v532_v17, %v533_v27  ;;  %v683_v38 = vrot.slane %v681_v30, 3  ;;  %v686_v39 = vrot.slane %v684_v31, 4  ;;  %v536_v63 = vsel %vm531_vm0, %v533_v27, %v5704_v19  ;;  %396 = vst [vmem:[#allocation2 + $0x20] sm:$0xff] %v5745_v5  ;;  %v4524_v27 = vld [vmem:[%s5666_s10 + $0xb8] sm:$0xff] }
  0x26   : > { %1880 = vmatprep.mubr.bf16.mxu0 %v534_v35  ;;  %v432_v46 = vor.u32 %v431_v37, %v428_v36  ;;  %v590_v55 = vor.u32 %v589_v43, %v586_v42  ;;  %4951 = vmatprep.subr.bf16.mxu1 %v5419_v53  ;;  %v707_v11 = vshrl.u32 %v5745_v5, 16  ;;  %v710_v12 = vshll.u32 %v5745_v5, 16  ;;  %v5415_v36 = vld [vmem:[%s6754_s1 + $0x158] sm:$0xff]  }
  0x27   : > { %v687_v54 = vor.u32 %v686_v39, %v683_v38  ;;  %v272_v17 = vmax.bf16 %v4522_v60, %v239_v58  ;;  %v5784_v29 = vsel %vm531_vm0, %v5704_v19, %v5755_v8  ;;  %v604_v30 = vrot.slane %v698_v32, 4 }
  0x28   : > { %v433_v62 = vsel %vm416_vm1, %v424_v18, %v432_v46  ;;  %v591_v4 = vsel %vm574_vm2, %v582_v25, %v590_v55  ;;  %v273_v18 = vmax.bf16 %v4523_v61, %v240_v59  ;;  %v442_v22 = vsel %vm416_vm1, %v432_v46, %v695_v40  ;;  %v5418_v61 = vld [vmem:[%s6754_s1 + $0x120] sm:$0xff]  }
  0x29   : > { %1881 = vmatmul.mubr.bf16.vlgmr.msra.gmra.mrb[0].mxu0 %v433_v62  ;;  %v696_v3 = vsel %vm416_vm1, %v687_v54, %v695_v40  ;;  %v709_v23 = vrot.slane %v707_v11, 3  ;;  %v712_v24 = vrot.slane %v710_v12, 4  ;;  %v303_v25 = vrot.slane %v271_v13, 4  ;;  %v5422_v40 = vld [vmem:[%s6754_s1 + $0x188] sm:$0xff]   ;;  %v5427_v62 = vld [vmem:[%s6754_s1 + $0x1d8] sm:$0xff]  }
  0x2a   : > { %1977 = vmatprep.mubr.bf16.mxu1 %v696_v3  ;;  %4888 = vmatpush3.bf16.msra.mxu0 %v5410_v41  ;;  %v607_v31 = vrot.slane %v701_v33, 5  ;;  %v334_v34 = vmax.bf16 %v302_v16, %v270_v2  ;;  %v304_v38 = vrot.slane %v272_v17, 4  ;;  %v305_v39 = vrot.slane %v273_v18, 4  ;;  %v5423_v2 = vld [vmem:[%s6754_s1 + $0x168] sm:$0xff]   ;;  %v5428_v3 = vld [vmem:[%s6754_s1 + $0x198] sm:$0xff]  }
  0x2b   : > { %1978 = vmatmul.mubr.bf16.vlgmr.msra.gmra.mrb[0].mxu1 %v591_v4  ;;  %1888 = vmatprep.mubr.bf16.mxu0 %v536_v63  ;;  %v713_v35 = vor.u32 %v712_v24, %v709_v23  ;;  %v335_v37 = vmax.bf16 %v303_v25, %v271_v13  ;;  %v600_v32 = vsel %vm574_vm2, %v590_v55, %v5767_v14  ;;  %v539_v46 = vrot.slane %v5745_v5, 4  ;;  %v243_v13 = vld [vmem:[%s5666_s10 + $0xc8] sm:$0xff]  ;;  %v4527_v23 = vld [vmem:[%s5666_s10 + $0xf0] sm:$0xff]  ;;  %v5431_v24 = vld [vmem:[%s6754_s1 + $0x1e0] sm:$0xff]  }
  0x2c   : > { %4889 = vmatprep.subr.bf16.mxu0 %v5411_v47  ;;  %1985 = vmatprep.mubr.bf16.mxu1 %v5752_v7  ;;  %v274_v20 = vmax.bf16 %v4524_v27, %v241_v21  ;;  %v275_v33 = vmax.bf16 %v4525_v28, %v242_v26  ;;  %v336_v43 = vmax.bf16 %v304_v38, %v272_v17  ;;  %v5416_v47 = vld [vmem:[%s6754_s1 + $0x118] sm:$0xff]   ;;  %v5429_v26 = vld [vmem:[%s6754_s1 + $0x170] sm:$0xff]   ;;  %v5432_v28 = vld [vmem:[%s6754_s1 + $0x1a0] sm:$0xff]  }
  0x2d   : > { %4952 = vmatpush3.bf16.msra.mxu1 %v5420_v6  ;;  %v5800_v41 = vsel %vm416_vm1, %v5738_v0, %v713_v35  ;;  %v5802_v42 = vcombine.low %v334_v34, %v335_v37  ;;  %v337_v44 = vmax.bf16 %v305_v39, %v273_v18  ;;  %v5821_v54 = vor.u32 %v607_v31, %v604_v30  ;;  %v4526_v18 = vld [vmem:[%s5666_s10 + $0xd8] sm:$0xff]  ;;  %v245_v39 = vld [vmem:[%s5666_s10 + $0xe8] sm:$0xff] }
  0x2e   : > { %4890 = vmatpush3.bf16.msra.mxu0 %v5412_v1  ;;  %4953 = vmatprep.subr.bf16.mxu1 %v5421_v9  ;;  %v306_v48 = vrot.slane %v274_v20, 4  ;;  %v307_v49 = vrot.slane %v275_v33, 4  ;;  %v5837_v63 = vsel %vm531_vm0, %v5755_v8, %v539_v46  ;;  %v613_v6 = vrot.slane %v707_v11, 4  ;;  %v5424_v11 = vld [vmem:[%s6754_s1 + $0x128] sm:$0xff]  }
  0x2f   : > { %4891 = vmatprep.subr.bf16.mxu0 %v5413_v10  ;;  %397 = vst [vmem:[#allocation2 + $0x28] sm:$0xff] %v5802_v42  ;;  %v716_v50 = vshrl.u32 %v5802_v42, 16  ;;  %v719_v51 = vshll.u32 %v5802_v42, 16  ;;  %v5818_v53 = vcombine.low %v336_v43, %v337_v44  ;;  %v616_v9 = vrot.slane %v710_v12, 5  ;;  %v5434_v5 = vld [vmem:[%s6754_s1 + $0x1a8] sm:$0xff]  }
  0x30   : > { %v338_v55 = vmax.bf16 %v306_v48, %v274_v20  ;;  %v339_v56 = vmax.bf16 %v307_v49, %v275_v33  ;;  %v5857_v16 = vsel %vm574_vm2, %v5767_v14, %v5821_v54  ;;  %v541_v17 = vrot.slane %v5802_v42, 4  ;;  %v5430_v20 = vld [vmem:[%s6754_s1 + $0x130] sm:$0xff]  }
  0x31   : > { %1889 = vmatmul.mubr.bf16.gmra.mrb[4].mxu0 %v442_v22  ;;  %4954 = vmatpush3.bf16.msra.mxu1 %v5422_v40  ;;  %v718_v58 = vrot.slane %v716_v50, 3  ;;  %v721_v59 = vrot.slane %v719_v51, 4  ;;  %v725_v60 = vshrl.u32 %v5818_v53, 16  ;;  %v728_v1 = vshll.u32 %v5818_v53, 16  ;;  %v4528_v40 = vld [vmem:[%s5666_s10 + $0xf8] sm:$0xff] }
  0x32   : > { %1896 = vmatprep.mubr.bf16.mxu0 %v5784_v29  ;;  %4892 = vmatpush3.bf16.msra.mxu0 %v5414_v15  ;;  %v5850_v10 = vcombine.low %v338_v55, %v339_v56  ;;  %v244_v15 = vld [vmem:[%s5666_s10 + $0xe0] sm:$0xff]  ;;  %v276_v27 = vmax.bf16 %v4526_v18, %v243_v13  ;;  %v617_v30 = vor.u32 %v616_v9, %v613_v6  ;;  %v625_v31 = vrot.slane %v719_v51, 5  ;;  %v5436_v56 = vld [vmem:[%s6754_s1 + $0x138] sm:$0xff]  }
  0x33   : > { %1986 = vmatmul.mubr.bf16.gmra.mrb[4].mxu1 %v600_v32  ;;  %4893 = vmatprep.subr.bf16.mxu0 %v5415_v36  ;;  %v722_v4 = vor.u32 %v721_v59, %v718_v58  ;;  %v727_v21 = vrot.slane %v725_v60, 3  ;;  %v730_v22 = vrot.slane %v728_v1, 4  ;;  %v277_v34 = vmax.bf16 %v4527_v23, %v244_v15  ;;  %v5934_v58 = vld [vmem:[%s6754_s1 + $0x200] sm:$0xff]   ;;  %v5439_v6 = vld [vmem:[%s6754_s1 + $0x1f8] sm:$0xff]  }
  0x34   : > { %1993 = vmatprep.mubr.bf16.mxu1 %v5800_v41  ;;  %4955 = vmatprep.subr.bf16.mxu1 %v5425_v45  ;;  %v734_v25 = vshrl.u32 %v5850_v10, 16  ;;  %v737_v37 = vshll.u32 %v5850_v10, 16  ;;  %v308_v38 = vrot.slane %v276_v27, 4  ;;  %v278_v33 = vmax.bf16 %v4528_v40, %v245_v39  ;;  %v5440_v18 = vld [vmem:[%s6754_s1 + $0x1b8] sm:$0xff]  }
  0x35   : > { %4956 = vmatpush3.bf16.msra.mxu1 %v5426_v57  ;;  %v5866_v12 = vsel %vm416_vm1, %v713_v35, %v722_v4  ;;  %v5433_v35 = vld [vmem:[%s6754_s1 + $0x1e8] sm:$0xff]   ;;  %v731_v36 = vor.u32 %v730_v22, %v727_v21  ;;  %v309_v32 = vrot.slane %v277_v34, 4  ;;  %v5900_v43 = vsel %vm531_vm0, %v539_v46, %v541_v17 }
  0x36   : > { %4894 = vmatpush3.bf16.msra.mxu0 %v5416_v47  ;;  %4957 = vmatprep.subr.bf16.mxu1 %v5427_v62  ;;  %v736_v44 = vrot.slane %v734_v25, 3  ;;  %v340_v45 = vmax.bf16 %v308_v38, %v276_v27  ;;  %v5435_v47 = vld [vmem:[%s6754_s1 + $0x178] sm:$0xff]   ;;  %v5909_v48 = vsel %vm574_vm2, %v5821_v54, %v617_v30  ;;  %v310_v46 = vrot.slane %v278_v33, 4  ;;  %v5438_v62 = vld [vmem:[%s6754_s1 + $0x1b0] sm:$0xff]  }
  0x37   : > { %4895 = vmatprep.subr.bf16.mxu0 %v5417_v52  ;;  %v341_v49 = vmax.bf16 %v309_v32, %v277_v34  ;;  %v739_v51 = vrot.slane %v737_v37, 4  ;;  %v5437_v52 = vld [vmem:[%s6754_s1 + $0x1f0] sm:$0xff]   ;;  %v543_v57 = vrot.slane %v5818_v53, 4  ;;  %v631_v13 = vrot.slane %v725_v60, 4 }
  0x38   : > { %v342_v55 = vmax.bf16 %v310_v46, %v278_v33  ;;  %v5976_v53 = vrot.slane %v5850_v10, 4 }
  0x39   : > { %1897 = vmatmul.mubr.bf16.gmra.mrb[8].mxu0 %v5752_v7  ;;  %v622_v7 = vrot.slane %v716_v50, 4  ;;  %4958 = vmatpush3.bf16.msra.mxu1 %v5428_v3  ;;  %v5916_v50 = vsel %vm416_vm1, %v722_v4, %v731_v36  ;;  %v5924_v54 = vcombine.low %v340_v45, %v341_v49  ;;  %v5951_v9 = vsel %vm531_vm0, %v541_v17, %v543_v57 }
  0x3a   : > { %1904 = vmatprep.mubr.bf16.mxu0 %v5837_v63  ;;  %4896 = vmatpush3.bf16.msra.mxu0 %v5418_v61  ;;  %v4537_v61 = vcombine.low %v342_v55, %v342_v55 }
  0x3b   : > { %1994 = vmatmul.mubr.bf16.gmra.mrb[8].mxu1 %v5857_v16  ;;  %4897 = vmatprep.subr.bf16.mxu0 %v5423_v2  ;;  %v626_v59 = vor.u32 %v625_v31, %v622_v7  ;;  %400 = vst [vmem:[#allocation2 + $0x40] sm:$0xff] %v5924_v54  ;;  %v5941_v2 = vor.u32 %v739_v51, %v736_v44  ;;  %v743_v3 = vshrl.u32 %v5924_v54, 16  ;;  %v746_v4 = vshll.u32 %v5924_v54, 16 }
  0x3c   : > { %2001 = vmatprep.mubr.bf16.mxu1 %v5866_v12  ;;  %4959 = vmatprep.subr.bf16.mxu1 %v5431_v24  ;;  %401 = vst [vmem:[#allocation2 + $0x48] sm:$0xf] %v4537_v61  ;;  %v827_v24 = vld [vmem:[#allocation2 + $0x8] sm:$0xf0]  ;;  %v5985_v7 = vsel %vm531_vm0, %v543_v57, %v5976_v53  ;;  %v643_v31 = vrot.slane %v737_v37, 5 }
  0x3d   : > { %4960 = vmatpush3.bf16.msra.mxu1 %v5432_v28  ;;  %v5957_v15 = vsel %vm574_vm2, %v617_v30, %v626_v59  ;;  %v5967_v42 = vsel %vm416_vm1, %v731_v36, %v5941_v2  ;;  %v745_v60 = vrot.slane %v743_v3, 3  ;;  %v748_v17 = vrot.slane %v746_v4, 4  ;;  %v776_v61 = vld [vmem:[#allocation2 + $0x8] sm:$0xf0] }
  0x3e   : > { %4898 = vmatpush3.bf16.msra.mxu0 %v5424_v11  ;;  %4961 = vmatprep.subr.bf16.mxu1 %v5433_v35  ;;  %v634_v11 = vrot.slane %v728_v1, 5  ;;  %v640_v30 = vrot.slane %v734_v25, 4  ;;  %v840_v25 = vshll.u32 %v827_v24, 16 }
  0x3f   : > { %4899 = vmatprep.subr.bf16.mxu0 %v5429_v26  ;;  %v5981_v21 = vor.u32 %v748_v17, %v745_v60  ;;  %v794_v17 = vrot.slane %v776_v61, 4 }
  0x40   : > { %v5979_v1 = vor.u32 %v634_v11, %v631_v13  ;;  %v644_v37 = vor.u32 %v643_v31, %v640_v30  ;;  %v842_v46 = vrot.slane %v840_v25, 5  ;;  %v1037_v13 = vld [vmem:[#allocation2 + $0x10] sm:$0xf0] }
  0x41   : > { %1905 = vmatmul.mubr.bf16.gmra.mrb[12].mxu0 %v5800_v41  ;;  %4962 = vmatpush3.bf16.msra.mxu1 %v5434_v5  ;;  %v5999_v35 = vsel %vm416_vm1, %v5941_v2, %v5981_v21  ;;  %v5443_v25 = vld [vmem:[%s6754_s1 + $0x210] sm:$0xff]  }
  0x42   : > { %1912 = vmatprep.mubr.bf16.mxu0 %v5900_v43  ;;  %4900 = vmatpush3.bf16.msra.mxu0 %v5430_v20  ;;  %v415_v26 = vld [vmem:[#allocation2 + $0x40] sm:$0xf]  ;;  %v5989_v28 = vsel %vm574_vm2, %v626_v59, %v5979_v1  ;;  %v837_v20 = vshrl.u32 %v827_v24, 16  ;;  %v6008_v55 = vsel %vm574_vm2, %v5979_v1, %v644_v37 }
  0x43   : > { %2002 = vmatmul.mubr.bf16.gmra.mrb[12].mxu1 %v5909_v48  ;;  %4901 = vmatprep.subr.bf16.mxu0 %v5435_v47  ;;  %v679_v22 = vld [vmem:[#allocation2 + $0x48] sm:$0xf]  ;;  %v521_v34 = vld [vmem:[#allocation2 + $0x40] sm:$0xf]  ;;  %v489_v40 = vshrl.u32 %v415_v26, 16  ;;  %v492_v32 = vshll.u32 %v415_v26, 16 }
  0x44   : > { %2009 = vmatprep.mubr.bf16.mxu1 %v5916_v50  ;;  %4963 = vmatprep.subr.bf16.mxu1 %v5437_v52  ;;  %v752_v23 = vshrl.u32 %v679_v22, 16  ;;  %v755_v27 = vshll.u32 %v679_v22, 16  ;;  %v573_v39 = vld [vmem:[#allocation2 + $0x40] sm:$0x1f]  ;;  %v547_v10 = vrot.slane %v521_v34, 4  ;;  %v839_v5 = vrot.slane %v837_v20, 4 }
  0x45   : > { %4964 = vmatpush3.bf16.msra.mxu1 %v5438_v62  ;;  %v647_v33 = vshrl.u32 %v573_v39, 16  ;;  %v650_v44 = vshll.u32 %v573_v39, 16  ;;  %v491_v47 = vrot.slane %v489_v40, 3  ;;  %v494_v49 = vrot.slane %v492_v32, 4  ;;  %v932_v52 = vld [vmem:[#allocation2 + $0x10] sm:$0xf8] }
  0x46   : > { %4902 = vmatpush3.bf16.msra.mxu0 %v5436_v56  ;;  %4965 = vmatprep.subr.bf16.mxu1 %v5439_v6  ;;  %v754_v36 = vrot.slane %v752_v23, 3  ;;  %v757_v38 = vrot.slane %v755_v27, 4  ;;  %v548_v51 = vsel %vm531_vm0, %v5976_v53, %v547_v10  ;;  %v843_v6 = vor.u32 %v842_v46, %v839_v5  ;;  %v5448_v10 = vld [vmem:[%s6754_s1 + $0x238] sm:$0xff]  }
  0x47   : > { %5303 = vmatprep.subr.bf16.mxu0 %v5934_v58  ;;  %v649_v56 = vrot.slane %v647_v33, 4  ;;  %v652_v57 = vrot.slane %v650_v44, 5  ;;  %v495_v62 = vor.u32 %v494_v49, %v491_v47  ;;  %v942_v11 = vshrl.u32 %v932_v52, 16 }
  0x48   : > { %v758_v45 = vor.u32 %v757_v38, %v754_v36  ;;  %v1055_v22 = vrot.slane %v1037_v13, 4  ;;  %v852_v24 = vsel %vm574_vm2, %v843_v6, %v5767_v14  ;;  %v1153_v34 = vrot.slane %v743_v3, 4  ;;  %v6025_v38 = vld [vmem:[#allocation2 + $0x48] sm:$0xff]  ;;  %v1090_v6 = vld [vmem:[#allocation2 + $0x20] sm:$0xff] }
  0x49   : > { %1913 = vmatmul.mubr.bf16.gmra.mrb[16].mxu0 %v5866_v12  ;;  %4966 = vmatpush3.bf16.msra.mxu1 %v5440_v18  ;;  %v945_v18 = vshll.u32 %v932_v52, 16  ;;  %v653_v60 = vor.u32 %v652_v57, %v649_v56  ;;  %v496_v23 = vsel %vm416_vm1, %v5941_v2, %v495_v62  ;;  %v944_v26 = vrot.slane %v942_v11, 3  ;;  %v784_v57 = vld [vmem:[#allocation2 + $0x48] sm:$0xf] }
  0x4a   : > { %1920 = vmatprep.mubr.bf16.mxu0 %v5951_v9  ;;  %v759_v59 = vsel %vm416_vm1, %v5981_v21, %v758_v45  ;;  %v1057_v31 = vsel %vm531_vm0, %v1055_v22, %v5755_v8  ;;  %v1156_v36 = vrot.slane %v746_v4, 5  ;;  %v6030_v39 = vrot.slane %v5924_v54, 4  ;;  %v5442_v8 = vld [vmem:[%s6754_s1 + $0x208] sm:$0xff]  }
  0x4b   : > { %2010 = vmatmul.mubr.bf16.gmra.mrb[16].mxu1 %v5957_v15  ;;  %v947_v27 = vrot.slane %v945_v18, 4  ;;  %v654_v30 = vsel %vm574_vm2, %v644_v37, %v653_v60  ;;  %v1068_v3 = vrot.slane %v6025_v38, 4  ;;  %v796_v40 = vsel %vm531_vm0, %v794_v17, %v5704_v19  ;;  %v5444_v19 = vld [vmem:[%s6754_s1 + $0x218] sm:$0xff]   ;;  %v1091_v18 = vld [vmem:[#allocation2 + $0x28] sm:$0xff] }
  0x4c   : > { %2017 = vmatprep.mubr.bf16.mxu1 %v5967_v42  ;;  %v6027_v2 = vor.u32 %v1156_v36, %v1153_v34  ;;  %v1004_v32 = vshrl.u32 %v6025_v38, 16  ;;  %v1007_v20 = vshll.u32 %v6025_v38, 16  ;;  %v809_v17 = vrot.slane %v784_v57, 4  ;;  %v5449_v38 = vld [vmem:[%s6756_s3 + $0x40] sm:$0xff]  }
  0x4d   : > { %v948_v14 = vor.u32 %v947_v27, %v944_v26  ;;  %v1115_v22 = vshrl.u32 %v1090_v6, 16  ;;  %v1124_v27 = vshrl.u32 %v1091_v18, 16  ;;  %5031 = vmatprep.subr.bf16.mxu1 %v5449_v38  ;;  %v5476_v38 = vld [vmem:[%s6756_s3 + $0x38] sm:$0xff]  }
  0x4e   : > { %v6038_v4 = vsel %vm574_vm2, %v644_v37, %v6027_v2  ;;  %v1089_v37 = vld [vmem:[#allocation2 + $0x18] sm:$0xff] }
  0x4f   : > { %v957_v54 = vsel %vm416_vm1, %v948_v14, %v5738_v0  ;;  %v5445_v0 = vld [vmem:[%s6754_s1 + $0x220] sm:$0xff]   ;;  %v1106_v47 = vshrl.u32 %v1089_v37, 16  ;;  %v1109_v49 = vshll.u32 %v1089_v37, 16  ;;  %v1117_v34 = vrot.slane %v1115_v22, 4 }
  0x50   : > { %v5459_v37 = vld [vmem:[%s6756_s3 + $0xc0] sm:$0xff]  }
  0x51   : > { %1921 = vmatmul.mubr.bf16.gmra.mrb[20].mxu0 %v5916_v50  ;;  %v1108_v61 = vrot.slane %v1106_v47, 4  ;;  %v1111_v62 = vrot.slane %v1109_v49, 5  ;;  %v5465_v47 = vld [vmem:[%s6756_s3 + $0xd0] sm:$0xff]   ;;  %v6168_v49 = vld [vmem:[%s6755_s2] ss:$0 sm:$0xff] }
  0x52   : > { %1928 = vmatprep.mubr.bf16.mxu0 %v5985_v7  ;;  %v5472_v22 = vld [vmem:[%s6756_s3 + $0xa0] sm:$0xff]  }
  0x53   : > { %2018 = vmatmul.mubr.bf16.gmra.mrb[20].mxu1 %v5989_v28  ;;  %v1112_v26 = vor.u32 %v1111_v62, %v1108_v61 }
  0x54   : > { %2025 = vmatprep.mubr.bf16.mxu1 %v5999_v35 }
  0x59   : > { %1929 = vmatmul.mubr.bf16.gmra.mrb[24].mxu0 %v5967_v42 }
  0x5a   : > { %1936 = vmatprep.mubr.bf16.mxu0 %v548_v51 }
  0x5b   : > { %2026 = vmatmul.mubr.bf16.gmra.mrb[24].mxu1 %v6008_v55 }
  0x5c   : > { %2033 = vmatprep.mubr.bf16.mxu1 %v759_v59 }
  0x61   : > { %1937 = vmatmul.mubr.bf16.gmra.mrb[28].mxu0 %v496_v23  ;;  %v1118_v23 = vshll.u32 %v1090_v6, 16  ;;  %v5467_v6 = vld [vmem:[%s6756_s3 + $0xd8] sm:$0xff]  }
  0x62   : > { %2074 = vmatprep.mubr.bf16.mxu0 %v852_v24 }
  0x63   : > { %2034 = vmatmul.mubr.bf16.gmra.mrb[28].mxu1 %v654_v30  ;;  %v1127_v30 = vshll.u32 %v1091_v18, 16  ;;  %v1120_v36 = vrot.slane %v1118_v23, 5 }
  0x64   : > { %2171 = vmatprep.mubr.bf16.mxu1 %v1057_v31 }
  0x69   : > { %2075 = vmatmul.mubr.bf16.vlgmr.msra.gmra.mrb[32].mxu0 %v796_v40 }
  0x6a   : > { %5304 = vmatpush3.bf16.msra.mxu0 %v5934_v58  ;;  %2082 = vmatprep.mubr.bf16.mxu0 %v5857_v16  ;;  %v5446_v16 = vld [vmem:[%s6754_s1 + $0x228] sm:$0xff]  }
  0x6b   : > { %2172 = vmatmul.mubr.bf16.vlgmr.msra.gmra.mrb[32].mxu1 %v957_v54  ;;  %5305 = vmatprep.subr.bf16.mxu0 %v5442_v8  ;;  %v835_v58 = vld [vmem:[#allocation2 + $0x48] sm:$0x1f]  ;;  %v1121_v54 = vor.u32 %v1120_v36, %v1117_v34 }
  0x6c   : > { %2179 = vmatprep.mubr.bf16.mxu1 %v5837_v63 }
  0x6e   : > { %5306 = vmatpush3.bf16.msra.mxu0 %v5442_v8  ;;  %v1126_v8 = vrot.slane %v1124_v27, 4 }
  0x6f   : > { %5307 = vmatprep.subr.bf16.mxu0 %v5443_v25 }
  0x71   : > { %2083 = vmatmul.mubr.bf16.gmra.mrb[36].mxu0 %v5784_v29  ;;  %v5447_v29 = vld [vmem:[%s6754_s1 + $0x230] sm:$0xff]  }
  0x72   : > { %2090 = vmatprep.mubr.bf16.mxu0 %v5909_v48  ;;  %5308 = vmatpush3.bf16.msra.mxu0 %v5443_v25  ;;  %v911_v48 = vshll.u32 %v835_v58, 16 }
  0x73   : > { %2180 = vmatmul.mubr.bf16.gmra.mrb[36].mxu1 %v5800_v41  ;;  %5309 = vmatprep.subr.bf16.mxu0 %v5444_v19  ;;  %v908_v41 = vshrl.u32 %v835_v58, 16  ;;  %v1165_v58 = vrot.slane %v1007_v20, 5 }
  0x74   : > { %2187 = vmatprep.mubr.bf16.mxu1 %v5900_v43 }
  0x76   : > { %5310 = vmatpush3.bf16.msra.mxu0 %v5444_v19  ;;  %v1122_v19 = vsel %vm574_vm2, %v1112_v26, %v1121_v54 }
  0x77   : > { %5311 = vmatprep.subr.bf16.mxu0 %v5445_v0 }
  0x79   : > { %2091 = vmatmul.mubr.bf16.gmra.mrb[40].mxu0 %v5837_v63  ;;  %v1067_v63 = vsel %vm531_vm0, %v5976_v53, %v6030_v39  ;;  %v940_v53 = vld [vmem:[#allocation2 + $0x50] sm:$0xf] }
  0x7a   : > { %2098 = vmatprep.mubr.bf16.mxu0 %v5957_v15  ;;  %5312 = vmatpush3.bf16.msra.mxu0 %v5445_v0  ;;  %v1088_v15 = vld [vmem:[#allocation2 + $0x10] sm:$0xf0]  ;;  %v1013_v46 = vshrl.u32 %v940_v53, 16 }
  0x7b   : > { %2188 = vmatmul.mubr.bf16.gmra.mrb[40].mxu1 %v5866_v12  ;;  %5313 = vmatprep.subr.bf16.mxu0 %v5446_v16  ;;  %v910_v12 = vrot.slane %v908_v41, 4  ;;  %v1098_v33 = vshrl.u32 %v1088_v15, 16  ;;  %v1101_v45 = vshll.u32 %v1088_v15, 16  ;;  %v5454_v15 = vld [vmem:[%s6756_s3 + $0x10] sm:$0xff]  }
  0x7c   : > { %2195 = vmatprep.mubr.bf16.mxu1 %v5951_v9  ;;  %v1015_v13 = vrot.slane %v1013_v46, 3  ;;  %v5466_v46 = vld [vmem:[%s6756_s3 + $0x90] sm:$0xff]  }
  0x7d   : > { %v1100_v52 = vrot.slane %v1098_v33, 4  ;;  %v1103_v59 = vrot.slane %v1101_v45, 5  ;;  %v5461_v33 = vld [vmem:[%s6756_s3 + $0xc8] sm:$0xff]  }
  0x7e   : > { %5314 = vmatpush3.bf16.msra.mxu0 %v5446_v16  ;;  %v1162_v16 = vrot.slane %v1004_v32, 4 }
  0x7f   : > { %5315 = vmatprep.subr.bf16.mxu0 %v5447_v29  ;;  %v1104_v24 = vor.u32 %v1103_v59, %v1100_v52 }
  0x81   : > { %2099 = vmatmul.mubr.bf16.gmra.mrb[44].mxu0 %v5900_v43  ;;  %v913_v43 = vrot.slane %v911_v48, 5  ;;  %v1113_v14 = vsel %vm574_vm2, %v1104_v24, %v1112_v26 }
  0x82   : > { %2106 = vmatprep.mubr.bf16.mxu0 %v5989_v28  ;;  %5316 = vmatpush3.bf16.msra.mxu0 %v5447_v29  ;;  %v1009_v28 = vrot.slane %v1007_v20, 4  ;;  %v1096_v29 = vld [vmem:[#allocation2 + $0x50] sm:$0x1f] }
  0x83   : > { %2196 = vmatmul.mubr.bf16.gmra.mrb[44].mxu1 %v5916_v50  ;;  %5317 = vmatprep.subr.bf16.mxu0 %v5448_v10  ;;  %v1006_v50 = vrot.slane %v1004_v32, 3  ;;  %v914_v44 = vor.u32 %v913_v43, %v910_v12  ;;  %v1169_v41 = vshrl.u32 %v1096_v29, 16  ;;  %v1172_v48 = vshll.u32 %v1096_v29, 16  ;;  %v5453_v20 = vld [vmem:[%s6756_s3 + $0x50] sm:$0xff]  }
  0x84   : > { %2203 = vmatprep.mubr.bf16.mxu1 %v5985_v7 }
  0x85   : > { %v1010_v5 = vor.u32 %v1009_v28, %v1006_v50  ;;  %v915_v56 = vsel %vm574_vm2, %v6027_v2, %v914_v44  ;;  %v1174_v12 = vrot.slane %v1172_v48, 5  ;;  %v5455_v50 = vld [vmem:[%s6756_s3 + $0x58] sm:$0xff]   ;;  %v5462_v44 = vld [vmem:[%s6756_s3 + $0x88] sm:$0xff]  }
  0x86   : > { %5318 = vmatpush3.bf16.msra.mxu0 %v5448_v10  ;;  %v1166_v10 = vor.u32 %v1165_v58, %v1162_v16  ;;  %v5456_v28 = vld [vmem:[%s6756_s3 + $0x18] sm:$0xff]   ;;  %v5478_v58 = vld [vmem:[%s6756_s3 + $0xb0] sm:$0xff]  }
  0x87   : > { %5095 = vmatprep.subr.bf16.mxu0 %v5459_v37 }
  0x88   : > { %v1167_v43 = vsel %vm574_vm2, %v6027_v2, %v1166_v10  ;;  %v5451_v2 = vld [vmem:[%s6756_s3 + $0x48] sm:$0xff]  }
  0x89   : > { %2107 = vmatmul.mubr.bf16.gmra.mrb[48].mxu0 %v5951_v9  ;;  %v1069_v9 = vsel %vm531_vm0, %v6030_v39, %v1068_v3 }
  0x8a   : > { %2114 = vmatprep.mubr.bf16.mxu0 %v6008_v55 }
  0x8b   : > { %2204 = vmatmul.mubr.bf16.gmra.mrb[48].mxu1 %v5967_v42  ;;  %v1045_v42 = vld [vmem:[#allocation2 + $0x50] sm:$0xf] }
  0x8c   : > { %2211 = vmatprep.mubr.bf16.mxu1 %v1067_v63  ;;  %v1070_v51 = vrot.slane %v1045_v42, 4  ;;  %v5458_v42 = vld [vmem:[%s6756_s3 + $0x20] sm:$0xff]  }
  0x8e   : > { %v1071_v60 = vsel %vm531_vm0, %v1068_v3, %v1070_v51  ;;  %v1129_v3 = vrot.slane %v1127_v30, 5 }
  0x90   : > { %v1130_v25 = vor.u32 %v1129_v3, %v1126_v8  ;;  %v5473_v8 = vld [vmem:[%s6756_s3 + $0xe8] sm:$0xff]  }
  0x91   : > { %2115 = vmatmul.mubr.bf16.gmra.mrb[52].mxu0 %v5985_v7  ;;  %v1016_v7 = vshll.u32 %v940_v53, 16  ;;  %v5457_v53 = vld [vmem:[%s6756_s3 + $0x60] sm:$0xff]  }
  0x92   : > { %2122 = vmatprep.mubr.bf16.mxu0 %v6038_v4  ;;  %v1131_v0 = vsel %vm574_vm2, %v1121_v54, %v1130_v25 }
  0x93   : > { %2212 = vmatmul.mubr.bf16.gmra.mrb[52].mxu1 %v5999_v35  ;;  %v1011_v35 = vsel %vm416_vm1, %v5981_v21, %v1010_v5  ;;  %v1018_v11 = vrot.slane %v1016_v7, 4  ;;  %v810_v21 = vsel %vm531_vm0, %v6030_v39, %v809_v17  ;;  %v1140_v39 = vsel %vm574_vm2, %v1130_v25, %v5979_v1  ;;  %v5469_v25 = vld [vmem:[%s6756_s3 + $0x70] sm:$0xff]  }
  0x94   : > { %2219 = vmatprep.mubr.bf16.mxu1 %v1069_v9  ;;  %v5460_v9 = vld [vmem:[%s6756_s3 + $0x80] sm:$0xff]  }
  0x95   : > { %v1019_v31 = vor.u32 %v1018_v11, %v1015_v13  ;;  %v5468_v13 = vld [vmem:[%s6756_s3 + $0x98] sm:$0xff]  }
  0x97   : > { %v1020_v40 = vsel %vm416_vm1, %v1010_v5, %v1019_v31  ;;  %v5463_v31 = vld [vmem:[%s6756_s3 + $0x68] sm:$0xff]  }
  0x99   : > { %2123 = vmatmul.mubr.bf16.gmra.mrb[56].mxu0 %v1067_v63  ;;  %v1171_v63 = vrot.slane %v1169_v41, 4 }
  0x9a   : > { %2130 = vmatprep.mubr.bf16.mxu0 %v915_v56 }
  0x9b   : > { %2220 = vmatmul.mubr.bf16.gmra.mrb[56].mxu1 %v1011_v35  ;;  %v1175_v1 = vor.u32 %v1174_v12, %v1171_v63  ;;  %v5475_v12 = vld [vmem:[%s6756_s3 + $0x78] sm:$0xff]  }
  0x9c   : > { %2227 = vmatprep.mubr.bf16.mxu1 %v1071_v60  ;;  %v5471_v60 = vld [vmem:[%s6756_s3 + $0xe0] sm:$0xff]  }
  0x9d   : > { %v1176_v32 = vsel %vm574_vm2, %v1166_v10, %v1175_v1 }
  0xa1   : > { %2131 = vmatmul.mubr.bf16.gmra.mrb[60].mxu0 %v810_v21  ;;  %v5464_v21 = vld [vmem:[%s6756_s3 + $0x28] sm:$0xff]  }
  0xa2   : > { %5319 = vmatprep.mubr.bf16.mxu0 %v1113_v14 }
  0xa3   : > { %2228 = vmatmul.mubr.bf16.gmra.mrb[60].mxu1 %v1020_v40  ;;  %v5474_v40 = vld [vmem:[%s6756_s3 + $0xa8] sm:$0xff]  }
  0xa9   : > { %5320 = vmatmul.mubr.bf16.vlgmr.msra.gmra.mrb[64].mxu0 %v1122_v19 }
  0xaa   : > { %5323 = vmatprep.mubr.bf16.mxu0 %v1131_v0  ;;  %5096 = vmatpush3.bf16.msra.mxu0 %v5460_v9  ;;  %v5470_v0 = vld [vmem:[%s6756_s3 + $0x30] sm:$0xff]  }
  0xab   : > { %5097 = vmatprep.subr.bf16.mxu0 %v5461_v33 }
  0xae   : > { %5098 = vmatpush3.bf16.msra.mxu0 %v5462_v44 }
  0xaf   : > { %5099 = vmatprep.subr.bf16.mxu0 %v5465_v47 }
  0xb1   : > { %5324 = vmatmul.mubr.bf16.gmra.mrb[68].mxu0 %v1140_v39  ;;  %v5477_v39 = vld [vmem:[%s6756_s3 + $0xf0] sm:$0xff]  }
  0xb2   : > { %5327 = vmatprep.mubr.bf16.mxu0 %v6008_v55  ;;  %v5450_v55 = vld [vmem:[%s6756_s3] sm:$0xff]   ;;  %5100 = vmatpush3.bf16.msra.mxu0 %v5466_v46 }
  0xb3   : > { %5032 = vmatpush3.bf16.msra.mxu1 %v5450_v55  ;;  %5101 = vmatprep.subr.bf16.mxu0 %v5467_v6  ;;  %v5479_v55 = vld [vmem:[%s6756_s3 + $0xf8] sm:$0xff]  }
  0xb4   : > { %5033 = vmatprep.subr.bf16.mxu1 %v5451_v2 }
  0xb6   : > { %5102 = vmatpush3.bf16.msra.mxu0 %v5468_v13 }
  0xb7   : > { %5103 = vmatprep.subr.bf16.mxu0 %v5471_v60 }
  0xb9   : > { %5328 = vmatmul.mubr.bf16.gmra.mrb[72].mxu0 %v6038_v4  ;;  %v5452_v4 = vld [vmem:[%s6756_s3 + $0x8] sm:$0xff]  }
  0xba   : > { %5331 = vmatprep.mubr.bf16.mxu0 %v1167_v43  ;;  %5034 = vmatpush3.bf16.msra.mxu1 %v5452_v4  ;;  %v5480_v4 = vld [vmem:[%s6756_s3 + $0xb8] sm:$0xff]  }
  0xbb   : > { %5035 = vmatprep.subr.bf16.mxu1 %v5453_v20  ;;  %5104 = vmatpush3.bf16.msra.mxu0 %v5472_v22 }
  0xbc   : > { %5105 = vmatprep.subr.bf16.mxu0 %v5473_v8 }
  0xbe   : > { %5036 = vmatpush3.bf16.msra.mxu1 %v5454_v15 }
  0xbf   : > { %5037 = vmatprep.subr.bf16.mxu1 %v5455_v50  ;;  %5106 = vmatpush3.bf16.msra.mxu0 %v5474_v40 }
  0xc0   : > { %5107 = vmatprep.subr.bf16.mxu0 %v5477_v39 }
  0xc1   : > { %5332 = vmatmul.mubr.bf16.gmra.mrb[76].mxu0 %v1176_v32 }
  0xc2   : > { %5038 = vmatpush3.bf16.msra.mxu1 %v5456_v28 }
  0xc3   : > { %5039 = vmatprep.subr.bf16.mxu1 %v5457_v53  ;;  %5108 = vmatpush3.bf16.msra.mxu0 %v5478_v58 }
  0xc4   : > { %5109 = vmatprep.subr.bf16.mxu0 %v5479_v55 }
  0xc6   : > { %5040 = vmatpush3.bf16.msra.mxu1 %v5458_v42 }
  0xc7   : > { %5041 = vmatprep.subr.bf16.mxu1 %v5463_v31  ;;  %5110 = vmatpush3.bf16.msra.mxu0 %v5480_v4 }
  0xca   : > { %5042 = vmatpush3.bf16.msra.mxu1 %v5464_v21 }
  0xcb   : > { %5043 = vmatprep.subr.bf16.mxu1 %v5469_v25 }
  0xce   : > { %5044 = vmatpush3.bf16.msra.mxu1 %v5470_v0 }
  0xcf   : > { %5045 = vmatprep.subr.bf16.mxu1 %v5475_v12 }
  0xd2   : > { %5046 = vmatpush3.bf16.msra.mxu1 %v5476_v38 }
  0xfc   : > { %v4775_v45 = vpop.f32.mrb[0].mxu0 }
  0xfd   : > { %v4776_v5 = vpop.f32.mrb[1].mxu0 }
  0xfe   : > { %v4777_v7 = vadd.f32 %v4776_v5, %v4775_v45  ;;  %v4778_v51 = vpop.f32.mrb[2].mxu0  ;;  %v4839_v52 = vpop.f32.mrb[0].mxu1 }
  0xff   : > { %v4779_v56 = vpop.f32.mrb[3].mxu0  ;;  %v4840_v57 = vpop.f32.mrb[1].mxu1 }
 0x100   : > { %v1883_v59 = vadd.f32 %v4777_v7, %v6168_v49  ;;  %v4841_v61 = vadd.f32 %v4840_v57, %v4839_v52  ;;  %v4842_v62 = vpop.f32.mrb[2].mxu1 }
 0x101   : > { %v4843_v35 = vpop.f32.mrb[3].mxu1 }
 0x102   : > { %v6180_v11 = vadd.f32 %v4841_v61, %v1883_v59  ;;  %v5481_v61 = vld [vmem:[%s6756_s3 + $0x140] sm:$0xff]  }
 0x103   : > { %5159 = vmatprep.subr.bf16.mxu1 %v5481_v61 }
 0x104   : > { %v4781_v18 = vpop.f32.mrb[4].mxu0 }
 0x105   : > { %v4782_v17 = vpop.f32.mrb[5].mxu0 }
 0x106   : > { %v4783_v23 = vadd.f32 %v4782_v17, %v4781_v18  ;;  %v4784_v24 = vpop.f32.mrb[6].mxu0  ;;  %v4845_v26 = vpop.f32.mrb[4].mxu1 }
 0x107   : > { %v4785_v27 = vpop.f32.mrb[7].mxu0  ;;  %v4846_v30 = vpop.f32.mrb[5].mxu1 }
 0x108   : > { %v1891_v34 = vadd.f32 %v4783_v23, %v6168_v49  ;;  %v4847_v36 = vadd.f32 %v4846_v30, %v4845_v26  ;;  %v4848_v14 = vpop.f32.mrb[6].mxu1 }
 0x109   : > { %v4849_v3 = vpop.f32.mrb[7].mxu1 }
 0x10a   : > { %v6201_v54 = vadd.f32 %v4847_v36, %v1891_v34 }
 0x10c   : > { %v4787_v19 = vpop.f32.mrb[8].mxu0 }
 0x10d   : > { %v4788_v16 = vpop.f32.mrb[9].mxu0 }
 0x10e   : > { %v4789_v29 = vadd.f32 %v4788_v16, %v4787_v19  ;;  %v4790_v41 = vpop.f32.mrb[10].mxu0  ;;  %v4851_v48 = vpop.f32.mrb[8].mxu1 }
 0x10f   : > { %v4791_v10 = vpop.f32.mrb[11].mxu0  ;;  %v4852_v63 = vpop.f32.mrb[9].mxu1  ;;  %v5489_v41 = vld [vmem:[%s6756_s3 + $0x1c0] sm:$0xff]  }
 0x110   : > { %v1899_v43 = vadd.f32 %v4789_v29, %v6168_v49  ;;  %v4853_v1 = vadd.f32 %v4852_v63, %v4851_v48  ;;  %v4854_v32 = vpop.f32.mrb[10].mxu1  ;;  %5223 = vmatprep.subr.bf16.mxu0 %v5489_v41 }
 0x111   : > { %v4855_v2 = vpop.f32.mrb[11].mxu1 }
 0x112   : > { %v6228_v20 = vadd.f32 %v4853_v1, %v1899_v43 }
 0x114   : > { %v4793_v15 = vpop.f32.mrb[12].mxu0 }
 0x115   : > { %v4794_v50 = vpop.f32.mrb[13].mxu0 }
 0x116   : > { %v4795_v28 = vadd.f32 %v4794_v50, %v4793_v15  ;;  %v4796_v37 = vpop.f32.mrb[14].mxu0  ;;  %v4857_v9 = vpop.f32.mrb[12].mxu1 }
 0x117   : > { %v4797_v53 = vpop.f32.mrb[15].mxu0  ;;  %v4858_v42 = vpop.f32.mrb[13].mxu1 }
 0x118   : > { %v1907_v33 = vadd.f32 %v4795_v28, %v6168_v49  ;;  %v4859_v44 = vadd.f32 %v4858_v42, %v4857_v9  ;;  %v4860_v45 = vpop.f32.mrb[14].mxu1 }
 0x119   : > { %v4861_v47 = vpop.f32.mrb[15].mxu1 }
 0x11a   : > { %v6231_v5 = vadd.f32 %v4859_v44, %v1907_v33 }
 0x11c   : > { %v4799_v46 = vpop.f32.mrb[16].mxu0 }
 0x11d   : > { %v4800_v7 = vpop.f32.mrb[17].mxu0 }
 0x11e   : > { %v4801_v51 = vadd.f32 %v4800_v7, %v4799_v46  ;;  %v4802_v52 = vpop.f32.mrb[18].mxu0  ;;  %v4863_v56 = vpop.f32.mrb[16].mxu1 }
 0x11f   : > { %v4803_v57 = vpop.f32.mrb[19].mxu0  ;;  %v4864_v59 = vpop.f32.mrb[17].mxu1 }
 0x120   : > { %v1915_v62 = vadd.f32 %v4801_v51, %v6168_v49  ;;  %v4865_v6 = vadd.f32 %v4864_v59, %v4863_v56  ;;  %v4866_v35 = vpop.f32.mrb[18].mxu1 }
 0x121   : > { %v4867_v13 = vpop.f32.mrb[19].mxu1 }
 0x122   : > { %v6237_v18 = vadd.f32 %v4865_v6, %v1915_v62 }
 0x124   : > { %v4805_v60 = vpop.f32.mrb[20].mxu0 }
 0x125   : > { %v4806_v17 = vpop.f32.mrb[21].mxu0 }
 0x126   : > { %v4807_v22 = vadd.f32 %v4806_v17, %v4805_v60  ;;  %v4808_v23 = vpop.f32.mrb[22].mxu0  ;;  %v4869_v24 = vpop.f32.mrb[20].mxu1 }
 0x127   : > { %v4809_v26 = vpop.f32.mrb[23].mxu0  ;;  %v4870_v27 = vpop.f32.mrb[21].mxu1 }
 0x128   : > { %v1923_v30 = vadd.f32 %v4807_v22, %v6168_v49  ;;  %v4871_v31 = vadd.f32 %v4870_v27, %v4869_v24  ;;  %v4872_v21 = vpop.f32.mrb[22].mxu1 }
 0x129   : > { %v4873_v34 = vpop.f32.mrb[23].mxu1 }
 0x12a   : > { %v6240_v36 = vadd.f32 %v4871_v31, %v1923_v30 }
 0x12c   : > { %v4811_v14 = vpop.f32.mrb[24].mxu0 }
 0x12d   : > { %v4812_v8 = vpop.f32.mrb[25].mxu0 }
 0x12e   : > { %v4813_v3 = vadd.f32 %v4812_v8, %v4811_v14  ;;  %v4814_v40 = vpop.f32.mrb[26].mxu0  ;;  %v4875_v25 = vpop.f32.mrb[24].mxu1 }
 0x12f   : > { %v4815_v19 = vpop.f32.mrb[27].mxu0  ;;  %v4876_v0 = vpop.f32.mrb[25].mxu1 }
 0x130   : > { %v1931_v39 = vadd.f32 %v4813_v3, %v6168_v49  ;;  %v4877_v16 = vadd.f32 %v4876_v0, %v4875_v25  ;;  %v4878_v58 = vpop.f32.mrb[26].mxu1 }
 0x131   : > { %v4879_v29 = vpop.f32.mrb[27].mxu1 }
 0x132   : > { %v6246_v48 = vadd.f32 %v4877_v16, %v1931_v39 }
 0x134   : > { %v4817_v10 = vpop.f32.mrb[28].mxu0 }
 0x135   : > { %v4818_v63 = vpop.f32.mrb[29].mxu0 }
 0x136   : > { %v4819_v12 = vadd.f32 %v4818_v63, %v4817_v10  ;;  %v4820_v43 = vpop.f32.mrb[30].mxu0  ;;  %v4881_v1 = vpop.f32.mrb[28].mxu1 }
 0x137   : > { %v4821_v32 = vpop.f32.mrb[31].mxu0  ;;  %v4882_v38 = vpop.f32.mrb[29].mxu1 }
 0x138   : > { %v1939_v55 = vadd.f32 %v4819_v12, %v6168_v49  ;;  %v4883_v2 = vadd.f32 %v4882_v38, %v4881_v1  ;;  %v4884_v4 = vpop.f32.mrb[30].mxu1 }
 0x139   : > { %v4885_v15 = vpop.f32.mrb[31].mxu1 }
 0x13a   : > { %v6249_v50 = vadd.f32 %v4883_v2, %v1939_v55 }
 0x13c   : > { %v4903_v28 = vpop.f32.mrb[32].mxu0 }
 0x13d   : > { %v4904_v37 = vpop.f32.mrb[33].mxu0 }
 0x13e   : > { %v4905_v9 = vadd.f32 %v4904_v37, %v4903_v28  ;;  %v4906_v53 = vpop.f32.mrb[34].mxu0  ;;  %v4967_v42 = vpop.f32.mrb[32].mxu1 }
 0x13f   : > { %v4907_v33 = vpop.f32.mrb[35].mxu0  ;;  %v4968_v44 = vpop.f32.mrb[33].mxu1 }
 0x140   : > { %v2077_v45 = vadd.f32 %v4905_v9, %v6180_v11  ;;  %v4969_v47 = vadd.f32 %v4968_v44, %v4967_v42  ;;  %v4970_v46 = vpop.f32.mrb[34].mxu1 }
 0x141   : > { %v4971_v7 = vpop.f32.mrb[35].mxu1 }
 0x142   : > { %v6252_v51 = vadd.f32 %v4969_v47, %v2077_v45 }
 0x144   : > { %v4909_v49 = vpop.f32.mrb[36].mxu0 }
 0x145   : > { %v4910_v52 = vpop.f32.mrb[37].mxu0 }
 0x146   : > { %v4911_v56 = vadd.f32 %v4910_v52, %v4909_v49  ;;  %v4912_v57 = vpop.f32.mrb[38].mxu0  ;;  %v4973_v59 = vpop.f32.mrb[36].mxu1 }
 0x147   : > { %v4913_v61 = vpop.f32.mrb[39].mxu0  ;;  %v4974_v62 = vpop.f32.mrb[37].mxu1 }
 0x148   : > { %v2085_v6 = vadd.f32 %v4911_v56, %v6201_v54  ;;  %v4975_v35 = vadd.f32 %v4974_v62, %v4973_v59  ;;  %v4976_v13 = vpop.f32.mrb[38].mxu1 }
 0x149   : > { %v4977_v60 = vpop.f32.mrb[39].mxu1 }
 0x14a   : > { %v6255_v17 = vadd.f32 %v4975_v35, %v2085_v6 }
 0x14c   : > { %v4915_v11 = vpop.f32.mrb[40].mxu0 }
 0x14d   : > { %v4916_v22 = vpop.f32.mrb[41].mxu0 }
 0x14e   : > { %v4917_v23 = vadd.f32 %v4916_v22, %v4915_v11  ;;  %v4918_v24 = vpop.f32.mrb[42].mxu0  ;;  %v4979_v26 = vpop.f32.mrb[40].mxu1 }
 0x14f   : > { %v4919_v27 = vpop.f32.mrb[43].mxu0  ;;  %v4980_v30 = vpop.f32.mrb[41].mxu1 }
 0x150   : > { %v2093_v31 = vadd.f32 %v4917_v23, %v6228_v20  ;;  %v4981_v21 = vadd.f32 %v4980_v30, %v4979_v26  ;;  %v4982_v34 = vpop.f32.mrb[42].mxu1 }
 0x151   : > { %v4983_v14 = vpop.f32.mrb[43].mxu1 }
 0x152   : > { %v6258_v8 = vadd.f32 %v4981_v21, %v2093_v31 }
 0x154   : > { %v4921_v54 = vpop.f32.mrb[44].mxu0 }
 0x155   : > { %v4922_v3 = vpop.f32.mrb[45].mxu0 }
 0x156   : > { %v4923_v40 = vadd.f32 %v4922_v3, %v4921_v54  ;;  %v4924_v25 = vpop.f32.mrb[46].mxu0  ;;  %v4985_v19 = vpop.f32.mrb[44].mxu1 }
 0x157   : > { %v4925_v0 = vpop.f32.mrb[47].mxu0  ;;  %v4986_v39 = vpop.f32.mrb[45].mxu1 }
 0x158   : > { %v2101_v16 = vadd.f32 %v4923_v40, %v6231_v5  ;;  %v4987_v58 = vadd.f32 %v4986_v39, %v4985_v19  ;;  %v4988_v29 = vpop.f32.mrb[46].mxu1 }
 0x159   : > { %v4989_v41 = vpop.f32.mrb[47].mxu1  ;;  %v5530_v29 = vmov 0.0  }
 0x15a   : > { %v6261_v10 = vadd.f32 %v4987_v58, %v2101_v16  ;;  %v2414_v58 = vld [vmem:[#allocation2] sm:$0xf8] }
 0x15c   : > { %v4927_v20 = vpop.f32.mrb[48].mxu0 }
 0x15d   : > { %v4928_v63 = vpop.f32.mrb[49].mxu0 }
 0x15e   : > { %v4929_v12 = vadd.f32 %v4928_v63, %v4927_v20  ;;  %v4930_v43 = vpop.f32.mrb[50].mxu0  ;;  %v4991_v1 = vpop.f32.mrb[48].mxu1 }
 0x15f   : > { %v4931_v32 = vpop.f32.mrb[51].mxu0  ;;  %v4992_v38 = vpop.f32.mrb[49].mxu1 }
 0x160   : > { %v2109_v55 = vadd.f32 %v4929_v12, %v6237_v18  ;;  %v4993_v2 = vadd.f32 %v4992_v38, %v4991_v1  ;;  %v4994_v4 = vpop.f32.mrb[50].mxu1  ;;  %v2424_v12 = vshrl.u32 %v2414_v58, 16  ;;  %v2427_v32 = vshll.u32 %v2414_v58, 16 }
 0x161   : > { %v4995_v15 = vpop.f32.mrb[51].mxu1 }
 0x162   : > { %v6264_v28 = vadd.f32 %v4993_v2, %v2109_v55 }
 0x164   : > { %v4933_v5 = vpop.f32.mrb[52].mxu0 }
 0x165   : > { %v4934_v37 = vpop.f32.mrb[53].mxu0 }
 0x166   : > { %v4935_v9 = vadd.f32 %v4934_v37, %v4933_v5  ;;  %v4936_v53 = vpop.f32.mrb[54].mxu0  ;;  %v4997_v42 = vpop.f32.mrb[52].mxu1 }
 0x167   : > { %v4937_v33 = vpop.f32.mrb[55].mxu0  ;;  %v4998_v44 = vpop.f32.mrb[53].mxu1 }
 0x168   : > { %v2117_v45 = vadd.f32 %v4935_v9, %v6240_v36  ;;  %v4999_v47 = vadd.f32 %v4998_v44, %v4997_v42  ;;  %v5000_v46 = vpop.f32.mrb[54].mxu1  ;;  %v6285_v9 = vrot.slane %v2424_v12, 3 }
 0x169   : > { %v5001_v7 = vpop.f32.mrb[55].mxu1 }
 0x16a   : > { %v6267_v49 = vadd.f32 %v4999_v47, %v2117_v45 }
 0x16c   : > { %v4939_v18 = vpop.f32.mrb[56].mxu0 }
 0x16d   : > { %v4940_v52 = vpop.f32.mrb[57].mxu0 }
 0x16e   : > { %v4941_v56 = vadd.f32 %v4940_v52, %v4939_v18  ;;  %v4942_v57 = vpop.f32.mrb[58].mxu0  ;;  %v5003_v59 = vpop.f32.mrb[56].mxu1 }
 0x16f   : > { %v4943_v61 = vpop.f32.mrb[59].mxu0  ;;  %v5004_v62 = vpop.f32.mrb[57].mxu1 }
 0x170   : > { %v2125_v6 = vadd.f32 %v4941_v56, %v6246_v48  ;;  %v5005_v35 = vadd.f32 %v5004_v62, %v5003_v59  ;;  %v5006_v13 = vpop.f32.mrb[58].mxu1 }
 0x171   : > { %v5007_v60 = vpop.f32.mrb[59].mxu1 }
 0x172   : > { %v6270_v11 = vadd.f32 %v5005_v35, %v2125_v6 }
 0x174   : > { %v4945_v36 = vpop.f32.mrb[60].mxu0 }
 0x175   : > { %v4946_v22 = vpop.f32.mrb[61].mxu0 }
 0x176   : > { %v4947_v23 = vadd.f32 %v4946_v22, %v4945_v36  ;;  %v4948_v24 = vpop.f32.mrb[62].mxu0  ;;  %v5009_v26 = vpop.f32.mrb[60].mxu1 }
 0x177   : > { %v4949_v27 = vpop.f32.mrb[63].mxu0  ;;  %v5010_v30 = vpop.f32.mrb[61].mxu1 }
 0x178   : > { %v2133_v31 = vadd.f32 %v4947_v23, %v6249_v50  ;;  %v5011_v21 = vadd.f32 %v5010_v30, %v5009_v26  ;;  %v5012_v34 = vpop.f32.mrb[62].mxu1  ;;  %v2570_v50 = vld [vmem:[#allocation2] sm:$0xf0] }
 0x179   : > { %v5013_v14 = vpop.f32.mrb[63].mxu1  ;;  %v2583_v38 = vshll.u32 %v2570_v50, 16 }
 0x17a   : > { %v6273_v54 = vadd.f32 %v5011_v21, %v2133_v31 }
 0x17b   : > { %v6291_v45 = vrot.slane %v2583_v38, 5 }
 0x17c   : > { %v5321_v48 = vpop.f32.mrb[64].mxu0 }
 0x17d   : > { %v2279_v3 = vadd.f32 %v5321_v48, %v6255_v17  ;;  %v2270_v40 = vpop.f32.mrb[65].mxu0  ;;  %v2580_v17 = vshrl.u32 %v2570_v50, 16 }
 0x17e   : > { %v2271_v25 = vadd.f32 %v2270_v40, %v6252_v51  ;;  %v5322_v19 = vpop.f32.mrb[66].mxu0 }
 0x17f   : > { %v2335_v0 = vmax.f32 %v2279_v3, 0.0  ;;  %v2273_v39 = vpop.f32.mrb[67].mxu0  ;;  %v6289_v44 = vrot.slane %v2580_v17, 4 }
 0x180   : > { %v2333_v16 = vmax.f32 %v2271_v25, 0.0 }
 0x181   : > { %v2366_v41 = vpack.c.bf16 %v5530_v29, %v2335_v0  ;;  %v2586_v35 = vor.u32 %v6291_v45, %v6289_v44 }
 0x182   : > { %v2365_v20 = vpack.c.bf16 %v5530_v29, %v2333_v16 }
 0x183   : > { %v2382_v63 = vrot.slane %v2366_v41, 4 }
 0x184   : > { %v2381_v43 = vrot.slane %v2365_v20, 4  ;;  %v5325_v1 = vpop.f32.mrb[68].mxu0 }
 0x185   : > { %v2295_v51 = vadd.f32 %v5325_v1, %v6261_v10  ;;  %v2286_v55 = vpop.f32.mrb[69].mxu0  ;;  %v2429_v10 = vrot.slane %v2427_v32, 4 }
 0x186   : > { %v6281_v2 = vsel %vm531_vm0, %v2381_v43, %v2382_v63  ;;  %2405 = vst [vmem:[#allocation2 + $0x8] sm:$0xf0] %v2381_v43  ;;  %v2287_v4 = vadd.f32 %v2286_v55, %v6258_v8  ;;  %v5326_v15 = vpop.f32.mrb[70].mxu0  ;;  %v2519_v8 = vld [vmem:[#allocation2] sm:$0xf0] }
 0x187   : > { %2406 = vst [vmem:[#allocation2 + $0x10] sm:$0xff] %v6281_v2  ;;  %v2339_v5 = vmax.f32 %v2295_v51, 0.0  ;;  %v2289_v37 = vpop.f32.mrb[71].mxu0  ;;  %v2693_v53 = vshrl.u32 %v6281_v2, 16  ;;  %v2696_v42 = vshll.u32 %v6281_v2, 16  ;;  %v2537_v62 = vrot.slane %v2519_v8, 4 }
 0x188   : > { %v2337_v33 = vmax.f32 %v2287_v4, 0.0  ;;  %v2430_v6 = vor.u32 %v2429_v10, %v6285_v9  ;;  %v2540_v22 = vrot.slane %v6281_v2, 4  ;;  %v5482_v2 = vld [vmem:[%s6756_s3 + $0x100] sm:$0xff]  }
 0x189   : > { %v6294_v47 = vpack.c.bf16 %v5530_v29, %v2339_v5  ;;  %v2695_v46 = vrot.slane %v2693_v53, 3  ;;  %v2698_v7 = vrot.slane %v2696_v42, 4  ;;  %v2599_v18 = vrot.slane %v2693_v53, 4  ;;  %v5490_v10 = vld [vmem:[%s6756_s3 + $0x180] sm:$0xff]  }
 0x18a   : > { %v2367_v52 = vpack.c.bf16 %v5530_v29, %v2337_v33  ;;  %v2602_v56 = vrot.slane %v2696_v42, 5  ;;  %v5483_v42 = vld [vmem:[%s6756_s3 + $0x148] sm:$0xff]  }
 0x18b   : > { %v2386_v57 = vrot.slane %v6294_v47, 4  ;;  %v6303_v24 = vor.u32 %v2698_v7, %v2695_v46 }
 0x18c   : > { %v2384_v59 = vrot.slane %v2367_v52, 4  ;;  %v5329_v61 = vpop.f32.mrb[72].mxu0  ;;  %v6305_v26 = vor.u32 %v2602_v56, %v2599_v18  ;;  %v5493_v18 = vld [vmem:[%s6756_s3 + $0x1c8] sm:$0xff]  }
 0x18d   : > { %v2311_v13 = vadd.f32 %v5329_v61, %v6267_v49  ;;  %v2302_v60 = vpop.f32.mrb[73].mxu0  ;;  %v2520_v36 = vld [vmem:[#allocation2 + $0x8] sm:$0xff] }
 0x18e   : > { %v2675_v23 = vld [vmem:[#allocation2 + $0x8] sm:$0xf8]  ;;  %v6308_v27 = vsel %vm531_vm0, %v2382_v63, %v2384_v59  ;;  %v6311_v30 = vsel %vm531_vm0, %v2384_v59, %v2386_v57  ;;  %v2303_v31 = vadd.f32 %v2302_v60, %v6264_v28  ;;  %v2538_v21 = vrot.slane %v2520_v36, 4  ;;  %v5330_v34 = vpop.f32.mrb[74].mxu0 }
 0x18f   : > { %2407 = vst [vmem:[#allocation2 + $0x18] sm:$0xff] %v6308_v27  ;;  %2408 = vst [vmem:[#allocation2 + $0x20] sm:$0xff] %v6311_v30  ;;  %v2343_v49 = vmax.f32 %v2311_v13, 0.0  ;;  %v2305_v14 = vpop.f32.mrb[75].mxu0  ;;  %v2432_v48 = vshrl.u32 %v2520_v36, 16  ;;  %v2435_v3 = vshll.u32 %v2520_v36, 16 }
 0x190   : > { %v2685_v40 = vshrl.u32 %v2675_v23, 16  ;;  %v2341_v25 = vmax.f32 %v2303_v31, 0.0  ;;  %v2539_v19 = vsel %vm531_vm0, %v2537_v62, %v2538_v21  ;;  %v2541_v0 = vsel %vm531_vm0, %v2538_v21, %v2540_v22  ;;  %v5484_v62 = vld [vmem:[%s6756_s3 + $0x108] sm:$0xff]  }
 0x191   : > { %v2688_v39 = vshll.u32 %v2675_v23, 16  ;;  %v6319_v16 = vpack.c.bf16 %v5530_v29, %v2343_v49  ;;  %3884 = vmatprep.mubr.bf16.mxu1 %v2539_v19  ;;  %v2434_v28 = vrot.slane %v2432_v48, 3  ;;  %v2437_v58 = vrot.slane %v2435_v3, 4  ;;  %v5494_v23 = vld [vmem:[%s6756_s3 + $0x188] sm:$0xff]  }
 0x192   : > { %v2687_v41 = vrot.slane %v2685_v40, 3  ;;  %v2369_v50 = vpack.c.bf16 %v5530_v29, %v2341_v25  ;;  %v2590_v63 = vrot.slane %v2432_v48, 4  ;;  %v2593_v12 = vrot.slane %v2435_v3, 5  ;;  %v5497_v3 = vld [vmem:[%s6756_s3 + $0x1d0] sm:$0xff]  }
 0x193   : > { %v2690_v20 = vrot.slane %v2688_v39, 4  ;;  %v2390_v43 = vrot.slane %v6319_v16, 4  ;;  %v2438_v1 = vor.u32 %v2437_v58, %v2434_v28  ;;  %v6324_v32 = vrot.slane %v6308_v27, 4  ;;  %v5487_v28 = vld [vmem:[%s6756_s3 + $0x158] sm:$0xff]  }
 0x194   : > { %v2702_v17 = vshrl.u32 %v6308_v27, 16  ;;  %v2388_v38 = vrot.slane %v2369_v50, 4  ;;  %v5333_v51 = vpop.f32.mrb[76].mxu0  ;;  %v2594_v4 = vor.u32 %v2593_v12, %v2590_v63  ;;  %v2705_v15 = vshll.u32 %v6308_v27, 16 }
 0x195   : > { %v2691_v55 = vor.u32 %v2690_v20, %v2687_v41  ;;  %v2327_v5 = vadd.f32 %v5333_v51, %v6273_v54  ;;  %v2318_v37 = vpop.f32.mrb[77].mxu0  ;;  %v2439_v9 = vsel %vm416_vm1, %v2430_v6, %v2438_v1  ;;  %v6335_v53 = vsel %vm416_vm1, %v2438_v1, %v6303_v24 }
 0x196   : > { %v6342_v33 = vsel %vm531_vm0, %v2540_v22, %v6324_v32  ;;  %v6348_v54 = vsel %vm531_vm0, %v2386_v57, %v2388_v38  ;;  %v6353_v47 = vsel %vm531_vm0, %v2388_v38, %v2390_v43  ;;  %v2319_v8 = vadd.f32 %v2318_v37, %v6270_v11  ;;  %3885 = vmatmul.mubr.bf16.vlgmr.msra.gmra.mrb[64].mxu1 %v2439_v9  ;;  %v5334_v7 = vpop.f32.mrb[78].mxu0 }
 0x197   : > { %v2700_v46 = vsel %vm416_vm1, %v2691_v55, %v6303_v24  ;;  %2409 = vst [vmem:[#allocation2 + $0x28] sm:$0xff] %v6348_v54  ;;  %2410 = vst [vmem:[#allocation2 + $0x30] sm:$0xff] %v6353_v47  ;;  %v2347_v52 = vmax.f32 %v2327_v5, 0.0  ;;  %3892 = vmatprep.mubr.bf16.mxu1 %v2541_v0  ;;  %v2595_v11 = vsel %vm574_vm2, %v2586_v35, %v2594_v4  ;;  %v2704_v56 = vrot.slane %v2702_v17, 3  ;;  %v2321_v59 = vpop.f32.mrb[79].mxu0  ;;  %v5485_v35 = vld [vmem:[%s6756_s3 + $0x150] sm:$0xff]  }
 0x198   : > { %3981 = vmatprep.mubr.bf16.mxu0 %v2700_v46  ;;  %v2707_v57 = vrot.slane %v2705_v15, 4  ;;  %v2345_v61 = vmax.f32 %v2319_v8, 0.0  ;;  %5160 = vmatpush3.bf16.msra.mxu1 %v5482_v2  ;;  %v2604_v6 = vsel %vm574_vm2, %v2594_v4, %v6305_v26  ;;  %v2711_v13 = vshrl.u32 %v6311_v30, 16  ;;  %v5499_v55 = vld [vmem:[%s6756_s3 + $0x1d8] sm:$0xff]  }
 0x199   : > { %3982 = vmatmul.mubr.bf16.vlgmr.msra.gmra.mrb[80].mxu0 %v2595_v11  ;;  %v2714_v60 = vshll.u32 %v6311_v30, 16  ;;  %v2372_v44 = vpack.c.bf16 %v5530_v29, %v2347_v52  ;;  %5161 = vmatprep.subr.bf16.mxu1 %v5483_v42  ;;  %v2544_v36 = vrot.slane %v6311_v30, 4  ;;  %v2608_v22 = vrot.slane %v2702_v17, 4  ;;  %v5498_v17 = vld [vmem:[%s6756_s3 + $0x190] sm:$0xff]   ;;  %v5488_v2 = vld [vmem:[%s6756_s3 + $0x118] sm:$0xff]  }
 0x19a   : > { %v6375_v45 = vor.u32 %v2707_v57, %v2704_v56  ;;  %5224 = vmatpush3.bf16.msra.mxu0 %v5490_v10  ;;  %v2371_v27 = vpack.c.bf16 %v5530_v29, %v2345_v61  ;;  %v2713_v31 = vrot.slane %v2711_v13, 3  ;;  %v2611_v34 = vrot.slane %v2705_v15, 5  ;;  %v5500_v7 = vld [vmem:[%s6756_s3 + $0x198] sm:$0xff]   ;;  %v5503_v57 = vld [vmem:[%s6756_s3 + $0x1e0] sm:$0xff]  }
 0x19b   : > { %v2716_v21 = vrot.slane %v2714_v60, 4  ;;  %5225 = vmatprep.subr.bf16.mxu0 %v5493_v18  ;;  %v2394_v49 = vrot.slane %v2372_v44, 4  ;;  %v6392_v30 = vsel %vm531_vm0, %v6324_v32, %v2544_v36  ;;  %v2720_v48 = vshrl.u32 %v6348_v54, 16  ;;  %v5492_v61 = vld [vmem:[%s6756_s3 + $0x120] sm:$0xff]  }
 0x19c   : > { %v6388_v14 = vsel %vm416_vm1, %v6303_v24, %v6375_v45  ;;  %v2392_v40 = vrot.slane %v2371_v27, 4  ;;  %5162 = vmatpush3.bf16.msra.mxu1 %v5484_v62  ;;  %v5486_v24 = vld [vmem:[%s6756_s3 + $0x110] sm:$0xff]   ;;  %v6402_v19 = vor.u32 %v2611_v34, %v2608_v22  ;;  %v2723_v0 = vshll.u32 %v6348_v54, 16  ;;  %v5504_v34 = vld [vmem:[%s6756_s3 + $0x1a0] sm:$0xff]  }
 0x19d   : > { %3989 = vmatprep.mubr.bf16.mxu0 %v6388_v14  ;;  %v2717_v25 = vor.u32 %v2716_v21, %v2713_v31  ;;  %2413 = vst [vmem:[#allocation2 + $0x48] sm:$0xf] %v2394_v49  ;;  %5163 = vmatprep.subr.bf16.mxu1 %v5485_v35  ;;  %v2722_v39 = vrot.slane %v2720_v48, 3  ;;  %v6409_v58 = vrot.slane %v6348_v54, 4  ;;  %v2617_v41 = vrot.slane %v2711_v13, 4 }
 0x19e   : > { %v2620_v50 = vrot.slane %v2714_v60, 5  ;;  %5226 = vmatpush3.bf16.msra.mxu0 %v5494_v23  ;;  %v2393_v20 = vsel %vm531_vm0, %v2390_v43, %v2392_v40  ;;  %v2395_v63 = vsel %vm531_vm0, %v2392_v40, %v2394_v49  ;;  %3893 = vmatmul.mubr.bf16.gmra.mrb[68].mxu1 %v6335_v53  ;;  %v6423_v1 = vsel %vm574_vm2, %v6305_v26, %v6402_v19  ;;  %v5495_v60 = vld [vmem:[%s6756_s3 + $0x168] sm:$0xff]  }
 0x19f   : > { %v6418_v12 = vsel %vm416_vm1, %v6375_v45, %v2717_v25  ;;  %2411 = vst [vmem:[#allocation2 + $0x38] sm:$0xff] %v2393_v20  ;;  %2412 = vst [vmem:[#allocation2 + $0x40] sm:$0xff] %v2395_v63  ;;  %3900 = vmatprep.mubr.bf16.mxu1 %v6342_v33  ;;  %v2725_v16 = vrot.slane %v2723_v0, 4  ;;  %v6431_v43 = vsel %vm531_vm0, %v2544_v36, %v6409_v58  ;;  %v2729_v51 = vshrl.u32 %v6353_v47, 16  ;;  %v5491_v33 = vld [vmem:[%s6756_s3 + $0x160] sm:$0xff]   ;;  %v5496_v40 = vld [vmem:[%s6756_s3 + $0x128] sm:$0xff]  }
 0x1a0   : > { %v2621_v38 = vor.u32 %v2620_v50, %v2617_v41  ;;  %5227 = vmatprep.subr.bf16.mxu0 %v5497_v3  ;;  %5164 = vmatpush3.bf16.msra.mxu1 %v5486_v24  ;;  %v2732_v4 = vshll.u32 %v6353_v47, 16  ;;  %v2548_v15 = vrot.slane %v6353_v47, 4  ;;  %v2626_v5 = vrot.slane %v2720_v48, 4  ;;  %v5509_v50 = vld [vmem:[%s6756_s3 + $0x1f0] sm:$0xff]  }
 0x1a1   : > { %3990 = vmatmul.mubr.bf16.gmra.mrb[84].mxu0 %v2604_v6  ;;  %v2629_v37 = vrot.slane %v2723_v0, 5  ;;  %v2726_v9 = vor.u32 %v2725_v16, %v2722_v39  ;;  %5165 = vmatprep.subr.bf16.mxu1 %v5487_v28  ;;  %v2731_v42 = vrot.slane %v2729_v51, 3  ;;  %v2738_v10 = vshrl.u32 %v2393_v20, 16  ;;  %v5501_v0 = vld [vmem:[%s6756_s3 + $0x170] sm:$0xff]   ;;  %v5506_v28 = vld [vmem:[%s6756_s3 + $0x1a8] sm:$0xff]   ;;  %v5511_v16 = vld [vmem:[%s6756_s3 + $0x1f8] sm:$0xff]  }
 0x1a2   : > { %3997 = vmatprep.mubr.bf16.mxu0 %v6418_v12  ;;  %v6445_v53 = vsel %vm574_vm2, %v6402_v19, %v2621_v38  ;;  %v2734_v54 = vrot.slane %v2732_v4, 4  ;;  %v6452_v47 = vsel %vm531_vm0, %v6409_v58, %v2548_v15  ;;  %v2741_v46 = vshll.u32 %v2393_v20, 16  ;;  %5228 = vmatpush3.bf16.msra.mxu0 %v5498_v17  ;;  %v5510_v17 = vld [vmem:[%s6756_s3 + $0x1b0] sm:$0xff]  }
 0x1a3   : > { %v2630_v8 = vor.u32 %v2629_v37, %v2626_v5  ;;  %v6458_v18 = vsel %vm416_vm1, %v2717_v25, %v2726_v9  ;;  %v2740_v52 = vrot.slane %v2738_v10, 3  ;;  %v6460_v11 = vrot.slane %v2393_v20, 4  ;;  %5229 = vmatprep.subr.bf16.mxu0 %v5499_v55  ;;  %v5502_v20 = vld [vmem:[%s6756_s3 + $0x130] sm:$0xff]   ;;  %v2831_v5 = vld [vmem:[#allocation2 + $0x8] sm:$0xf0] }
 0x1a4   : > { %v2635_v56 = vrot.slane %v2729_v51, 4  ;;  %5166 = vmatpush3.bf16.msra.mxu1 %v5488_v2  ;;  %v2735_v59 = vor.u32 %v2734_v54, %v2731_v42  ;;  %v2743_v6 = vrot.slane %v2741_v46, 4  ;;  %v2638_v13 = vrot.slane %v2732_v4, 5  ;;  %v2683_v51 = vld [vmem:[#allocation2 + $0x48] sm:$0xf] }
 0x1a5   : > { %v2631_v62 = vsel %vm574_vm2, %v2621_v38, %v2630_v8  ;;  %5167 = vmatprep.subr.bf16.mxu1 %v5491_v33  ;;  %v2551_v44 = vsel %vm531_vm0, %v2548_v15, %v6460_v11  ;;  %v2747_v35 = vshrl.u32 %v2395_v63, 16  ;;  %v2750_v36 = vshll.u32 %v2395_v63, 16  ;;  %v5507_v63 = vld [vmem:[%s6756_s3 + $0x178] sm:$0xff]  }
 0x1a6   : > { %v2644_v22 = vrot.slane %v2738_v10, 4  ;;  %3901 = vmatmul.mubr.bf16.gmra.mrb[72].mxu1 %v6388_v14  ;;  %v2736_v23 = vsel %vm416_vm1, %v2726_v9, %v2735_v59  ;;  %v6476_v27 = vor.u32 %v2743_v6, %v2740_v52  ;;  %v2639_v31 = vor.u32 %v2638_v13, %v2635_v56  ;;  %5230 = vmatpush3.bf16.msra.mxu0 %v5500_v7  ;;  %v5505_v14 = vld [vmem:[%s6756_s3 + $0x1e8] sm:$0xff]   ;;  %v5508_v38 = vld [vmem:[%s6756_s3 + $0x138] sm:$0xff]   ;;  %v2422_v4 = vld [vmem:[#allocation2 + $0x40] sm:$0xf] }
 0x1a7   : > { %v2647_v21 = vrot.slane %v2741_v46, 5  ;;  %3908 = vmatprep.mubr.bf16.mxu1 %v6392_v30  ;;  %v2749_v49 = vrot.slane %v2747_v35, 3  ;;  %v2752_v48 = vrot.slane %v2750_v36, 4  ;;  %5231 = vmatprep.subr.bf16.mxu0 %v5503_v57  ;;  %v2756_v55 = vshrl.u32 %v2683_v51, 16  ;;  %v2527_v15 = vld [vmem:[#allocation2 + $0x40] sm:$0xf] }
 0x1a8   : > { %5168 = vmatpush3.bf16.msra.mxu1 %v5492_v61  ;;  %v2745_v3 = vsel %vm416_vm1, %v2735_v59, %v6476_v27  ;;  %v2640_v25 = vsel %vm574_vm2, %v2630_v8, %v2639_v31  ;;  %v2759_v2 = vshll.u32 %v2683_v51, 16  ;;  %v2495_v42 = vshrl.u32 %v2422_v4, 16  ;;  %v2936_v13 = vld [vmem:[#allocation2 + $0x10] sm:$0xf8]  ;;  %v6564_v51 = vld [vmem:[#allocation2 + $0x28] sm:$0xff] }
 0x1a9   : > { %3998 = vmatmul.mubr.bf16.gmra.mrb[88].mxu0 %v6423_v1  ;;  %v6492_v30 = vor.u32 %v2647_v21, %v2644_v22  ;;  %5169 = vmatprep.subr.bf16.mxu1 %v5495_v60  ;;  %v6495_v24 = vor.u32 %v2752_v48, %v2749_v49  ;;  %v2758_v37 = vrot.slane %v2756_v55, 3  ;;  %v2498_v33 = vshll.u32 %v2422_v4, 16  ;;  %v2780_v49 = vld [vmem:[#allocation2 + $0x8] sm:$0xf0]  ;;  %v2781_v48 = vld [vmem:[#allocation2 + $0x10] sm:$0xff] }
 0x1aa   : > { %4005 = vmatprep.mubr.bf16.mxu0 %v6458_v18  ;;  %5232 = vmatpush3.bf16.msra.mxu0 %v5504_v34  ;;  %v2761_v9 = vrot.slane %v2759_v2, 4  ;;  %v2552_v10 = vrot.slane %v2527_v15, 4  ;;  %v2841_v54 = vshrl.u32 %v2831_v5, 16  ;;  %v2946_v22 = vshrl.u32 %v2936_v13, 16  ;;  %v5515_v2 = vld [vmem:[%s6756_s3 + $0x210] sm:$0xff]  }
 0x1ab   : > { %v2649_v39 = vsel %vm574_vm2, %v2639_v31, %v6492_v30  ;;  %v2754_v41 = vsel %vm416_vm1, %v6476_v27, %v6495_v24  ;;  %5233 = vmatprep.subr.bf16.mxu0 %v5505_v14  ;;  %v2500_v52 = vrot.slane %v2498_v33, 4  ;;  %v2876_v4 = vshrl.u32 %v6564_v51, 16 }
 0x1ac   : > { %5170 = vmatpush3.bf16.msra.mxu1 %v5496_v40  ;;  %v2762_v7 = vor.u32 %v2761_v9, %v2758_v37  ;;  %v2553_v56 = vsel %vm531_vm0, %v6460_v11, %v2552_v10  ;;  %v2843_v57 = vrot.slane %v2841_v54, 4  ;;  %v2879_v15 = vshll.u32 %v6564_v51, 16 }
 0x1ad   : > { %5171 = vmatprep.subr.bf16.mxu1 %v5501_v0  ;;  %v2798_v0 = vrot.slane %v2780_v49, 4  ;;  %v2974_v10 = vrot.slane %v2876_v4, 3 }
 0x1ae   : > { %3909 = vmatmul.mubr.bf16.gmra.mrb[76].mxu1 %v6418_v12  ;;  %5234 = vmatpush3.bf16.msra.mxu0 %v5506_v28  ;;  %v6532_v12 = vld [vmem:[%s6756_s3 + $0x200] sm:$0xff]   ;;  %v2763_v6 = vsel %vm416_vm1, %v6495_v24, %v2762_v7  ;;  %v2977_v54 = vrot.slane %v2879_v15, 4 }
 0x1af   : > { %3916 = vmatprep.mubr.bf16.mxu1 %v6431_v43  ;;  %5235 = vmatprep.subr.bf16.mxu0 %v5509_v50  ;;  %v5512_v43 = vld [vmem:[%s6756_s3 + $0x1b8] sm:$0xff]   ;;  %v5514_v50 = vld [vmem:[%s6756_s3 + $0x208] sm:$0xff]  }
 0x1b0   : > { %5172 = vmatpush3.bf16.msra.mxu1 %v5502_v20  ;;  %v6558_v20 = vld [vmem:[#allocation2 + $0x18] sm:$0xff] }
 0x1b1   : > { %4006 = vmatmul.mubr.bf16.gmra.mrb[92].mxu0 %v6445_v53  ;;  %5173 = vmatprep.subr.bf16.mxu1 %v5507_v63  ;;  %v2578_v53 = vld [vmem:[#allocation2 + $0x40] sm:$0x1f] }
 0x1b2   : > { %4013 = vmatprep.mubr.bf16.mxu0 %v2736_v23  ;;  %5236 = vmatpush3.bf16.msra.mxu0 %v5510_v17  ;;  %v2651_v8 = vshrl.u32 %v2578_v53, 16  ;;  %v2654_v46 = vshll.u32 %v2578_v53, 16  ;;  %v2878_v53 = vrot.slane %v2876_v4, 4 }
 0x1b3   : > { %5237 = vmatprep.subr.bf16.mxu0 %v5511_v16 }
 0x1b4   : > { %5174 = vmatpush3.bf16.msra.mxu1 %v5508_v38  ;;  %v2653_v61 = vrot.slane %v2651_v8, 4 }
 0x1b5   : > { %5335 = vmatprep.subr.bf16.mxu1 %v6532_v12 }
 0x1b6   : > { %3917 = vmatmul.mubr.bf16.gmra.mrb[80].mxu1 %v6458_v18  ;;  %5238 = vmatpush3.bf16.msra.mxu0 %v5512_v43  ;;  %v2497_v18 = vrot.slane %v2495_v42, 3  ;;  %v2881_v42 = vrot.slane %v2879_v15, 5  ;;  %v6644_v15 = vld [vmem:[#allocation2 + $0x48] sm:$0xff] }
 0x1b7   : > { %3924 = vmatprep.mubr.bf16.mxu1 %v6452_v47  ;;  %v2844_v47 = vshll.u32 %v2831_v5, 16 }
 0x1b8   : > { %v2501_v60 = vor.u32 %v2500_v52, %v2497_v18  ;;  %v2978_v52 = vor.u32 %v2977_v54, %v2974_v10 }
 0x1b9   : > { %4014 = vmatmul.mubr.bf16.gmra.mrb[96].mxu0 %v2631_v62  ;;  %v2846_v59 = vrot.slane %v2844_v47, 5  ;;  %v2656_v62 = vrot.slane %v2654_v46, 5  ;;  %v3045_v47 = vld [vmem:[#allocation2 + $0x30] sm:$0xff]  ;;  %v2882_v46 = vor.u32 %v2881_v42, %v2878_v53  ;;  %v3008_v53 = vshrl.u32 %v6644_v15, 16 }
 0x1ba   : > { %4021 = vmatprep.mubr.bf16.mxu0 %v2745_v3  ;;  %v2502_v21 = vsel %vm416_vm1, %v6476_v27, %v2501_v60  ;;  %v2799_v27 = vrot.slane %v2781_v48, 4  ;;  %v2885_v7 = vshrl.u32 %v3045_v47, 16  ;;  %v2888_v18 = vshll.u32 %v3045_v47, 16 }
 0x1bb   : > { %v2847_v35 = vor.u32 %v2846_v59, %v2843_v57  ;;  %v2657_v36 = vor.u32 %v2656_v62, %v2653_v61  ;;  %v3011_v42 = vshll.u32 %v6644_v15, 16 }
 0x1bc   : > { %v2887_v61 = vrot.slane %v2885_v7, 4  ;;  %v2890_v62 = vrot.slane %v2888_v18, 5  ;;  %v2986_v60 = vrot.slane %v2888_v18, 4  ;;  %v3049_v18 = vld [vmem:[#allocation2 + $0x50] sm:$0xf] }
 0x1bd   : > { %v2856_v34 = vsel %vm574_vm2, %v2847_v35, %v6305_v26  ;;  %v2658_v14 = vsel %vm574_vm2, %v6492_v30, %v2657_v36  ;;  %v2800_v30 = vsel %vm531_vm0, %v2798_v0, %v2799_v27  ;;  %v5519_v36 = vld [vmem:[%s6756_s3 + $0x230] sm:$0xff]   ;;  %v3047_v0 = vld [vmem:[#allocation2 + $0x40] sm:$0xff] }
 0x1be   : > { %3925 = vmatmul.mubr.bf16.gmra.mrb[84].mxu1 %v2736_v23  ;;  %v2949_v23 = vshll.u32 %v2936_v13, 16  ;;  %v2983_v13 = vrot.slane %v2885_v7, 3  ;;  %v3013_v7 = vrot.slane %v3011_v42, 4 }
 0x1bf   : > { %3932 = vmatprep.mubr.bf16.mxu1 %v2551_v44  ;;  %v3041_v44 = vld [vmem:[#allocation2 + $0x10] sm:$0xf0] }
 0x1c0   : > { %v3059_v31 = vrot.slane %v3041_v44, 4  ;;  %v2951_v40 = vrot.slane %v2949_v23, 4  ;;  %v6605_v44 = vld [vmem:[#allocation2 + $0x38] sm:$0xff]  ;;  %v2891_v23 = vor.u32 %v2890_v62, %v2887_v61 }
 0x1c1   : > { %4022 = vmatmul.mubr.bf16.gmra.mrb[100].mxu0 %v2640_v25  ;;  %v3043_v25 = vld [vmem:[#allocation2 + $0x20] sm:$0xff] }
 0x1c2   : > { %4029 = vmatprep.mubr.bf16.mxu0 %v2754_v41  ;;  %v3061_v24 = vsel %vm531_vm0, %v3059_v31, %v6324_v32  ;;  %v2870_v28 = vshll.u32 %v3043_v25, 16  ;;  %v6552_v26 = vrot.slane %v3043_v25, 4  ;;  %v2894_v31 = vshrl.u32 %v6605_v44, 16 }
 0x1c3   : > { %v6622_v48 = vsel %vm574_vm2, %v2882_v46, %v2891_v23 }
 0x1c4   : > { %v2872_v17 = vrot.slane %v2870_v28, 5  ;;  %v2968_v43 = vrot.slane %v2870_v28, 4  ;;  %v3063_v55 = vsel %vm531_vm0, %v6324_v32, %v6552_v26  ;;  %v5516_v32 = vld [vmem:[%s6756_s3 + $0x218] sm:$0xff]   ;;  %v3065_v8 = vsel %vm531_vm0, %v6552_v26, %v6409_v58 }
 0x1c5   : > { %v2903_v28 = vshrl.u32 %v3047_v0, 16 }
 0x1c6   : > { %3933 = vmatmul.mubr.bf16.gmra.mrb[88].mxu1 %v2745_v3  ;;  %v2948_v3 = vrot.slane %v2946_v22, 3  ;;  %v2805_v22 = vrot.slane %v6564_v51, 4 }
 0x1c7   : > { %3940 = vmatprep.mubr.bf16.mxu1 %v2553_v56  ;;  %v5518_v56 = vld [vmem:[%s6756_s3 + $0x228] sm:$0xff]  }
 0x1c8   : > { %v2952_v41 = vor.u32 %v2951_v40, %v2948_v3  ;;  %v2806_v49 = vsel %vm531_vm0, %v6552_v26, %v2805_v22 }
 0x1c9   : > { %4030 = vmatmul.mubr.bf16.gmra.mrb[104].mxu0 %v2649_v39  ;;  %v2867_v39 = vshrl.u32 %v3043_v25, 16  ;;  %v2992_v25 = vrot.slane %v2894_v31, 3 }
 0x1ca   : > { %4037 = vmatprep.mubr.bf16.mxu0 %v2763_v6  ;;  %v2961_v16 = vsel %vm416_vm1, %v2952_v41, %v6375_v45  ;;  %v2906_v41 = vshll.u32 %v3047_v0, 16 }
 0x1cb   : > { %v2869_v63 = vrot.slane %v2867_v39, 4  ;;  %v2965_v38 = vrot.slane %v2867_v39, 3 }
 0x1cc   : > { %v3004_v51 = vrot.slane %v2906_v41, 4 }
 0x1cd   : > { %v2969_v5 = vor.u32 %v2968_v43, %v2965_v38  ;;  %v3001_v43 = vrot.slane %v2903_v28, 3 }
 0x1ce   : > { %3941 = vmatmul.mubr.bf16.gmra.mrb[92].mxu1 %v2502_v21  ;;  %v2897_v21 = vshll.u32 %v6605_v44, 16 }
 0x1cf   : > { %4078 = vmatprep.mubr.bf16.mxu1 %v2856_v34  ;;  %v2970_v33 = vsel %vm416_vm1, %v6375_v45, %v2969_v5  ;;  %v6592_v45 = vrot.slane %v3045_v47, 4  ;;  %v2979_v6 = vsel %vm416_vm1, %v2969_v5, %v2978_v52  ;;  %v2987_v34 = vor.u32 %v2986_v60, %v2983_v13 }
 0x1d0   : > { %v2899_v3 = vrot.slane %v2897_v21, 5  ;;  %v3005_v5 = vor.u32 %v3004_v51, %v3001_v43 }
 0x1d1   : > { %4038 = vmatmul.mubr.bf16.gmra.mrb[108].mxu0 %v2658_v14  ;;  %v3067_v35 = vsel %vm531_vm0, %v6409_v58, %v6592_v45  ;;  %v5520_v58 = vld [vmem:[%s6756_s3 + $0x238] sm:$0xff]   ;;  %v2896_v14 = vrot.slane %v2894_v31, 4  ;;  %v2988_v40 = vsel %vm416_vm1, %v2978_v52, %v2987_v34  ;;  %v3092_v52 = vld [vmem:[#allocation2 + $0x10] sm:$0xf0] }
 0x1d2   : > { %4175 = vmatprep.mubr.bf16.mxu0 %v3061_v24  ;;  %v2995_v24 = vrot.slane %v2897_v21, 4  ;;  %v3102_v13 = vshrl.u32 %v3092_v52, 16  ;;  %v3105_v60 = vshll.u32 %v3092_v52, 16 }
 0x1d3   : > { %v2900_v39 = vor.u32 %v2899_v3, %v2896_v14 }
 0x1d4   : > { %v3107_v14 = vrot.slane %v3105_v60, 5 }
 0x1d6   : > { %4079 = vmatmul.mubr.bf16.vlgmr.msra.gmra.mrb[96].mxu1 %v2800_v30  ;;  %v2808_v30 = vsel %vm531_vm0, %v2805_v22, %v6592_v45 }
 0x1d7   : > { %4086 = vmatprep.mubr.bf16.mxu1 %v6423_v1  ;;  %5336 = vmatpush3.bf16.msra.mxu1 %v6532_v12  ;;  %v2801_v1 = vrot.slane %v6558_v20, 4  ;;  %v6573_v12 = vor.u32 %v2872_v17, %v2869_v63  ;;  %v6634_v63 = vsel %vm574_vm2, %v2891_v23, %v2900_v39  ;;  %v2905_v17 = vrot.slane %v2903_v28, 4 }
 0x1d8   : > { %5337 = vmatprep.subr.bf16.mxu1 %v5514_v50 }
 0x1d9   : > { %4176 = vmatmul.mubr.bf16.vlgmr.msra.gmra.mrb[112].mxu0 %v2961_v16  ;;  %v2802_v37 = vsel %vm531_vm0, %v2799_v27, %v2801_v1  ;;  %v2874_v9 = vsel %vm574_vm2, %v6402_v19, %v6573_v12  ;;  %v5517_v19 = vld [vmem:[%s6756_s3 + $0x220] sm:$0xff]   ;;  %v2804_v57 = vsel %vm531_vm0, %v2801_v1, %v6552_v26  ;;  %v6601_v59 = vsel %vm574_vm2, %v6573_v12, %v2882_v46  ;;  %v2839_v1 = vld [vmem:[#allocation2 + $0x48] sm:$0x1f] }
 0x1da   : > { %4183 = vmatprep.mubr.bf16.mxu0 %v3063_v55  ;;  %v3069_v27 = vsel %vm531_vm0, %v6592_v45, %v6460_v11  ;;  %v2996_v26 = vor.u32 %v2995_v24, %v2992_v25  ;;  %v2908_v16 = vrot.slane %v2906_v41, 5  ;;  %v3010_v46 = vrot.slane %v3008_v53, 3  ;;  %v3100_v41 = vld [vmem:[#allocation2 + $0x50] sm:$0x1f] }
 0x1db   : > { %5338 = vmatpush3.bf16.msra.mxu1 %v5514_v50  ;;  %v6629_v50 = vrot.slane %v3047_v0, 4 }
 0x1dc   : > { %5339 = vmatprep.subr.bf16.mxu1 %v5515_v2  ;;  %v2997_v38 = vsel %vm416_vm1, %v2987_v34, %v2996_v26  ;;  %v6642_v4 = vor.u32 %v2908_v16, %v2905_v17  ;;  %v3006_v10 = vsel %vm416_vm1, %v2996_v26, %v3005_v5  ;;  %v3166_v26 = vrot.slane %v3008_v53, 4 }
 0x1dd   : > { %v3071_v55 = vsel %vm531_vm0, %v6460_v11, %v6629_v50  ;;  %v3176_v17 = vshll.u32 %v3100_v41, 16 }
 0x1de   : > { %4087 = vmatmul.mubr.bf16.gmra.mrb[100].mxu1 %v2802_v37  ;;  %v2915_v37 = vshll.u32 %v2839_v1, 16  ;;  %v2910_v11 = vsel %vm574_vm2, %v2900_v39, %v6642_v4 }
 0x1df   : > { %4094 = vmatprep.mubr.bf16.mxu1 %v2874_v9  ;;  %5340 = vmatpush3.bf16.msra.mxu1 %v5515_v2  ;;  %v2809_v2 = vrot.slane %v6605_v44, 4  ;;  %v3178_v43 = vrot.slane %v3176_v17, 5 }
 0x1e0   : > { %5341 = vmatprep.subr.bf16.mxu1 %v5516_v32 }
 0x1e1   : > { %4184 = vmatmul.mubr.bf16.gmra.mrb[116].mxu0 %v2970_v33  ;;  %v2810_v9 = vsel %vm531_vm0, %v6592_v45, %v2809_v2  ;;  %v3072_v33 = vrot.slane %v6644_v15, 4  ;;  %v3110_v45 = vshrl.u32 %v6558_v20, 16  ;;  %v2812_v44 = vsel %vm531_vm0, %v2809_v2, %v6629_v50 }
 0x1e2   : > { %4191 = vmatprep.mubr.bf16.mxu0 %v3065_v8  ;;  %v2917_v8 = vrot.slane %v2915_v37, 5 }
 0x1e3   : > { %5342 = vmatpush3.bf16.msra.mxu1 %v5516_v32  ;;  %v2912_v32 = vshrl.u32 %v2839_v1, 16  ;;  %v3073_v54 = vsel %vm531_vm0, %v6629_v50, %v3072_v33  ;;  %v3112_v22 = vrot.slane %v3110_v45, 4 }
 0x1e4   : > { %5343 = vmatprep.subr.bf16.mxu1 %v5517_v19 }
 0x1e5   : > { %v2914_v47 = vrot.slane %v2912_v32, 4 }
 0x1e6   : > { %4095 = vmatmul.mubr.bf16.gmra.mrb[104].mxu1 %v2804_v57 }
 0x1e7   : > { %4102 = vmatprep.mubr.bf16.mxu1 %v6601_v59  ;;  %5344 = vmatpush3.bf16.msra.mxu1 %v5517_v19  ;;  %v2944_v19 = vld [vmem:[#allocation2 + $0x50] sm:$0xf]  ;;  %v2918_v62 = vor.u32 %v2917_v8, %v2914_v47 }
 0x1e8   : > { %5345 = vmatprep.subr.bf16.mxu1 %v5518_v56  ;;  %v3017_v57 = vshrl.u32 %v2944_v19, 16  ;;  %v3020_v61 = vshll.u32 %v2944_v19, 16 }
 0x1e9   : > { %4192 = vmatmul.mubr.bf16.gmra.mrb[120].mxu0 %v2979_v6  ;;  %v3074_v6 = vrot.slane %v3049_v18, 4 }
 0x1ea   : > { %4199 = vmatprep.mubr.bf16.mxu0 %v3067_v35  ;;  %v3014_v35 = vor.u32 %v3013_v7, %v3010_v46  ;;  %v3022_v21 = vrot.slane %v3020_v61, 4 }
 0x1eb   : > { %5346 = vmatpush3.bf16.msra.mxu1 %v5518_v56  ;;  %v3113_v56 = vshll.u32 %v6558_v20, 16  ;;  %v3019_v20 = vrot.slane %v3017_v57, 3  ;;  %v3075_v34 = vsel %vm531_vm0, %v3072_v33, %v3074_v6 }
 0x1ec   : > { %5347 = vmatprep.subr.bf16.mxu1 %v5519_v36  ;;  %v3015_v31 = vsel %vm416_vm1, %v3005_v5, %v3014_v35 }
 0x1ed   : > { %v3115_v23 = vrot.slane %v3113_v56, 5  ;;  %v3023_v25 = vor.u32 %v3022_v21, %v3019_v20 }
 0x1ee   : > { %4103 = vmatmul.mubr.bf16.gmra.mrb[108].mxu1 %v2806_v49  ;;  %v3104_v49 = vrot.slane %v3102_v13, 4 }
 0x1ef   : > { %4110 = vmatprep.mubr.bf16.mxu1 %v6622_v48  ;;  %5348 = vmatpush3.bf16.msra.mxu1 %v5519_v36  ;;  %v2919_v36 = vsel %vm574_vm2, %v6642_v4, %v2918_v62  ;;  %v3116_v3 = vor.u32 %v3115_v23, %v3112_v22  ;;  %v3024_v39 = vsel %vm416_vm1, %v3014_v35, %v3023_v25 }
 0x1f0   : > { %5349 = vmatprep.subr.bf16.mxu1 %v5520_v58  ;;  %v3108_v24 = vor.u32 %v3107_v14, %v3104_v49 }
 0x1f1   : > { %4200 = vmatmul.mubr.bf16.gmra.mrb[124].mxu0 %v2988_v40  ;;  %v3126_v28 = vsel %vm574_vm2, %v3116_v3, %v6573_v12 }
 0x1f2   : > { %4207 = vmatprep.mubr.bf16.mxu0 %v3069_v27  ;;  %v3117_v27 = vsel %vm574_vm2, %v3108_v24, %v3116_v3 }
 0x1f3   : > { %5350 = vmatpush3.bf16.msra.mxu1 %v5520_v58  ;;  %v2788_v58 = vld [vmem:[#allocation2 + $0x48] sm:$0xf] }
 0x1f4   : > { %v2813_v40 = vrot.slane %v2788_v58, 4 }
 0x1f6   : > { %4111 = vmatmul.mubr.bf16.gmra.mrb[112].mxu1 %v2808_v30  ;;  %v2814_v0 = vsel %vm531_vm0, %v6629_v50, %v2813_v40  ;;  %v3169_v50 = vrot.slane %v3011_v42, 5  ;;  %v3173_v30 = vshrl.u32 %v3100_v41, 16 }
 0x1f7   : > { %4118 = vmatprep.mubr.bf16.mxu1 %v6634_v63 }
 0x1f8   : > { %v3170_v16 = vor.u32 %v3169_v50, %v3166_v26 }
 0x1f9   : > { %4208 = vmatmul.mubr.bf16.gmra.mrb[128].mxu0 %v2997_v38  ;;  %v3175_v38 = vrot.slane %v3173_v30, 4 }
 0x1fa   : > { %4215 = vmatprep.mubr.bf16.mxu0 %v3071_v55  ;;  %v3171_v51 = vsel %vm574_vm2, %v6642_v4, %v3170_v16 }
 0x1fb   : > { %v3179_v12 = vor.u32 %v3178_v43, %v3175_v38 }
 0x1fe   : > { %4119 = vmatmul.mubr.bf16.gmra.mrb[116].mxu1 %v2810_v9 }
 0x1ff   : > { %4126 = vmatprep.mubr.bf16.mxu1 %v2910_v11 }
 0x201   : > { %4216 = vmatmul.mubr.bf16.gmra.mrb[132].mxu0 %v3006_v10 }
 0x202   : > { %4223 = vmatprep.mubr.bf16.mxu0 %v3073_v54 }
 0x206   : > { %4127 = vmatmul.mubr.bf16.gmra.mrb[120].mxu1 %v2812_v44 }
 0x207   : > { %4134 = vmatprep.mubr.bf16.mxu1 %v2919_v36 }
 0x209   : > { %4224 = vmatmul.mubr.bf16.gmra.mrb[136].mxu0 %v3015_v31 }
 0x20a   : > { %4231 = vmatprep.mubr.bf16.mxu0 %v3075_v34 }
 0x20e   : > { %4135 = vmatmul.mubr.bf16.gmra.mrb[124].mxu1 %v2814_v0 }
 0x20f   : > { %5351 = vmatprep.mubr.bf16.mxu1 %v3117_v27 }
 0x211   : > { %4232 = vmatmul.mubr.bf16.gmra.mrb[140].mxu0 %v3024_v39 }
 0x216   : > { %5352 = vmatmul.mubr.bf16.vlgmr.msra.gmra.mrb[128].mxu1 %v3126_v28 }
 0x217   : > { %5355 = vmatprep.mubr.bf16.mxu1 %v6601_v59  ;;  %v3180_v59 = vsel %vm574_vm2, %v3170_v16, %v3179_v12 }
 0x21e   : > { %5356 = vmatmul.mubr.bf16.gmra.mrb[132].mxu1 %v6622_v48 }
 0x21f   : > { %5359 = vmatprep.mubr.bf16.mxu1 %v6634_v63  ;;  %v6679_v63 = vld [vmem:[%s6757_s4] ss:$0 sm:$0xff] }
 0x226   : > { %5360 = vmatmul.mubr.bf16.gmra.mrb[136].mxu1 %v2910_v11 }
 0x227   : > { %5363 = vmatprep.mubr.bf16.mxu1 %v3171_v51 }
 0x22e   : > { %5364 = vmatmul.mubr.bf16.gmra.mrb[140].mxu1 %v3180_v59 }
 0x269   : > { %v5047_v48 = vpop.f32.mrb[64].mxu1 }
 0x26a   : > { %v5048_v55 = vpop.f32.mrb[65].mxu1 }
 0x26b   : > { %v5049_v2 = vadd.f32 %v5048_v55, %v5047_v48  ;;  %v5050_v1 = vpop.f32.mrb[66].mxu1 }
 0x26c   : > { %v5111_v15 = vpop.f32.mrb[80].mxu0  ;;  %v5051_v5 = vpop.f32.mrb[67].mxu1 }
 0x26d   : > { %v5112_v32 = vpop.f32.mrb[81].mxu0  ;;  %v3887_v37 = vadd.f32 %v5049_v2, %v6679_v63 }
 0x26e   : > { %v5113_v4 = vadd.f32 %v5112_v32, %v5111_v15  ;;  %v5114_v9 = vpop.f32.mrb[82].mxu0 }
 0x26f   : > { %v5115_v53 = vpop.f32.mrb[83].mxu0 }
 0x270   : > { %v6682_v42 = vadd.f32 %v5113_v4, %v3887_v37 }
 0x271   : > { %v5053_v11 = vpop.f32.mrb[68].mxu1 }
 0x272   : > { %v5054_v33 = vpop.f32.mrb[69].mxu1 }
 0x273   : > { %v5055_v10 = vadd.f32 %v5054_v33, %v5053_v11  ;;  %v5056_v54 = vpop.f32.mrb[70].mxu1 }
 0x274   : > { %v5117_v47 = vpop.f32.mrb[84].mxu0  ;;  %v5057_v8 = vpop.f32.mrb[71].mxu1 }
 0x275   : > { %v5118_v19 = vpop.f32.mrb[85].mxu0  ;;  %v3895_v46 = vadd.f32 %v5055_v10, %v6679_v63 }
 0x276   : > { %v5119_v7 = vadd.f32 %v5118_v19, %v5117_v47  ;;  %v5120_v18 = vpop.f32.mrb[86].mxu0 }
 0x277   : > { %v5121_v52 = vpop.f32.mrb[87].mxu0 }
 0x278   : > { %v6685_v45 = vadd.f32 %v5119_v7, %v3895_v46 }
 0x279   : > { %v5059_v56 = vpop.f32.mrb[72].mxu1 }
 0x27a   : > { %v5060_v57 = vpop.f32.mrb[73].mxu1 }
 0x27b   : > { %v5061_v61 = vadd.f32 %v5060_v57, %v5059_v56  ;;  %v5062_v62 = vpop.f32.mrb[74].mxu1 }
 0x27c   : > { %v5123_v6 = vpop.f32.mrb[88].mxu0  ;;  %v5063_v13 = vpop.f32.mrb[75].mxu1 }
 0x27d   : > { %v5124_v60 = vpop.f32.mrb[89].mxu0  ;;  %v3903_v44 = vadd.f32 %v5061_v61, %v6679_v63 }
 0x27e   : > { %v5125_v35 = vadd.f32 %v5124_v60, %v5123_v6  ;;  %v5126_v36 = vpop.f32.mrb[90].mxu0 }
 0x27f   : > { %v5127_v22 = vpop.f32.mrb[91].mxu0 }
 0x280   : > { %v6688_v23 = vadd.f32 %v5125_v35, %v3903_v44 }
 0x281   : > { %v5065_v31 = vpop.f32.mrb[76].mxu1 }
 0x282   : > { %v5066_v20 = vpop.f32.mrb[77].mxu1 }
 0x283   : > { %v5067_v21 = vadd.f32 %v5066_v20, %v5065_v31  ;;  %v5068_v34 = vpop.f32.mrb[78].mxu1 }
 0x284   : > { %v5129_v58 = vpop.f32.mrb[92].mxu0  ;;  %v5069_v49 = vpop.f32.mrb[79].mxu1 }
 0x285   : > { %v5130_v14 = vpop.f32.mrb[93].mxu0  ;;  %v3911_v3 = vadd.f32 %v5067_v21, %v6679_v63 }
 0x286   : > { %v5131_v40 = vadd.f32 %v5130_v14, %v5129_v58  ;;  %v5132_v25 = vpop.f32.mrb[94].mxu0 }
 0x287   : > { %v5133_v24 = vpop.f32.mrb[95].mxu0 }
 0x288   : > { %v6691_v0 = vadd.f32 %v5131_v40, %v3911_v3 }
 0x289   : > { %v5071_v27 = vpop.f32.mrb[80].mxu1 }
 0x28a   : > { %v5072_v39 = vpop.f32.mrb[81].mxu1 }
 0x28b   : > { %v5073_v28 = vadd.f32 %v5072_v39, %v5071_v27  ;;  %v5074_v41 = vpop.f32.mrb[82].mxu1 }
 0x28c   : > { %v5135_v26 = vpop.f32.mrb[96].mxu0  ;;  %v5075_v50 = vpop.f32.mrb[83].mxu1 }
 0x28d   : > { %v5136_v30 = vpop.f32.mrb[97].mxu0  ;;  %v3919_v17 = vadd.f32 %v5073_v28, %v6679_v63 }
 0x28e   : > { %v5137_v16 = vadd.f32 %v5136_v30, %v5135_v26  ;;  %v5138_v38 = vpop.f32.mrb[98].mxu0 }
 0x28f   : > { %v5139_v43 = vpop.f32.mrb[99].mxu0 }
 0x290   : > { %v6694_v51 = vadd.f32 %v5137_v16, %v3919_v17 }
 0x291   : > { %v5077_v12 = vpop.f32.mrb[84].mxu1 }
 0x292   : > { %v5078_v59 = vpop.f32.mrb[85].mxu1 }
 0x293   : > { %v5079_v48 = vadd.f32 %v5078_v59, %v5077_v12  ;;  %v5080_v55 = vpop.f32.mrb[86].mxu1 }
 0x294   : > { %v5141_v2 = vpop.f32.mrb[100].mxu0  ;;  %v5081_v1 = vpop.f32.mrb[87].mxu1 }
 0x295   : > { %v5142_v15 = vpop.f32.mrb[101].mxu0  ;;  %v3927_v5 = vadd.f32 %v5079_v48, %v6679_v63 }
 0x296   : > { %v5143_v32 = vadd.f32 %v5142_v15, %v5141_v2  ;;  %v5144_v37 = vpop.f32.mrb[102].mxu0 }
 0x297   : > { %v5145_v4 = vpop.f32.mrb[103].mxu0 }
 0x298   : > { %v6697_v9 = vadd.f32 %v5143_v32, %v3927_v5 }
 0x299   : > { %v5083_v53 = vpop.f32.mrb[88].mxu1 }
 0x29a   : > { %v5084_v11 = vpop.f32.mrb[89].mxu1 }
 0x29b   : > { %v5085_v33 = vadd.f32 %v5084_v11, %v5083_v53  ;;  %v5086_v10 = vpop.f32.mrb[90].mxu1 }
 0x29c   : > { %v5147_v54 = vpop.f32.mrb[104].mxu0  ;;  %v5087_v47 = vpop.f32.mrb[91].mxu1 }
 0x29d   : > { %v5148_v8 = vpop.f32.mrb[105].mxu0  ;;  %v3935_v19 = vadd.f32 %v5085_v33, %v6679_v63 }
 0x29e   : > { %v5149_v46 = vadd.f32 %v5148_v8, %v5147_v54  ;;  %v5150_v7 = vpop.f32.mrb[106].mxu0 }
 0x29f   : > { %v5151_v18 = vpop.f32.mrb[107].mxu0 }
 0x2a0   : > { %v6700_v52 = vadd.f32 %v5149_v46, %v3935_v19 }
 0x2a1   : > { %v5089_v56 = vpop.f32.mrb[92].mxu1 }
 0x2a2   : > { %v5090_v57 = vpop.f32.mrb[93].mxu1 }
 0x2a3   : > { %v5091_v61 = vadd.f32 %v5090_v57, %v5089_v56  ;;  %v5092_v62 = vpop.f32.mrb[94].mxu1 }
 0x2a4   : > { %v5153_v6 = vpop.f32.mrb[108].mxu0  ;;  %v5093_v13 = vpop.f32.mrb[95].mxu1 }
 0x2a5   : > { %v5154_v60 = vpop.f32.mrb[109].mxu0  ;;  %v3943_v44 = vadd.f32 %v5091_v61, %v6679_v63 }
 0x2a6   : > { %v5155_v35 = vadd.f32 %v5154_v60, %v5153_v6  ;;  %v5156_v36 = vpop.f32.mrb[110].mxu0 }
 0x2a7   : > { %v5157_v22 = vpop.f32.mrb[111].mxu0 }
 0x2a8   : > { %v6703_v31 = vadd.f32 %v5155_v35, %v3943_v44 }
 0x2a9   : > { %v5175_v20 = vpop.f32.mrb[96].mxu1 }
 0x2aa   : > { %v5176_v21 = vpop.f32.mrb[97].mxu1 }
 0x2ab   : > { %v5177_v34 = vadd.f32 %v5176_v21, %v5175_v20  ;;  %v5178_v58 = vpop.f32.mrb[98].mxu1 }
 0x2ac   : > { %v5239_v49 = vpop.f32.mrb[112].mxu0  ;;  %v5179_v14 = vpop.f32.mrb[99].mxu1 }
 0x2ad   : > { %v5240_v3 = vpop.f32.mrb[113].mxu0  ;;  %v4081_v40 = vadd.f32 %v5177_v34, %v6682_v42 }
 0x2ae   : > { %v5241_v25 = vadd.f32 %v5240_v3, %v5239_v49  ;;  %v5242_v24 = vpop.f32.mrb[114].mxu0 }
 0x2af   : > { %v5243_v27 = vpop.f32.mrb[115].mxu0 }
 0x2b0   : > { %v6706_v39 = vadd.f32 %v5241_v25, %v4081_v40 }
 0x2b1   : > { %v5181_v63 = vpop.f32.mrb[100].mxu1 }
 0x2b2   : > { %v5182_v28 = vpop.f32.mrb[101].mxu1 }
 0x2b3   : > { %v5183_v41 = vadd.f32 %v5182_v28, %v5181_v63  ;;  %v5184_v26 = vpop.f32.mrb[102].mxu1 }
 0x2b4   : > { %v5245_v50 = vpop.f32.mrb[116].mxu0  ;;  %v5185_v30 = vpop.f32.mrb[103].mxu1 }
 0x2b5   : > { %v5246_v17 = vpop.f32.mrb[117].mxu0  ;;  %v4089_v16 = vadd.f32 %v5183_v41, %v6685_v45 }
 0x2b6   : > { %v5247_v38 = vadd.f32 %v5246_v17, %v5245_v50  ;;  %v5248_v43 = vpop.f32.mrb[118].mxu0 }
 0x2b7   : > { %v5249_v12 = vpop.f32.mrb[119].mxu0 }
 0x2b8   : > { %v6709_v59 = vadd.f32 %v5247_v38, %v4089_v16 }
 0x2b9   : > { %v5187_v42 = vpop.f32.mrb[104].mxu1 }
 0x2ba   : > { %v5188_v48 = vpop.f32.mrb[105].mxu1 }
 0x2bb   : > { %v5189_v55 = vadd.f32 %v5188_v48, %v5187_v42  ;;  %v5190_v2 = vpop.f32.mrb[106].mxu1 }
 0x2bc   : > { %v5251_v1 = vpop.f32.mrb[120].mxu0  ;;  %v5191_v15 = vpop.f32.mrb[107].mxu1 }
 0x2bd   : > { %v5252_v5 = vpop.f32.mrb[121].mxu0  ;;  %v4097_v32 = vadd.f32 %v5189_v55, %v6688_v23 }
 0x2be   : > { %v5253_v37 = vadd.f32 %v5252_v5, %v5251_v1  ;;  %v5254_v4 = vpop.f32.mrb[122].mxu0 }
 0x2bf   : > { %v5255_v53 = vpop.f32.mrb[123].mxu0 }
 0x2c0   : > { %v6712_v11 = vadd.f32 %v5253_v37, %v4097_v32 }
 0x2c1   : > { %v5193_v45 = vpop.f32.mrb[108].mxu1 }
 0x2c2   : > { %v5194_v33 = vpop.f32.mrb[109].mxu1 }
 0x2c3   : > { %v5195_v10 = vadd.f32 %v5194_v33, %v5193_v45  ;;  %v5196_v54 = vpop.f32.mrb[110].mxu1 }
 0x2c4   : > { %v5257_v47 = vpop.f32.mrb[124].mxu0  ;;  %v5197_v8 = vpop.f32.mrb[111].mxu1 }
 0x2c5   : > { %v5258_v19 = vpop.f32.mrb[125].mxu0  ;;  %v4105_v46 = vadd.f32 %v5195_v10, %v6691_v0 }
 0x2c6   : > { %v5259_v7 = vadd.f32 %v5258_v19, %v5257_v47  ;;  %v5260_v18 = vpop.f32.mrb[126].mxu0 }
 0x2c7   : > { %v5261_v56 = vpop.f32.mrb[127].mxu0 }
 0x2c8   : > { %v6715_v57 = vadd.f32 %v5259_v7, %v4105_v46 }
 0x2c9   : > { %v5199_v23 = vpop.f32.mrb[112].mxu1 }
 0x2ca   : > { %v5200_v61 = vpop.f32.mrb[113].mxu1 }
 0x2cb   : > { %v5201_v62 = vadd.f32 %v5200_v61, %v5199_v23  ;;  %v5202_v6 = vpop.f32.mrb[114].mxu1 }
 0x2cc   : > { %v5263_v13 = vpop.f32.mrb[128].mxu0  ;;  %v5203_v60 = vpop.f32.mrb[115].mxu1 }
 0x2cd   : > { %v5264_v44 = vpop.f32.mrb[129].mxu0  ;;  %v4113_v35 = vadd.f32 %v5201_v62, %v6694_v51 }
 0x2ce   : > { %v5265_v36 = vadd.f32 %v5264_v44, %v5263_v13  ;;  %v5266_v22 = vpop.f32.mrb[130].mxu0 }
 0x2cf   : > { %v5267_v20 = vpop.f32.mrb[131].mxu0 }
 0x2d0   : > { %v6718_v21 = vadd.f32 %v5265_v36, %v4113_v35 }
 0x2d1   : > { %v5205_v0 = vpop.f32.mrb[116].mxu1 }
 0x2d2   : > { %v5206_v34 = vpop.f32.mrb[117].mxu1 }
 0x2d3   : > { %v5207_v58 = vadd.f32 %v5206_v34, %v5205_v0  ;;  %v5208_v49 = vpop.f32.mrb[118].mxu1 }
 0x2d4   : > { %v5269_v14 = vpop.f32.mrb[132].mxu0  ;;  %v5209_v3 = vpop.f32.mrb[119].mxu1 }
 0x2d5   : > { %v5270_v40 = vpop.f32.mrb[133].mxu0  ;;  %v4121_v25 = vadd.f32 %v5207_v58, %v6697_v9 }
 0x2d6   : > { %v5271_v24 = vadd.f32 %v5270_v40, %v5269_v14  ;;  %v5272_v27 = vpop.f32.mrb[134].mxu0 }
 0x2d7   : > { %v5273_v63 = vpop.f32.mrb[135].mxu0 }
 0x2d8   : > { %v4218_v28 = vadd.f32 %v5271_v24, %v4121_v25 }
 0x2d9   : > { %v5211_v41 = vpop.f32.mrb[120].mxu1 }
 0x2da   : > { %v5212_v51 = vpop.f32.mrb[121].mxu1 }
 0x2db   : > { %v5213_v26 = vadd.f32 %v5212_v51, %v5211_v41  ;;  %v5214_v50 = vpop.f32.mrb[122].mxu1 }
 0x2dc   : > { %v5275_v30 = vpop.f32.mrb[136].mxu0  ;;  %v5215_v17 = vpop.f32.mrb[123].mxu1 }
 0x2dd   : > { %v5276_v16 = vpop.f32.mrb[137].mxu0  ;;  %v4129_v38 = vadd.f32 %v5213_v26, %v6700_v52 }
 0x2de   : > { %v5277_v43 = vadd.f32 %v5276_v16, %v5275_v30  ;;  %v5278_v12 = vpop.f32.mrb[138].mxu0 }
 0x2df   : > { %v5279_v42 = vpop.f32.mrb[139].mxu0 }
 0x2e0   : > { %v4226_v48 = vadd.f32 %v5277_v43, %v4129_v38 }
 0x2e1   : > { %v5217_v55 = vpop.f32.mrb[124].mxu1 }
 0x2e2   : > { %v5218_v9 = vpop.f32.mrb[125].mxu1 }
 0x2e3   : > { %v5219_v2 = vadd.f32 %v5218_v9, %v5217_v55  ;;  %v5220_v1 = vpop.f32.mrb[126].mxu1 }
 0x2e4   : > { %v5281_v15 = vpop.f32.mrb[140].mxu0  ;;  %v5221_v5 = vpop.f32.mrb[127].mxu1 }
 0x2e5   : > { %v5282_v32 = vpop.f32.mrb[141].mxu0  ;;  %v4137_v37 = vadd.f32 %v5219_v2, %v6703_v31 }
 0x2e6   : > { %v5283_v4 = vadd.f32 %v5282_v32, %v5281_v15  ;;  %v5284_v53 = vpop.f32.mrb[142].mxu0 }
 0x2e7   : > { %v5285_v45 = vpop.f32.mrb[143].mxu0 }
 0x2e8   : > { %v4234_v33 = vadd.f32 %v5283_v4, %v4137_v37 }
 0x2e9   : > { %v5353_v10 = vpop.f32.mrb[128].mxu1 }
 0x2ea   : > { %v4283_v52 = vadd.f32 %v5353_v10, %v6709_v59  ;;  %v4274_v54 = vpop.f32.mrb[129].mxu1 }
 0x2eb   : > { %v4275_v47 = vadd.f32 %v4274_v54, %v6706_v39  ;;  %v5354_v8 = vpop.f32.mrb[130].mxu1 }
 0x2ec   : > { %v4339_v19 = vmax.f32 %v4283_v52, 0.0  ;;  %v4277_v46 = vpop.f32.mrb[131].mxu1 }
 0x2ed   : > { %v4337_v31 = vmax.f32 %v4275_v47, 0.0 }
 0x2ee   : > { %v4726_v7 = vpack.c.bf16 %v5530_v29, %v4339_v19 }
 0x2ef   : > { %v4722_v59 = vpack.c.bf16 %v5530_v29, %v4337_v31 }
 0x2f0   : > { %4752 = vst [vmem:[%s6729_s22 + $0x8] sm:$0xff] %v4726_v7  }
 0x2f1   : > { %4723 = vst [vmem:[%s6729_s22] sm:$0xff] %v4722_v59   ;;  %v5357_v39 = vpop.f32.mrb[132].mxu1 }
 0x2f2   : > { %v4299_v18 = vadd.f32 %v5357_v39, %v6715_v57  ;;  %v4290_v56 = vpop.f32.mrb[133].mxu1 }
 0x2f3   : > { %v4291_v23 = vadd.f32 %v4290_v56, %v6712_v11  ;;  %v5358_v61 = vpop.f32.mrb[134].mxu1 }
 0x2f4   : > { %v4343_v62 = vmax.f32 %v4299_v18, 0.0  ;;  %v4293_v6 = vpop.f32.mrb[135].mxu1 }
 0x2f5   : > { %v4341_v13 = vmax.f32 %v4291_v23, 0.0 }
 0x2f6   : > { %v4734_v60 = vpack.c.bf16 %v5530_v29, %v4343_v62 }
 0x2f7   : > { %v4730_v44 = vpack.c.bf16 %v5530_v29, %v4341_v13 }
 0x2f8   : > { %4754 = vst [vmem:[%s6729_s22 + $0x18] sm:$0xff] %v4734_v60  }
 0x2f9   : > { %4753 = vst [vmem:[%s6729_s22 + $0x10] sm:$0xff] %v4730_v44   ;;  %v5361_v35 = vpop.f32.mrb[136].mxu1 }
 0x2fa   : > { %v4315_v36 = vadd.f32 %v5361_v35, %v4218_v28  ;;  %v4306_v22 = vpop.f32.mrb[137].mxu1 }
 0x2fb   : > { %v4307_v57 = vadd.f32 %v4306_v22, %v6718_v21  ;;  %v5362_v20 = vpop.f32.mrb[138].mxu1 }
 0x2fc   : > { %v4347_v0 = vmax.f32 %v4315_v36, 0.0  ;;  %v4309_v11 = vpop.f32.mrb[139].mxu1 }
 0x2fd   : > { %v4345_v34 = vmax.f32 %v4307_v57, 0.0 }
 0x2fe   : > { %v4742_v58 = vpack.c.bf16 %v5530_v29, %v4347_v0 }
 0x2ff   : > { %v4738_v49 = vpack.c.bf16 %v5530_v29, %v4345_v34 }
 0x300   : > { %4756 = vst [vmem:[%s6729_s22 + $0x28] sm:$0xff] %v4742_v58  }
 0x301   : > { %4755 = vst [vmem:[%s6729_s22 + $0x20] sm:$0xff] %v4738_v49   ;;  %v5365_v14 = vpop.f32.mrb[140].mxu1 }
 0x302   : > { %v4331_v3 = vadd.f32 %v5365_v14, %v4234_v33  ;;  %v4322_v40 = vpop.f32.mrb[141].mxu1 }
 0x303   : > { %v4323_v25 = vadd.f32 %v4322_v40, %v4226_v48  ;;  %v5366_v24 = vpop.f32.mrb[142].mxu1 }
 0x304   : > { %v4351_v27 = vmax.f32 %v4331_v3, 0.0  ;;  %v4325_v63 = vpop.f32.mrb[143].mxu1 }
 0x305   : > { %v4349_v21 = vmax.f32 %v4323_v25, 0.0 }
 0x306   : > { %v4750_v28 = vpack.c.bf16 %v5530_v29, %v4351_v27 }
 0x307   : > { %v4746_v41 = vpack.c.bf16 %v5530_v29, %v4349_v21 }
 0x308   : > { %4758 = vst [vmem:[%s6729_s22 + $0x38] sm:$0xff] %v4750_v28  }
 0x309   : > { %4757 = vst [vmem:[%s6729_s22 + $0x30] sm:$0xff] %v4746_v41  }
 0x30a PF: > { %s15_s18 = sadd.s32 1, %s5527_s18  }
 0x30b   : > { %p12_p4 = scmp.ge.s32.totalorder %s15_s18, 4  }
 0x30d   :  { %14 = sbr.rel (!%p12_p4) target bundleno = 1 (0x1), region = 71 }

// kernel: vgg_forward.2
= control target key start
LH: loop header
LB: loop body
LE: loop exit
PB: predicated region body
PF: predicated region fallthrough
CT: control target
= control target key end

     0   :  { %s13217_s18 = smov 0   ;;  %s16379_s0 = inlined_call_operand.vmem [shape: bf16[2,512,128], index: 0, kind: input, shape index: {}]   ;;  %s16380_s1 = inlined_call_operand.vmem [shape: bf16[1152,128], index: 1, kind: input, shape index: {}]   ;;  %s16381_s2 = inlined_call_operand.vmem [shape: f32[1,128], index: 2, kind: input, shape index: {}]   ;;  %s16382_s3 = inlined_call_operand.vmem [shape: bf16[1152,128], index: 3, kind: input, shape index: {}]   ;;  %s16383_s4 = inlined_call_operand.vmem [shape: f32[1,128], index: 4, kind: input, shape index: {}]   ;;  %s16384_s5 = inlined_call_operand.vmem [shape: bf16[2,512,128], index: 5, kind: output, shape index: {}]  }
   0x1 LB: > { %s11877_s19 = sadd.s32 4294967295, %s13183_s18   ;;  %p11881_p0 = scmp.ge.s32.totalorder %s13183_s18, 1  ;;  %s13183_s18 = sphi %s13217_s18, %s15_s18  }
   0x2   : > { %p187_p1 = scmp.lt.s32.totalorder %s13183_s18, 3 }
   0x4   : > { %p188_p2 = pnand %p11881_p0, %p187_p1 }
   0x6   : > { %191 = sbr.rel (%p188_p2) target bundleno = 2333 (0x91d), region = 40 }
   0xd   : > { %v12974_v0 = vld [vmem:[%s16380_s1] sm:$0xff]   ;;  %v13185_v1 = vmov 0   ;;  %v12975_v2 = vld [vmem:[%s16380_s1 + $0x8] sm:$0xff]   ;;  %v12976_v3 = vld [vmem:[%s16380_s1 + $0x10] sm:$0xff]   ;;  %p215_p3 = scmp.lt.s32.totalorder %s11877_s19, 1  ;;  %vm992_vm0 = vcmask 1043456  }
   0xe   : > { %4349 = vmatprep.subr.bf16.mxu0 %v13185_v1  ;;  %226 = vst [vmem:[#allocation2] sm:$0xff] %v13185_v1  ;;  %228 = vst [vmem:[#allocation2 + $0x10] sm:$0xf] %v13185_v1  ;;  %v12977_v4 = vld [vmem:[%s16380_s1 + $0x18] sm:$0xff]   ;;  %v12978_v5 = vld [vmem:[%s16380_s1 + $0x20] sm:$0xff]   ;;  %v13253_v6 = vrot.slane %v13185_v1, 4 }
   0xf   : > { %229 = vst [vmem:[#allocation2 + $0x110] sm:$0xf0] %v13185_v1  ;;  %231 = vst [vmem:[#allocation2 + $0x120] sm:$0xff] %v13185_v1  ;;  %4350 = vmatpush1.bf16.msra.mxu0 %v12974_v0  ;;  %s16620_s19 = smov (!%p215_p3, %s11877_s19), 1  ;;  %v12979_v8 = vld [vmem:[%s16380_s1 + $0x28] sm:$0xff]   ;;  %v12980_v14 = vld [vmem:[%s16380_s1 + $0x30] sm:$0xff]  }
  0x10   : > { %4351 = vmatprep.subr.bf16.mxu0 %v13185_v1  ;;  %s12131_s28 = sshll.u32 %s16620_s19, 8  ;;  %v12981_v21 = vld [vmem:[%s16380_s1 + $0x38] sm:$0xff]   ;;  %v13290_v22 = vrot.slane %v13185_v1, 3  ;;  %vm565_vm1 = vsmask.f32 4352  ;;  %v12982_v31 = vld [vmem:[%s16380_s1 + $0x40] sm:$0xff]  }
  0x11   : > { %s13260_s8 = scalar_lea.vmem %s16379_s0, %s12131_s28  ;;  %v12983_v44 = vld [vmem:[%s16380_s1 + $0x48] sm:$0xff]   ;;  %vm1155_vm2 = vsmask.f32 3328  ;;  %s16168_s29 = scalar_lea.vmem %s16384_s5, %s12131_s28 }
  0x12   : > { %v12991_v10 = vld [vmem:[%s13260_s8] ss:$0 sps:$4 sm:$0xff]   ;;  %v13270_v13 = vld [vmem:[%s13260_s8 + $0x4] sm:$0xff]   ;;  %v13277_v16 = vld [vmem:[%s13260_s8 + $0xc] sm:$0xff]  }
  0x13   : > { %4352 = vmatpush1.bf16.msra.mxu0 %v12975_v2  ;;  %490 = vst [vmem:[#allocation2 + $0x10] sm:$0xf0] %v12991_v10  ;;  %491 = vst [vmem:[#allocation2 + $0x18] sm:$0xff] %v13270_v13  ;;  %v13281_v18 = vld [vmem:[%s13260_s8 + $0x14] sm:$0xff]   ;;  %v593_v19 = vshrl.u32 %v13270_v13, 16  ;;  %v596_v20 = vshll.u32 %v13270_v13, 16 }
  0x14   : > { %4353 = vmatprep.subr.bf16.mxu0 %v13185_v1  ;;  %492 = vst [vmem:[#allocation2 + $0x20] sm:$0xff] %v13277_v16  ;;  %493 = vst [vmem:[#allocation2 + $0x28] sm:$0xff] %v13281_v18  ;;  %v611_v23 = vshrl.u32 %v13281_v18, 16  ;;  %v13295_v24 = vld [vmem:[%s13260_s8 + $0x1c] sm:$0xff]   ;;  %v614_v25 = vshll.u32 %v13281_v18, 16  ;;  %v12998_v26 = vld [vmem:[%s13260_s8 + $0x24] sm:$0xff]  }
  0x15   : > { %v926_v7 = vld [vmem:[#allocation2] sm:$0xf0]  ;;  %v998_v30 = vrot.slane %v13270_v13, 4  ;;  %494 = vst [vmem:[#allocation2 + $0x30] sm:$0xff] %v13295_v24  ;;  %v13311_v32 = vrot.slane %v593_v19, 3  ;;  %v13313_v33 = vrot.slane %v596_v20, 4 }
  0x16   : > { %v993_v9 = vrot.slane %v926_v7, 4  ;;  %v532_v12 = vld [vmem:[#allocation2] sm:$0xf8]  ;;  %v602_v34 = vshrl.u32 %v13277_v16, 16  ;;  %v613_v35 = vrot.slane %v611_v23, 3  ;;  %495 = vst [vmem:[#allocation2 + $0x38] sm:$0xff] %v12998_v26 }
  0x17   : > { %4354 = vmatpush1.bf16.msra.mxu0 %v12976_v3  ;;  %v567_v15 = vshrl.u32 %v532_v12, 16  ;;  %v570_v17 = vshll.u32 %v532_v12, 16  ;;  %v620_v36 = vshrl.u32 %v13295_v24, 16  ;;  %v623_v37 = vshll.u32 %v13295_v24, 16  ;;  %v13000_v41 = vld [vmem:[%s13260_s8 + $0x2c] sm:$0xff]   ;;  %v13001_v43 = vld [vmem:[%s13260_s8 + $0x34] sm:$0xff]  }
  0x18   : > { %4355 = vmatprep.subr.bf16.mxu0 %v13185_v1  ;;  %v995_v11 = vsel %vm992_vm0, %v993_v9, %v13253_v6  ;;  %v616_v40 = vrot.slane %v614_v25, 4  ;;  %v1004_v45 = vrot.slane %v13295_v24, 4  ;;  %v1006_v47 = vrot.slane %v12998_v26, 4  ;;  %496 = vst [vmem:[#allocation2 + $0x40] sm:$0xff] %v13000_v41  ;;  %497 = vst [vmem:[#allocation2 + $0x48] sm:$0xff] %v13001_v43  ;;  %v13003_v60 = vld [vmem:[%s13260_s8 + $0x3c] sm:$0xff]  }
  0x19   : > { %4381 = vmatprep.mubr.bf16.mxu0 %v995_v11  ;;  %v13300_v27 = vrot.slane %v567_v15, 3  ;;  %v13302_v28 = vrot.slane %v570_v17, 4  ;;  %v622_v42 = vrot.slane %v620_v36, 3  ;;  %v625_v46 = vrot.slane %v623_v37, 4  ;;  %v13004_v2 = vld [vmem:[%s13260_s8 + $0x44] sm:$0xff]   ;;  %v12984_v3 = vld [vmem:[%s16380_s1 + $0x50] sm:$0xff]  }
  0x1a   : > { %v13304_v29 = vld [vmem:[#allocation2 + $0x10] sm:$0xff]  ;;  %v629_v48 = vshrl.u32 %v12998_v26, 16  ;;  %v632_v49 = vshll.u32 %v12998_v26, 16  ;;  %v1008_v50 = vrot.slane %v13000_v41, 4  ;;  %v638_v51 = vshrl.u32 %v13000_v41, 16  ;;  %498 = vst [vmem:[#allocation2 + $0x50] sm:$0xff] %v13003_v60 }
  0x1b   : > { %4356 = vmatpush1.bf16.msra.mxu0 %v12977_v4  ;;  %v996_v38 = vrot.slane %v13304_v29, 4  ;;  %v584_v39 = vshrl.u32 %v13304_v29, 16  ;;  %v641_v52 = vshll.u32 %v13000_v41, 16  ;;  %v13327_v53 = vor.u32 %v616_v40, %v613_v35  ;;  %499 = vst [vmem:[#allocation2 + $0x58] sm:$0xff] %v13004_v2  ;;  %v13006_v20 = vld [vmem:[%s13260_s8 + $0x4c] sm:$0xff]   ;;  %v12985_v23 = vld [vmem:[%s16380_s1 + $0x58] sm:$0xff]  }
  0x1c   : > { %4357 = vmatprep.subr.bf16.mxu0 %v13185_v1  ;;  %v626_v54 = vor.u32 %v625_v46, %v622_v42  ;;  %v13332_v55 = vsel %vm992_vm0, %v1004_v45, %v1006_v47  ;;  %v631_v56 = vrot.slane %v629_v48, 3  ;;  %v634_v57 = vrot.slane %v632_v49, 4  ;;  %500 = vst [vmem:[#allocation2 + $0x60] sm:$0xff] %v13006_v20  ;;  %v13009_v42 = vld [vmem:[%s13260_s8 + $0x5c] sm:$0xff]  }
  0x1d   : > { %v13336_v58 = vsel %vm992_vm0, %v1006_v47, %v1008_v50  ;;  %v640_v59 = vrot.slane %v638_v51, 3  ;;  %v643_v62 = vrot.slane %v641_v52, 4  ;;  %v1010_v63 = vrot.slane %v13001_v43, 4  ;;  %502 = vst [vmem:[#allocation2 + $0x70] sm:$0xff] %v13009_v42 }
  0x1e   : > { %v13341_v61 = vsel %vm565_vm1, %v13327_v53, %v626_v54  ;;  %v647_v0 = vshrl.u32 %v13001_v43, 16  ;;  %v635_v4 = vor.u32 %v634_v57, %v631_v56  ;;  %v1012_v7 = vrot.slane %v13003_v60, 4 }
  0x1f   : > { %4358 = vmatpush1.bf16.msra.mxu0 %v12978_v5  ;;  %v650_v5 = vshll.u32 %v13001_v43, 16  ;;  %v644_v9 = vor.u32 %v643_v62, %v640_v59  ;;  %v13348_v10 = vsel %vm992_vm0, %v1008_v50, %v1010_v63  ;;  %v659_v12 = vshll.u32 %v13003_v60, 16  ;;  %v13010_v59 = vld [vmem:[%s13260_s8 + $0x64] sm:$0xff]  }
  0x20   : > { %4359 = vmatprep.subr.bf16.mxu0 %v13185_v1  ;;  %v649_v11 = vrot.slane %v647_v0, 3  ;;  %v13355_v17 = vsel %vm992_vm0, %v1010_v63, %v1012_v7  ;;  %v665_v35 = vshrl.u32 %v13004_v2, 16  ;;  %v668_v37 = vshll.u32 %v13004_v2, 16  ;;  %503 = vst [vmem:[#allocation2 + $0x78] sm:$0xff] %v13010_v59 }
  0x21   : > { %v652_v15 = vrot.slane %v650_v5, 4  ;;  %v13363_v25 = vsel %vm565_vm1, %v635_v4, %v644_v9  ;;  %v661_v26 = vrot.slane %v659_v12, 4  ;;  %v1016_v40 = vrot.slane %v13006_v20, 4 }
  0x22   : > { %v674_v41 = vshrl.u32 %v13006_v20, 16  ;;  %v667_v46 = vrot.slane %v665_v35, 3  ;;  %v677_v47 = vshll.u32 %v13006_v20, 16  ;;  %v670_v49 = vrot.slane %v668_v37, 4 }
  0x23   : > { %4360 = vmatpush1.bf16.msra.mxu0 %v12979_v8  ;;  %v656_v8 = vshrl.u32 %v13003_v60, 16  ;;  %v653_v36 = vor.u32 %v652_v15, %v649_v11  ;;  %v12986_v60 = vld [vmem:[%s16380_s1 + $0x60] sm:$0xff]   ;;  %v1020_v0 = vrot.slane %v13009_v42, 4  ;;  %v12987_v15 = vld [vmem:[%s16380_s1 + $0x68] sm:$0xff]  }
  0x24   : > { %4361 = vmatprep.subr.bf16.mxu0 %v13185_v1  ;;  %v676_v51 = vrot.slane %v674_v41, 3  ;;  %v671_v62 = vor.u32 %v670_v49, %v667_v46 }
  0x25   : > { %v658_v19 = vrot.slane %v656_v8, 3  ;;  %v13371_v48 = vsel %vm565_vm1, %v644_v9, %v653_v36 }
  0x27   : > { %4362 = vmatpush1.bf16.msra.mxu0 %v12980_v14  ;;  %v13352_v14 = vsel %vm565_vm1, %v626_v54, %v635_v4  ;;  %v662_v43 = vor.u32 %v661_v26, %v658_v19  ;;  %v679_v54 = vrot.slane %v677_v47, 4  ;;  %v13012_v26 = vld [vmem:[%s13260_s8 + $0x6c] sm:$0xff]  }
  0x28   : > { %4363 = vmatprep.subr.bf16.mxu0 %v13185_v1  ;;  %504 = vst [vmem:[#allocation2 + $0x80] sm:$0xff] %v13012_v26  ;;  %v710_v47 = vshrl.u32 %v13012_v26, 16  ;;  %v713_v49 = vshll.u32 %v13012_v26, 16 }
  0x29   : > { %v13377_v52 = vsel %vm565_vm1, %v653_v36, %v662_v43  ;;  %v13388_v8 = vsel %vm565_vm1, %v662_v43, %v671_v62  ;;  %v704_v36 = vshll.u32 %v13010_v59, 16 }
  0x2b   : > { %4364 = vmatpush1.bf16.msra.mxu0 %v12981_v21  ;;  %v13007_v21 = vld [vmem:[%s13260_s8 + $0x54] sm:$0xff]   ;;  %v706_v46 = vrot.slane %v704_v36, 4 }
  0x2c   : > { %4365 = vmatprep.subr.bf16.mxu0 %v13185_v1  ;;  %501 = vst [vmem:[#allocation2 + $0x68] sm:$0xff] %v13007_v21  ;;  %v1018_v56 = vrot.slane %v13007_v21, 4  ;;  %v683_v57 = vshrl.u32 %v13007_v21, 16  ;;  %v686_v63 = vshll.u32 %v13007_v21, 16  ;;  %v1022_v21 = vrot.slane %v13010_v59, 4 }
  0x2e   : > { %v13384_v4 = vsel %vm992_vm0, %v1016_v40, %v1018_v56  ;;  %v685_v5 = vrot.slane %v683_v57, 3  ;;  %v688_v9 = vrot.slane %v686_v63, 4  ;;  %v13391_v11 = vsel %vm992_vm0, %v1018_v56, %v1020_v0 }
  0x2f   : > { %4366 = vmatpush1.bf16.msra.mxu0 %v12982_v31  ;;  %v1014_v31 = vrot.slane %v13004_v2, 4  ;;  %v692_v2 = vshrl.u32 %v13009_v42, 16 }
  0x30   : > { %4367 = vmatprep.subr.bf16.mxu0 %v13185_v1  ;;  %v689_v35 = vor.u32 %v688_v9, %v685_v5  ;;  %v573_v5 = vor.u32 %v13302_v28, %v13300_v27 }
  0x31   : > { %v13374_v50 = vsel %vm992_vm0, %v1014_v31, %v1016_v40  ;;  %v694_v12 = vrot.slane %v692_v2, 3  ;;  %v13402_v40 = vsel %vm992_vm0, %v1020_v0, %v1022_v21  ;;  %v12989_v0 = vld [vmem:[%s16380_s1 + $0x78] sm:$0xff]   ;;  %v586_v2 = vrot.slane %v584_v39, 3  ;;  %v12990_v39 = vld [vmem:[%s16380_s1 + $0x80] sm:$0xff]  }
  0x33   : > { %4368 = vmatpush1.bf16.msra.mxu0 %v12983_v44  ;;  %v13367_v44 = vsel %vm992_vm0, %v1012_v7, %v1014_v31  ;;  %v695_v7 = vshll.u32 %v13009_v42, 16  ;;  %v587_v31 = vshll.u32 %v13304_v29, 16  ;;  %v1024_v42 = vrot.slane %v13012_v26, 4 }
  0x34   : > { %4369 = vmatprep.subr.bf16.mxu0 %v13185_v1 }
  0x35   : > { %v697_v20 = vrot.slane %v695_v7, 4  ;;  %v13415_v56 = vsel %vm992_vm0, %v1022_v21, %v1024_v42  ;;  %v581_v7 = vor.u32 %v13253_v6, %v13290_v22 }
  0x37   : > { %4370 = vmatpush1.bf16.msra.mxu0 %v12984_v3  ;;  %v680_v3 = vor.u32 %v679_v54, %v676_v51  ;;  %v698_v37 = vor.u32 %v697_v20, %v694_v12  ;;  %v12988_v51 = vld [vmem:[%s16380_s1 + $0x70] sm:$0xff]   ;;  %v589_v12 = vrot.slane %v587_v31, 4  ;;  %v997_v31 = vsel %vm992_vm0, %v13253_v6, %v996_v38 }
  0x38   : > { %4371 = vmatprep.subr.bf16.mxu0 %v13185_v1 }
  0x39   : > { %v13397_v19 = vsel %vm565_vm1, %v671_v62, %v680_v3  ;;  %v13406_v43 = vsel %vm565_vm1, %v680_v3, %v689_v35  ;;  %v13412_v54 = vsel %vm565_vm1, %v689_v35, %v698_v37  ;;  %v13013_v3 = vld [vmem:[%s13260_s8 + $0x74] sm:$0xff]   ;;  %v1000_v35 = vrot.slane %v13277_v16, 4 }
  0x3a   : > { %505 = vst [vmem:[#allocation2 + $0x88] sm:$0xff] %v13013_v3  ;;  %v719_v20 = vshrl.u32 %v13013_v3, 16  ;;  %v722_v21 = vshll.u32 %v13013_v3, 16 }
  0x3b   : > { %4372 = vmatpush1.bf16.msra.mxu0 %v12985_v23  ;;  %v701_v23 = vshrl.u32 %v13010_v59, 16  ;;  %v712_v59 = vrot.slane %v710_v47, 3  ;;  %v12993_v47 = vld [vmem:[%s16380_s1 + $0x88] sm:$0xff]  }
  0x3c   : > { %4373 = vmatprep.subr.bf16.mxu0 %v13185_v1  ;;  %v721_v22 = vrot.slane %v719_v20, 3  ;;  %v724_v28 = vrot.slane %v722_v21, 4  ;;  %v13002_v21 = vld [vmem:[%s16380_s1 + $0xa0] sm:$0xff]  }
  0x3d   : > { %v703_v41 = vrot.slane %v701_v23, 3  ;;  %v582_v23 = vsel %vm565_vm1, %v573_v5, %v581_v7 }
  0x3e   : > { %v725_v26 = vor.u32 %v724_v28, %v721_v22 }
  0x3f   : > { %4374 = vmatpush1.bf16.msra.mxu0 %v12986_v60  ;;  %v707_v57 = vor.u32 %v706_v46, %v703_v41  ;;  %v715_v60 = vrot.slane %v713_v49, 4  ;;  %v604_v41 = vrot.slane %v602_v34, 3  ;;  %v590_v46 = vor.u32 %v589_v12, %v586_v2  ;;  %v12996_v34 = vld [vmem:[%s16380_s1 + $0x90] sm:$0xff]   ;;  %v13016_v12 = vld [vmem:[%s13260_s8 + $0x84] sm:$0xff]  }
  0x40   : > { %4375 = vmatprep.subr.bf16.mxu0 %v13185_v1  ;;  %v999_v2 = vsel %vm992_vm0, %v996_v38, %v998_v30  ;;  %507 = vst [vmem:[#allocation2 + $0x98] sm:$0xff] %v13016_v12  ;;  %v1030_v29 = vrot.slane %v13016_v12, 4  ;;  %v737_v38 = vshrl.u32 %v13016_v12, 16  ;;  %v740_v20 = vshll.u32 %v13016_v12, 16 }
  0x41   : > { %v13419_v62 = vsel %vm565_vm1, %v698_v37, %v707_v57  ;;  %v716_v63 = vor.u32 %v715_v60, %v712_v59  ;;  %v13015_v37 = vld [vmem:[%s13260_s8 + $0x7c] sm:$0xff]  }
  0x42   : > { %506 = vst [vmem:[#allocation2 + $0x90] sm:$0xff] %v13015_v37  ;;  %v1028_v6 = vrot.slane %v13015_v37, 4  ;;  %v728_v49 = vshrl.u32 %v13015_v37, 16 }
  0x43   : > { %4376 = vmatpush1.bf16.msra.mxu0 %v12987_v15  ;;  %v13432_v9 = vsel %vm565_vm1, %v707_v57, %v716_v63  ;;  %v1026_v15 = vrot.slane %v13013_v3, 4  ;;  %v13449_v36 = vsel %vm565_vm1, %v716_v63, %v725_v26  ;;  %v591_v63 = vsel %vm565_vm1, %v581_v7, %v590_v46 }
  0x44   : > { %4377 = vmatprep.subr.bf16.mxu0 %v13185_v1  ;;  %v730_v59 = vrot.slane %v728_v49, 3  ;;  %v599_v7 = vor.u32 %v13313_v33, %v13311_v32  ;;  %v739_v32 = vrot.slane %v737_v38, 3  ;;  %v742_v33 = vrot.slane %v740_v20, 4 }
  0x45   : > { %v13439_v27 = vsel %vm992_vm0, %v1024_v42, %v1026_v15  ;;  %v605_v42 = vshll.u32 %v13277_v16, 16  ;;  %v13463_v57 = vsel %vm992_vm0, %v1026_v15, %v1028_v6  ;;  %v12999_v15 = vld [vmem:[%s16380_s1 + $0x98] sm:$0xff]  }
  0x46   : > { %v600_v22 = vsel %vm565_vm1, %v590_v46, %v599_v7  ;;  %v743_v28 = vor.u32 %v742_v33, %v739_v32  ;;  %v13005_v46 = vld [vmem:[%s16380_s1 + $0xa8] sm:$0xff]   ;;  %v13021_v32 = vld [vmem:[%s13260_s8 + $0x9c] sm:$0xff]  }
  0x47   : > { %4378 = vmatpush1.bf16.msra.mxu0 %v12988_v51  ;;  %v731_v51 = vshll.u32 %v13015_v37, 16  ;;  %v607_v3 = vrot.slane %v605_v42, 4  ;;  %v1002_v37 = vrot.slane %v13281_v18, 4  ;;  %510 = vst [vmem:[#allocation2 + $0xb0] sm:$0xff] %v13021_v32  ;;  %v1036_v33 = vrot.slane %v13021_v32, 4 }
  0x48   : > { %4379 = vmatprep.subr.bf16.mxu0 %v13185_v1  ;;  %v767_v24 = vshll.u32 %v13021_v32, 16 }
  0x49   : > { %v733_v60 = vrot.slane %v731_v51, 4  ;;  %v608_v42 = vor.u32 %v607_v3, %v604_v41  ;;  %v1005_v20 = vsel %vm992_vm0, %v1002_v37, %v1004_v45 }
  0x4b   : > { %4380 = vmatpush1.bf16.msra.mxu0 %v12989_v0  ;;  %v734_v0 = vor.u32 %v733_v60, %v730_v59  ;;  %v609_v51 = vsel %vm565_vm1, %v599_v7, %v608_v42  ;;  %v1003_v59 = vsel %vm992_vm0, %v1000_v35, %v1002_v37 }
  0x4c   : > { %4638 = vmatprep.subr.bf16.mxu0 %v13185_v1 }
  0x4d   : > { %v13473_v5 = vsel %vm565_vm1, %v725_v26, %v734_v0  ;;  %v13496_v26 = vsel %vm565_vm1, %v734_v0, %v743_v28  ;;  %v13011_v0 = vld [vmem:[%s16380_s1 + $0xb8] sm:$0xff]  }
  0x4e   : > { %4382 = vmatmul.mubr.bf16.vlgmr.msra.gmra.mrb[0].mxu0 %v582_v23  ;;  %v1001_v23 = vsel %vm992_vm0, %v998_v30, %v1000_v35  ;;  %v13014_v35 = vld [vmem:[%s16380_s1 + $0xc0] sm:$0xff]  }
  0x4f   : > { %4639 = vmatpush1.bf16.msra.mxu0 %v12990_v39  ;;  %4389 = vmatprep.mubr.bf16.mxu0 %v997_v31  ;;  %v13486_v39 = vsel %vm992_vm0, %v1028_v6, %v1030_v29  ;;  %v13018_v31 = vld [vmem:[%s13260_s8 + $0x8c] sm:$0xff]  }
  0x50   : > { %4640 = vmatprep.subr.bf16.mxu0 %v13185_v1  ;;  %508 = vst [vmem:[#allocation2 + $0xa0] sm:$0xff] %v13018_v31  ;;  %v1032_v13 = vrot.slane %v13018_v31, 4  ;;  %v746_v30 = vshrl.u32 %v13018_v31, 16  ;;  %v13008_v6 = vld [vmem:[%s16380_s1 + $0xb0] sm:$0xff]  }
  0x52   : > { %v13508_v18 = vsel %vm992_vm0, %v1030_v29, %v1032_v13  ;;  %v748_v41 = vrot.slane %v746_v30, 3  ;;  %v618_v29 = vsel %vm565_vm1, %v608_v42, %v13327_v53  ;;  %v13017_v53 = vld [vmem:[%s16380_s1 + $0xc8] sm:$0xff]  }
  0x53   : > { %4641 = vmatpush1.bf16.msra.mxu0 %v12993_v47  ;;  %v749_v47 = vshll.u32 %v13018_v31, 16  ;;  %v769_v31 = vrot.slane %v767_v24, 4 }
  0x54   : > { %4642 = vmatprep.subr.bf16.mxu0 %v13185_v1 }
  0x55   : > { %v751_v49 = vrot.slane %v749_v47, 4 }
  0x56   : > { %4390 = vmatmul.mubr.bf16.gmra.mrb[4].mxu0 %v591_v63  ;;  %v13019_v63 = vld [vmem:[%s13260_s8 + $0x94] sm:$0xff]  }
  0x57   : > { %4397 = vmatprep.mubr.bf16.mxu0 %v999_v2  ;;  %4643 = vmatpush1.bf16.msra.mxu0 %v12996_v34  ;;  %v752_v34 = vor.u32 %v751_v49, %v748_v41  ;;  %509 = vst [vmem:[#allocation2 + $0xa8] sm:$0xff] %v13019_v63  ;;  %v1034_v2 = vrot.slane %v13019_v63, 4  ;;  %v755_v3 = vshrl.u32 %v13019_v63, 16  ;;  %v758_v16 = vshll.u32 %v13019_v63, 16 }
  0x58   : > { %4644 = vmatprep.subr.bf16.mxu0 %v13185_v1 }
  0x59   : > { %v13516_v60 = vsel %vm565_vm1, %v743_v28, %v752_v34  ;;  %v13527_v12 = vsel %vm992_vm0, %v1032_v13, %v1034_v2  ;;  %v757_v7 = vrot.slane %v755_v3, 3  ;;  %v13542_v28 = vld [vmem:[#allocation2] sm:$0xff]  ;;  %v13549_v45 = vsel %vm992_vm0, %v1034_v2, %v1036_v33 }
  0x5b   : > { %4645 = vmatpush1.bf16.msra.mxu0 %v12999_v15  ;;  %v760_v15 = vrot.slane %v758_v16, 4 }
  0x5c   : > { %4646 = vmatprep.subr.bf16.mxu0 %v13185_v1 }
  0x5d   : > { %v761_v38 = vor.u32 %v760_v15, %v757_v7  ;;  %v13025_v7 = vld [vmem:[%s13260_s8 + $0xb4] sm:$0xff]  }
  0x5e   : > { %4398 = vmatmul.mubr.bf16.gmra.mrb[8].mxu0 %v600_v22  ;;  %v764_v22 = vshrl.u32 %v13021_v32, 16  ;;  %513 = vst [vmem:[#allocation2 + $0xc8] sm:$0xff] %v13025_v7  ;;  %v791_v15 = vshrl.u32 %v13025_v7, 16 }
  0x5f   : > { %4405 = vmatprep.mubr.bf16.mxu0 %v1001_v23  ;;  %4647 = vmatpush1.bf16.msra.mxu0 %v13002_v21  ;;  %v13536_v21 = vsel %vm565_vm1, %v752_v34, %v761_v38 }
  0x60   : > { %4648 = vmatprep.subr.bf16.mxu0 %v13185_v1  ;;  %v766_v23 = vrot.slane %v764_v22, 3  ;;  %v13027_v22 = vld [vmem:[%s13260_s8 + $0xbc] sm:$0xff]  }
  0x61   : > { %514 = vst [vmem:[#allocation2 + $0xd0] sm:$0xff] %v13027_v22  ;;  %v800_v24 = vshrl.u32 %v13027_v22, 16 }
  0x62   : > { %v770_v37 = vor.u32 %v769_v31, %v766_v23 }
  0x63   : > { %4649 = vmatpush1.bf16.msra.mxu0 %v13005_v46  ;;  %v13022_v46 = vld [vmem:[%s13260_s8 + $0xa4] sm:$0xff]   ;;  %v802_v31 = vrot.slane %v800_v24, 3 }
  0x64   : > { %4650 = vmatprep.subr.bf16.mxu0 %v13185_v1  ;;  %v13553_v42 = vsel %vm565_vm1, %v761_v38, %v770_v37  ;;  %511 = vst [vmem:[#allocation2 + $0xb8] sm:$0xff] %v13022_v46  ;;  %v1038_v13 = vrot.slane %v13022_v46, 4  ;;  %v773_v30 = vshrl.u32 %v13022_v46, 16  ;;  %v776_v47 = vshll.u32 %v13022_v46, 16 }
  0x66   : > { %4406 = vmatmul.mubr.bf16.gmra.mrb[12].mxu0 %v609_v51  ;;  %v775_v41 = vrot.slane %v773_v30, 3  ;;  %v778_v49 = vrot.slane %v776_v47, 4 }
  0x67   : > { %4413 = vmatprep.mubr.bf16.mxu0 %v1003_v59  ;;  %4651 = vmatpush1.bf16.msra.mxu0 %v13008_v6  ;;  %v13560_v6 = vsel %vm992_vm0, %v1036_v33, %v1038_v13 }
  0x68   : > { %4652 = vmatprep.subr.bf16.mxu0 %v13185_v1  ;;  %v779_v51 = vor.u32 %v778_v49, %v775_v41 }
  0x6a   : > { %v13563_v34 = vsel %vm565_vm1, %v770_v37, %v779_v51 }
  0x6b   : > { %4653 = vmatpush1.bf16.msra.mxu0 %v13011_v0 }
  0x6c   : > { %4654 = vmatprep.subr.bf16.mxu0 %v13185_v1  ;;  %v13020_v1 = vld [vmem:[%s16380_s1 + $0xd0] sm:$0xff]  }
  0x6e   : > { %4414 = vmatmul.mubr.bf16.gmra.mrb[16].mxu0 %v618_v29  ;;  %v794_v29 = vshll.u32 %v13025_v7, 16 }
  0x6f   : > { %4421 = vmatprep.mubr.bf16.mxu0 %v1005_v20  ;;  %4655 = vmatpush1.bf16.msra.mxu0 %v13014_v35  ;;  %v793_v20 = vrot.slane %v791_v15, 3 }
  0x70   : > { %4656 = vmatprep.subr.bf16.mxu0 %v13542_v28  ;;  %v796_v32 = vrot.slane %v794_v29, 4 }
  0x73   : > { %4657 = vmatpush1.bf16.msra.mxu0 %v13017_v53  ;;  %v797_v53 = vor.u32 %v796_v32, %v793_v20 }
  0x74   : > { %4658 = vmatprep.subr.bf16.mxu0 %v13542_v28 }
  0x76   : > { %4422 = vmatmul.mubr.bf16.gmra.mrb[20].mxu0 %v13341_v61  ;;  %v13024_v61 = vld [vmem:[%s13260_s8 + $0xac] sm:$0xff]  }
  0x77   : > { %4429 = vmatprep.mubr.bf16.mxu0 %v13332_v55  ;;  %4659 = vmatpush1.bf16.msra.mxu0 %v13020_v1  ;;  %v13023_v55 = vld [vmem:[%s16380_s1 + $0xd8] sm:$0xff]   ;;  %512 = vst [vmem:[#allocation2 + $0xc0] sm:$0xff] %v13024_v61  ;;  %v1040_v59 = vrot.slane %v13024_v61, 4  ;;  %v782_v63 = vshrl.u32 %v13024_v61, 16  ;;  %v785_v0 = vshll.u32 %v13024_v61, 16  ;;  %v803_v1 = vshll.u32 %v13027_v22, 16 }
  0x78   : > { %4660 = vmatprep.subr.bf16.mxu0 %v13542_v28 }
  0x79   : > { %v13572_v2 = vsel %vm992_vm0, %v1038_v13, %v1040_v59  ;;  %v784_v3 = vrot.slane %v782_v63, 3  ;;  %v787_v16 = vrot.slane %v785_v0, 4  ;;  %v805_v37 = vrot.slane %v803_v1, 4  ;;  %v13028_v13 = vld [vmem:[%s13260_s8 + $0xc4] sm:$0xff]  }
  0x7a   : > { %515 = vst [vmem:[#allocation2 + $0xd8] sm:$0xff] %v13028_v13  ;;  %v809_v30 = vshrl.u32 %v13028_v13, 16  ;;  %v812_v47 = vshll.u32 %v13028_v13, 16 }
  0x7b   : > { %4661 = vmatpush1.bf16.msra.mxu0 %v13023_v55 }
  0x7c   : > { %4662 = vmatprep.subr.bf16.mxu0 %v13542_v28  ;;  %v811_v49 = vrot.slane %v809_v30, 3  ;;  %v13036_v30 = vld [vmem:[%s13260_s8 + $0xec] sm:$0xff]  }
  0x7d   : > { %520 = vst [vmem:[#allocation2 + $0x100] sm:$0xff] %v13036_v30 }
  0x7e   : > { %4430 = vmatmul.mubr.bf16.gmra.mrb[24].mxu0 %v13352_v14  ;;  %v788_v14 = vor.u32 %v787_v16, %v784_v3 }
  0x7f   : > { %4437 = vmatprep.mubr.bf16.mxu0 %v13336_v58  ;;  %v1042_v58 = vrot.slane %v13025_v7, 4 }
  0x80   : > { %v13576_v35 = vsel %vm565_vm1, %v779_v51, %v788_v14  ;;  %v13585_v33 = vsel %vm565_vm1, %v788_v14, %v797_v53  ;;  %v814_v51 = vrot.slane %v812_v47, 4 }
  0x81   : > { %v13582_v38 = vsel %vm992_vm0, %v1040_v59, %v1042_v58  ;;  %v13030_v59 = vld [vmem:[%s13260_s8 + $0xcc] sm:$0xff]  }
  0x82   : > { %v815_v61 = vor.u32 %v814_v51, %v811_v49  ;;  %516 = vst [vmem:[#allocation2 + $0xe0] sm:$0xff] %v13030_v59  ;;  %v818_v63 = vshrl.u32 %v13030_v59, 16  ;;  %v821_v0 = vshll.u32 %v13030_v59, 16 }
  0x84   : > { %v820_v16 = vrot.slane %v818_v63, 3  ;;  %v823_v14 = vrot.slane %v821_v0, 4  ;;  %v13696_v0 = vld [vmem:[#allocation2 + $0x20] sm:$0xff] }
  0x86   : > { %4438 = vmatmul.mubr.bf16.gmra.mrb[28].mxu0 %v13363_v25  ;;  %v1044_v25 = vrot.slane %v13027_v22, 4 }
  0x87   : > { %4445 = vmatprep.mubr.bf16.mxu0 %v13348_v10  ;;  %v13026_v10 = vld [vmem:[%s16380_s1 + $0xe0] sm:$0xff]  }
  0x88   : > { %4663 = vmatpush1.bf16.msra.mxu0 %v13026_v10  ;;  %v13594_v23 = vsel %vm992_vm0, %v1042_v58, %v1044_v25  ;;  %v13031_v58 = vld [vmem:[%s13260_s8 + $0xd4] sm:$0xff]  }
  0x89   : > { %4664 = vmatprep.subr.bf16.mxu0 %v13542_v28  ;;  %517 = vst [vmem:[#allocation2 + $0xe8] sm:$0xff] %v13031_v58  ;;  %v830_v15 = vshll.u32 %v13031_v58, 16  ;;  %v1050_v32 = vrot.slane %v13031_v58, 4 }
  0x8b   : > { %v832_v20 = vrot.slane %v830_v15, 4  ;;  %v1567_v15 = vshrl.u32 %v13696_v0, 16 }
  0x8e   : > { %4446 = vmatmul.mubr.bf16.gmra.mrb[32].mxu0 %v13371_v48  ;;  %v806_v48 = vor.u32 %v805_v37, %v802_v31 }
  0x8f   : > { %4453 = vmatprep.mubr.bf16.mxu0 %v13355_v17  ;;  %v1046_v17 = vrot.slane %v13028_v13, 4 }
  0x90   : > { %v13598_v46 = vsel %vm565_vm1, %v797_v53, %v806_v48  ;;  %v13607_v55 = vsel %vm565_vm1, %v806_v48, %v815_v61 }
  0x91   : > { %v13604_v41 = vsel %vm992_vm0, %v1044_v25, %v1046_v17  ;;  %v13033_v25 = vld [vmem:[%s13260_s8 + $0xdc] sm:$0xff]  }
  0x92   : > { %518 = vst [vmem:[#allocation2 + $0xf0] sm:$0xff] %v13033_v25  ;;  %v836_v24 = vshrl.u32 %v13033_v25, 16  ;;  %v839_v1 = vshll.u32 %v13033_v25, 16 }
  0x94   : > { %v838_v37 = vrot.slane %v836_v24, 3  ;;  %v841_v48 = vrot.slane %v839_v1, 4  ;;  %v1124_v24 = vld [vmem:[#allocation2 + $0x10] sm:$0xff]  ;;  %v13710_v1 = vld [vmem:[#allocation2 + $0x28] sm:$0xff] }
  0x95   : > { %v1579_v30 = vshll.u32 %v13710_v1, 16 }
  0x96   : > { %4454 = vmatmul.mubr.bf16.gmra.mrb[36].mxu0 %v13377_v52  ;;  %v1048_v52 = vrot.slane %v13030_v59, 4  ;;  %v842_v13 = vor.u32 %v841_v48, %v838_v37  ;;  %v1174_v48 = vshrl.u32 %v1124_v24, 16 }
  0x97   : > { %4461 = vmatprep.mubr.bf16.mxu0 %v13367_v44  ;;  %v13029_v44 = vld [vmem:[%s16380_s1 + $0xe8] sm:$0xff]  }
  0x98   : > { %4665 = vmatpush1.bf16.msra.mxu0 %v13029_v44  ;;  %v13616_v3 = vsel %vm992_vm0, %v1046_v17, %v1048_v52  ;;  %v1051_v22 = vsel %vm992_vm0, %v1048_v52, %v1050_v32  ;;  %v13639_v17 = vld [vmem:[%s13260_s8 + $0xe4] sm:$0xff]  }
  0x99   : > { %4666 = vmatprep.subr.bf16.mxu0 %v13542_v28  ;;  %519 = vst [vmem:[#allocation2 + $0xf8] sm:$0xff] %v13639_v17  ;;  %v848_v47 = vshll.u32 %v13639_v17, 16 }
  0x9b   : > { %v850_v51 = vrot.slane %v848_v47, 4 }
  0x9e   : > { %4462 = vmatmul.mubr.bf16.gmra.mrb[40].mxu0 %v13388_v8  ;;  %v824_v8 = vor.u32 %v823_v14, %v820_v16 }
  0x9f   : > { %4469 = vmatprep.mubr.bf16.mxu0 %v13374_v50  ;;  %v827_v50 = vshrl.u32 %v13031_v58, 16 }
  0xa0   : > { %v13620_v7 = vsel %vm565_vm1, %v815_v61, %v824_v8  ;;  %v1054_v61 = vrot.slane %v13639_v17, 4 }
  0xa1   : > { %v829_v29 = vrot.slane %v827_v50, 3 }
  0xa3   : > { %v833_v53 = vor.u32 %v832_v20, %v829_v29  ;;  %v1570_v29 = vshll.u32 %v13696_v0, 16 }
  0xa5   : > { %v13627_v10 = vsel %vm565_vm1, %v824_v8, %v833_v53  ;;  %v1165_v8 = vshrl.u32 %v13542_v28, 16 }
  0xa6   : > { %4470 = vmatmul.mubr.bf16.gmra.mrb[44].mxu0 %v13397_v19  ;;  %v1052_v19 = vrot.slane %v13033_v25, 4 }
  0xa7   : > { %4477 = vmatprep.mubr.bf16.mxu0 %v13384_v4  ;;  %v13032_v4 = vld [vmem:[%s16380_s1 + $0xf0] sm:$0xff]  }
  0xa8   : > { %4667 = vmatpush1.bf16.msra.mxu0 %v13032_v4  ;;  %v1053_v31 = vsel %vm992_vm0, %v1050_v32, %v1052_v19  ;;  %v1055_v44 = vsel %vm992_vm0, %v1052_v19, %v1054_v61  ;;  %v1569_v4 = vrot.slane %v1567_v15, 3  ;;  %v1572_v19 = vrot.slane %v1570_v29, 4 }
  0xa9   : > { %4668 = vmatprep.subr.bf16.mxu0 %v13542_v28 }
  0xae   : > { %4478 = vmatmul.mubr.bf16.gmra.mrb[48].mxu0 %v13406_v43  ;;  %v843_v43 = vsel %vm565_vm1, %v833_v53, %v842_v13 }
  0xaf   : > { %4485 = vmatprep.mubr.bf16.mxu0 %v13391_v11  ;;  %v845_v11 = vshrl.u32 %v13639_v17, 16  ;;  %v1576_v17 = vshrl.u32 %v13710_v1, 16 }
  0xb1   : > { %v847_v49 = vrot.slane %v845_v11, 3 }
  0xb3   : > { %v13648_v59 = vor.u32 %v850_v51, %v847_v49 }
  0xb6   : > { %4486 = vmatmul.mubr.bf16.gmra.mrb[52].mxu0 %v13412_v54  ;;  %v13653_v54 = vsel %vm565_vm1, %v842_v13, %v13648_v59  ;;  %v1177_v13 = vshll.u32 %v1124_v24, 16  ;;  %v13789_v24 = vld [vmem:[#allocation2 + $0x48] sm:$0xff] }
  0xb7   : > { %4493 = vmatprep.mubr.bf16.mxu0 %v13402_v40  ;;  %v13035_v40 = vld [vmem:[%s16380_s1 + $0xf8] sm:$0xff]  }
  0xb8   : > { %4669 = vmatpush1.bf16.msra.mxu0 %v13035_v40 }
  0xb9   : > { %4927 = vmatprep.subr.bf16.mxu0 %v13542_v28 }
  0xbe   : > { %4494 = vmatmul.mubr.bf16.gmra.mrb[56].mxu0 %v13419_v62 }
  0xbf   : > { %4501 = vmatprep.mubr.bf16.mxu0 %v13415_v56 }
  0xc6   : > { %4502 = vmatmul.mubr.bf16.gmra.mrb[60].mxu0 %v13432_v9 }
  0xc7   : > { %4509 = vmatprep.mubr.bf16.mxu0 %v13439_v27 }
  0xce   : > { %4510 = vmatmul.mubr.bf16.gmra.mrb[64].mxu0 %v13449_v36  ;;  %v564_v36 = vld [vmem:[#allocation2 + $0x100] sm:$0xf] }
  0xcf   : > { %4517 = vmatprep.mubr.bf16.mxu0 %v13463_v57  ;;  %v958_v57 = vld [vmem:[#allocation2 + $0x100] sm:$0xf] }
  0xd6   : > { %4518 = vmatmul.mubr.bf16.gmra.mrb[68].mxu0 %v13473_v5  ;;  %v1516_v5 = vld [vmem:[#allocation2 + $0x10] sm:$0xf8] }
  0xd7   : > { %4525 = vmatprep.mubr.bf16.mxu0 %v13486_v39  ;;  %v13687_v39 = vld [vmem:[#allocation2 + $0x18] sm:$0xff] }
  0xde   : > { %4526 = vmatmul.mubr.bf16.gmra.mrb[72].mxu0 %v13496_v26  ;;  %v854_v26 = vshrl.u32 %v564_v36, 16 }
  0xdf   : > { %4533 = vmatprep.mubr.bf16.mxu0 %v13508_v18  ;;  %v857_v18 = vshll.u32 %v564_v36, 16  ;;  %v13038_v36 = vld [vmem:[%s16380_s1 + $0x108] sm:$0xff]  }
  0xe6   : > { %4534 = vmatmul.mubr.bf16.gmra.mrb[76].mxu0 %v13516_v60  ;;  %v1056_v60 = vrot.slane %v958_v57, 4 }
  0xe7   : > { %4541 = vmatprep.mubr.bf16.mxu0 %v13527_v12  ;;  %v1550_v12 = vshrl.u32 %v1516_v5, 16 }
  0xee   : > { %4542 = vmatmul.mubr.bf16.gmra.mrb[80].mxu0 %v13536_v21  ;;  %v1553_v21 = vshll.u32 %v1516_v5, 16 }
  0xef   : > { %4549 = vmatprep.mubr.bf16.mxu0 %v13549_v45  ;;  %v1558_v45 = vshrl.u32 %v13687_v39, 16 }
  0xf1   : > { %v1560_v52 = vrot.slane %v1558_v45, 3 }
  0xf6   : > { %4550 = vmatmul.mubr.bf16.gmra.mrb[84].mxu0 %v13553_v42  ;;  %v1561_v42 = vshll.u32 %v13687_v39, 16 }
  0xf7   : > { %4557 = vmatprep.mubr.bf16.mxu0 %v13560_v6 }
  0xf8   : > { %v1563_v63 = vrot.slane %v1561_v42, 4 }
  0xfa   : > { %v1564_v50 = vor.u32 %v1563_v63, %v1560_v52  ;;  %v1194_v52 = vrot.slane %v1567_v15, 4  ;;  %v1197_v63 = vrot.slane %v1570_v29, 5 }
  0xfc   : > { %v1198_v0 = vor.u32 %v1197_v63, %v1194_v52 }
  0xfe   : > { %4558 = vmatmul.mubr.bf16.gmra.mrb[88].mxu0 %v13563_v34 }
  0xff   : > { %4565 = vmatprep.mubr.bf16.mxu0 %v13572_v2  ;;  %v856_v2 = vrot.slane %v854_v26, 3 }
 0x106   : > { %4566 = vmatmul.mubr.bf16.gmra.mrb[92].mxu0 %v13576_v35  ;;  %v859_v35 = vrot.slane %v857_v18, 4 }
 0x107   : > { %4573 = vmatprep.mubr.bf16.mxu0 %v13582_v38 }
 0x10e   : > { %4574 = vmatmul.mubr.bf16.gmra.mrb[96].mxu0 %v13585_v33  ;;  %v1057_v33 = vsel %vm992_vm0, %v1054_v61, %v1056_v60  ;;  %v13037_v61 = vld [vmem:[%s16380_s1 + $0x100] sm:$0xff]   ;;  %v1185_v60 = vrot.slane %v1558_v45, 4  ;;  %v13040_v45 = vld [vmem:[%s16380_s1 + $0x118] sm:$0xff]  }
 0x10f   : > { %4581 = vmatprep.mubr.bf16.mxu0 %v13594_v23  ;;  %v1122_v23 = vld [vmem:[#allocation2] sm:$0xf0] }
 0x110   : > { %v1157_v16 = vshrl.u32 %v1122_v23, 16  ;;  %v1160_v14 = vshll.u32 %v1122_v23, 16 }
 0x112   : > { %v1159_v32 = vrot.slane %v1157_v16, 4  ;;  %v1162_v53 = vrot.slane %v1160_v14, 5 }
 0x116   : > { %4582 = vmatmul.mubr.bf16.gmra.mrb[100].mxu0 %v13598_v46 }
 0x117   : > { %4589 = vmatprep.mubr.bf16.mxu0 %v13604_v41  ;;  %v1552_v41 = vrot.slane %v1550_v12, 3  ;;  %v1188_v12 = vrot.slane %v1561_v42, 5 }
 0x119   : > { %v1189_v39 = vor.u32 %v1188_v12, %v1185_v60 }
 0x11e   : > { %4590 = vmatmul.mubr.bf16.gmra.mrb[104].mxu0 %v13607_v55  ;;  %v1555_v55 = vrot.slane %v1553_v21, 4  ;;  %v13039_v21 = vld [vmem:[%s16380_s1 + $0x110] sm:$0xff]  }
 0x11f   : > { %4597 = vmatprep.mubr.bf16.mxu0 %v13616_v3  ;;  %v860_v3 = vor.u32 %v859_v35, %v856_v2  ;;  %v13745_v35 = vld [vmem:[#allocation2 + $0x38] sm:$0xff] }
 0x120   : > { %v1556_v58 = vor.u32 %v1555_v55, %v1552_v41 }
 0x121   : > { %v861_v20 = vsel %vm565_vm1, %v13648_v59, %v860_v3  ;;  %v1176_v59 = vrot.slane %v1174_v48, 4  ;;  %v13041_v3 = vld [vmem:[%s16380_s1 + $0x120] sm:$0xff]   ;;  %v1612_v48 = vshrl.u32 %v13789_v24, 16 }
 0x122   : > { %v1565_v25 = vsel %vm565_vm1, %v1556_v58, %v1564_v50  ;;  %v13767_v58 = vld [vmem:[#allocation2 + $0x40] sm:$0xff] }
 0x123   : > { %v1603_v29 = vshrl.u32 %v13767_v58, 16 }
 0x126   : > { %4598 = vmatmul.mubr.bf16.gmra.mrb[108].mxu0 %v13620_v7  ;;  %v1168_v7 = vshll.u32 %v13542_v28, 16 }
 0x127   : > { %4605 = vmatprep.mubr.bf16.mxu0 %v1051_v22  ;;  %v1167_v22 = vrot.slane %v1165_v8, 4 }
 0x129   : > { %v4391_v56 = vpop.f32.mrb[4].mxu0 }
 0x12a   : > { %v4393_v62 = vpop.f32.mrb[5].mxu0  ;;  %v1578_v56 = vrot.slane %v1576_v17, 3 }
 0x12b   : > { %v4394_v9 = vpop.f32.mrb[6].mxu0  ;;  %v1581_v62 = vrot.slane %v1579_v30, 4 }
 0x12c   : > { %v4396_v27 = vpop.f32.mrb[7].mxu0  ;;  %v13723_v9 = vld [vmem:[#allocation2 + $0x30] sm:$0xff] }
 0x12d   : > { %v1582_v57 = vor.u32 %v1581_v62, %v1578_v56  ;;  %v1585_v5 = vshrl.u32 %v13723_v9, 16  ;;  %v1588_v26 = vshll.u32 %v13723_v9, 16  ;;  %v13046_v62 = vld [vmem:[%s16380_s1 + $0x148] sm:$0xff]  }
 0x12e   : > { %4606 = vmatmul.mubr.bf16.gmra.mrb[112].mxu0 %v13627_v10  ;;  %v1170_v10 = vrot.slane %v1168_v7, 5 }
 0x12f   : > { %4613 = vmatprep.mubr.bf16.mxu0 %v1053_v31  ;;  %v1163_v31 = vor.u32 %v1162_v53, %v1159_v32  ;;  %v1590_v2 = vrot.slane %v1588_v26, 4  ;;  %v1199_v32 = vsel %vm1155_vm2, %v1189_v39, %v1198_v0  ;;  %v1203_v53 = vrot.slane %v1576_v17, 4 }
 0x130   : > { %v1171_v37 = vor.u32 %v1170_v10, %v1167_v22  ;;  %v1206_v22 = vrot.slane %v1579_v30, 5  ;;  %v13043_v10 = vld [vmem:[%s16380_s1 + $0x130] sm:$0xff]  }
 0x132   : > { %v1172_v51 = vsel %vm1155_vm2, %v1163_v31, %v1171_v37  ;;  %v1207_v1 = vor.u32 %v1206_v22, %v1203_v53  ;;  %v13044_v31 = vld [vmem:[%s16380_s1 + $0x138] sm:$0xff]   ;;  %v1527_v53 = vld [vmem:[#allocation2 + $0x68] sm:$0xff] }
 0x136   : > { %4614 = vmatmul.mubr.bf16.gmra.mrb[116].mxu0 %v843_v43  ;;  %v1573_v43 = vor.u32 %v1572_v19, %v1569_v4  ;;  %v1605_v4 = vrot.slane %v1603_v29, 3 }
 0x137   : > { %4621 = vmatprep.mubr.bf16.mxu0 %v1055_v44  ;;  %v1179_v44 = vrot.slane %v1177_v13, 5  ;;  %v1615_v13 = vshll.u32 %v13789_v24, 16 }
 0x138   : > { %v1574_v40 = vsel %vm565_vm1, %v1564_v50, %v1573_v43  ;;  %v13042_v50 = vld [vmem:[%s16380_s1 + $0x128] sm:$0xff]  }
 0x139   : > { %v4407_v6 = vpop.f32.mrb[12].mxu0  ;;  %v1180_v27 = vor.u32 %v1179_v44, %v1176_v59  ;;  %v1614_v44 = vrot.slane %v1612_v48, 3 }
 0x13a   : > { %v4409_v34 = vpop.f32.mrb[13].mxu0  ;;  %v1583_v6 = vsel %vm565_vm1, %v1573_v43, %v1582_v57 }
 0x13b   : > { %v4410_v38 = vpop.f32.mrb[14].mxu0  ;;  %v1181_v18 = vsel %vm1155_vm2, %v1171_v37, %v1180_v27  ;;  %v1587_v34 = vrot.slane %v1585_v5, 3  ;;  %v1190_v55 = vsel %vm1155_vm2, %v1180_v27, %v1189_v39 }
 0x13c   : > { %v4412_v46 = vpop.f32.mrb[15].mxu0  ;;  %v1594_v38 = vshrl.u32 %v13745_v35, 16 }
 0x13d   : > { %v1591_v42 = vor.u32 %v1590_v2, %v1587_v34 }
 0x13e   : > { %4622 = vmatmul.mubr.bf16.gmra.mrb[120].mxu0 %v13653_v54  ;;  %v1596_v8 = vrot.slane %v1594_v38, 3 }
 0x13f   : > { %4629 = vmatprep.mubr.bf16.mxu0 %v1057_v33  ;;  %v1597_v33 = vshll.u32 %v13745_v35, 16  ;;  %v1592_v14 = vsel %vm565_vm1, %v1582_v57, %v1591_v42 }
 0x141   : > { %v1599_v7 = vrot.slane %v1597_v33, 4 }
 0x143   : > { %v1600_v15 = vor.u32 %v1599_v7, %v1596_v8 }
 0x146   : > { %4630 = vmatmul.mubr.bf16.gmra.mrb[124].mxu0 %v861_v20  ;;  %v1606_v20 = vshll.u32 %v13767_v58, 16 }
 0x147   : > { %4670 = vmatprep.mubr.bf16.mxu0 %v1565_v25  ;;  %v1601_v25 = vsel %vm565_vm1, %v1591_v42, %v1600_v15 }
 0x148   : > { %v1608_v19 = vrot.slane %v1606_v20, 4 }
 0x149   : > { %v4423_v11 = vpop.f32.mrb[20].mxu0 }
 0x14a   : > { %v4425_v47 = vpop.f32.mrb[21].mxu0  ;;  %v1609_v37 = vor.u32 %v1608_v19, %v1605_v4  ;;  %v1208_v11 = vsel %vm1155_vm2, %v1198_v0, %v1207_v1  ;;  %v13843_v0 = vld [vmem:[#allocation2] sm:$0xff]  ;;  %v1651_v4 = vshll.u32 %v1527_v53, 16 }
 0x14b   : > { %v4426_v49 = vpop.f32.mrb[22].mxu0  ;;  %v1212_v47 = vrot.slane %v1585_v5, 4  ;;  %v1221_v5 = vrot.slane %v1594_v38, 4 }
 0x14c   : > { %v4428_v54 = vpop.f32.mrb[23].mxu0  ;;  %v1215_v49 = vrot.slane %v1588_v26, 5  ;;  %v1610_v59 = vsel %vm565_vm1, %v1600_v15, %v1609_v37  ;;  %v1224_v26 = vrot.slane %v1597_v33, 5  ;;  %v1242_v15 = vrot.slane %v1615_v13, 5 }
 0x14d   : > { %v1617_v54 = vrot.slane %v1615_v13, 4 }
 0x14e   : > { %4671 = vmatmul.mubr.bf16.vlgmr.msra.gmra.mrb[0].mxu0 %v1172_v51  ;;  %v13045_v51 = vld [vmem:[%s16380_s1 + $0x140] sm:$0xff]   ;;  %v1216_v56 = vor.u32 %v1215_v49, %v1212_v47  ;;  %v1225_v34 = vor.u32 %v1224_v26, %v1221_v5 }
 0x14f   : > { %4928 = vmatpush1.bf16.msra.mxu0 %v13037_v61  ;;  %4678 = vmatprep.mubr.bf16.mxu0 %v1574_v40  ;;  %v13811_v40 = vld [vmem:[#allocation2 + $0x50] sm:$0xff]  ;;  %v1618_v9 = vor.u32 %v1617_v54, %v1614_v44  ;;  %v13049_v47 = vld [vmem:[%s16380_s1 + $0x160] sm:$0xff]  }
 0x150   : > { %4929 = vmatprep.subr.bf16.mxu0 %v13542_v28  ;;  %v1621_v27 = vshrl.u32 %v13811_v40, 16  ;;  %v1217_v57 = vsel %vm1155_vm2, %v1207_v1, %v1216_v56  ;;  %v1226_v33 = vsel %vm1155_vm2, %v1216_v56, %v1225_v34 }
 0x151   : > { %v1619_v60 = vsel %vm565_vm1, %v1609_v37, %v1618_v9 }
 0x152   : > { %v1623_v12 = vrot.slane %v1621_v27, 3 }
 0x153   : > { %4930 = vmatpush1.bf16.msra.mxu0 %v13038_v36  ;;  %v1624_v36 = vshll.u32 %v13811_v40, 16 }
 0x154   : > { %4931 = vmatprep.subr.bf16.mxu0 %v13542_v28 }
 0x156   : > { %4679 = vmatmul.mubr.bf16.gmra.mrb[128].mxu0 %v1181_v18  ;;  %v13047_v18 = vld [vmem:[%s16380_s1 + $0x150] sm:$0xff]  }
 0x157   : > { %4686 = vmatprep.mubr.bf16.mxu0 %v1583_v6  ;;  %4932 = vmatpush1.bf16.msra.mxu0 %v13039_v21  ;;  %v1626_v21 = vrot.slane %v1624_v36, 4  ;;  %v13829_v6 = vld [vmem:[#allocation2 + $0x58] sm:$0xff] }
 0x158   : > { %4933 = vmatprep.subr.bf16.mxu0 %v13542_v28  ;;  %v1630_v35 = vshrl.u32 %v13829_v6, 16  ;;  %v1633_v39 = vshll.u32 %v13829_v6, 16 }
 0x159   : > { %v4439_v23 = vpop.f32.mrb[28].mxu0  ;;  %v1627_v2 = vor.u32 %v1626_v21, %v1623_v12 }
 0x15a   : > { %v4441_v46 = vpop.f32.mrb[29].mxu0  ;;  %v1230_v23 = vrot.slane %v1603_v29, 4  ;;  %v1632_v52 = vrot.slane %v1630_v35, 3  ;;  %v1635_v63 = vrot.slane %v1633_v39, 4  ;;  %v1257_v54 = vrot.slane %v1630_v35, 4 }
 0x15b   : > { %v4442_v41 = vpop.f32.mrb[30].mxu0  ;;  %4934 = vmatpush1.bf16.msra.mxu0 %v13040_v45  ;;  %v1233_v46 = vrot.slane %v1606_v20, 5  ;;  %v1260_v40 = vrot.slane %v1633_v39, 5 }
 0x15c   : > { %v4444_v16 = vpop.f32.mrb[31].mxu0  ;;  %4935 = vmatprep.subr.bf16.mxu0 %v13542_v28 }
 0x15d   : > { %v1234_v16 = vor.u32 %v1233_v46, %v1230_v23 }
 0x15e   : > { %4687 = vmatmul.mubr.bf16.gmra.mrb[8].mxu0 %v1190_v55  ;;  %v1628_v55 = vsel %vm565_vm1, %v1618_v9, %v1627_v2 }
 0x15f   : > { %4694 = vmatprep.mubr.bf16.mxu0 %v1592_v14  ;;  %4936 = vmatpush1.bf16.msra.mxu0 %v13041_v3  ;;  %v1526_v3 = vld [vmem:[#allocation2 + $0x60] sm:$0xff]  ;;  %v1636_v14 = vor.u32 %v1635_v63, %v1632_v52  ;;  %v1235_v58 = vsel %vm1155_vm2, %v1225_v34, %v1234_v16  ;;  %v1278_v63 = vrot.slane %v1651_v4, 5 }
 0x160   : > { %4937 = vmatprep.subr.bf16.mxu0 %v13542_v28  ;;  %v1639_v8 = vshrl.u32 %v1526_v3, 16  ;;  %v1642_v7 = vshll.u32 %v1526_v3, 16 }
 0x161   : > { %v1637_v29 = vsel %vm565_vm1, %v1627_v2, %v1636_v14 }
 0x162   : > { %v1641_v20 = vrot.slane %v1639_v8, 3  ;;  %v1266_v6 = vrot.slane %v1639_v8, 4  ;;  %v1269_v34 = vrot.slane %v1642_v7, 5 }
 0x163   : > { %4938 = vmatpush1.bf16.msra.mxu0 %v13042_v50  ;;  %v1239_v50 = vrot.slane %v1612_v48, 4  ;;  %v1248_v48 = vrot.slane %v1621_v27, 4  ;;  %v1529_v27 = vld [vmem:[#allocation2 + $0x78] sm:$0xff] }
 0x164   : > { %4939 = vmatprep.subr.bf16.mxu0 %v13542_v28  ;;  %v1666_v5 = vshrl.u32 %v1529_v27, 16  ;;  %v1669_v26 = vshll.u32 %v1529_v27, 16 }
 0x165   : > { %v1243_v22 = vor.u32 %v1242_v15, %v1239_v50 }
 0x166   : > { %4695 = vmatmul.mubr.bf16.gmra.mrb[132].mxu0 %v1199_v32  ;;  %v1644_v32 = vrot.slane %v1642_v7, 4  ;;  %v1668_v39 = vrot.slane %v1666_v5, 3 }
 0x167   : > { %4702 = vmatprep.mubr.bf16.mxu0 %v1601_v25  ;;  %4940 = vmatpush1.bf16.msra.mxu0 %v13043_v10  ;;  %v1648_v25 = vshrl.u32 %v1527_v53, 16  ;;  %v1244_v37 = vsel %vm1155_vm2, %v1234_v16, %v1243_v22 }
 0x168   : > { %4941 = vmatprep.subr.bf16.mxu0 %v13542_v28  ;;  %v1645_v10 = vor.u32 %v1644_v32, %v1641_v20 }
 0x169   : > { %v4455_v43 = vpop.f32.mrb[36].mxu0  ;;  %v1275_v52 = vrot.slane %v1648_v25, 4 }
 0x16a   : > { %v4457_v17 = vpop.f32.mrb[37].mxu0  ;;  %v1251_v43 = vrot.slane %v1624_v36, 5  ;;  %v1646_v13 = vsel %vm565_vm1, %v1636_v14, %v1645_v10  ;;  %v1261_v36 = vor.u32 %v1260_v40, %v1257_v54  ;;  %v13872_v14 = vld [vmem:[#allocation2 + $0x88] sm:$0xff] }
 0x16b   : > { %v4458_v30 = vpop.f32.mrb[38].mxu0  ;;  %4942 = vmatpush1.bf16.msra.mxu0 %v13044_v31  ;;  %v1650_v17 = vrot.slane %v1648_v25, 3  ;;  %v1279_v8 = vor.u32 %v1278_v63, %v1275_v52  ;;  %v1687_v50 = vshll.u32 %v13872_v14, 16 }
 0x16c   : > { %v4460_v61 = vpop.f32.mrb[39].mxu0  ;;  %4943 = vmatprep.subr.bf16.mxu0 %v13542_v28  ;;  %v1653_v30 = vrot.slane %v1651_v4, 4  ;;  %v1252_v49 = vor.u32 %v1251_v43, %v1248_v48 }
 0x16e   : > { %4703 = vmatmul.mubr.bf16.gmra.mrb[16].mxu0 %v1208_v11  ;;  %v1528_v11 = vld [vmem:[#allocation2 + $0x70] sm:$0xff]  ;;  %v1253_v44 = vsel %vm1155_vm2, %v1243_v22, %v1252_v49  ;;  %v1262_v21 = vsel %vm1155_vm2, %v1252_v49, %v1261_v36 }
 0x16f   : > { %4710 = vmatprep.mubr.bf16.mxu0 %v1610_v59  ;;  %4944 = vmatpush1.bf16.msra.mxu0 %v13045_v51  ;;  %v1654_v51 = vor.u32 %v1653_v30, %v1650_v17  ;;  %v1657_v61 = vshrl.u32 %v1528_v11, 16  ;;  %v1660_v59 = vshll.u32 %v1528_v11, 16  ;;  %v1293_v17 = vrot.slane %v1666_v5, 4 }
 0x170   : > { %4945 = vmatprep.subr.bf16.mxu0 %v13542_v28  ;;  %v1296_v30 = vrot.slane %v1669_v26, 5 }
 0x171   : > { %v1655_v56 = vsel %vm565_vm1, %v1645_v10, %v1654_v51  ;;  %v1662_v9 = vrot.slane %v1660_v59, 4  ;;  %v1284_v53 = vrot.slane %v1657_v61, 4  ;;  %v1287_v22 = vrot.slane %v1660_v59, 5  ;;  %v1533_v59 = vld [vmem:[#allocation2 + $0x98] sm:$0xff] }
 0x172   : > { %v1702_v40 = vshrl.u32 %v1533_v59, 16 }
 0x173   : > { %4946 = vmatpush1.bf16.msra.mxu0 %v13046_v62  ;;  %v1659_v62 = vrot.slane %v1657_v61, 3  ;;  %v13054_v61 = vld [vmem:[%s13260_s8 + $0xfc] ss:$0 sps:$4 sm:$0xff]  }
 0x174   : > { %4947 = vmatprep.subr.bf16.mxu0 %v13542_v28  ;;  %522 = vst [vmem:[#allocation2 + $0x110] sm:$0xf] %v13054_v61 }
 0x176   : > { %4711 = vmatmul.mubr.bf16.gmra.mrb[136].mxu0 %v1217_v57  ;;  %v1663_v57 = vor.u32 %v1662_v9, %v1659_v62 }
 0x177   : > { %4718 = vmatprep.mubr.bf16.mxu0 %v1619_v60  ;;  %4948 = vmatpush1.bf16.msra.mxu0 %v13047_v18 }
 0x178   : > { %4949 = vmatprep.subr.bf16.mxu0 %v13542_v28  ;;  %v13048_v28 = vld [vmem:[%s16380_s1 + $0x158] sm:$0xff]   ;;  %v1664_v35 = vsel %vm565_vm1, %v1654_v51, %v1663_v57 }
 0x179   : > { %v4471_v45 = vpop.f32.mrb[44].mxu0  ;;  %v13889_v51 = vld [vmem:[%s13260_s8 + $0xf4] sm:$0xff]  }
 0x17a   : > { %v4473_v42 = vpop.f32.mrb[45].mxu0  ;;  %v1671_v45 = vrot.slane %v1669_v26, 4  ;;  %521 = vst [vmem:[#allocation2 + $0x108] sm:$0xff] %v13889_v51 }
 0x17b   : > { %v4474_v38 = vpop.f32.mrb[46].mxu0  ;;  %4950 = vmatpush1.bf16.msra.mxu0 %v13048_v28  ;;  %v13862_v42 = vld [vmem:[#allocation2 + $0x80] sm:$0xff] }
 0x17c   : > { %v4476_v41 = vpop.f32.mrb[47].mxu0  ;;  %4951 = vmatprep.subr.bf16.mxu0 %v13843_v0  ;;  %v13050_v38 = vld [vmem:[%s16380_s1 + $0x168] sm:$0xff]   ;;  %v1672_v23 = vor.u32 %v1671_v45, %v1668_v39  ;;  %v1675_v46 = vshrl.u32 %v13862_v42, 16 }
 0x17d   : > { %v1678_v41 = vshll.u32 %v13862_v42, 16 }
 0x17e   : > { %4719 = vmatmul.mubr.bf16.gmra.mrb[24].mxu0 %v1226_v33  ;;  %v1270_v33 = vor.u32 %v1269_v34, %v1266_v6  ;;  %v1673_v3 = vsel %vm565_vm1, %v1663_v57, %v1672_v23  ;;  %v1677_v28 = vrot.slane %v1675_v46, 3  ;;  %v1302_v57 = vrot.slane %v1675_v46, 4  ;;  %v13053_v6 = vld [vmem:[%s16380_s1 + $0x178] sm:$0xff]  }
 0x17f   : > { %4726 = vmatprep.mubr.bf16.mxu0 %v1628_v55  ;;  %4952 = vmatpush1.bf16.msra.mxu0 %v13049_v47  ;;  %v1680_v16 = vrot.slane %v1678_v41, 4  ;;  %v1305_v5 = vrot.slane %v1678_v41, 5  ;;  %v1535_v41 = vld [vmem:[#allocation2 + $0xa8] sm:$0xff] }
 0x180   : > { %4953 = vmatprep.subr.bf16.mxu0 %v13843_v0  ;;  %v1271_v55 = vsel %vm1155_vm2, %v1261_v36, %v1270_v33  ;;  %v1280_v32 = vsel %vm1155_vm2, %v1270_v33, %v1279_v8  ;;  %v1720_v63 = vshrl.u32 %v1535_v41, 16 }
 0x181   : > { %v1681_v7 = vor.u32 %v1680_v16, %v1677_v28  ;;  %v1306_v34 = vor.u32 %v1305_v5, %v1302_v57 }
 0x183   : > { %4954 = vmatpush1.bf16.msra.mxu0 %v13050_v38  ;;  %v1682_v25 = vsel %vm565_vm1, %v1672_v23, %v1681_v7  ;;  %v1314_v38 = vrot.slane %v1687_v50, 5 }
 0x184   : > { %4955 = vmatprep.subr.bf16.mxu0 %v13843_v0 }
 0x186   : > { %4727 = vmatmul.mubr.bf16.gmra.mrb[140].mxu0 %v1235_v58  ;;  %v1684_v58 = vshrl.u32 %v13872_v14, 16 }
 0x187   : > { %4734 = vmatprep.mubr.bf16.mxu0 %v1637_v29 }
 0x188   : > { %v1686_v4 = vrot.slane %v1684_v58, 3  ;;  %v1311_v42 = vrot.slane %v1684_v58, 4 }
 0x189   : > { %v4487_v19 = vpop.f32.mrb[52].mxu0 }
 0x18a   : > { %v4489_v1 = vpop.f32.mrb[53].mxu0  ;;  %v1689_v19 = vrot.slane %v1687_v50, 4 }
 0x18b   : > { %v4490_v31 = vpop.f32.mrb[54].mxu0  ;;  %v13878_v1 = vld [vmem:[#allocation2 + $0x90] sm:$0xff] }
 0x18c   : > { %v4492_v24 = vpop.f32.mrb[55].mxu0  ;;  %v13051_v31 = vld [vmem:[%s16380_s1 + $0x170] sm:$0xff]   ;;  %v1690_v48 = vor.u32 %v1689_v19, %v1686_v4  ;;  %v1693_v43 = vshrl.u32 %v13878_v1, 16  ;;  %v1329_v19 = vrot.slane %v1702_v40, 4 }
 0x18d   : > { %v1696_v24 = vshll.u32 %v13878_v1, 16  ;;  %4956 = vmatpush1.bf16.msra.mxu0 %v13051_v31 }
 0x18e   : > { %4735 = vmatmul.mubr.bf16.gmra.mrb[32].mxu0 %v1244_v37  ;;  %v1288_v37 = vor.u32 %v1287_v22, %v1284_v53  ;;  %4957 = vmatprep.subr.bf16.mxu0 %v13843_v0  ;;  %v1691_v11 = vsel %vm565_vm1, %v1681_v7, %v1690_v48  ;;  %v1695_v47 = vrot.slane %v1693_v43, 3  ;;  %v1320_v7 = vrot.slane %v1693_v43, 4  ;;  %v1537_v43 = vld [vmem:[#allocation2 + $0xb8] sm:$0xff] }
 0x18f   : > { %4742 = vmatprep.mubr.bf16.mxu0 %v1646_v13  ;;  %v1698_v49 = vrot.slane %v1696_v24, 4 }
 0x190   : > { %v1289_v13 = vsel %vm1155_vm2, %v1279_v8, %v1288_v37 }
 0x191   : > { %v1699_v54 = vor.u32 %v1698_v49, %v1695_v47  ;;  %4958 = vmatpush1.bf16.msra.mxu0 %v13053_v6 }
 0x192   : > { %5216 = vmatprep.subr.bf16.mxu0 %v13843_v0 }
 0x196   : > { %4743 = vmatmul.mubr.bf16.gmra.mrb[144].mxu0 %v1253_v44  ;;  %v1297_v44 = vor.u32 %v1296_v30, %v1293_v17  ;;  %v1738_v17 = vshrl.u32 %v1537_v43, 16  ;;  %v1741_v30 = vshll.u32 %v1537_v43, 16 }
 0x197   : > { %4750 = vmatprep.mubr.bf16.mxu0 %v1655_v56  ;;  %v1705_v56 = vshll.u32 %v1533_v59, 16 }
 0x198   : > { %v1298_v36 = vsel %vm1155_vm2, %v1288_v37, %v1297_v44  ;;  %v1307_v45 = vsel %vm1155_vm2, %v1297_v44, %v1306_v34 }
 0x199   : > { %v4503_v18 = vpop.f32.mrb[60].mxu0  ;;  %v1332_v1 = vrot.slane %v1705_v56, 5 }
 0x19a   : > { %v4505_v60 = vpop.f32.mrb[61].mxu0  ;;  %v1700_v18 = vsel %vm565_vm1, %v1690_v48, %v1699_v54 }
 0x19b   : > { %v4506_v12 = vpop.f32.mrb[62].mxu0  ;;  %v1704_v60 = vrot.slane %v1702_v40, 3 }
 0x19c   : > { %v4508_v2 = vpop.f32.mrb[63].mxu0  ;;  %v1707_v12 = vrot.slane %v1705_v56, 4  ;;  %v1740_v56 = vrot.slane %v1738_v17, 3 }
 0x19e   : > { %4751 = vmatmul.mubr.bf16.gmra.mrb[40].mxu0 %v1262_v21  ;;  %v1534_v21 = vld [vmem:[#allocation2 + $0xa0] sm:$0xff]  ;;  %v1708_v2 = vor.u32 %v1707_v12, %v1704_v60 }
 0x19f   : > { %4758 = vmatprep.mubr.bf16.mxu0 %v1664_v35  ;;  %v1711_v35 = vshrl.u32 %v1534_v21, 16  ;;  %v1714_v39 = vshll.u32 %v1534_v21, 16 }
 0x1a0   : > { %v1709_v33 = vsel %vm565_vm1, %v1699_v54, %v1708_v2 }
 0x1a1   : > { %v1713_v23 = vrot.slane %v1711_v35, 3  ;;  %v1716_v46 = vrot.slane %v1714_v39, 4  ;;  %v1338_v59 = vrot.slane %v1711_v35, 4  ;;  %v1341_v44 = vrot.slane %v1714_v39, 5 }
 0x1a3   : > { %v1717_v52 = vor.u32 %v1716_v46, %v1713_v23 }
 0x1a5   : > { %v1718_v50 = vsel %vm565_vm1, %v1708_v2, %v1717_v52 }
 0x1a6   : > { %4759 = vmatmul.mubr.bf16.gmra.mrb[148].mxu0 %v1271_v55  ;;  %v1315_v55 = vor.u32 %v1314_v38, %v1311_v42 }
 0x1a7   : > { %4766 = vmatprep.mubr.bf16.mxu0 %v1673_v3  ;;  %v1723_v3 = vshll.u32 %v1535_v41, 16 }
 0x1a8   : > { %v1316_v8 = vsel %vm1155_vm2, %v1306_v34, %v1315_v55  ;;  %v1539_v34 = vld [vmem:[#allocation2 + $0xc8] sm:$0xff] }
 0x1a9   : > { %v4519_v15 = vpop.f32.mrb[68].mxu0  ;;  %v1350_v60 = vrot.slane %v1723_v3, 5  ;;  %v1756_v39 = vshrl.u32 %v1539_v34, 16 }
 0x1aa   : > { %v4521_v29 = vpop.f32.mrb[69].mxu0  ;;  %v1323_v15 = vrot.slane %v1696_v24, 5  ;;  %v1333_v24 = vor.u32 %v1332_v1, %v1329_v19 }
 0x1ab   : > { %v4522_v20 = vpop.f32.mrb[70].mxu0  ;;  %v1722_v29 = vrot.slane %v1720_v63, 3 }
 0x1ac   : > { %v4524_v10 = vpop.f32.mrb[71].mxu0  ;;  %v1725_v20 = vrot.slane %v1723_v3, 4  ;;  %v1324_v53 = vor.u32 %v1323_v15, %v1320_v7 }
 0x1ae   : > { %4767 = vmatmul.mubr.bf16.gmra.mrb[48].mxu0 %v1280_v32  ;;  %v1536_v32 = vld [vmem:[#allocation2 + $0xb0] sm:$0xff]  ;;  %v1726_v22 = vor.u32 %v1725_v20, %v1722_v29  ;;  %v1325_v4 = vsel %vm1155_vm2, %v1315_v55, %v1324_v53  ;;  %v1334_v61 = vsel %vm1155_vm2, %v1324_v53, %v1333_v24  ;;  %v1541_v53 = vld [vmem:[#allocation2 + $0xd8] sm:$0xff] }
 0x1af   : > { %4774 = vmatprep.mubr.bf16.mxu0 %v1682_v25  ;;  %v1729_v10 = vshrl.u32 %v1536_v32, 16  ;;  %v1732_v25 = vshll.u32 %v1536_v32, 16 }
 0x1b0   : > { %v1727_v31 = vsel %vm565_vm1, %v1717_v52, %v1726_v22 }
 0x1b1   : > { %v1731_v37 = vrot.slane %v1729_v10, 3  ;;  %v1734_v48 = vrot.slane %v1732_v25, 4  ;;  %v1356_v46 = vrot.slane %v1729_v10, 4  ;;  %v1359_v41 = vrot.slane %v1732_v25, 5 }
 0x1b2   : > { %v1774_v25 = vshrl.u32 %v1541_v53, 16 }
 0x1b6   : > { %4775 = vmatmul.mubr.bf16.gmra.mrb[152].mxu0 %v1289_v13  ;;  %v1735_v13 = vor.u32 %v1734_v48, %v1731_v37 }
 0x1b7   : > { %4782 = vmatprep.mubr.bf16.mxu0 %v1691_v11 }
 0x1b8   : > { %v1736_v40 = vsel %vm565_vm1, %v1726_v22, %v1735_v13 }
 0x1b9   : > { %v4535_v62 = vpop.f32.mrb[76].mxu0 }
 0x1ba   : > { %v4537_v9 = vpop.f32.mrb[77].mxu0  ;;  %v1743_v62 = vrot.slane %v1741_v30, 4 }
 0x1bb   : > { %v4538_v27 = vpop.f32.mrb[78].mxu0  ;;  %v1538_v9 = vld [vmem:[#allocation2 + $0xc0] sm:$0xff] }
 0x1bc   : > { %v4540_v26 = vpop.f32.mrb[79].mxu0  ;;  %v1342_v27 = vor.u32 %v1341_v44, %v1338_v59  ;;  %v1747_v57 = vshrl.u32 %v1538_v9, 16  ;;  %v1750_v5 = vshll.u32 %v1538_v9, 16 }
 0x1be   : > { %4783 = vmatmul.mubr.bf16.gmra.mrb[56].mxu0 %v1298_v36  ;;  %v1744_v36 = vor.u32 %v1743_v62, %v1740_v56  ;;  %v1343_v26 = vsel %vm1155_vm2, %v1333_v24, %v1342_v27  ;;  %v1749_v21 = vrot.slane %v1747_v57, 3  ;;  %v1752_v6 = vrot.slane %v1750_v5, 4 }
 0x1bf   : > { %4790 = vmatprep.mubr.bf16.mxu0 %v1700_v18  ;;  %v1347_v18 = vrot.slane %v1720_v63, 4  ;;  %v1758_v63 = vrot.slane %v1756_v39, 3  ;;  %v1374_v48 = vrot.slane %v1747_v57, 4  ;;  %v1377_v43 = vrot.slane %v1750_v5, 5 }
 0x1c0   : > { %v1745_v12 = vsel %vm565_vm1, %v1735_v13, %v1744_v36  ;;  %v1753_v35 = vor.u32 %v1752_v6, %v1749_v21 }
 0x1c1   : > { %v1351_v2 = vor.u32 %v1350_v60, %v1347_v18 }
 0x1c2   : > { %v1754_v52 = vsel %vm565_vm1, %v1744_v36, %v1753_v35 }
 0x1c3   : > { %v1352_v23 = vsel %vm1155_vm2, %v1342_v27, %v1351_v2  ;;  %v1543_v27 = vld [vmem:[#allocation2 + $0xe8] sm:$0xff] }
 0x1c4   : > { %v1792_v5 = vshrl.u32 %v1543_v27, 16 }
 0x1c6   : > { %4791 = vmatmul.mubr.bf16.gmra.mrb[156].mxu0 %v1307_v45  ;;  %v1759_v45 = vshll.u32 %v1539_v34, 16 }
 0x1c7   : > { %4798 = vmatprep.mubr.bf16.mxu0 %v1709_v33 }
 0x1c8   : > { %v1761_v3 = vrot.slane %v1759_v45, 4 }
 0x1c9   : > { %v4551_v28 = vpop.f32.mrb[84].mxu0 }
 0x1ca   : > { %v4553_v16 = vpop.f32.mrb[85].mxu0  ;;  %v1540_v28 = vld [vmem:[#allocation2 + $0xd0] sm:$0xff] }
 0x1cb   : > { %v4554_v14 = vpop.f32.mrb[86].mxu0  ;;  %v1360_v16 = vor.u32 %v1359_v41, %v1356_v46  ;;  %v1768_v7 = vshll.u32 %v1540_v28, 16 }
 0x1cc   : > { %v4556_v58 = vpop.f32.mrb[87].mxu0  ;;  %v1762_v14 = vor.u32 %v1761_v3, %v1758_v63 }
 0x1cd   : > { %v1361_v15 = vsel %vm1155_vm2, %v1351_v2, %v1360_v16  ;;  %v1365_v58 = vrot.slane %v1738_v17, 4  ;;  %v1770_v32 = vrot.slane %v1768_v7, 4  ;;  %v1776_v17 = vrot.slane %v1774_v25, 3 }
 0x1ce   : > { %4799 = vmatmul.mubr.bf16.gmra.mrb[64].mxu0 %v1316_v8  ;;  %v1765_v8 = vshrl.u32 %v1540_v28, 16  ;;  %v1763_v29 = vsel %vm565_vm1, %v1753_v35, %v1762_v14  ;;  %v1395_v34 = vrot.slane %v1768_v7, 5 }
 0x1cf   : > { %4806 = vmatprep.mubr.bf16.mxu0 %v1718_v50  ;;  %v1368_v50 = vrot.slane %v1741_v30, 5 }
 0x1d0   : > { %v1767_v20 = vrot.slane %v1765_v8, 3  ;;  %v1392_v6 = vrot.slane %v1765_v8, 4 }
 0x1d1   : > { %v1369_v22 = vor.u32 %v1368_v50, %v1365_v58 }
 0x1d2   : > { %v1771_v10 = vor.u32 %v1770_v32, %v1767_v20 }
 0x1d3   : > { %v1370_v37 = vsel %vm1155_vm2, %v1360_v16, %v1369_v22  ;;  %v1545_v16 = vld [vmem:[#allocation2 + $0xf8] sm:$0xff] }
 0x1d4   : > { %v1772_v13 = vsel %vm565_vm1, %v1762_v14, %v1771_v10  ;;  %v1810_v7 = vshrl.u32 %v1545_v16, 16 }
 0x1d6   : > { %4807 = vmatmul.mubr.bf16.gmra.mrb[160].mxu0 %v1325_v4  ;;  %v1777_v4 = vshll.u32 %v1541_v53, 16 }
 0x1d7   : > { %4814 = vmatprep.mubr.bf16.mxu0 %v1727_v31 }
 0x1d8   : > { %v1779_v30 = vrot.slane %v1777_v4, 4 }
 0x1d9   : > { %v4567_v11 = vpop.f32.mrb[92].mxu0 }
 0x1da   : > { %v4569_v47 = vpop.f32.mrb[93].mxu0  ;;  %v1542_v11 = vld [vmem:[#allocation2 + $0xe0] sm:$0xff] }
 0x1db   : > { %v4570_v49 = vpop.f32.mrb[94].mxu0  ;;  %v1378_v47 = vor.u32 %v1377_v43, %v1374_v48  ;;  %v1786_v59 = vshll.u32 %v1542_v11, 16 }
 0x1dc   : > { %v4572_v54 = vpop.f32.mrb[95].mxu0  ;;  %v1780_v49 = vor.u32 %v1779_v30, %v1776_v17 }
 0x1dd   : > { %v1379_v44 = vsel %vm1155_vm2, %v1369_v22, %v1378_v47  ;;  %v1383_v54 = vrot.slane %v1756_v39, 4  ;;  %v1788_v9 = vrot.slane %v1786_v59, 4  ;;  %v1794_v39 = vrot.slane %v1792_v5, 3 }
 0x1de   : > { %4815 = vmatmul.mubr.bf16.gmra.mrb[72].mxu0 %v1334_v61  ;;  %v1783_v61 = vshrl.u32 %v1542_v11, 16  ;;  %v1781_v56 = vsel %vm565_vm1, %v1771_v10, %v1780_v49  ;;  %v1413_v53 = vrot.slane %v1786_v59, 5  ;;  %v1831_v59 = vshll.u32 %v13889_v51, 16 }
 0x1df   : > { %4822 = vmatprep.mubr.bf16.mxu0 %v1736_v40  ;;  %v1386_v40 = vrot.slane %v1759_v45, 5 }
 0x1e0   : > { %v1785_v62 = vrot.slane %v1783_v61, 3  ;;  %v1410_v32 = vrot.slane %v1783_v61, 4  ;;  %v1828_v61 = vshrl.u32 %v13889_v51, 16 }
 0x1e1   : > { %v1387_v36 = vor.u32 %v1386_v40, %v1383_v54 }
 0x1e2   : > { %v1789_v57 = vor.u32 %v1788_v9, %v1785_v62 }
 0x1e3   : > { %v1388_v21 = vsel %vm1155_vm2, %v1378_v47, %v1387_v36 }
 0x1e4   : > { %v1790_v35 = vsel %vm565_vm1, %v1780_v49, %v1789_v57 }
 0x1e6   : > { %4823 = vmatmul.mubr.bf16.gmra.mrb[164].mxu0 %v1343_v26  ;;  %v1795_v26 = vshll.u32 %v1543_v27, 16 }
 0x1e7   : > { %4830 = vmatprep.mubr.bf16.mxu0 %v1745_v12 }
 0x1e8   : > { %v1797_v45 = vrot.slane %v1795_v26, 4 }
 0x1e9   : > { %v4583_v42 = vpop.f32.mrb[100].mxu0 }
 0x1ea   : > { %v4585_v38 = vpop.f32.mrb[101].mxu0  ;;  %v1544_v42 = vld [vmem:[#allocation2 + $0xf0] sm:$0xff] }
 0x1eb   : > { %v4586_v33 = vpop.f32.mrb[102].mxu0  ;;  %v1396_v38 = vor.u32 %v1395_v34, %v1392_v6  ;;  %v1804_v46 = vshll.u32 %v1544_v42, 16  ;;  %v1437_v6 = vrot.slane %v1810_v7, 4 }
 0x1ec   : > { %v4588_v55 = vpop.f32.mrb[103].mxu0  ;;  %v1798_v33 = vor.u32 %v1797_v45, %v1794_v39  ;;  %v1154_v45 = vld [vmem:[#allocation2 + $0x100] sm:$0x1f] }
 0x1ed   : > { %v1397_v41 = vsel %vm1155_vm2, %v1387_v36, %v1396_v38  ;;  %v1401_v55 = vrot.slane %v1774_v25, 4  ;;  %v1806_v28 = vrot.slane %v1804_v46, 4  ;;  %v1812_v25 = vrot.slane %v1810_v7, 3 }
 0x1ee   : > { %4831 = vmatmul.mubr.bf16.gmra.mrb[80].mxu0 %v1352_v23  ;;  %v1801_v23 = vshrl.u32 %v1544_v42, 16  ;;  %v1799_v63 = vsel %vm565_vm1, %v1789_v57, %v1798_v33  ;;  %v1830_v57 = vrot.slane %v1828_v61, 3  ;;  %v2104_v42 = vld [vmem:[#allocation2 + $0x10] sm:$0xf0] }
 0x1ef   : > { %4838 = vmatprep.mubr.bf16.mxu0 %v1754_v52  ;;  %v1404_v52 = vrot.slane %v1777_v4, 5 }
 0x1f0   : > { %v1803_v3 = vrot.slane %v1801_v23, 3  ;;  %v1428_v40 = vrot.slane %v1801_v23, 4 }
 0x1f1   : > { %v1405_v14 = vor.u32 %v1404_v52, %v1401_v55  ;;  %v2138_v55 = vshrl.u32 %v2104_v42, 16  ;;  %v2141_v52 = vshll.u32 %v2104_v42, 16 }
 0x1f2   : > { %v1807_v8 = vor.u32 %v1806_v28, %v1803_v3 }
 0x1f3   : > { %v1406_v20 = vsel %vm1155_vm2, %v1396_v38, %v1405_v14  ;;  %v13931_v38 = vld [vmem:[#allocation2 + $0x18] sm:$0xff] }
 0x1f4   : > { %v1808_v10 = vsel %vm565_vm1, %v1798_v33, %v1807_v8  ;;  %v2149_v3 = vshll.u32 %v13931_v38, 16 }
 0x1f6   : > { %4839 = vmatmul.mubr.bf16.gmra.mrb[168].mxu0 %v1361_v15  ;;  %v1813_v15 = vshll.u32 %v1545_v16, 16 }
 0x1f7   : > { %4846 = vmatprep.mubr.bf16.mxu0 %v1763_v29 }
 0x1f8   : > { %v1815_v4 = vrot.slane %v1813_v15, 4  ;;  %v1440_v34 = vrot.slane %v1813_v15, 5 }
 0x1f9   : > { %v4599_v19 = vpop.f32.mrb[108].mxu0 }
 0x1fa   : > { %v4601_v1 = vpop.f32.mrb[109].mxu0  ;;  %v1546_v19 = vld [vmem:[#allocation2 + $0x100] sm:$0xff]  ;;  %v1441_v33 = vor.u32 %v1440_v34, %v1437_v6 }
 0x1fb   : > { %v4602_v31 = vpop.f32.mrb[110].mxu0  ;;  %v1414_v1 = vor.u32 %v1413_v53, %v1410_v32  ;;  %v1822_v48 = vshll.u32 %v1546_v19, 16  ;;  %v2151_v53 = vrot.slane %v2149_v3, 5 }
 0x1fc   : > { %v4604_v24 = vpop.f32.mrb[111].mxu0  ;;  %v1816_v31 = vor.u32 %v1815_v4, %v1812_v25 }
 0x1fd   : > { %v1415_v43 = vsel %vm1155_vm2, %v1405_v14, %v1414_v1  ;;  %v1419_v24 = vrot.slane %v1792_v5, 4  ;;  %v1824_v11 = vrot.slane %v1822_v48, 4  ;;  %v1833_v5 = vrot.slane %v1831_v59, 4  ;;  %v1909_v48 = vld [vmem:[#allocation2 + $0x10] sm:$0xf0] }
 0x1fe   : > { %4847 = vmatmul.mubr.bf16.gmra.mrb[88].mxu0 %v1370_v37  ;;  %v1819_v37 = vshrl.u32 %v1546_v19, 16  ;;  %v1817_v17 = vsel %vm565_vm1, %v1807_v8, %v1816_v31 }
 0x1ff   : > { %4854 = vmatprep.mubr.bf16.mxu0 %v1772_v13  ;;  %v1422_v13 = vrot.slane %v1795_v26, 5  ;;  %v1548_v26 = vld [vmem:[#allocation2 + $0x110] sm:$0xf] }
 0x200   : > { %v1821_v30 = vrot.slane %v1819_v37, 3 }
 0x201   : > { %v1423_v47 = vor.u32 %v1422_v13, %v1419_v24  ;;  %v13939_v13 = vld [vmem:[#allocation2 + $0x28] sm:$0xff] }
 0x202   : > { %v1825_v49 = vor.u32 %v1824_v11, %v1821_v30  ;;  %v1976_v30 = vrot.slane %v13931_v38, 4 }
 0x203   : > { %v1424_v9 = vsel %vm1155_vm2, %v1414_v1, %v1423_v47 }
 0x204   : > { %v1826_v36 = vsel %vm565_vm1, %v1816_v31, %v1825_v49 }
 0x206   : > { %4855 = vmatmul.mubr.bf16.gmra.mrb[172].mxu0 %v1379_v44 }
 0x207   : > { %4862 = vmatprep.mubr.bf16.mxu0 %v1781_v56  ;;  %v1431_v56 = vrot.slane %v1804_v46, 5  ;;  %v1444_v46 = vshrl.u32 %v1154_v45, 16 }
 0x209   : > { %v4615_v18 = vpop.f32.mrb[116].mxu0  ;;  %v1446_v15 = vrot.slane %v1444_v46, 4 }
 0x20a   : > { %v4617_v60 = vpop.f32.mrb[117].mxu0  ;;  %v1432_v18 = vor.u32 %v1431_v56, %v1428_v40  ;;  %v13055_v40 = vld [vmem:[%s16380_s1 + $0x180] sm:$0xff]  }
 0x20b   : > { %v4618_v12 = vpop.f32.mrb[118].mxu0  ;;  %v1837_v60 = vshrl.u32 %v1548_v26, 16 }
 0x20c   : > { %v4620_v2 = vpop.f32.mrb[119].mxu0  ;;  %v1840_v12 = vshll.u32 %v1548_v26, 16  ;;  %v1433_v51 = vsel %vm1155_vm2, %v1423_v47, %v1432_v18  ;;  %v1442_v8 = vsel %vm1155_vm2, %v1432_v18, %v1441_v33  ;;  %v2164_v47 = vshrl.u32 %v13939_v13, 16 }
 0x20d   : > { %v1839_v2 = vrot.slane %v1837_v60, 3 }
 0x20e   : > { %4863 = vmatmul.mubr.bf16.gmra.mrb[96].mxu0 %v1388_v21  ;;  %v1834_v21 = vor.u32 %v1833_v5, %v1830_v57  ;;  %v13056_v5 = vld [vmem:[%s16380_s1 + $0x188] sm:$0xff]  }
 0x20f   : > { %4870 = vmatprep.mubr.bf16.mxu0 %v1790_v35  ;;  %v1842_v35 = vrot.slane %v1840_v12, 4 }
 0x210   : > { %v1835_v39 = vsel %vm565_vm1, %v1825_v49, %v1834_v21  ;;  %v2167_v49 = vshll.u32 %v13939_v13, 16 }
 0x211   : > { %v1843_v23 = vor.u32 %v1842_v35, %v1839_v2  ;;  %v13963_v2 = vld [vmem:[#allocation2 + $0x38] sm:$0xff]  ;;  %v1980_v35 = vrot.slane %v13939_v13, 4 }
 0x212   : > { %v2182_v42 = vshrl.u32 %v13963_v2, 16 }
 0x213   : > { %v1844_v7 = vsel %vm565_vm1, %v1834_v21, %v1843_v23  ;;  %v13057_v21 = vld [vmem:[%s16380_s1 + $0x190] sm:$0xff]  }
 0x214   : > { %v2184_v3 = vrot.slane %v2182_v42, 4 }
 0x216   : > { %4871 = vmatmul.mubr.bf16.gmra.mrb[176].mxu0 %v1397_v41  ;;  %v1447_v41 = vshll.u32 %v1154_v45, 16 }
 0x217   : > { %4878 = vmatprep.mubr.bf16.mxu0 %v1799_v63  ;;  %v2146_v63 = vshrl.u32 %v13931_v38, 16  ;;  %v2185_v38 = vshll.u32 %v13963_v2, 16 }
 0x219   : > { %v4631_v58 = vpop.f32.mrb[124].mxu0  ;;  %v2148_v32 = vrot.slane %v2146_v63, 4 }
 0x21a   : > { %v4633_v50 = vpop.f32.mrb[125].mxu0  ;;  %v1449_v58 = vrot.slane %v1447_v41, 5 }
 0x21b   : > { %v4634_v29 = vpop.f32.mrb[126].mxu0  ;;  %v2152_v4 = vor.u32 %v2151_v53, %v2148_v32 }
 0x21c   : > { %v4636_v22 = vpop.f32.mrb[127].mxu0  ;;  %v2140_v29 = vrot.slane %v2138_v55, 4  ;;  %v13059_v55 = vld [vmem:[%s16380_s1 + $0x1a0] sm:$0xff]  }
 0x21d   : > { %v2106_v22 = vld [vmem:[#allocation2 + $0x20] sm:$0xff] }
 0x21e   : > { %4879 = vmatmul.mubr.bf16.gmra.mrb[104].mxu0 %v1406_v20  ;;  %v2143_v20 = vrot.slane %v2141_v52, 5  ;;  %v2155_v19 = vshrl.u32 %v2106_v22, 16  ;;  %v2158_v1 = vshll.u32 %v2106_v22, 16  ;;  %v1978_v57 = vrot.slane %v2106_v22, 4  ;;  %v13993_v22 = vld [vmem:[#allocation2 + $0x48] sm:$0xff] }
 0x21f   : > { %4886 = vmatprep.mubr.bf16.mxu0 %v1808_v10  ;;  %v1450_v10 = vor.u32 %v1449_v58, %v1446_v15 }
 0x220   : > { %v2144_v25 = vor.u32 %v2143_v20, %v2140_v29  ;;  %v2160_v24 = vrot.slane %v2158_v1, 5  ;;  %v1979_v12 = vsel %vm992_vm0, %v1976_v30, %v1978_v57  ;;  %v1981_v41 = vsel %vm992_vm0, %v1978_v57, %v1980_v35  ;;  %v13061_v29 = vld [vmem:[%s16380_s1 + $0x1b0] sm:$0xff]  }
 0x221   : > { %v1451_v31 = vsel %vm1155_vm2, %v1441_v33, %v1450_v10  ;;  %v1984_v10 = vrot.slane %v13963_v2, 4  ;;  %v2203_v1 = vshll.u32 %v13993_v22, 16  ;;  %v1988_v57 = vrot.slane %v13993_v22, 4 }
 0x222   : > { %v2153_v37 = vsel %vm1155_vm2, %v2144_v25, %v2152_v4  ;;  %v13062_v25 = vld [vmem:[%s16380_s1 + $0x1b8] sm:$0xff]  }
 0x226   : > { %4887 = vmatmul.mubr.bf16.gmra.mrb[180].mxu0 %v1415_v43  ;;  %v2157_v43 = vrot.slane %v2155_v19, 4  ;;  %v2200_v19 = vshrl.u32 %v13993_v22, 16  ;;  %v13067_v22 = vld [vmem:[%s16380_s1 + $0x1e0] sm:$0xff]  }
 0x227   : > { %4894 = vmatprep.mubr.bf16.mxu0 %v1817_v17  ;;  %v1975_v17 = vrot.slane %v1909_v48, 4 }
 0x228   : > { %v2161_v11 = vor.u32 %v2160_v24, %v2157_v43  ;;  %v13063_v24 = vld [vmem:[%s16380_s1 + $0x1c0] sm:$0xff]  }
 0x229   : > { %v4680_v44 = vpop.f32.mrb[128].mxu0 }
 0x22a   : > { %v4682_v54 = vpop.f32.mrb[129].mxu0 }
 0x22b   : > { %v4683_v62 = vpop.f32.mrb[130].mxu0  ;;  %v1977_v54 = vsel %vm992_vm0, %v1975_v17, %v1976_v30  ;;  %v2202_v30 = vrot.slane %v2200_v19, 4 }
 0x22c   : > { %v4685_v27 = vpop.f32.mrb[131].mxu0  ;;  %v2162_v62 = vsel %vm1155_vm2, %v2152_v4, %v2161_v11 }
 0x22d   : > { %v2169_v27 = vrot.slane %v2167_v49, 5 }
 0x22e   : > { %4895 = vmatmul.mubr.bf16.gmra.mrb[112].mxu0 %v1424_v9  ;;  %v2166_v9 = vrot.slane %v2164_v47, 4  ;;  %v2112_v47 = vld [vmem:[#allocation2 + $0x50] sm:$0xff] }
 0x22f   : > { %4902 = vmatprep.mubr.bf16.mxu0 %v1826_v36  ;;  %v13949_v36 = vld [vmem:[#allocation2 + $0x30] sm:$0xff]  ;;  %v1990_v42 = vrot.slane %v2112_v47, 4 }
 0x230   : > { %v2170_v26 = vor.u32 %v2169_v27, %v2166_v9  ;;  %v2173_v18 = vshrl.u32 %v13949_v36, 16  ;;  %v2176_v60 = vshll.u32 %v13949_v36, 16 }
 0x232   : > { %v2175_v6 = vrot.slane %v2173_v18, 4  ;;  %v2178_v34 = vrot.slane %v2176_v60, 5 }
 0x234   : > { %v2179_v45 = vor.u32 %v2178_v34, %v2175_v6 }
 0x236   : > { %4903 = vmatmul.mubr.bf16.gmra.mrb[184].mxu0 %v1433_v51  ;;  %v2171_v51 = vsel %vm1155_vm2, %v2161_v11, %v2170_v26  ;;  %v2180_v63 = vsel %vm1155_vm2, %v2170_v26, %v2179_v45  ;;  %v2205_v11 = vrot.slane %v2203_v1, 5 }
 0x237   : > { %4910 = vmatprep.mubr.bf16.mxu0 %v1835_v39  ;;  %v13058_v39 = vld [vmem:[%s16380_s1 + $0x198] sm:$0xff]  }
 0x239   : > { %v4696_v28 = vpop.f32.mrb[132].mxu0 }
 0x23a   : > { %v4698_v16 = vpop.f32.mrb[133].mxu0  ;;  %v2187_v28 = vrot.slane %v2185_v38, 5 }
 0x23b   : > { %v4699_v14 = vpop.f32.mrb[134].mxu0  ;;  %v13978_v16 = vld [vmem:[#allocation2 + $0x40] sm:$0xff] }
 0x23c   : > { %v4701_v50 = vpop.f32.mrb[135].mxu0  ;;  %v1982_v14 = vrot.slane %v13949_v36, 4  ;;  %v2191_v15 = vshrl.u32 %v13978_v16, 16  ;;  %v2194_v58 = vshll.u32 %v13978_v16, 16  ;;  %v1986_v49 = vrot.slane %v13978_v16, 4  ;;  %v2113_v36 = vld [vmem:[#allocation2 + $0x58] sm:$0xff] }
 0x23d   : > { %v2218_v26 = vshrl.u32 %v2113_v36, 16  ;;  %v2221_v18 = vshll.u32 %v2113_v36, 16 }
 0x23e   : > { %4911 = vmatmul.mubr.bf16.gmra.mrb[120].mxu0 %v1442_v8  ;;  %v13060_v8 = vld [vmem:[%s16380_s1 + $0x1a8] sm:$0xff]   ;;  %v1983_v50 = vsel %vm992_vm0, %v1980_v35, %v1982_v14  ;;  %v2193_v32 = vrot.slane %v2191_v15, 4  ;;  %v2196_v53 = vrot.slane %v2194_v58, 5  ;;  %v1985_v43 = vsel %vm992_vm0, %v1982_v14, %v1984_v10 }
 0x23f   : > { %4918 = vmatprep.mubr.bf16.mxu0 %v1844_v7  ;;  %v2188_v7 = vor.u32 %v2187_v28, %v2184_v3  ;;  %v2220_v2 = vrot.slane %v2218_v26, 4  ;;  %v2223_v35 = vrot.slane %v2221_v18, 5  ;;  %v1992_v3 = vrot.slane %v2113_v36, 4 }
 0x240   : > { %v2197_v4 = vor.u32 %v2196_v53, %v2193_v32  ;;  %v2116_v53 = vld [vmem:[#allocation2 + $0x70] sm:$0xff] }
 0x241   : > { %v2189_v20 = vsel %vm1155_vm2, %v2179_v45, %v2188_v7  ;;  %v13066_v45 = vld [vmem:[%s16380_s1 + $0x1d8] sm:$0xff]   ;;  %v2224_v38 = vor.u32 %v2223_v35, %v2220_v2  ;;  %v1993_v58 = vsel %vm992_vm0, %v1990_v42, %v1992_v3  ;;  %v2248_v19 = vshll.u32 %v2116_v53, 16 }
 0x242   : > { %v2198_v17 = vsel %vm1155_vm2, %v2188_v7, %v2197_v4 }
 0x246   : > { %4919 = vmatmul.mubr.bf16.gmra.mrb[188].mxu0 %v1451_v31 }
 0x247   : > { %4959 = vmatprep.mubr.bf16.mxu0 %v2153_v37 }
 0x249   : > { %v4712_v61 = vpop.f32.mrb[136].mxu0 }
 0x24a   : > { %v4714_v59 = vpop.f32.mrb[137].mxu0  ;;  %v13064_v61 = vld [vmem:[%s16380_s1 + $0x1c8] sm:$0xff]  }
 0x24b   : > { %v4715_v44 = vpop.f32.mrb[138].mxu0  ;;  %v2206_v59 = vor.u32 %v2205_v11, %v2202_v30 }
 0x24c   : > { %v4717_v56 = vpop.f32.mrb[139].mxu0  ;;  %v2209_v44 = vshrl.u32 %v2112_v47, 16 }
 0x24d   : > { %v13065_v56 = vld [vmem:[%s16380_s1 + $0x1d0] sm:$0xff]  }
 0x24e   : > { %4960 = vmatmul.mubr.bf16.vlgmr.msra.gmra.mrb[0].mxu0 %v1977_v54  ;;  %v2212_v54 = vshll.u32 %v2112_v47, 16  ;;  %v2211_v9 = vrot.slane %v2209_v44, 4 }
 0x24f   : > { %5217 = vmatpush1.bf16.msra.mxu0 %v13055_v40  ;;  %4967 = vmatprep.mubr.bf16.mxu0 %v2162_v62  ;;  %v1987_v40 = vsel %vm992_vm0, %v1984_v10, %v1986_v49  ;;  %v2207_v62 = vsel %vm1155_vm2, %v2197_v4, %v2206_v59  ;;  %v2245_v4 = vshrl.u32 %v2116_v53, 16 }
 0x250   : > { %5218 = vmatprep.subr.bf16.mxu0 %v13843_v0  ;;  %v2214_v27 = vrot.slane %v2212_v54, 5 }
 0x253   : > { %5219 = vmatpush1.bf16.msra.mxu0 %v13056_v5  ;;  %v2215_v5 = vor.u32 %v2214_v27, %v2211_v9  ;;  %v1998_v9 = vrot.slane %v2116_v53, 4 }
 0x254   : > { %5220 = vmatprep.subr.bf16.mxu0 %v13843_v0 }
 0x255   : > { %v2216_v34 = vsel %vm1155_vm2, %v2206_v59, %v2215_v5 }
 0x256   : > { %4968 = vmatmul.mubr.bf16.gmra.mrb[192].mxu0 %v1979_v12 }
 0x257   : > { %4975 = vmatprep.mubr.bf16.mxu0 %v2171_v51  ;;  %5221 = vmatpush1.bf16.msra.mxu0 %v13057_v21  ;;  %v1989_v51 = vsel %vm992_vm0, %v1986_v49, %v1988_v57 }
 0x258   : > { %5222 = vmatprep.subr.bf16.mxu0 %v13843_v0 }
 0x259   : > { %v4728_v33 = vpop.f32.mrb[140].mxu0 }
 0x25a   : > { %v4730_v23 = vpop.f32.mrb[141].mxu0 }
 0x25b   : > { %v4731_v46 = vpop.f32.mrb[142].mxu0  ;;  %5223 = vmatpush1.bf16.msra.mxu0 %v13058_v39  ;;  %v2114_v39 = vld [vmem:[#allocation2 + $0x60] sm:$0xff] }
 0x25c   : > { %v4733_v52 = vpop.f32.mrb[143].mxu0  ;;  %5224 = vmatprep.subr.bf16.mxu0 %v13843_v0  ;;  %v2230_v33 = vshll.u32 %v2114_v39, 16  ;;  %v14026_v23 = vld [vmem:[#allocation2] sm:$0xff]  ;;  %v1991_v46 = vsel %vm992_vm0, %v1988_v57, %v1990_v42  ;;  %v1994_v10 = vrot.slane %v2114_v39, 4 }
 0x25d   : > { %v13069_v42 = vld [vmem:[%s16380_s1 + $0x200] sm:$0xff]  }
 0x25e   : > { %4976 = vmatmul.mubr.bf16.gmra.mrb[8].mxu0 %v1981_v41  ;;  %v2225_v41 = vsel %vm1155_vm2, %v2215_v5, %v2224_v38  ;;  %v2232_v52 = vrot.slane %v2230_v33, 5  ;;  %v1995_v1 = vsel %vm992_vm0, %v1992_v3, %v1994_v10  ;;  %12340 = vmatprep.subr.bf16.mxu1 %v13069_v42 }
 0x25f   : > { %4983 = vmatprep.mubr.bf16.mxu0 %v2180_v63  ;;  %5225 = vmatpush1.bf16.msra.mxu0 %v13059_v55  ;;  %v2115_v63 = vld [vmem:[#allocation2 + $0x68] sm:$0xff] }
 0x260   : > { %5226 = vmatprep.subr.bf16.mxu0 %v13843_v0  ;;  %v2236_v16 = vshrl.u32 %v2115_v63, 16  ;;  %v2239_v14 = vshll.u32 %v2115_v63, 16  ;;  %12341 = vmatpush3.bf16.msra.mxu1 %v13069_v42 }
 0x262   : > { %v2241_v32 = vrot.slane %v2239_v14, 5 }
 0x263   : > { %5227 = vmatpush1.bf16.msra.mxu0 %v13060_v8 }
 0x264   : > { %5228 = vmatprep.subr.bf16.mxu0 %v13843_v0 }
 0x266   : > { %4984 = vmatmul.mubr.bf16.gmra.mrb[196].mxu0 %v1983_v50 }
 0x267   : > { %4991 = vmatprep.mubr.bf16.mxu0 %v2189_v20  ;;  %5229 = vmatpush1.bf16.msra.mxu0 %v13061_v29  ;;  %v2238_v20 = vrot.slane %v2236_v16, 4 }
 0x268   : > { %5230 = vmatprep.subr.bf16.mxu0 %v13843_v0 }
 0x269   : > { %v4744_v31 = vpop.f32.mrb[144].mxu0 }
 0x26a   : > { %v4746_v37 = vpop.f32.mrb[145].mxu0 }
 0x26b   : > { %v4747_v48 = vpop.f32.mrb[146].mxu0  ;;  %5231 = vmatpush1.bf16.msra.mxu0 %v13062_v25  ;;  %v2242_v25 = vor.u32 %v2241_v32, %v2238_v20  ;;  %v2247_v37 = vrot.slane %v2245_v4, 4  ;;  %v13073_v20 = vld [vmem:[%s16380_s1 + $0x218] sm:$0xff]  }
 0x26c   : > { %v4749_v13 = vpop.f32.mrb[147].mxu0  ;;  %5232 = vmatprep.subr.bf16.mxu0 %v13843_v0  ;;  %v2250_v48 = vrot.slane %v2248_v19, 5 }
 0x26e   : > { %4992 = vmatmul.mubr.bf16.gmra.mrb[16].mxu0 %v1985_v43  ;;  %v2117_v43 = vld [vmem:[#allocation2 + $0x78] sm:$0xff]  ;;  %v2251_v13 = vor.u32 %v2250_v48, %v2247_v37 }
 0x26f   : > { %4999 = vmatprep.mubr.bf16.mxu0 %v2198_v17  ;;  %5233 = vmatpush1.bf16.msra.mxu0 %v13063_v24  ;;  %v1996_v24 = vrot.slane %v2115_v63, 4  ;;  %v2254_v17 = vshrl.u32 %v2117_v43, 16  ;;  %v2257_v30 = vshll.u32 %v2117_v43, 16 }
 0x270   : > { %5234 = vmatprep.subr.bf16.mxu0 %v13843_v0  ;;  %v2252_v44 = vsel %vm1155_vm2, %v2242_v25, %v2251_v13 }
 0x271   : > { %v2256_v54 = vrot.slane %v2254_v17, 4  ;;  %v1999_v5 = vsel %vm992_vm0, %v1996_v24, %v1998_v9 }
 0x273   : > { %5235 = vmatpush1.bf16.msra.mxu0 %v13064_v61  ;;  %v1997_v61 = vsel %vm992_vm0, %v1994_v10, %v1996_v24 }
 0x274   : > { %5236 = vmatprep.subr.bf16.mxu0 %v13843_v0 }
 0x276   : > { %5000 = vmatmul.mubr.bf16.gmra.mrb[200].mxu0 %v1987_v40  ;;  %v2259_v40 = vrot.slane %v2257_v30, 5  ;;  %v13075_v30 = vld [vmem:[%s16380_s1 + $0x1f8] sm:$0xff]  }
 0x277   : > { %5007 = vmatprep.mubr.bf16.mxu0 %v2207_v62  ;;  %5237 = vmatpush1.bf16.msra.mxu0 %v13065_v56  ;;  %v14041_v56 = vld [vmem:[#allocation2 + $0x80] sm:$0xff]  ;;  %v13068_v62 = vld [vmem:[%s16380_s1 + $0x1e8] sm:$0xff]  }
 0x278   : > { %5238 = vmatprep.subr.bf16.mxu0 %v13843_v0  ;;  %v2227_v0 = vshrl.u32 %v2114_v39, 16  ;;  %v2260_v27 = vor.u32 %v2259_v40, %v2256_v54  ;;  %v2263_v36 = vshrl.u32 %v14041_v56, 16  ;;  %v2266_v57 = vshll.u32 %v14041_v56, 16  ;;  %v13077_v54 = vld [vmem:[%s16380_s1 + $0x230] sm:$0xff]  }
 0x279   : > { %v4760_v60 = vpop.f32.mrb[148].mxu0  ;;  %v2002_v63 = vrot.slane %v14041_v56, 4  ;;  %v14106_v56 = vld [vmem:[#allocation2 + $0x28] sm:$0xff] }
 0x27a   : > { %v4762_v12 = vpop.f32.mrb[149].mxu0  ;;  %v2229_v55 = vrot.slane %v2227_v0, 4  ;;  %v2261_v26 = vsel %vm1155_vm2, %v2251_v13, %v2260_v27  ;;  %v2265_v18 = vrot.slane %v2263_v36, 4  ;;  %v2268_v60 = vrot.slane %v2266_v57, 5 }
 0x27b   : > { %v4763_v21 = vpop.f32.mrb[150].mxu0  ;;  %5239 = vmatpush1.bf16.msra.mxu0 %v13066_v45  ;;  %v14051_v12 = vld [vmem:[#allocation2 + $0x88] sm:$0xff]  ;;  %v3127_v57 = vshrl.u32 %v14106_v56, 16 }
 0x27c   : > { %v4765_v6 = vpop.f32.mrb[151].mxu0  ;;  %5240 = vmatprep.subr.bf16.mxu0 %v14026_v23  ;;  %v2233_v28 = vor.u32 %v2232_v52, %v2229_v55  ;;  %v2000_v21 = vrot.slane %v2117_v43, 4  ;;  %v13070_v55 = vld [vmem:[%s16380_s1 + $0x1f0] sm:$0xff]   ;;  %v13071_v52 = vld [vmem:[%s16380_s1 + $0x208] sm:$0xff]  }
 0x27d   : > { %v2272_v6 = vshrl.u32 %v14051_v12, 16  ;;  %12342 = vmatprep.subr.bf16.mxu1 %v13071_v52 }
 0x27e   : > { %5008 = vmatmul.mubr.bf16.gmra.mrb[24].mxu0 %v1989_v51  ;;  %v2234_v29 = vsel %vm1155_vm2, %v2224_v38, %v2233_v28  ;;  %v2243_v31 = vsel %vm1155_vm2, %v2233_v28, %v2242_v25  ;;  %v2269_v51 = vor.u32 %v2268_v60, %v2265_v18  ;;  %v2001_v45 = vsel %vm992_vm0, %v1998_v9, %v2000_v21  ;;  %v14108_v9 = vld [vmem:[#allocation2 + $0xa8] sm:$0xff] }
 0x27f   : > { %5015 = vmatprep.mubr.bf16.mxu0 %v2216_v34  ;;  %5241 = vmatpush1.bf16.msra.mxu0 %v13067_v22  ;;  %v2275_v34 = vshll.u32 %v14051_v12, 16  ;;  %v2274_v33 = vrot.slane %v2272_v6, 4  ;;  %v2003_v14 = vsel %vm992_vm0, %v2000_v21, %v2002_v63 }
 0x280   : > { %5242 = vmatprep.subr.bf16.mxu0 %v14026_v23  ;;  %v2270_v0 = vsel %vm1155_vm2, %v2260_v27, %v2269_v51  ;;  %12343 = vmatpush3.bf16.msra.mxu1 %v13071_v52 }
 0x283   : > { %5243 = vmatpush1.bf16.msra.mxu0 %v13068_v62  ;;  %v3085_v62 = vld [vmem:[#allocation2 + $0x20] sm:$0xf0] }
 0x284   : > { %5244 = vmatprep.subr.bf16.mxu0 %v14026_v23  ;;  %v3119_v27 = vshrl.u32 %v3085_v62, 16  ;;  %v3122_v36 = vshll.u32 %v3085_v62, 16 }
 0x286   : > { %5016 = vmatmul.mubr.bf16.gmra.mrb[204].mxu0 %v1991_v46  ;;  %v2277_v46 = vrot.slane %v2275_v34, 5  ;;  %v3121_v6 = vrot.slane %v3119_v27, 4  ;;  %v3124_v34 = vrot.slane %v3122_v36, 5 }
 0x287   : > { %5023 = vmatprep.mubr.bf16.mxu0 %v2225_v41  ;;  %v14060_v41 = vld [vmem:[#allocation2 + $0x90] sm:$0xff]  ;;  %5245 = vmatpush1.bf16.msra.mxu0 %v13070_v55 }
 0x288   : > { %v2278_v3 = vor.u32 %v2277_v46, %v2274_v33  ;;  %v2281_v28 = vshrl.u32 %v14060_v41, 16  ;;  %v2284_v16 = vshll.u32 %v14060_v41, 16  ;;  %5246 = vmatprep.subr.bf16.mxu0 %v14026_v23  ;;  %v3125_v33 = vor.u32 %v3124_v34, %v3121_v6 }
 0x289   : > { %v4776_v8 = vpop.f32.mrb[152].mxu0 }
 0x28a   : > { %v4778_v7 = vpop.f32.mrb[153].mxu0  ;;  %v13072_v8 = vld [vmem:[%s16380_s1 + $0x210] sm:$0xff]  }
 0x28b   : > { %v4779_v15 = vpop.f32.mrb[154].mxu0  ;;  %v2279_v7 = vsel %vm1155_vm2, %v2269_v51, %v2278_v3  ;;  %12344 = vmatprep.subr.bf16.mxu1 %v13072_v8  ;;  %5247 = vmatpush1.bf16.msra.mxu0 %v13075_v30  ;;  %v13078_v51 = vld [vmem:[%s16380_s1 + $0x238] sm:$0xff]  }
 0x28c   : > { %v4781_v50 = vpop.f32.mrb[155].mxu0  ;;  %v2283_v15 = vrot.slane %v2281_v28, 4  ;;  %12345 = vmatpush3.bf16.msra.mxu1 %v13072_v8 }
 0x28d   : > { %v14077_v50 = vld [vmem:[#allocation2 + $0x98] sm:$0xff]  ;;  %12346 = vmatprep.subr.bf16.mxu1 %v13073_v20 }
 0x28e   : > { %5024 = vmatmul.mubr.bf16.gmra.mrb[32].mxu0 %v1993_v58  ;;  %v2286_v58 = vrot.slane %v2284_v16, 5  ;;  %v2290_v53 = vshrl.u32 %v14077_v50, 16  ;;  %v2293_v22 = vshll.u32 %v14077_v50, 16  ;;  %v2008_v18 = vrot.slane %v14077_v50, 4  ;;  %v14128_v50 = vld [vmem:[#allocation2 + $0xb0] sm:$0xff] }
 0x28f   : > { %5031 = vmatprep.mubr.bf16.mxu0 %v2234_v29  ;;  %v2004_v29 = vrot.slane %v14051_v12, 4 }
 0x290   : > { %v2287_v32 = vor.u32 %v2286_v58, %v2283_v15  ;;  %12347 = vmatpush3.bf16.msra.mxu1 %v13073_v20  ;;  %v2292_v43 = vrot.slane %v2290_v53, 4  ;;  %v2295_v24 = vrot.slane %v2293_v22, 5  ;;  %v2320_v53 = vshll.u32 %v14128_v50, 16 }
 0x291   : > { %v2005_v19 = vsel %vm992_vm0, %v2002_v63, %v2004_v29 }
 0x292   : > { %v2288_v48 = vsel %vm1155_vm2, %v2278_v3, %v2287_v32 }
 0x296   : > { %5032 = vmatmul.mubr.bf16.gmra.mrb[208].mxu0 %v1995_v1  ;;  %v14086_v1 = vld [vmem:[#allocation2 + $0xa0] sm:$0xff] }
 0x297   : > { %5039 = vmatprep.mubr.bf16.mxu0 %v2243_v31  ;;  %v13074_v31 = vld [vmem:[%s16380_s1 + $0x220] sm:$0xff]   ;;  %v2299_v13 = vshrl.u32 %v14086_v1, 16  ;;  %v2302_v17 = vshll.u32 %v14086_v1, 16  ;;  %v2010_v20 = vrot.slane %v14086_v1, 4 }
 0x298   : > { %12348 = vmatprep.subr.bf16.mxu1 %v13074_v31 }
 0x299   : > { %v4792_v11 = vpop.f32.mrb[156].mxu0  ;;  %12349 = vmatpush3.bf16.msra.mxu1 %v13074_v31  ;;  %v2322_v31 = vrot.slane %v2320_v53, 5  ;;  %v14178_v53 = vld [vmem:[#allocation2 + $0x50] sm:$0xff] }
 0x29a   : > { %v4794_v47 = vpop.f32.mrb[157].mxu0  ;;  %v13076_v11 = vld [vmem:[%s16380_s1 + $0x228] sm:$0xff]  }
 0x29b   : > { %v4795_v49 = vpop.f32.mrb[158].mxu0  ;;  %v2006_v47 = vrot.slane %v14060_v41, 4  ;;  %12350 = vmatprep.subr.bf16.mxu1 %v13076_v11  ;;  %v2541_v41 = vrot.slane %v3127_v57, 3 }
 0x29c   : > { %v4797_v59 = vpop.f32.mrb[159].mxu0  ;;  %v2296_v49 = vor.u32 %v2295_v24, %v2292_v43  ;;  %v2012_v43 = vrot.slane %v14108_v9, 4  ;;  %v14143_v24 = vld [vmem:[#allocation2 + $0x38] sm:$0xff] }
 0x29d   : > { %v2304_v59 = vrot.slane %v2302_v17, 5  ;;  %12351 = vmatpush3.bf16.msra.mxu1 %v13076_v11  ;;  %v2009_v3 = vsel %vm992_vm0, %v2006_v47, %v2008_v18  ;;  %v3145_v30 = vshrl.u32 %v14143_v24, 16  ;;  %v3148_v11 = vshll.u32 %v14143_v24, 16 }
 0x29e   : > { %5040 = vmatmul.mubr.bf16.gmra.mrb[40].mxu0 %v1997_v61  ;;  %v2301_v61 = vrot.slane %v2299_v13, 4  ;;  %v2297_v40 = vsel %vm1155_vm2, %v2287_v32, %v2296_v49  ;;  %12352 = vmatprep.subr.bf16.mxu1 %v13077_v54  ;;  %v2317_v32 = vshrl.u32 %v14128_v50, 16  ;;  %v2013_v36 = vsel %vm992_vm0, %v2010_v20, %v2012_v43 }
 0x29f   : > { %5047 = vmatprep.mubr.bf16.mxu0 %v2252_v44  ;;  %v2007_v44 = vsel %vm992_vm0, %v2004_v29, %v2006_v47  ;;  %v14148_v47 = vld [vmem:[#allocation2 + $0x40] sm:$0xff]  ;;  %v2559_v62 = vrot.slane %v3145_v30, 3 }
 0x2a0   : > { %v2305_v60 = vor.u32 %v2304_v59, %v2301_v61  ;;  %v3154_v61 = vshrl.u32 %v14148_v47, 16  ;;  %v3157_v59 = vshll.u32 %v14148_v47, 16 }
 0x2a1   : > { %12353 = vmatpush3.bf16.msra.mxu1 %v13077_v54  ;;  %v3147_v54 = vrot.slane %v3145_v30, 4 }
 0x2a2   : > { %12354 = vmatprep.subr.bf16.mxu1 %v13078_v51 }
 0x2a5   : > { %12355 = vmatpush3.bf16.msra.mxu1 %v13078_v51 }
 0x2a6   : > { %5048 = vmatmul.mubr.bf16.gmra.mrb[212].mxu0 %v1999_v5  ;;  %v3130_v5 = vshll.u32 %v14106_v56, 16  ;;  %9929 = vmatprep.subr.bf16.mxu1 %v14026_v23 }
 0x2a7   : > { %5055 = vmatprep.mubr.bf16.mxu0 %v2261_v26  ;;  %v14112_v26 = vld [vmem:[#allocation2 + $0x30] sm:$0xff] }
 0x2a8   : > { %v3136_v12 = vshrl.u32 %v14112_v26, 16  ;;  %v3139_v21 = vshll.u32 %v14112_v26, 16  ;;  %v2544_v55 = vrot.slane %v3130_v5, 4 }
 0x2a9   : > { %v4808_v2 = vpop.f32.mrb[160].mxu0 }
 0x2aa   : > { %v4810_v35 = vpop.f32.mrb[161].mxu0  ;;  %v3129_v2 = vrot.slane %v3127_v57, 4  ;;  %v3138_v42 = vrot.slane %v3136_v12, 4  ;;  %v14124_v16 = vor.u32 %v2544_v55, %v2541_v41  ;;  %v2550_v23 = vrot.slane %v3136_v12, 3 }
 0x2ab   : > { %v4811_v39 = vpop.f32.mrb[162].mxu0  ;;  %v3132_v35 = vrot.slane %v3130_v5, 5  ;;  %v2553_v22 = vrot.slane %v3139_v21, 4  ;;  %v3156_v57 = vrot.slane %v3154_v61, 4  ;;  %v3159_v5 = vrot.slane %v3157_v59, 5 }
 0x2ac   : > { %v4813_v38 = vpop.f32.mrb[163].mxu0  ;;  %v2308_v39 = vshrl.u32 %v14108_v9, 16 }
 0x2ad   : > { %v3141_v38 = vrot.slane %v3139_v21, 5  ;;  %v3133_v46 = vor.u32 %v3132_v35, %v3129_v2  ;;  %v14155_v2 = vld [vmem:[#allocation2 + $0xc0] sm:$0xff]  ;;  %v3160_v35 = vor.u32 %v3159_v5, %v3156_v57 }
 0x2ae   : > { %5056 = vmatmul.mubr.bf16.gmra.mrb[48].mxu0 %v2001_v45  ;;  %v2311_v45 = vshll.u32 %v14108_v9, 16  ;;  %v2310_v15 = vrot.slane %v2308_v39, 4  ;;  %v2562_v9 = vrot.slane %v3148_v11, 4  ;;  %v2568_v39 = vrot.slane %v3154_v61, 3 }
 0x2af   : > { %5063 = vmatprep.mubr.bf16.mxu0 %v2270_v0  ;;  %v3134_v28 = vsel %vm1155_vm2, %v3125_v33, %v3133_v46  ;;  %v2335_v41 = vshrl.u32 %v14155_v2, 16  ;;  %v2338_v55 = vshll.u32 %v14155_v2, 16 }
 0x2b0   : > { %v2313_v58 = vrot.slane %v2311_v45, 5  ;;  %12356 = vmatprep.mubr.bf16.mxu1 %v3134_v28  ;;  %v2563_v51 = vor.u32 %v2562_v9, %v2559_v62  ;;  %v2571_v45 = vrot.slane %v3157_v59, 4 }
 0x2b1   : > { %v2337_v28 = vrot.slane %v2335_v41, 4 }
 0x2b2   : > { %v2572_v33 = vor.u32 %v2571_v45, %v2568_v39 }
 0x2b6   : > { %5064 = vmatmul.mubr.bf16.gmra.mrb[216].mxu0 %v2003_v14  ;;  %v3142_v14 = vor.u32 %v3141_v38, %v3138_v42 }
 0x2b7   : > { %5071 = vmatprep.mubr.bf16.mxu0 %v2279_v7  ;;  %v2306_v7 = vsel %vm1155_vm2, %v2296_v49, %v2305_v60 }
 0x2b8   : > { %v3143_v29 = vsel %vm1155_vm2, %v3133_v46, %v3142_v14  ;;  %v2014_v46 = vrot.slane %v14128_v50, 4 }
 0x2b9   : > { %v4824_v10 = vpop.f32.mrb[164].mxu0  ;;  %12357 = vmatmul.mubr.bf16.vlgmr.msra.gmra.mrb[0].mxu1 %v3143_v29 }
 0x2ba   : > { %v4826_v25 = vpop.f32.mrb[165].mxu0  ;;  %v2314_v10 = vor.u32 %v2313_v58, %v2310_v15  ;;  %v14173_v58 = vld [vmem:[#allocation2 + $0x48] sm:$0xff] }
 0x2bb   : > { %v4827_v4 = vpop.f32.mrb[166].mxu0  ;;  %v2554_v25 = vor.u32 %v2553_v22, %v2550_v23  ;;  %v3172_v22 = vshrl.u32 %v14178_v53, 16 }
 0x2bc   : > { %v4829_v37 = vpop.f32.mrb[167].mxu0  ;;  %v2011_v4 = vsel %vm992_vm0, %v2008_v18, %v2010_v20  ;;  %v2315_v1 = vsel %vm1155_vm2, %v2305_v60, %v2314_v10  ;;  %v3163_v20 = vshrl.u32 %v14173_v58, 16 }
 0x2bd   : > { %v14137_v37 = vsel %vm565_vm1, %v14124_v16, %v2554_v25  ;;  %v14159_v38 = vsel %vm565_vm1, %v2554_v25, %v2563_v51  ;;  %v2586_v9 = vrot.slane %v3172_v22, 3 }
 0x2be   : > { %5072 = vmatmul.mubr.bf16.gmra.mrb[56].mxu0 %v2005_v19  ;;  %v2319_v19 = vrot.slane %v2317_v32, 4  ;;  %v3166_v32 = vshll.u32 %v14173_v58, 16 }
 0x2bf   : > { %5079 = vmatprep.mubr.bf16.mxu0 %v2288_v48  ;;  %v14140_v48 = vld [vmem:[#allocation2 + $0xb8] sm:$0xff] }
 0x2c0   : > { %v2323_v13 = vor.u32 %v2322_v31, %v2319_v19  ;;  %v2326_v17 = vshrl.u32 %v14140_v48, 16  ;;  %v2329_v49 = vshll.u32 %v14140_v48, 16  ;;  %v2016_v15 = vrot.slane %v14140_v48, 4 }
 0x2c1   : > { %v3168_v19 = vrot.slane %v3166_v32, 5  ;;  %v2577_v31 = vrot.slane %v3163_v20, 3 }
 0x2c2   : > { %v2324_v60 = vsel %vm1155_vm2, %v2314_v10, %v2323_v13  ;;  %v2328_v12 = vrot.slane %v2326_v17, 4  ;;  %v2331_v34 = vrot.slane %v2329_v49, 5  ;;  %v3175_v10 = vshll.u32 %v14178_v53, 16 }
 0x2c4   : > { %v3177_v17 = vrot.slane %v3175_v10, 5 }
 0x2c6   : > { %5080 = vmatmul.mubr.bf16.gmra.mrb[220].mxu0 %v2007_v44 }
 0x2c7   : > { %5087 = vmatprep.mubr.bf16.mxu0 %v2297_v40  ;;  %v3150_v40 = vrot.slane %v3148_v11, 5 }
 0x2c9   : > { %v4840_v0 = vpop.f32.mrb[168].mxu0  ;;  %v3151_v21 = vor.u32 %v3150_v40, %v3147_v54  ;;  %v14185_v40 = vld [vmem:[#allocation2 + $0xd0] sm:$0xff] }
 0x2ca   : > { %v4842_v52 = vpop.f32.mrb[169].mxu0 }
 0x2cb   : > { %v4843_v63 = vpop.f32.mrb[170].mxu0  ;;  %v3152_v42 = vsel %vm1155_vm2, %v3142_v14, %v3151_v21  ;;  %v3161_v0 = vsel %vm1155_vm2, %v3151_v21, %v3160_v35  ;;  %v2332_v52 = vor.u32 %v2331_v34, %v2328_v12  ;;  %v2340_v14 = vrot.slane %v2338_v55, 5 }
 0x2cc   : > { %v4845_v8 = vpop.f32.mrb[171].mxu0  ;;  %12360 = vmatprep.mubr.bf16.mxu1 %v3152_v42  ;;  %v14166_v63 = vsel %vm565_vm1, %v2563_v51, %v2572_v33  ;;  %v2353_v12 = vshrl.u32 %v14185_v40, 16  ;;  %v2356_v21 = vshll.u32 %v14185_v40, 16  ;;  %v14200_v42 = vld [vmem:[#allocation2 + $0xd8] sm:$0xff] }
 0x2cd   : > { %12361 = vmatmul.mubr.bf16.gmra.mrb[4].mxu1 %v3161_v0  ;;  %v2333_v8 = vsel %vm1155_vm2, %v2323_v13, %v2332_v52  ;;  %v2341_v50 = vor.u32 %v2340_v14, %v2337_v28  ;;  %v3174_v13 = vrot.slane %v3172_v22, 4  ;;  %v14203_v0 = vld [vmem:[#allocation2 + $0x58] sm:$0xff] }
 0x2ce   : > { %5088 = vmatmul.mubr.bf16.gmra.mrb[64].mxu0 %v2009_v3  ;;  %v2015_v3 = vsel %vm992_vm0, %v2012_v43, %v2014_v46  ;;  %v2017_v43 = vsel %vm992_vm0, %v2014_v46, %v2016_v15  ;;  %v2358_v39 = vrot.slane %v2356_v21, 5  ;;  %v2362_v46 = vshrl.u32 %v14200_v42, 16  ;;  %v14233_v21 = vld [vmem:[#allocation2 + $0x68] sm:$0xff] }
 0x2cf   : > { %5095 = vmatprep.mubr.bf16.mxu0 %v2306_v7  ;;  %v14170_v7 = vld [vmem:[#allocation2 + $0xc8] sm:$0xff]  ;;  %v2342_v11 = vsel %vm1155_vm2, %v2332_v52, %v2341_v50  ;;  %v3178_v62 = vor.u32 %v3177_v17, %v3174_v13  ;;  %v3181_v41 = vshrl.u32 %v14203_v0, 16  ;;  %v3184_v55 = vshll.u32 %v14203_v0, 16  ;;  %v14208_v52 = vld [vmem:[#allocation2 + $0x60] sm:$0xff] }
 0x2d0   : > { %v2344_v29 = vshrl.u32 %v14170_v7, 16  ;;  %v2347_v23 = vshll.u32 %v14170_v7, 16  ;;  %v3190_v28 = vshrl.u32 %v14208_v52, 16  ;;  %v3193_v14 = vshll.u32 %v14208_v52, 16 }
 0x2d2   : > { %v2346_v49 = vrot.slane %v2344_v29, 4  ;;  %v2349_v54 = vrot.slane %v2347_v23, 5  ;;  %v2598_v29 = vrot.slane %v3184_v55, 4  ;;  %v3192_v23 = vrot.slane %v3190_v28, 4 }
 0x2d3   : > { %v3195_v22 = vrot.slane %v3193_v14, 5  ;;  %v2604_v17 = vrot.slane %v3190_v28, 3 }
 0x2d4   : > { %v2350_v51 = vor.u32 %v2349_v54, %v2346_v49 }
 0x2d5   : > { %v3196_v13 = vor.u32 %v3195_v22, %v3192_v23 }
 0x2d6   : > { %5096 = vmatmul.mubr.bf16.gmra.mrb[224].mxu0 %v2011_v4  ;;  %v3165_v4 = vrot.slane %v3163_v20, 4  ;;  %v2351_v45 = vsel %vm1155_vm2, %v2341_v50, %v2350_v51  ;;  %v2595_v50 = vrot.slane %v3181_v41, 3 }
 0x2d7   : > { %5103 = vmatprep.mubr.bf16.mxu0 %v2315_v1  ;;  %v2580_v1 = vrot.slane %v3166_v32, 4 }
 0x2d8   : > { %v3169_v61 = vor.u32 %v3168_v19, %v3165_v4  ;;  %v2364_v4 = vrot.slane %v2362_v46, 4 }
 0x2d9   : > { %v4856_v44 = vpop.f32.mrb[172].mxu0  ;;  %v2581_v59 = vor.u32 %v2580_v1, %v2577_v31  ;;  %v2599_v31 = vor.u32 %v2598_v29, %v2595_v50 }
 0x2da   : > { %v4858_v27 = vpop.f32.mrb[173].mxu0  ;;  %v3179_v5 = vsel %vm1155_vm2, %v3169_v61, %v3178_v62 }
 0x2db   : > { %v4859_v18 = vpop.f32.mrb[174].mxu0  ;;  %v2589_v27 = vrot.slane %v3175_v10, 4  ;;  %v14189_v57 = vsel %vm565_vm1, %v2572_v33, %v2581_v59 }
 0x2dc   : > { %v4861_v6 = vpop.f32.mrb[175].mxu0 }
 0x2dd   : > { %v2590_v18 = vor.u32 %v2589_v27, %v2586_v9 }
 0x2de   : > { %5104 = vmatmul.mubr.bf16.gmra.mrb[72].mxu0 %v2013_v36  ;;  %v3170_v36 = vsel %vm1155_vm2, %v3160_v35, %v3169_v61  ;;  %v2355_v35 = vrot.slane %v2353_v12, 4  ;;  %v14230_v12 = vld [vmem:[#allocation2 + $0xe8] sm:$0xff] }
 0x2df   : > { %5111 = vmatprep.mubr.bf16.mxu0 %v2324_v60  ;;  %12364 = vmatprep.mubr.bf16.mxu1 %v3170_v36  ;;  %v2018_v60 = vrot.slane %v14155_v2, 4  ;;  %v14196_v6 = vsel %vm565_vm1, %v2581_v59, %v2590_v18  ;;  %v2020_v2 = vrot.slane %v14170_v7, 4  ;;  %v3183_v7 = vrot.slane %v3181_v41, 4 }
 0x2e0   : > { %12365 = vmatmul.mubr.bf16.gmra.mrb[8].mxu1 %v3179_v5  ;;  %v2359_v33 = vor.u32 %v2358_v39, %v2355_v35  ;;  %v14219_v49 = vsel %vm565_vm1, %v2590_v18, %v2599_v31  ;;  %v3199_v35 = vshrl.u32 %v14233_v21, 16  ;;  %v3202_v39 = vshll.u32 %v14233_v21, 16 }
 0x2e1   : > { %v2019_v34 = vsel %vm992_vm0, %v2016_v15, %v2018_v60  ;;  %v3186_v15 = vrot.slane %v3184_v55, 5  ;;  %v2021_v32 = vsel %vm992_vm0, %v2018_v60, %v2020_v2 }
 0x2e2   : > { %v3204_v55 = vrot.slane %v3202_v39, 5  ;;  %v2616_v28 = vrot.slane %v3202_v39, 4 }
 0x2e3   : > { %v3187_v19 = vor.u32 %v3186_v15, %v3183_v7 }
 0x2e5   : > { %v3197_v61 = vsel %vm1155_vm2, %v3187_v19, %v3196_v13 }
 0x2e6   : > { %5112 = vmatmul.mubr.bf16.gmra.mrb[228].mxu0 %v2015_v3  ;;  %v2365_v3 = vshll.u32 %v14200_v42, 16 }
 0x2e7   : > { %5119 = vmatprep.mubr.bf16.mxu0 %v2333_v8 }
 0x2e9   : > { %v4872_v25 = vpop.f32.mrb[176].mxu0 }
 0x2ea   : > { %v4874_v48 = vpop.f32.mrb[177].mxu0  ;;  %v2360_v25 = vsel %vm1155_vm2, %v2350_v51, %v2359_v33 }
 0x2eb   : > { %v4875_v30 = vpop.f32.mrb[178].mxu0  ;;  %v2367_v48 = vrot.slane %v2365_v3, 5  ;;  %v2613_v3 = vrot.slane %v3199_v35, 3 }
 0x2ec   : > { %v4877_v44 = vpop.f32.mrb[179].mxu0  ;;  %v2607_v30 = vrot.slane %v3193_v14, 4 }
 0x2ed   : > { %v2022_v44 = vrot.slane %v14185_v40, 4  ;;  %v2368_v27 = vor.u32 %v2367_v48, %v2364_v4  ;;  %v2024_v40 = vrot.slane %v14200_v42, 4  ;;  %v3201_v42 = vrot.slane %v3199_v35, 4 }
 0x2ee   : > { %5120 = vmatmul.mubr.bf16.gmra.mrb[80].mxu0 %v2017_v43  ;;  %v14215_v43 = vld [vmem:[#allocation2 + $0xe0] sm:$0xff]  ;;  %v2608_v59 = vor.u32 %v2607_v30, %v2604_v17  ;;  %v2617_v23 = vor.u32 %v2616_v28, %v2613_v3 }
 0x2ef   : > { %5127 = vmatprep.mubr.bf16.mxu0 %v2342_v11  ;;  %v3188_v11 = vsel %vm1155_vm2, %v3178_v62, %v3187_v19  ;;  %v2371_v54 = vshrl.u32 %v14215_v43, 16  ;;  %v2374_v9 = vshll.u32 %v14215_v43, 16  ;;  %v2023_v62 = vsel %vm992_vm0, %v2020_v2, %v2022_v44 }
 0x2f0   : > { %12368 = vmatprep.mubr.bf16.mxu1 %v3188_v11  ;;  %v14226_v36 = vsel %vm565_vm1, %v2599_v31, %v2608_v59  ;;  %v2369_v60 = vsel %vm1155_vm2, %v2359_v33, %v2368_v27  ;;  %v2383_v2 = vshll.u32 %v14230_v12, 16  ;;  %v14249_v48 = vsel %vm565_vm1, %v2608_v59, %v2617_v23 }
 0x2f1   : > { %12369 = vmatmul.mubr.bf16.gmra.mrb[12].mxu1 %v3197_v61  ;;  %v2373_v5 = vrot.slane %v2371_v54, 4  ;;  %v2376_v18 = vrot.slane %v2374_v9, 5  ;;  %v2026_v11 = vrot.slane %v14215_v43, 4  ;;  %v2028_v43 = vrot.slane %v14230_v12, 4 }
 0x2f3   : > { %v2377_v51 = vor.u32 %v2376_v18, %v2373_v5  ;;  %v14260_v5 = vld [vmem:[#allocation2 + $0xf8] sm:$0xff]  ;;  %v2029_v28 = vsel %vm992_vm0, %v2026_v11, %v2028_v43 }
 0x2f4   : > { %v14263_v18 = vld [vmem:[#allocation2 + $0x78] sm:$0xff] }
 0x2f5   : > { %v2378_v29 = vsel %vm1155_vm2, %v2368_v27, %v2377_v51  ;;  %v3217_v35 = vshrl.u32 %v14263_v18, 16  ;;  %v3220_v39 = vshll.u32 %v14263_v18, 16 }
 0x2f6   : > { %5128 = vmatmul.mubr.bf16.gmra.mrb[232].mxu0 %v2019_v34  ;;  %v2380_v34 = vshrl.u32 %v14230_v12, 16 }
 0x2f7   : > { %5135 = vmatprep.mubr.bf16.mxu0 %v2351_v45  ;;  %v14238_v45 = vld [vmem:[#allocation2 + $0x70] sm:$0xff]  ;;  %v3219_v12 = vrot.slane %v3217_v35, 4 }
 0x2f8   : > { %v3208_v33 = vshrl.u32 %v14238_v45, 16  ;;  %v3211_v46 = vshll.u32 %v14238_v45, 16 }
 0x2f9   : > { %v4888_v8 = vpop.f32.mrb[180].mxu0 }
 0x2fa   : > { %v4890_v20 = vpop.f32.mrb[181].mxu0  ;;  %v2025_v8 = vsel %vm992_vm0, %v2022_v44, %v2024_v40  ;;  %v3210_v7 = vrot.slane %v3208_v33, 4  ;;  %v3213_v15 = vrot.slane %v3211_v46, 5  ;;  %v2622_v19 = vrot.slane %v3208_v33, 3 }
 0x2fb   : > { %v4891_v10 = vpop.f32.mrb[182].mxu0  ;;  %v2382_v20 = vrot.slane %v2380_v34, 4  ;;  %v2625_v31 = vrot.slane %v3211_v46, 4  ;;  %v2398_v34 = vshrl.u32 %v14260_v5, 16 }
 0x2fc   : > { %v4893_v1 = vpop.f32.mrb[183].mxu0  ;;  %v2385_v10 = vrot.slane %v2383_v2, 5  ;;  %v3214_v4 = vor.u32 %v3213_v15, %v3210_v7  ;;  %v2401_v2 = vshll.u32 %v14260_v5, 16 }
 0x2fd   : > { %v2626_v30 = vor.u32 %v2625_v31, %v2622_v19 }
 0x2fe   : > { %5136 = vmatmul.mubr.bf16.gmra.mrb[88].mxu0 %v2021_v32  ;;  %v3205_v32 = vor.u32 %v3204_v55, %v3201_v42  ;;  %v2386_v54 = vor.u32 %v2385_v10, %v2382_v20  ;;  %v2631_v42 = vrot.slane %v3217_v35, 3  ;;  %v2634_v55 = vrot.slane %v3220_v39, 4  ;;  %v14290_v35 = vld [vmem:[#allocation2 + $0x108] sm:$0xff] }
 0x2ff   : > { %5143 = vmatprep.mubr.bf16.mxu0 %v2360_v25  ;;  %v14245_v25 = vld [vmem:[#allocation2 + $0xf0] sm:$0xff]  ;;  %v14256_v9 = vsel %vm565_vm1, %v2617_v23, %v2626_v30  ;;  %v2403_v23 = vrot.slane %v2401_v2, 5 }
 0x300   : > { %v3206_v1 = vsel %vm1155_vm2, %v3196_v13, %v3205_v32  ;;  %v3215_v17 = vsel %vm1155_vm2, %v3205_v32, %v3214_v4  ;;  %v2389_v61 = vshrl.u32 %v14245_v25, 16  ;;  %v2392_v44 = vshll.u32 %v14245_v25, 16 }
 0x301   : > { %12372 = vmatprep.mubr.bf16.mxu1 %v3206_v1  ;;  %v2027_v13 = vsel %vm992_vm0, %v2024_v40, %v2026_v11  ;;  %v14268_v40 = vld [vmem:[#allocation2 + $0x80] sm:$0xff]  ;;  %v2635_v20 = vor.u32 %v2634_v55, %v2631_v42 }
 0x302   : > { %12373 = vmatmul.mubr.bf16.gmra.mrb[16].mxu1 %v3215_v17  ;;  %v2391_v59 = vrot.slane %v2389_v61, 4  ;;  %v2394_v27 = vrot.slane %v2392_v44, 5  ;;  %v3229_v33 = vshll.u32 %v14268_v40, 16  ;;  %v2030_v44 = vrot.slane %v14245_v25, 4 }
 0x303   : > { %v14279_v17 = vsel %vm565_vm1, %v2626_v30, %v2635_v20  ;;  %v2032_v25 = vrot.slane %v14260_v5, 4 }
 0x304   : > { %v2643_v31 = vrot.slane %v3229_v33, 4 }
 0x306   : > { %5144 = vmatmul.mubr.bf16.gmra.mrb[236].mxu0 %v2023_v62  ;;  %v2387_v62 = vsel %vm1155_vm2, %v2377_v51, %v2386_v54  ;;  %v3226_v51 = vshrl.u32 %v14268_v40, 16 }
 0x307   : > { %5151 = vmatprep.mubr.bf16.mxu0 %v2369_v60  ;;  %v2395_v60 = vor.u32 %v2394_v27, %v2391_v59 }
 0x308   : > { %v2640_v19 = vrot.slane %v3226_v51, 3 }
 0x309   : > { %v4904_v41 = vpop.f32.mrb[184].mxu0  ;;  %v2396_v15 = vsel %vm1155_vm2, %v2386_v54, %v2395_v60 }
 0x30a   : > { %v4906_v14 = vpop.f32.mrb[185].mxu0  ;;  %v3222_v41 = vrot.slane %v3220_v39, 5  ;;  %v2644_v61 = vor.u32 %v2643_v31, %v2640_v19  ;;  %v14293_v39 = vld [vmem:[#allocation2 + $0x88] sm:$0xff] }
 0x30b   : > { %v4907_v50 = vpop.f32.mrb[186].mxu0  ;;  %v3228_v14 = vrot.slane %v3226_v51, 4  ;;  %v2416_v51 = vshrl.u32 %v14290_v35, 16 }
 0x30c   : > { %v4909_v22 = vpop.f32.mrb[187].mxu0  ;;  %v2400_v50 = vrot.slane %v2398_v34, 4  ;;  %v14286_v27 = vsel %vm565_vm1, %v2635_v20, %v2644_v61 }
 0x30d   : > { %v14275_v22 = vld [vmem:[#allocation2 + $0x100] sm:$0xff]  ;;  %v2418_v20 = vrot.slane %v2416_v51, 4 }
 0x30e   : > { %5152 = vmatmul.mubr.bf16.gmra.mrb[96].mxu0 %v2025_v8  ;;  %v3231_v8 = vrot.slane %v3229_v33, 5  ;;  %v2407_v54 = vshrl.u32 %v14275_v22, 16  ;;  %v2404_v59 = vor.u32 %v2403_v23, %v2400_v50  ;;  %v3235_v33 = vshrl.u32 %v14293_v39, 16 }
 0x30f   : > { %5159 = vmatprep.mubr.bf16.mxu0 %v2378_v29  ;;  %v3223_v29 = vor.u32 %v3222_v41, %v3219_v12  ;;  %v2419_v12 = vshll.u32 %v14290_v35, 16 }
 0x310   : > { %v3232_v10 = vor.u32 %v3231_v8, %v3228_v14  ;;  %v2409_v30 = vrot.slane %v2407_v54, 4  ;;  %v2405_v34 = vsel %vm1155_vm2, %v2395_v60, %v2404_v59  ;;  %v3237_v5 = vrot.slane %v3235_v33, 4 }
 0x311   : > { %v3224_v1 = vsel %vm1155_vm2, %v3214_v4, %v3223_v29  ;;  %v2031_v4 = vsel %vm992_vm0, %v2028_v43, %v2030_v44  ;;  %v14298_v43 = vld [vmem:[#allocation2 + $0x90] sm:$0xff]  ;;  %v2033_v8 = vsel %vm992_vm0, %v2030_v44, %v2032_v25  ;;  %v2421_v31 = vrot.slane %v2419_v12, 5 }
 0x312   : > { %12376 = vmatprep.mubr.bf16.mxu1 %v3224_v1  ;;  %v3233_v11 = vsel %vm1155_vm2, %v3223_v29, %v3232_v10  ;;  %v3244_v60 = vshrl.u32 %v14298_v43, 16  ;;  %v3247_v41 = vshll.u32 %v14298_v43, 16 }
 0x313   : > { %12377 = vmatmul.mubr.bf16.gmra.mrb[20].mxu1 %v3233_v11 }
 0x314   : > { %v2658_v11 = vrot.slane %v3244_v60, 3  ;;  %v2661_v54 = vrot.slane %v3247_v41, 4 }
 0x316   : > { %5160 = vmatmul.mubr.bf16.gmra.mrb[240].mxu0 %v2027_v13  ;;  %v2410_v13 = vshll.u32 %v14275_v22, 16 }
 0x317   : > { %5167 = vmatprep.mubr.bf16.mxu0 %v2387_v62 }
 0x318   : > { %v2412_v62 = vrot.slane %v2410_v13, 5  ;;  %v2136_v13 = vld [vmem:[#allocation2 + $0x110] sm:$0x1f] }
 0x319   : > { %v4920_v46 = vpop.f32.mrb[188].mxu0  ;;  %v2425_v51 = vshrl.u32 %v2136_v13, 16 }
 0x31a   : > { %v4922_v3 = vpop.f32.mrb[189].mxu0  ;;  %v2413_v2 = vor.u32 %v2412_v62, %v2409_v30  ;;  %v3238_v46 = vshll.u32 %v14293_v39, 16  ;;  %v2662_v62 = vor.u32 %v2661_v54, %v2658_v11 }
 0x31b   : > { %v4923_v7 = vpop.f32.mrb[190].mxu0  ;;  %v2649_v3 = vrot.slane %v3235_v33, 3  ;;  %v2428_v33 = vshll.u32 %v2136_v13, 16  ;;  %v2427_v12 = vrot.slane %v2425_v51, 4 }
 0x31c   : > { %v4925_v32 = vpop.f32.mrb[191].mxu0  ;;  %v3240_v55 = vrot.slane %v3238_v46, 5  ;;  %v3246_v7 = vrot.slane %v3244_v60, 4  ;;  %v2414_v29 = vsel %vm1155_vm2, %v2404_v59, %v2413_v2  ;;  %v2034_v59 = vrot.slane %v14275_v22, 4 }
 0x31d   : > { %v2430_v60 = vrot.slane %v2428_v33, 5  ;;  %v2036_v22 = vrot.slane %v14290_v35, 4 }
 0x31e   : > { %5168 = vmatmul.mubr.bf16.gmra.mrb[104].mxu0 %v2029_v28  ;;  %v2652_v28 = vrot.slane %v3238_v46, 4  ;;  %v3241_v32 = vor.u32 %v3240_v55, %v3237_v5 }
 0x31f   : > { %5175 = vmatprep.mubr.bf16.mxu0 %v2396_v15  ;;  %v3249_v15 = vrot.slane %v3247_v41, 5  ;;  %v13079_v41 = vld [vmem:[%s16382_s3] sm:$0xff]  }
 0x320   : > { %v2653_v23 = vor.u32 %v2652_v28, %v2649_v3  ;;  %v14324_v3 = vld [vmem:[#allocation2 + $0xa0] sm:$0xff]  ;;  %9930 = vmatpush1.bf16.msra.mxu1 %v13079_v41 }
 0x321   : > { %v3250_v1 = vor.u32 %v3249_v15, %v3246_v7  ;;  %v3265_v28 = vshll.u32 %v14324_v3, 16 }
 0x322   : > { %v14307_v30 = vsel %vm565_vm1, %v2644_v61, %v2653_v23  ;;  %v14312_v46 = vsel %vm565_vm1, %v2653_v23, %v2662_v62 }
 0x323   : > { %v3251_v44 = vsel %vm1155_vm2, %v3241_v32, %v3250_v1 }
 0x326   : > { %5176 = vmatmul.mubr.bf16.gmra.mrb[244].mxu0 %v2031_v4  ;;  %v3242_v4 = vsel %vm1155_vm2, %v3232_v10, %v3241_v32  ;;  %v2035_v10 = vsel %vm992_vm0, %v2032_v25, %v2034_v59  ;;  %v2431_v25 = vor.u32 %v2430_v60, %v2427_v12  ;;  %v3267_v32 = vrot.slane %v3265_v28, 5 }
 0x327   : > { %5183 = vmatprep.mubr.bf16.mxu0 %v2405_v34  ;;  %12380 = vmatprep.mubr.bf16.mxu1 %v3242_v4  ;;  %v2422_v34 = vor.u32 %v2421_v31, %v2418_v20  ;;  %v1941_v31 = vld [vmem:[#allocation2 + $0x110] sm:$0xf] }
 0x328   : > { %12381 = vmatmul.mubr.bf16.gmra.mrb[24].mxu1 %v3251_v44  ;;  %v2497_v44 = vld [vmem:[#allocation2 + $0x20] sm:$0xf8] }
 0x329   : > { %v4969_v42 = vpop.f32.mrb[192].mxu0  ;;  %v2423_v61 = vsel %vm1155_vm2, %v2413_v2, %v2422_v34  ;;  %v3262_v2 = vshrl.u32 %v14324_v3, 16  ;;  %v2432_v4 = vsel %vm1155_vm2, %v2422_v34, %v2431_v25  ;;  %v2038_v34 = vrot.slane %v1941_v31, 4 }
 0x32a   : > { %v4971_v14 = vpop.f32.mrb[193].mxu0  ;;  %v14319_v42 = vld [vmem:[#allocation2 + $0x98] sm:$0xff]  ;;  %v2534_v25 = vshll.u32 %v2497_v44, 16 }
 0x32b   : > { %v4972_v50 = vpop.f32.mrb[194].mxu0  ;;  %v3253_v5 = vshrl.u32 %v14319_v42, 16  ;;  %v3256_v55 = vshll.u32 %v14319_v42, 16  ;;  %v3264_v20 = vrot.slane %v3262_v2, 4  ;;  %v2676_v33 = vrot.slane %v3262_v2, 3 }
 0x32c   : > { %v4974_v19 = vpop.f32.mrb[195].mxu0 }
 0x32d   : > { %v3258_v7 = vrot.slane %v3256_v55, 5  ;;  %v2667_v15 = vrot.slane %v3253_v5, 3  ;;  %v2670_v50 = vrot.slane %v3256_v55, 4  ;;  %v2037_v19 = vsel %vm992_vm0, %v2034_v59, %v2036_v22 }
 0x32e   : > { %5184 = vmatmul.mubr.bf16.gmra.mrb[112].mxu0 %v2033_v8  ;;  %v3255_v8 = vrot.slane %v3253_v5, 4  ;;  %v3268_v51 = vor.u32 %v3267_v32, %v3264_v20  ;;  %v13080_v5 = vld [vmem:[%s16382_s3 + $0x8] sm:$0xff]   ;;  %v2531_v55 = vshrl.u32 %v2497_v44, 16  ;;  %v14355_v32 = vld [vmem:[#allocation2 + $0xb0] sm:$0xff] }
 0x32f   : > { %5191 = vmatprep.mubr.bf16.mxu0 %v2414_v29  ;;  %v14328_v29 = vld [vmem:[#allocation2] sm:$0xff]  ;;  %v2671_v54 = vor.u32 %v2670_v50, %v2667_v15  ;;  %v13081_v15 = vld [vmem:[%s16382_s3 + $0x10] sm:$0xff]   ;;  %v14351_v50 = vld [vmem:[#allocation2 + $0xa8] sm:$0xff] }
 0x330   : > { %9931 = vmatprep.subr.bf16.mxu1 %v14328_v29  ;;  %v3259_v11 = vor.u32 %v3258_v7, %v3255_v8  ;;  %v2536_v8 = vrot.slane %v2534_v25, 4  ;;  %v3274_v20 = vshll.u32 %v14351_v50, 16 }
 0x331   : > { %v14335_v60 = vsel %vm565_vm1, %v2662_v62, %v2671_v54  ;;  %9932 = vmatpush1.bf16.msra.mxu1 %v13080_v5 }
 0x332   : > { %v3260_v12 = vsel %vm1155_vm2, %v3250_v1, %v3259_v11  ;;  %v3269_v59 = vsel %vm1155_vm2, %v3259_v11, %v3268_v51  ;;  %v2957_v1 = vrot.slane %v14106_v56, 4  ;;  %9933 = vmatprep.subr.bf16.mxu1 %v14328_v29 }
 0x333   : > { %12384 = vmatprep.mubr.bf16.mxu1 %v3260_v12 }
 0x334   : > { %12385 = vmatmul.mubr.bf16.gmra.mrb[28].mxu1 %v3269_v59 }
 0x335   : > { %9934 = vmatpush1.bf16.msra.mxu1 %v13081_v15 }
 0x336   : > { %5192 = vmatmul.mubr.bf16.gmra.mrb[248].mxu0 %v2035_v10  ;;  %v2679_v10 = vrot.slane %v3265_v28, 4  ;;  %v2039_v28 = vsel %vm992_vm0, %v2036_v22, %v2038_v34  ;;  %v2959_v22 = vrot.slane %v14112_v26, 4  ;;  %9935 = vmatprep.subr.bf16.mxu1 %v14328_v29 }
 0x337   : > { %5199 = vmatprep.mubr.bf16.mxu0 %v2423_v61  ;;  %v2890_v61 = vld [vmem:[#allocation2 + $0x20] sm:$0xf0] }
 0x338   : > { %v2680_v41 = vor.u32 %v2679_v10, %v2676_v33  ;;  %v2956_v2 = vrot.slane %v2890_v61, 4  ;;  %v2960_v34 = vsel %vm992_vm0, %v2957_v1, %v2959_v22 }
 0x339   : > { %v4985_v14 = vpop.f32.mrb[196].mxu0 }
 0x33a   : > { %v4987_v35 = vpop.f32.mrb[197].mxu0  ;;  %v14343_v62 = vsel %vm565_vm1, %v2671_v54, %v2680_v41  ;;  %v2533_v14 = vrot.slane %v2531_v55, 3  ;;  %v2958_v7 = vsel %vm992_vm0, %v2956_v2, %v2957_v1  ;;  %v3276_v54 = vrot.slane %v3274_v20, 5 }
 0x33b   : > { %v4988_v23 = vpop.f32.mrb[198].mxu0  ;;  %v3271_v35 = vshrl.u32 %v14351_v50, 16  ;;  %v2961_v1 = vrot.slane %v14143_v24, 4 }
 0x33c   : > { %v4990_v13 = vpop.f32.mrb[199].mxu0  ;;  %v2537_v56 = vor.u32 %v2536_v8, %v2533_v14  ;;  %v3280_v23 = vshrl.u32 %v14355_v32, 16 }
 0x33d   : > { %v3273_v11 = vrot.slane %v3271_v35, 4  ;;  %v2685_v13 = vrot.slane %v3271_v35, 3 }
 0x33e   : > { %5200 = vmatmul.mubr.bf16.gmra.mrb[120].mxu0 %v2037_v19  ;;  %v3283_v19 = vshll.u32 %v14355_v32, 16  ;;  %v3282_v33 = vrot.slane %v3280_v23, 4  ;;  %v2546_v12 = vsel %vm565_vm1, %v2537_v56, %v14124_v16  ;;  %v2694_v25 = vrot.slane %v3280_v23, 3  ;;  %v13082_v16 = vld [vmem:[%s16382_s3 + $0x18] sm:$0xff]  }
 0x33f   : > { %5207 = vmatprep.mubr.bf16.mxu0 %v2432_v4  ;;  %v2688_v4 = vrot.slane %v3274_v20, 4  ;;  %v3277_v26 = vor.u32 %v3276_v54, %v3273_v11  ;;  %9936 = vmatpush1.bf16.msra.mxu1 %v13082_v16  ;;  %v14382_v56 = vld [vmem:[#allocation2 + $0xb8] sm:$0xff]  ;;  %v14386_v20 = vld [vmem:[#allocation2 + $0xc0] sm:$0xff]  ;;  %v2963_v23 = vrot.slane %v14148_v47, 4  ;;  %v13084_v16 = vld [vmem:[%s16382_s3 + $0x28] sm:$0xff]  }
 0x340   : > { %v3285_v10 = vrot.slane %v3283_v19, 5  ;;  %v2697_v2 = vrot.slane %v3283_v19, 4  ;;  %9937 = vmatprep.subr.bf16.mxu1 %v14328_v29  ;;  %v3289_v35 = vshrl.u32 %v14382_v56, 16  ;;  %v3292_v24 = vshll.u32 %v14382_v56, 16 }
 0x341   : > { %v2689_v59 = vor.u32 %v2688_v4, %v2685_v13  ;;  %v2964_v47 = vsel %vm992_vm0, %v2961_v1, %v2963_v23 }
 0x342   : > { %v3286_v55 = vor.u32 %v3285_v10, %v3282_v33  ;;  %v3294_v11 = vrot.slane %v3292_v24, 5  ;;  %v2703_v54 = vrot.slane %v3289_v35, 3  ;;  %v2706_v13 = vrot.slane %v3292_v24, 4 }
 0x343   : > { %v14366_v14 = vsel %vm565_vm1, %v2680_v41, %v2689_v59  ;;  %v13083_v41 = vld [vmem:[%s16382_s3 + $0x20] sm:$0xff]   ;;  %v2967_v24 = vrot.slane %v14178_v53, 4 }
 0x344   : > { %v3287_v8 = vsel %vm1155_vm2, %v3277_v26, %v3286_v55  ;;  %9938 = vmatpush1.bf16.msra.mxu1 %v13083_v41 }
 0x345   : > { %9939 = vmatprep.subr.bf16.mxu1 %v14328_v29 }
 0x346   : > { %5208 = vmatmul.mubr.bf16.gmra.mrb[252].mxu0 %v2039_v28  ;;  %v3278_v28 = vsel %vm1155_vm2, %v3268_v51, %v3277_v26  ;;  %v2962_v51 = vsel %vm992_vm0, %v2959_v22, %v2961_v1  ;;  %v3298_v22 = vshrl.u32 %v14386_v20, 16  ;;  %v2965_v1 = vrot.slane %v14173_v58, 4 }
 0x347   : > { %5248 = vmatprep.mubr.bf16.mxu0 %v2958_v7  ;;  %12388 = vmatprep.mubr.bf16.mxu1 %v3278_v28  ;;  %v2698_v7 = vor.u32 %v2697_v2, %v2694_v25 }
 0x348   : > { %12389 = vmatmul.mubr.bf16.gmra.mrb[32].mxu1 %v3287_v8  ;;  %v2968_v53 = vsel %vm992_vm0, %v2965_v1, %v2967_v24 }
 0x349   : > { %v5001_v31 = vpop.f32.mrb[200].mxu0  ;;  %v14374_v15 = vsel %vm565_vm1, %v2689_v59, %v2698_v7  ;;  %9940 = vmatpush1.bf16.msra.mxu1 %v13084_v16  ;;  %v13086_v16 = vld [vmem:[%s16382_s3 + $0x38] sm:$0xff]  }
 0x34a   : > { %v5003_v44 = vpop.f32.mrb[201].mxu0  ;;  %v3291_v31 = vrot.slane %v3289_v35, 4  ;;  %9941 = vmatprep.subr.bf16.mxu1 %v14328_v29  ;;  %v14416_v35 = vld [vmem:[#allocation2 + $0xd0] sm:$0xff] }
 0x34b   : > { %v5004_v61 = vpop.f32.mrb[202].mxu0  ;;  %v3300_v44 = vrot.slane %v3298_v22, 4 }
 0x34c   : > { %v5006_v5 = vpop.f32.mrb[203].mxu0  ;;  %v3295_v61 = vor.u32 %v3294_v11, %v3291_v31 }
 0x34d   : > { %v2712_v5 = vrot.slane %v3298_v22, 3 }
 0x34e   : > { %5249 = vmatmul.mubr.bf16.vlgmr.msra.gmra.mrb[0].mxu0 %v2546_v12  ;;  %v2707_v12 = vor.u32 %v2706_v13, %v2703_v54  ;;  %v3296_v25 = vsel %vm1155_vm2, %v3286_v55, %v3295_v61  ;;  %v13085_v55 = vld [vmem:[%s16382_s3 + $0x30] sm:$0xff]  }
 0x34f   : > { %5256 = vmatprep.mubr.bf16.mxu0 %v2960_v34  ;;  %12392 = vmatprep.mubr.bf16.mxu1 %v3296_v25 }
 0x350   : > { %v14395_v2 = vsel %vm565_vm1, %v2698_v7, %v2707_v12  ;;  %v14412_v7 = vld [vmem:[#allocation2 + $0xc8] sm:$0xff]  ;;  %9942 = vmatpush1.bf16.msra.mxu1 %v13085_v55 }
 0x351   : > { %v3307_v41 = vshrl.u32 %v14412_v7, 16  ;;  %v3310_v58 = vshll.u32 %v14412_v7, 16  ;;  %9943 = vmatprep.subr.bf16.mxu1 %v14328_v29 }
 0x353   : > { %v2721_v31 = vrot.slane %v3307_v41, 3  ;;  %v2724_v11 = vrot.slane %v3310_v58, 4 }
 0x354   : > { %9944 = vmatpush1.bf16.msra.mxu1 %v13086_v16  ;;  %v13088_v16 = vld [vmem:[%s16382_s3 + $0x48] sm:$0xff]  }
 0x355   : > { %9945 = vmatprep.subr.bf16.mxu1 %v14328_v29 }
 0x356   : > { %5257 = vmatmul.mubr.bf16.gmra.mrb[4].mxu0 %v14137_v37  ;;  %v3301_v37 = vshll.u32 %v14386_v20, 16 }
 0x357   : > { %5264 = vmatprep.mubr.bf16.mxu0 %v2962_v51 }
 0x358   : > { %v3303_v33 = vrot.slane %v3301_v37, 5  ;;  %v2715_v34 = vrot.slane %v3301_v37, 4  ;;  %v3309_v37 = vrot.slane %v3307_v41, 4  ;;  %v14446_v41 = vld [vmem:[#allocation2 + $0xe0] sm:$0xff] }
 0x359   : > { %v5017_v19 = vpop.f32.mrb[204].mxu0 }
 0x35a   : > { %v5019_v4 = vpop.f32.mrb[205].mxu0  ;;  %v3304_v59 = vor.u32 %v3303_v33, %v3300_v44  ;;  %v2716_v8 = vor.u32 %v2715_v34, %v2712_v5  ;;  %v3312_v19 = vrot.slane %v3310_v58, 5  ;;  %v2971_v58 = vrot.slane %v14208_v52, 4 }
 0x35b   : > { %v5020_v10 = vpop.f32.mrb[206].mxu0 }
 0x35c   : > { %v5022_v26 = vpop.f32.mrb[207].mxu0  ;;  %v3305_v28 = vsel %vm1155_vm2, %v3295_v61, %v3304_v59  ;;  %v14404_v51 = vsel %vm565_vm1, %v2707_v12, %v2716_v8  ;;  %v3313_v33 = vor.u32 %v3312_v19, %v3309_v37  ;;  %v2725_v10 = vor.u32 %v2724_v11, %v2721_v31 }
 0x35d   : > { %12393 = vmatmul.mubr.bf16.gmra.mrb[36].mxu1 %v3305_v28 }
 0x35e   : > { %5265 = vmatmul.mubr.bf16.gmra.mrb[8].mxu0 %v14159_v38  ;;  %v2966_v38 = vsel %vm992_vm0, %v2963_v23, %v2965_v1  ;;  %v3316_v23 = vshrl.u32 %v14416_v35, 16  ;;  %v3314_v5 = vsel %vm1155_vm2, %v3304_v59, %v3313_v33  ;;  %v14425_v34 = vsel %vm565_vm1, %v2716_v8, %v2725_v10  ;;  %v13087_v59 = vld [vmem:[%s16382_s3 + $0x40] sm:$0xff]   ;;  %v14442_v8 = vld [vmem:[#allocation2 + $0xd8] sm:$0xff] }
 0x35f   : > { %5272 = vmatprep.mubr.bf16.mxu0 %v2964_v47  ;;  %12396 = vmatprep.mubr.bf16.mxu1 %v3314_v5  ;;  %v2969_v1 = vrot.slane %v14203_v0, 4  ;;  %v3325_v55 = vshrl.u32 %v14442_v8, 16  ;;  %v3328_v0 = vshll.u32 %v14442_v8, 16 }
 0x360   : > { %v3318_v13 = vrot.slane %v3316_v23, 4  ;;  %v2730_v26 = vrot.slane %v3316_v23, 3  ;;  %9946 = vmatpush1.bf16.msra.mxu1 %v13087_v59 }
 0x361   : > { %v2739_v37 = vrot.slane %v3325_v55, 3  ;;  %v2742_v19 = vrot.slane %v3328_v0, 4  ;;  %9947 = vmatprep.subr.bf16.mxu1 %v14328_v29  ;;  %v2972_v52 = vsel %vm992_vm0, %v2969_v1, %v2971_v58 }
 0x364   : > { %9948 = vmatpush1.bf16.msra.mxu1 %v13088_v16  ;;  %v13090_v16 = vld [vmem:[%s16382_s3 + $0x58] sm:$0xff]  }
 0x365   : > { %9949 = vmatprep.subr.bf16.mxu1 %v14328_v29 }
 0x366   : > { %5273 = vmatmul.mubr.bf16.gmra.mrb[12].mxu0 %v14166_v63  ;;  %v3319_v63 = vshll.u32 %v14416_v35, 16 }
 0x367   : > { %5280 = vmatprep.mubr.bf16.mxu0 %v2966_v38 }
 0x368   : > { %v3321_v4 = vrot.slane %v3319_v63, 5  ;;  %v2733_v47 = vrot.slane %v3319_v63, 4  ;;  %v3327_v63 = vrot.slane %v3325_v55, 4  ;;  %v14476_v55 = vld [vmem:[#allocation2 + $0xf0] sm:$0xff] }
 0x369   : > { %v5033_v22 = vpop.f32.mrb[208].mxu0 }
 0x36a   : > { %v5035_v54 = vpop.f32.mrb[209].mxu0  ;;  %v3322_v12 = vor.u32 %v3321_v4, %v3318_v13  ;;  %v2734_v28 = vor.u32 %v2733_v47, %v2730_v26  ;;  %v3330_v22 = vrot.slane %v3328_v0, 5  ;;  %v2975_v0 = vrot.slane %v14238_v45, 4 }
 0x36b   : > { %v5036_v44 = vpop.f32.mrb[210].mxu0 }
 0x36c   : > { %v5038_v61 = vpop.f32.mrb[211].mxu0  ;;  %v3323_v25 = vsel %vm1155_vm2, %v3313_v33, %v3322_v12  ;;  %v14434_v38 = vsel %vm565_vm1, %v2725_v10, %v2734_v28  ;;  %v3331_v4 = vor.u32 %v3330_v22, %v3327_v63  ;;  %v2743_v44 = vor.u32 %v2742_v19, %v2739_v37 }
 0x36d   : > { %12397 = vmatmul.mubr.bf16.gmra.mrb[40].mxu1 %v3323_v25 }
 0x36e   : > { %5281 = vmatmul.mubr.bf16.gmra.mrb[16].mxu0 %v14189_v57  ;;  %v2970_v57 = vsel %vm992_vm0, %v2967_v24, %v2969_v1  ;;  %v3334_v24 = vshrl.u32 %v14446_v41, 16  ;;  %v3332_v26 = vsel %vm1155_vm2, %v3322_v12, %v3331_v4  ;;  %v14455_v47 = vsel %vm565_vm1, %v2734_v28, %v2743_v44  ;;  %v13089_v12 = vld [vmem:[%s16382_s3 + $0x50] sm:$0xff]   ;;  %v14472_v28 = vld [vmem:[#allocation2 + $0xe8] sm:$0xff] }
 0x36f   : > { %5288 = vmatprep.mubr.bf16.mxu0 %v2968_v53  ;;  %12400 = vmatprep.mubr.bf16.mxu1 %v3332_v26  ;;  %v2973_v1 = vrot.slane %v14233_v21, 4  ;;  %v3343_v59 = vshrl.u32 %v14472_v28, 16  ;;  %v3346_v21 = vshll.u32 %v14472_v28, 16 }
 0x370   : > { %v3336_v11 = vrot.slane %v3334_v24, 4  ;;  %v2748_v61 = vrot.slane %v3334_v24, 3  ;;  %9950 = vmatpush1.bf16.msra.mxu1 %v13089_v12  ;;  %v14501_v12 = vld [vmem:[#allocation2 + $0x100] sm:$0xff] }
 0x371   : > { %v2757_v63 = vrot.slane %v3343_v59, 3  ;;  %v2760_v22 = vrot.slane %v3346_v21, 4  ;;  %9951 = vmatprep.subr.bf16.mxu1 %v14328_v29  ;;  %v2976_v45 = vsel %vm992_vm0, %v2973_v1, %v2975_v0 }
 0x374   : > { %9952 = vmatpush1.bf16.msra.mxu1 %v13090_v16 }
 0x375   : > { %9953 = vmatprep.subr.bf16.mxu1 %v14328_v29 }
 0x376   : > { %5289 = vmatmul.mubr.bf16.gmra.mrb[20].mxu0 %v14196_v6  ;;  %v3337_v6 = vshll.u32 %v14446_v41, 16 }
 0x377   : > { %5296 = vmatprep.mubr.bf16.mxu0 %v2970_v57 }
 0x378   : > { %v3339_v54 = vrot.slane %v3337_v6, 5  ;;  %v2751_v53 = vrot.slane %v3337_v6, 4  ;;  %v3345_v6 = vrot.slane %v3343_v59, 4 }
 0x379   : > { %v5049_v23 = vpop.f32.mrb[212].mxu0 }
 0x37a   : > { %v5051_v31 = vpop.f32.mrb[213].mxu0  ;;  %v3340_v10 = vor.u32 %v3339_v54, %v3336_v11  ;;  %v2752_v25 = vor.u32 %v2751_v53, %v2748_v61  ;;  %v3348_v23 = vrot.slane %v3346_v21, 5  ;;  %v3370_v21 = vshrl.u32 %v14501_v12, 16 }
 0x37b   : > { %v5052_v13 = vpop.f32.mrb[214].mxu0 }
 0x37c   : > { %v5054_v33 = vpop.f32.mrb[215].mxu0  ;;  %v3341_v5 = vsel %vm1155_vm2, %v3331_v4, %v3340_v10  ;;  %v14464_v57 = vsel %vm565_vm1, %v2743_v44, %v2752_v25  ;;  %v3349_v54 = vor.u32 %v3348_v23, %v3345_v6  ;;  %v2761_v13 = vor.u32 %v2760_v22, %v2757_v63 }
 0x37d   : > { %12401 = vmatmul.mubr.bf16.gmra.mrb[44].mxu1 %v3341_v5  ;;  %v3372_v6 = vrot.slane %v3370_v21, 4  ;;  %v2979_v22 = vrot.slane %v14268_v40, 4 }
 0x37e   : > { %5297 = vmatmul.mubr.bf16.gmra.mrb[24].mxu0 %v14219_v49  ;;  %v2974_v49 = vsel %vm992_vm0, %v2971_v58, %v2973_v1  ;;  %v3352_v58 = vshrl.u32 %v14476_v55, 16  ;;  %v3350_v61 = vsel %vm1155_vm2, %v3340_v10, %v3349_v54  ;;  %v14485_v53 = vsel %vm565_vm1, %v2752_v25, %v2761_v13  ;;  %v14497_v10 = vld [vmem:[#allocation2 + $0xf8] sm:$0xff] }
 0x37f   : > { %5304 = vmatprep.mubr.bf16.mxu0 %v2972_v52  ;;  %12404 = vmatprep.mubr.bf16.mxu1 %v3350_v61  ;;  %v2977_v1 = vrot.slane %v14263_v18, 4  ;;  %v3364_v25 = vshll.u32 %v14497_v10, 16  ;;  %v3373_v18 = vshll.u32 %v14501_v12, 16 }
 0x380   : > { %v3354_v19 = vrot.slane %v3352_v58, 4  ;;  %v2766_v33 = vrot.slane %v3352_v58, 3 }
 0x381   : > { %v2978_v59 = vsel %vm992_vm0, %v2975_v0, %v2977_v1  ;;  %v3375_v23 = vrot.slane %v3373_v18, 5  ;;  %v2980_v61 = vsel %vm992_vm0, %v2977_v1, %v2979_v22  ;;  %v2787_v16 = vrot.slane %v3373_v18, 4 }
 0x383   : > { %v3376_v0 = vor.u32 %v3375_v23, %v3372_v6  ;;  %v13092_v6 = vld [vmem:[%s16382_s3 + $0x68] sm:$0xff]  }
 0x386   : > { %5305 = vmatmul.mubr.bf16.gmra.mrb[28].mxu0 %v14226_v36  ;;  %v3355_v36 = vshll.u32 %v14476_v55, 16 }
 0x387   : > { %5312 = vmatprep.mubr.bf16.mxu0 %v2974_v49 }
 0x388   : > { %v3357_v31 = vrot.slane %v3355_v36, 5  ;;  %v2769_v52 = vrot.slane %v3355_v36, 4  ;;  %v3366_v36 = vrot.slane %v3364_v25, 5 }
 0x389   : > { %v5065_v24 = vpop.f32.mrb[216].mxu0 }
 0x38a   : > { %v5067_v37 = vpop.f32.mrb[217].mxu0  ;;  %v3358_v44 = vor.u32 %v3357_v31, %v3354_v19  ;;  %v2770_v5 = vor.u32 %v2769_v52, %v2766_v33  ;;  %v13091_v24 = vld [vmem:[%s16382_s3 + $0x60] sm:$0xff]   ;;  %v14518_v52 = vld [vmem:[#allocation2 + $0x110] sm:$0xff] }
 0x38b   : > { %v5068_v11 = vpop.f32.mrb[218].mxu0  ;;  %9954 = vmatpush1.bf16.msra.mxu1 %v13091_v24 }
 0x38c   : > { %v5070_v4 = vpop.f32.mrb[219].mxu0  ;;  %v3359_v26 = vsel %vm1155_vm2, %v3349_v54, %v3358_v44  ;;  %v14494_v49 = vsel %vm565_vm1, %v2761_v13, %v2770_v5  ;;  %v2778_v11 = vrot.slane %v3364_v25, 4  ;;  %9955 = vmatprep.subr.bf16.mxu1 %v14328_v29  ;;  %v14514_v13 = vld [vmem:[#allocation2 + $0x108] sm:$0xff] }
 0x38d   : > { %12405 = vmatmul.mubr.bf16.gmra.mrb[48].mxu1 %v3359_v26  ;;  %v3379_v40 = vshrl.u32 %v14514_v13, 16  ;;  %v3382_v33 = vshll.u32 %v14514_v13, 16  ;;  %v2784_v26 = vrot.slane %v3370_v21, 3 }
 0x38e   : > { %5313 = vmatmul.mubr.bf16.gmra.mrb[32].mxu0 %v14249_v48  ;;  %v3361_v48 = vshrl.u32 %v14497_v10, 16 }
 0x38f   : > { %5320 = vmatprep.mubr.bf16.mxu0 %v2976_v45  ;;  %v2788_v24 = vor.u32 %v2787_v16, %v2784_v26  ;;  %9956 = vmatpush1.bf16.msra.mxu1 %v13092_v6  ;;  %v2983_v6 = vrot.slane %v14298_v43, 4  ;;  %v13093_v43 = vld [vmem:[%s16382_s3 + $0x70] sm:$0xff]  }
 0x390   : > { %v3363_v58 = vrot.slane %v3361_v48, 4  ;;  %v2775_v31 = vrot.slane %v3361_v48, 3  ;;  %v16385_v48 = vshrl.u32 %v14518_v52, 16  ;;  %9957 = vmatprep.subr.bf16.mxu1 %v14328_v29 }
 0x392   : > { %v3367_v63 = vor.u32 %v3366_v36, %v3363_v58  ;;  %v2779_v45 = vor.u32 %v2778_v11, %v2775_v31  ;;  %v3384_v58 = vrot.slane %v3382_v33, 5  ;;  %v3391_v36 = vshll.u32 %v14518_v52, 16 }
 0x393   : > { %v3390_v1 = vrot.slane %v16385_v48, 4  ;;  %9958 = vmatpush1.bf16.msra.mxu1 %v13093_v43 }
 0x394   : > { %v3368_v19 = vsel %vm1155_vm2, %v3358_v44, %v3367_v63  ;;  %v3377_v54 = vsel %vm1155_vm2, %v3367_v63, %v3376_v0  ;;  %v14523_v25 = vsel %vm565_vm1, %v2770_v5, %v2779_v45  ;;  %v3393_v18 = vrot.slane %v3391_v36, 5  ;;  %v12358_v63 = vpop.f32.mrb[0].mxu1  ;;  %9959 = vmatprep.subr.bf16.mxu1 %v14328_v29 }
 0x395   : > { %12408 = vmatprep.mubr.bf16.mxu1 %v3368_v19  ;;  %v2981_v5 = vrot.slane %v14293_v39, 4  ;;  %v14534_v23 = vsel %vm565_vm1, %v2779_v45, %v2788_v24  ;;  %v14538_v19 = vpop.f32.mrb[1].mxu1  ;;  %v3400_v39 = vshll.u32 %v14328_v29, 16  ;;  %v2796_v63 = vrot.slane %v3382_v33, 4  ;;  %v6115_v33 = vld [vmem:[#allocation2] sm:$0xf8] }
 0x396   : > { %5321 = vmatmul.mubr.bf16.gmra.mrb[36].mxu0 %v14256_v9  ;;  %12409 = vmatmul.mubr.bf16.gmra.mrb[52].mxu1 %v3377_v54  ;;  %v12359_v31 = vpop.f32.mrb[2].mxu1  ;;  %v3117_v54 = vld [vmem:[#allocation2 + $0x120] sm:$0x1f] }
 0x397   : > { %5328 = vmatprep.mubr.bf16.mxu0 %v2978_v59  ;;  %v3381_v59 = vrot.slane %v3379_v40, 4  ;;  %v14544_v45 = vpop.f32.mrb[3].mxu1  ;;  %v3402_v26 = vrot.slane %v3400_v39, 5 }
 0x399   : > { %v5081_v37 = vpop.f32.mrb[220].mxu0  ;;  %v3385_v21 = vor.u32 %v3384_v58, %v3381_v59 }
 0x39a   : > { %v5083_v9 = vpop.f32.mrb[221].mxu0  ;;  %v3394_v37 = vor.u32 %v3393_v18, %v3390_v1 }
 0x39b   : > { %v5084_v4 = vpop.f32.mrb[222].mxu0  ;;  %v3397_v9 = vshrl.u32 %v14328_v29, 16 }
 0x39c   : > { %v5086_v44 = vpop.f32.mrb[223].mxu0  ;;  %v3395_v11 = vsel %vm1155_vm2, %v3385_v21, %v3394_v37  ;;  %v2982_v4 = vsel %vm992_vm0, %v2979_v22, %v2981_v5  ;;  %v2793_v22 = vrot.slane %v3379_v40, 3 }
 0x39d   : > { %v3409_v44 = vshll.u32 %v3117_v54, 16 }
 0x39e   : > { %5329 = vmatmul.mubr.bf16.gmra.mrb[40].mxu0 %v14279_v17  ;;  %v3386_v17 = vsel %vm1155_vm2, %v3376_v0, %v3385_v21  ;;  %v3406_v0 = vshrl.u32 %v3117_v54, 16  ;;  %v2797_v54 = vor.u32 %v2796_v63, %v2793_v22  ;;  %v14570_v22 = vrot.slane %v14328_v29, 4 }
 0x39f   : > { %5336 = vmatprep.mubr.bf16.mxu0 %v2980_v61  ;;  %12412 = vmatprep.mubr.bf16.mxu1 %v3386_v17  ;;  %v3399_v61 = vrot.slane %v3397_v9, 4  ;;  %v3411_v59 = vrot.slane %v3409_v44, 5  ;;  %v16470_v44 = vshrl.u32 %v14518_v52, 16 }
 0x3a0   : > { %12413 = vmatmul.mubr.bf16.gmra.mrb[56].mxu1 %v3395_v11  ;;  %v3408_v16 = vrot.slane %v3406_v0, 4  ;;  %v16386_v0 = vmov 0.0|0.0   ;;  %v14558_v40 = vsel %vm565_vm1, %v2788_v24, %v2797_v54  ;;  %v13094_v24 = vld [vmem:[%s16382_s3 + $0x78] sm:$0xff]  }
 0x3a1   : > { %v3403_v58 = vor.u32 %v3402_v26, %v3399_v61  ;;  %v2802_v61 = vrot.slane %v16470_v44, 3  ;;  %v2805_v26 = vrot.slane %v3391_v36, 4  ;;  %9960 = vmatpush1.bf16.msra.mxu1 %v13094_v24  ;;  %v13095_v24 = vld [vmem:[%s16382_s3 + $0x80] sm:$0xff]  }
 0x3a2   : > { %v3412_v1 = vor.u32 %v3411_v59, %v3408_v16  ;;  %v6508_v16 = vld [vmem:[#allocation2] sm:$0xf0]  ;;  %10218 = vmatprep.subr.bf16.mxu1 %v14328_v29 }
 0x3a3   : > { %v3404_v18 = vsel %vm1155_vm2, %v3394_v37, %v3403_v58  ;;  %v2985_v37 = vrot.slane %v14319_v42, 4  ;;  %v12362_v42 = vpop.f32.mrb[4].mxu1 }
 0x3a4   : > { %12416 = vmatprep.mubr.bf16.mxu1 %v3404_v18  ;;  %v3413_v31 = vsel %vm1155_vm2, %v3403_v58, %v3412_v1  ;;  %v6159_v58 = vrot.slane %v3397_v9, 3  ;;  %v6162_v1 = vrot.slane %v3400_v39, 4  ;;  %v6574_v18 = vrot.slane %v6508_v16, 4  ;;  %v13102_v42 = vld [vmem:[%s16382_s3 + $0x228] sm:$0xff]  }
 0x3a5   : > { %v2986_v9 = vsel %vm992_vm0, %v2983_v6, %v2985_v37  ;;  %v2989_v16 = vrot.slane %v14351_v50, 4  ;;  %v13101_v50 = vld [vmem:[%s16382_s3 + $0x220] sm:$0xff]  }
 0x3a6   : > { %5337 = vmatmul.mubr.bf16.gmra.mrb[44].mxu0 %v14286_v27  ;;  %v2984_v27 = vsel %vm992_vm0, %v2981_v5, %v2983_v6  ;;  %v6152_v5 = vshll.u32 %v6115_v33, 16  ;;  %v14572_v36 = vor.u32 %v6162_v1, %v6159_v58 }
 0x3a7   : > { %5344 = vmatprep.mubr.bf16.mxu0 %v2982_v4  ;;  %v14552_v4 = vrot.slane %v16386_v0, 4 }
 0x3a8   : > { %12417 = vmatmul.mubr.bf16.gmra.mrb[60].mxu1 %v3413_v31  ;;  %v6154_v59 = vrot.slane %v6152_v5, 4  ;;  %v14577_v31 = vpop.f32.mrb[5].mxu1 }
 0x3a9   : > { %v5097_v21 = vpop.f32.mrb[224].mxu0  ;;  %6114 = vst [vmem:[#allocation2 + $0x110] sm:$0xf] %v14552_v4  ;;  %v12363_v39 = vpop.f32.mrb[6].mxu1 }
 0x3aa   : > { %v5099_v17 = vpop.f32.mrb[225].mxu0  ;;  %v2806_v21 = vor.u32 %v2805_v26, %v2802_v61  ;;  %v14585_v43 = vpop.f32.mrb[7].mxu1 }
 0x3ab   : > { %v5100_v11 = vpop.f32.mrb[226].mxu0 }
 0x3ac   : > { %v5102_v48 = vpop.f32.mrb[227].mxu0  ;;  %v14575_v17 = vsel %vm565_vm1, %v2797_v54, %v2806_v21  ;;  %v6576_v11 = vsel %vm992_vm0, %v6574_v18, %v14570_v22  ;;  %v13096_v54 = vld [vmem:[%s16382_s3 + $0x200] sm:$0xff]  }
 0x3ad   : > { %v6149_v48 = vshrl.u32 %v6115_v33, 16  ;;  %9961 = vmatprep.mubr.bf16.mxu1 %v6576_v11  ;;  %12420 = vmatprep.subr.bf16.mxu0 %v13096_v54  ;;  %v2987_v33 = vrot.slane %v14324_v3, 4  ;;  %v14602_v3 = vsel %vm565_vm1, %v2806_v21, %v14572_v36  ;;  %v2991_v21 = vrot.slane %v14355_v32, 4  ;;  %v13099_v32 = vld [vmem:[%s16382_s3 + $0x88] sm:$0xff]  }
 0x3ae   : > { %5345 = vmatmul.mubr.bf16.gmra.mrb[48].mxu0 %v14307_v30 }
 0x3af   : > { %5352 = vmatprep.mubr.bf16.mxu0 %v2984_v27  ;;  %v6151_v30 = vrot.slane %v6149_v48, 3  ;;  %12421 = vmatpush3.bf16.msra.mxu0 %v13096_v54  ;;  %v13097_v48 = vld [vmem:[%s16382_s3 + $0x208] sm:$0xff]   ;;  %v2988_v26 = vsel %vm992_vm0, %v2985_v37, %v2987_v33  ;;  %v13100_v37 = vld [vmem:[%s16382_s3 + $0x218] sm:$0xff]   ;;  %v2992_v39 = vsel %vm992_vm0, %v2989_v16, %v2991_v21 }
 0x3b0   : > { %12422 = vmatprep.subr.bf16.mxu0 %v13097_v48 }
 0x3b1   : > { %v6155_v63 = vor.u32 %v6154_v59, %v6151_v30  ;;  %v2990_v59 = vsel %vm992_vm0, %v2987_v33, %v2989_v16  ;;  %v13104_v16 = vld [vmem:[%s16382_s3 + $0x90] sm:$0xff]  }
 0x3b3   : > { %v6164_v27 = vsel %vm565_vm1, %v6155_v63, %v14572_v36  ;;  %12423 = vmatpush3.bf16.msra.mxu0 %v13097_v48  ;;  %v12366_v30 = vpop.f32.mrb[8].mxu1 }
 0x3b4   : > { %9962 = vmatmul.mubr.bf16.vlgmr.msra.gmra.mrb[64].mxu1 %v6164_v27  ;;  %v2993_v27 = vrot.slane %v14382_v56, 4 }
 0x3b5   : > { %10219 = vmatpush1.bf16.msra.mxu1 %v13095_v24 }
 0x3b6   : > { %5353 = vmatmul.mubr.bf16.gmra.mrb[52].mxu0 %v14312_v46  ;;  %v13098_v46 = vld [vmem:[%s16382_s3 + $0x210] sm:$0xff]   ;;  %10220 = vmatprep.subr.bf16.mxu1 %v14328_v29  ;;  %v2994_v33 = vsel %vm992_vm0, %v2991_v21, %v2993_v27 }
 0x3b7   : > { %5360 = vmatprep.mubr.bf16.mxu0 %v2986_v9  ;;  %12424 = vmatprep.subr.bf16.mxu0 %v13098_v46 }
 0x3b8   : > { %12425 = vmatpush3.bf16.msra.mxu0 %v13098_v46 }
 0x3b9   : > { %v5113_v6 = vpop.f32.mrb[228].mxu0  ;;  %12426 = vmatprep.subr.bf16.mxu0 %v13100_v37  ;;  %10221 = vmatpush1.bf16.msra.mxu1 %v13099_v32 }
 0x3ba   : > { %v5115_v5 = vpop.f32.mrb[229].mxu0  ;;  %10222 = vmatprep.subr.bf16.mxu1 %v14328_v29 }
 0x3bb   : > { %v5116_v44 = vpop.f32.mrb[230].mxu0  ;;  %v2995_v5 = vrot.slane %v14386_v20, 4 }
 0x3bc   : > { %v5118_v61 = vpop.f32.mrb[231].mxu0  ;;  %12427 = vmatpush3.bf16.msra.mxu0 %v13100_v37 }
 0x3bd   : > { %12428 = vmatprep.subr.bf16.mxu0 %v13101_v50  ;;  %v2996_v24 = vsel %vm992_vm0, %v2993_v27, %v2995_v5  ;;  %10223 = vmatpush1.bf16.msra.mxu1 %v13104_v16 }
 0x3be   : > { %5361 = vmatmul.mubr.bf16.gmra.mrb[56].mxu0 %v14335_v60  ;;  %v14612_v60 = vpop.f32.mrb[9].mxu1  ;;  %10224 = vmatprep.subr.bf16.mxu1 %v14328_v29 }
 0x3bf   : > { %5368 = vmatprep.mubr.bf16.mxu0 %v2988_v26  ;;  %v12367_v58 = vpop.f32.mrb[10].mxu1 }
 0x3c0   : > { %v14619_v1 = vpop.f32.mrb[11].mxu1  ;;  %12429 = vmatpush3.bf16.msra.mxu0 %v13101_v50  ;;  %v2999_v58 = vrot.slane %v14416_v35, 4 }
 0x3c1   : > { %12430 = vmatprep.subr.bf16.mxu0 %v13102_v42 }
 0x3c4   : > { %12431 = vmatpush3.bf16.msra.mxu0 %v13102_v42  ;;  %v12370_v54 = vpop.f32.mrb[12].mxu1 }
 0x3c5   : > { %v14639_v6 = vpop.f32.mrb[13].mxu1 }
 0x3c6   : > { %5369 = vmatmul.mubr.bf16.gmra.mrb[60].mxu0 %v14343_v62  ;;  %v13103_v62 = vld [vmem:[%s16382_s3 + $0x230] sm:$0xff]   ;;  %v12371_v48 = vpop.f32.mrb[14].mxu1 }
 0x3c7   : > { %5376 = vmatprep.mubr.bf16.mxu0 %v2990_v59  ;;  %12432 = vmatprep.subr.bf16.mxu0 %v13103_v62  ;;  %v14642_v56 = vpop.f32.mrb[15].mxu1 }
 0x3c8   : > { %12433 = vmatpush3.bf16.msra.mxu0 %v13103_v62  ;;  %v3003_v62 = vrot.slane %v14446_v41, 4 }
 0x3c9   : > { %v5129_v18 = vpop.f32.mrb[232].mxu0 }
 0x3ca   : > { %v5131_v63 = vpop.f32.mrb[233].mxu0 }
 0x3cb   : > { %v5132_v11 = vpop.f32.mrb[234].mxu0  ;;  %v13106_v63 = vld [vmem:[%s16382_s3 + $0x98] sm:$0xff]  }
 0x3cc   : > { %v5134_v9 = vpop.f32.mrb[235].mxu0  ;;  %10225 = vmatpush1.bf16.msra.mxu1 %v13106_v63 }
 0x3cd   : > { %10226 = vmatprep.subr.bf16.mxu1 %v14328_v29 }
 0x3ce   : > { %5377 = vmatmul.mubr.bf16.gmra.mrb[64].mxu0 %v14366_v14  ;;  %v13105_v14 = vld [vmem:[%s16382_s3 + $0x238] sm:$0xff]  }
 0x3cf   : > { %5384 = vmatprep.mubr.bf16.mxu0 %v2992_v39  ;;  %12434 = vmatprep.subr.bf16.mxu0 %v13105_v14 }
 0x3d0   : > { %12435 = vmatpush3.bf16.msra.mxu0 %v13105_v14 }
 0x3d5   : > { %v12374_v37 = vpop.f32.mrb[16].mxu1 }
 0x3d6   : > { %5385 = vmatmul.mubr.bf16.gmra.mrb[68].mxu0 %v14374_v15  ;;  %v2997_v15 = vrot.slane %v14412_v7, 4  ;;  %v14653_v30 = vpop.f32.mrb[17].mxu1  ;;  %v14693_v37 = vld [vmem:[#allocation2] sm:$0xff] }
 0x3d7   : > { %5392 = vmatprep.mubr.bf16.mxu0 %v2994_v33  ;;  %v12375_v59 = vpop.f32.mrb[18].mxu1  ;;  %v13107_v33 = vld [vmem:[%s16382_s3 + $0xa0] sm:$0xff]  }
 0x3d8   : > { %v2998_v20 = vsel %vm992_vm0, %v2995_v5, %v2997_v15  ;;  %v3000_v42 = vsel %vm992_vm0, %v2997_v15, %v2999_v58  ;;  %10227 = vmatpush1.bf16.msra.mxu1 %v13107_v33 }
 0x3d9   : > { %v5145_v44 = vpop.f32.mrb[236].mxu0  ;;  %10228 = vmatprep.subr.bf16.mxu1 %v14328_v29  ;;  %v13108_v29 = vld [vmem:[%s16382_s3 + $0xa8] sm:$0xff]  }
 0x3da   : > { %v5147_v61 = vpop.f32.mrb[237].mxu0 }
 0x3db   : > { %v5148_v26 = vpop.f32.mrb[238].mxu0  ;;  %v3007_v61 = vrot.slane %v14476_v55, 4 }
 0x3dc   : > { %v5150_v46 = vpop.f32.mrb[239].mxu0  ;;  %10229 = vmatpush1.bf16.msra.mxu1 %v13108_v29  ;;  %v2529_v29 = vld [vmem:[#allocation2 + $0x120] sm:$0xf] }
 0x3dd   : > { %10230 = vmatprep.subr.bf16.mxu1 %v14693_v37 }
 0x3de   : > { %5393 = vmatmul.mubr.bf16.gmra.mrb[72].mxu0 %v14395_v2  ;;  %v14656_v2 = vpop.f32.mrb[19].mxu1 }
 0x3df   : > { %5400 = vmatprep.mubr.bf16.mxu0 %v2996_v24 }
 0x3e6   : > { %5401 = vmatmul.mubr.bf16.gmra.mrb[76].mxu0 %v14404_v51  ;;  %v3001_v51 = vrot.slane %v14442_v8, 4  ;;  %v12378_v11 = vpop.f32.mrb[20].mxu1 }
 0x3e7   : > { %5408 = vmatprep.mubr.bf16.mxu0 %v2998_v20  ;;  %v14667_v9 = vpop.f32.mrb[21].mxu1 }
 0x3e8   : > { %v3002_v35 = vsel %vm992_vm0, %v2999_v58, %v3001_v51  ;;  %v12379_v39 = vpop.f32.mrb[22].mxu1  ;;  %v3004_v14 = vsel %vm992_vm0, %v3001_v51, %v3003_v62  ;;  %v3011_v58 = vrot.slane %v14501_v12, 4  ;;  %v3013_v12 = vrot.slane %v14514_v13, 4 }
 0x3e9   : > { %v5161_v50 = vpop.f32.mrb[240].mxu0 }
 0x3ea   : > { %v5163_v21 = vpop.f32.mrb[241].mxu0 }
 0x3eb   : > { %v5164_v18 = vpop.f32.mrb[242].mxu0 }
 0x3ec   : > { %v5166_v7 = vpop.f32.mrb[243].mxu0 }
 0x3ee   : > { %5409 = vmatmul.mubr.bf16.gmra.mrb[80].mxu0 %v14425_v34  ;;  %v14670_v34 = vpop.f32.mrb[23].mxu1 }
 0x3ef   : > { %5416 = vmatprep.mubr.bf16.mxu0 %v3000_v42  ;;  %v14708_v42 = vld [vmem:[%s16381_s2] ss:$0 sm:$0xff] }
 0x3f6   : > { %5417 = vmatmul.mubr.bf16.gmra.mrb[84].mxu0 %v14434_v38  ;;  %v3005_v38 = vrot.slane %v14472_v28, 4 }
 0x3f7   : > { %5424 = vmatprep.mubr.bf16.mxu0 %v3002_v35 }
 0x3f8   : > { %v3006_v41 = vsel %vm992_vm0, %v3003_v62, %v3005_v38  ;;  %v3008_v16 = vsel %vm992_vm0, %v3005_v38, %v3007_v61 }
 0x3f9   : > { %v5177_v32 = vpop.f32.mrb[244].mxu0 }
 0x3fa   : > { %v5179_v27 = vpop.f32.mrb[245].mxu0 }
 0x3fb   : > { %v5180_v54 = vpop.f32.mrb[246].mxu0  ;;  %v12382_v48 = vpop.f32.mrb[24].mxu1  ;;  %v3014_v27 = vsel %vm992_vm0, %v3011_v58, %v3013_v12 }
 0x3fc   : > { %v5182_v8 = vpop.f32.mrb[247].mxu0  ;;  %v14681_v5 = vpop.f32.mrb[25].mxu1  ;;  %v3015_v48 = vrot.slane %v14518_v52, 4  ;;  %v13110_v52 = vld [vmem:[%s16382_s3 + $0xb8] sm:$0xff]  }
 0x3fd   : > { %v12383_v44 = vpop.f32.mrb[26].mxu1 }
 0x3fe   : > { %5425 = vmatmul.mubr.bf16.gmra.mrb[88].mxu0 %v14455_v47  ;;  %v14684_v47 = vpop.f32.mrb[27].mxu1 }
 0x3ff   : > { %5432 = vmatprep.mubr.bf16.mxu0 %v3004_v14 }
 0x406   : > { %5433 = vmatmul.mubr.bf16.gmra.mrb[92].mxu0 %v14464_v57  ;;  %v3009_v57 = vrot.slane %v14497_v10, 4 }
 0x407   : > { %5440 = vmatprep.mubr.bf16.mxu0 %v3006_v41  ;;  %v12386_v15 = vpop.f32.mrb[28].mxu1 }
 0x408   : > { %v3010_v55 = vsel %vm992_vm0, %v3007_v61, %v3009_v57  ;;  %v14697_v20 = vpop.f32.mrb[29].mxu1  ;;  %v3012_v7 = vsel %vm992_vm0, %v3009_v57, %v3011_v58  ;;  %v3018_v58 = vsel %vm992_vm0, %v3015_v48, %v14570_v22 }
 0x409   : > { %v5193_v26 = vpop.f32.mrb[248].mxu0 }
 0x40a   : > { %v5195_v46 = vpop.f32.mrb[249].mxu0 }
 0x40b   : > { %v5196_v24 = vpop.f32.mrb[250].mxu0 }
 0x40c   : > { %v5198_v28 = vpop.f32.mrb[251].mxu0  ;;  %v3016_v24 = vsel %vm992_vm0, %v3013_v12, %v3015_v48 }
 0x40e   : > { %5441 = vmatmul.mubr.bf16.gmra.mrb[96].mxu0 %v14485_v53  ;;  %v12387_v53 = vpop.f32.mrb[30].mxu1 }
 0x40f   : > { %5448 = vmatprep.mubr.bf16.mxu0 %v3008_v16  ;;  %v14700_v59 = vpop.f32.mrb[31].mxu1 }
 0x416   : > { %5449 = vmatmul.mubr.bf16.gmra.mrb[100].mxu0 %v14494_v49  ;;  %v13109_v49 = vld [vmem:[%s16382_s3 + $0xb0] sm:$0xff]  }
 0x417   : > { %5456 = vmatprep.mubr.bf16.mxu0 %v3010_v55  ;;  %10231 = vmatpush1.bf16.msra.mxu1 %v13109_v49 }
 0x418   : > { %10232 = vmatprep.subr.bf16.mxu1 %v14693_v37 }
 0x419   : > { %v5209_v50 = vpop.f32.mrb[252].mxu0 }
 0x41a   : > { %v5211_v10 = vpop.f32.mrb[253].mxu0  ;;  %v2922_v50 = vld [vmem:[#allocation2 + $0x120] sm:$0xf] }
 0x41b   : > { %v5212_v21 = vpop.f32.mrb[254].mxu0  ;;  %v12390_v35 = vpop.f32.mrb[32].mxu1  ;;  %10233 = vmatpush1.bf16.msra.mxu1 %v13110_v52 }
 0x41c   : > { %v5214_v18 = vpop.f32.mrb[255].mxu0  ;;  %v14719_v54 = vpop.f32.mrb[33].mxu1  ;;  %10234 = vmatprep.subr.bf16.mxu1 %v14693_v37  ;;  %v2818_v21 = vshrl.u32 %v2529_v29, 16 }
 0x41d   : > { %v12391_v8 = vpop.f32.mrb[34].mxu1  ;;  %v2821_v18 = vshll.u32 %v2529_v29, 16 }
 0x41e   : > { %5457 = vmatmul.mubr.bf16.gmra.mrb[104].mxu0 %v14523_v25  ;;  %v14723_v14 = vpop.f32.mrb[35].mxu1 }
 0x41f   : > { %5464 = vmatprep.mubr.bf16.mxu0 %v3012_v7  ;;  %v2823_v8 = vrot.slane %v2821_v18, 4 }
 0x421   : > { %v5250_v63 = vpop.f32.mrb[0].mxu0 }
 0x422   : > { %v12516_v51 = vadd.f32 %v14708_v42, %v5250_v63  ;;  %v5252_v11 = vpop.f32.mrb[1].mxu0 }
 0x423   : > { %v5253_v25 = vpop.f32.mrb[2].mxu0  ;;  %v3019_v11 = vrot.slane %v2922_v50, 4 }
 0x424   : > { %v5540_v39 = vadd.f32 %v12516_v51, %v14538_v19  ;;  %v12517_v62 = vadd.f32 %v14708_v42, %v5253_v25  ;;  %v5255_v32 = vpop.f32.mrb[3].mxu0 }
 0x426   : > { %v5543_v13 = vadd.f32 %v12517_v62, %v14544_v45  ;;  %5465 = vmatmul.mubr.bf16.gmra.mrb[108].mxu0 %v14534_v23  ;;  %v5794_v33 = vmax.f32 %v5540_v39, 0.0 }
 0x427   : > { %5472 = vmatprep.mubr.bf16.mxu0 %v3014_v27 }
 0x428   : > { %v5795_v38 = vmax.f32 %v5543_v13, 0.0 }
 0x429   : > { %v5258_v19 = vpop.f32.mrb[4].mxu0 }
 0x42a   : > { %v5922_v41 = vpack.c.bf16 %v5795_v38, %v5794_v33  ;;  %v5260_v44 = vpop.f32.mrb[5].mxu0 }
 0x42b   : > { %v5261_v61 = vpop.f32.mrb[6].mxu0 }
 0x42c   : > { %v5986_v26 = vrot.slane %v5922_v41, 4  ;;  %v5263_v46 = vpop.f32.mrb[7].mxu0 }
 0x42d   : > { %v3020_v46 = vsel %vm992_vm0, %v14570_v22, %v3019_v11 }
 0x42e   : > { %v14729_v45 = vsel %vm992_vm0, %v5986_v26, %v14552_v4  ;;  %6082 = vst [vmem:[#allocation2 + $0x10] sm:$0xf0] %v5986_v26  ;;  %5473 = vmatmul.mubr.bf16.gmra.mrb[112].mxu0 %v14558_v40 }
 0x42f   : > { %6083 = vst [vmem:[#allocation2 + $0x18] sm:$0xff] %v14729_v45  ;;  %5480 = vmatprep.mubr.bf16.mxu0 %v3016_v24  ;;  %v6175_v38 = vshrl.u32 %v14729_v45, 16  ;;  %v6178_v41 = vshll.u32 %v14729_v45, 16  ;;  %v6579_v26 = vrot.slane %v14729_v45, 4 }
 0x430   : > { %v12394_v57 = vpop.f32.mrb[36].mxu1 }
 0x431   : > { %v5266_v23 = vpop.f32.mrb[8].mxu0  ;;  %v14742_v7 = vpop.f32.mrb[37].mxu1 }
 0x432   : > { %v12518_v28 = vadd.f32 %v14708_v42, %v5266_v23  ;;  %v5268_v16 = vpop.f32.mrb[9].mxu0  ;;  %v12395_v51 = vpop.f32.mrb[38].mxu1 }
 0x433   : > { %v5269_v15 = vpop.f32.mrb[10].mxu0  ;;  %v14746_v35 = vpop.f32.mrb[39].mxu1  ;;  %v6177_v16 = vrot.slane %v6175_v38, 3 }
 0x434   : > { %v5556_v55 = vadd.f32 %v12518_v28, %v14577_v31  ;;  %v12519_v40 = vadd.f32 %v14708_v42, %v5269_v15  ;;  %v5271_v53 = vpop.f32.mrb[11].mxu0 }
 0x435   : > { %v6510_v10 = vld [vmem:[#allocation2 + $0x10] sm:$0xff] }
 0x436   : > { %v5559_v49 = vadd.f32 %v12519_v40, %v14585_v43  ;;  %5481 = vmatmul.mubr.bf16.gmra.mrb[116].mxu0 %v14575_v17  ;;  %v6577_v12 = vrot.slane %v6510_v10, 4  ;;  %v6166_v63 = vshrl.u32 %v6510_v10, 16  ;;  %v6169_v31 = vshll.u32 %v6510_v10, 16 }
 0x437   : > { %5488 = vmatprep.mubr.bf16.mxu0 %v3018_v58  ;;  %v5798_v25 = vmax.f32 %v5556_v55, 0.0  ;;  %v2820_v43 = vrot.slane %v2818_v21, 3 }
 0x438   : > { %v5799_v39 = vmax.f32 %v5559_v49, 0.0  ;;  %v6578_v62 = vsel %vm992_vm0, %v14570_v22, %v6577_v12  ;;  %v6168_v32 = vrot.slane %v6166_v63, 3  ;;  %v6171_v13 = vrot.slane %v6169_v31, 4 }
 0x439   : > { %v5274_v27 = vpop.f32.mrb[12].mxu0  ;;  %9969 = vmatprep.mubr.bf16.mxu1 %v6578_v62  ;;  %v2824_v52 = vor.u32 %v2823_v8, %v2820_v43  ;;  %v6580_v45 = vsel %vm992_vm0, %v6577_v12, %v6579_v26  ;;  %v6180_v22 = vrot.slane %v6178_v41, 4 }
 0x43a   : > { %v5924_v17 = vpack.c.bf16 %v5799_v39, %v5798_v25  ;;  %v5276_v33 = vpop.f32.mrb[13].mxu0  ;;  %v6172_v19 = vor.u32 %v6171_v13, %v6168_v32 }
 0x43b   : > { %v5277_v48 = vpop.f32.mrb[14].mxu0  ;;  %v2825_v50 = vsel %vm565_vm1, %v14572_v36, %v2824_v52  ;;  %v6181_v12 = vor.u32 %v6180_v22, %v6177_v16 }
 0x43c   : > { %v5989_v44 = vrot.slane %v5924_v17, 4  ;;  %v5279_v61 = vpop.f32.mrb[15].mxu0  ;;  %v6173_v24 = vsel %vm565_vm1, %v14572_v36, %v6172_v19 }
 0x43d   : > { %9970 = vmatmul.mubr.bf16.gmra.mrb[68].mxu1 %v6173_v24  ;;  %v6182_v36 = vsel %vm565_vm1, %v6172_v19, %v6181_v12 }
 0x43e   : > { %v14759_v23 = vsel %vm992_vm0, %v14552_v4, %v5989_v44  ;;  %v14763_v28 = vsel %vm992_vm0, %v5989_v44, %v14552_v4  ;;  %5489 = vmatmul.mubr.bf16.gmra.mrb[120].mxu0 %v14602_v3  ;;  %9977 = vmatprep.mubr.bf16.mxu1 %v6580_v45  ;;  %v13111_v3 = vld [vmem:[%s16382_s3 + $0xc0] sm:$0xff]  }
 0x43f   : > { %6085 = vst [vmem:[#allocation2 + $0x28] sm:$0xff] %v14763_v28  ;;  %6084 = vst [vmem:[#allocation2 + $0x20] sm:$0xff] %v14759_v23  ;;  %v6581_v29 = vrot.slane %v14759_v23, 4  ;;  %5496 = vmatprep.mubr.bf16.mxu0 %v3020_v46  ;;  %v6184_v57 = vshrl.u32 %v14759_v23, 16  ;;  %v6187_v15 = vshll.u32 %v14759_v23, 16  ;;  %10235 = vmatpush1.bf16.msra.mxu1 %v13111_v3  ;;  %v8707_v51 = vshrl.u32 %v14763_v28, 16 }
 0x440   : > { %v12398_v18 = vpop.f32.mrb[40].mxu1  ;;  %10236 = vmatprep.subr.bf16.mxu1 %v14693_v37  ;;  %v8710_v31 = vshll.u32 %v14763_v28, 16 }
 0x441   : > { %v5282_v55 = vpop.f32.mrb[16].mxu0  ;;  %v6582_v40 = vsel %vm992_vm0, %v6579_v26, %v6581_v29  ;;  %v6186_v53 = vrot.slane %v6184_v57, 3  ;;  %v6189_v58 = vrot.slane %v6187_v15, 4  ;;  %v14789_v32 = vpop.f32.mrb[41].mxu1  ;;  %v6195_v22 = vrot.slane %v8707_v51, 3 }
 0x442   : > { %v12520_v10 = vadd.f32 %v14708_v42, %v5282_v55  ;;  %v5284_v21 = vpop.f32.mrb[17].mxu0  ;;  %v12399_v43 = vpop.f32.mrb[42].mxu1  ;;  %v8712_v33 = vrot.slane %v8710_v31, 5  ;;  %v6198_v57 = vrot.slane %v8710_v31, 4 }
 0x443   : > { %v5285_v49 = vpop.f32.mrb[18].mxu0  ;;  %v14780_v63 = vor.u32 %v6189_v58, %v6186_v53  ;;  %v14792_v38 = vpop.f32.mrb[43].mxu1 }
 0x444   : > { %v5572_v11 = vadd.f32 %v12520_v10, %v14612_v60  ;;  %v12521_v25 = vadd.f32 %v14708_v42, %v5285_v49  ;;  %v5287_v39 = vpop.f32.mrb[19].mxu0  ;;  %v8709_v60 = vrot.slane %v8707_v51, 4  ;;  %v6199_v10 = vor.u32 %v6198_v57, %v6195_v22 }
 0x445   : > { %v6191_v62 = vsel %vm565_vm1, %v6181_v12, %v14780_v63  ;;  %9978 = vmatmul.mubr.bf16.gmra.mrb[72].mxu1 %v6182_v36 }
 0x446   : > { %v5575_v27 = vadd.f32 %v12521_v25, %v14619_v1  ;;  %5497 = vmatmul.mubr.bf16.gmra.mrb[124].mxu0 %v2825_v50  ;;  %v8665_v13 = vld [vmem:[#allocation2 + $0x20] sm:$0xf0]  ;;  %9985 = vmatprep.mubr.bf16.mxu1 %v6582_v40  ;;  %v5802_v48 = vmax.f32 %v5572_v11, 0.0  ;;  %v6583_v1 = vrot.slane %v14763_v28, 4  ;;  %v8713_v23 = vor.u32 %v8712_v33, %v8709_v60  ;;  %v13112_v50 = vld [vmem:[%s16382_s3 + $0xc8] sm:$0xff]  }
 0x447   : > { %v8699_v8 = vshrl.u32 %v8665_v13, 16  ;;  %v8702_v17 = vshll.u32 %v8665_v13, 16  ;;  %10237 = vmatpush1.bf16.msra.mxu1 %v13112_v50 }
 0x448   : > { %v5803_v19 = vmax.f32 %v5575_v27, 0.0  ;;  %v6584_v28 = vsel %vm992_vm0, %v6581_v29, %v6583_v1  ;;  %10238 = vmatprep.subr.bf16.mxu1 %v14693_v37 }
 0x449   : > { %v5290_v41 = vpop.f32.mrb[20].mxu0  ;;  %v8701_v44 = vrot.slane %v8699_v8, 4  ;;  %v8704_v61 = vrot.slane %v8702_v17, 5 }
 0x44a   : > { %v5926_v26 = vpack.c.bf16 %v5803_v19, %v5802_v48  ;;  %v5292_v46 = vpop.f32.mrb[21].mxu0  ;;  %v6200_v19 = vsel %vm565_vm1, %v14780_v63, %v6199_v10 }
 0x44b   : > { %v5293_v24 = vpop.f32.mrb[22].mxu0  ;;  %v8705_v52 = vor.u32 %v8704_v61, %v8701_v44 }
 0x44c   : > { %v5993_v45 = vrot.slane %v5926_v26, 4  ;;  %v5295_v16 = vpop.f32.mrb[23].mxu0 }
 0x44d   : > { %v8714_v15 = vsel %vm1155_vm2, %v8705_v52, %v8713_v23  ;;  %9986 = vmatmul.mubr.bf16.gmra.mrb[76].mxu1 %v6191_v62 }
 0x44e   : > { %v14798_v3 = vsel %vm992_vm0, %v14552_v4, %v5993_v45  ;;  %v14802_v55 = vsel %vm992_vm0, %v5993_v45, %v14552_v4  ;;  %12436 = vmatprep.mubr.bf16.mxu0 %v8714_v15  ;;  %9993 = vmatprep.mubr.bf16.mxu1 %v6584_v28 }
 0x44f   : > { %6086 = vst [vmem:[#allocation2 + $0x30] sm:$0xff] %v14798_v3  ;;  %6087 = vst [vmem:[#allocation2 + $0x38] sm:$0xff] %v14802_v55  ;;  %v8716_v40 = vshrl.u32 %v14798_v3, 16  ;;  %v8719_v53 = vshll.u32 %v14798_v3, 16  ;;  %v6585_v58 = vrot.slane %v14798_v3, 4  ;;  %v8725_v21 = vshrl.u32 %v14802_v55, 16 }
 0x450   : > { %v8728_v29 = vshll.u32 %v14802_v55, 16  ;;  %v12402_v62 = vpop.f32.mrb[44].mxu1  ;;  %v6587_v16 = vrot.slane %v14802_v55, 4 }
 0x451   : > { %v8718_v18 = vrot.slane %v8716_v40, 4  ;;  %v8721_v49 = vrot.slane %v8719_v53, 5  ;;  %v5298_v12 = vpop.f32.mrb[24].mxu0  ;;  %v6586_v51 = vsel %vm992_vm0, %v6583_v1, %v6585_v58  ;;  %v6204_v31 = vrot.slane %v8716_v40, 3  ;;  %v14823_v44 = vpop.f32.mrb[45].mxu1 }
 0x452   : > { %v12522_v11 = vadd.f32 %v14708_v42, %v5298_v12  ;;  %v5300_v25 = vpop.f32.mrb[25].mxu0  ;;  %v6207_v39 = vrot.slane %v8719_v53, 4  ;;  %v8727_v36 = vrot.slane %v8725_v21, 4  ;;  %v8730_v43 = vrot.slane %v8728_v29, 5  ;;  %v12403_v46 = vpop.f32.mrb[46].mxu1 }
 0x453   : > { %v8722_v27 = vor.u32 %v8721_v49, %v8718_v18  ;;  %v5301_v13 = vpop.f32.mrb[26].mxu0  ;;  %v14828_v1 = vpop.f32.mrb[47].mxu1  ;;  %v6213_v15 = vrot.slane %v8725_v21, 3  ;;  %v6216_v3 = vrot.slane %v8728_v29, 4  ;;  %v6588_v53 = vsel %vm992_vm0, %v6585_v58, %v6587_v16  ;;  %v13113_v21 = vld [vmem:[%s16382_s3 + $0xd0] sm:$0xff]  }
 0x454   : > { %v5588_v8 = vadd.f32 %v12522_v11, %v14639_v6  ;;  %v12523_v17 = vadd.f32 %v14708_v42, %v5301_v13  ;;  %v5303_v60 = vpop.f32.mrb[27].mxu0  ;;  %v6208_v33 = vor.u32 %v6207_v39, %v6204_v31  ;;  %v8731_v41 = vor.u32 %v8730_v43, %v8727_v36  ;;  %10239 = vmatpush1.bf16.msra.mxu1 %v13113_v21 }
 0x455   : > { %v8723_v48 = vsel %vm1155_vm2, %v8713_v23, %v8722_v27  ;;  %9994 = vmatmul.mubr.bf16.gmra.mrb[80].mxu1 %v6200_v19  ;;  %v6217_v29 = vor.u32 %v6216_v3, %v6213_v15  ;;  %10240 = vmatprep.subr.bf16.mxu1 %v14693_v37 }
 0x456   : > { %v5591_v61 = vadd.f32 %v12523_v17, %v14642_v56  ;;  %v6209_v26 = vsel %vm565_vm1, %v6199_v10, %v6208_v33  ;;  %12437 = vmatmul.mubr.bf16.vlgmr.msra.gmra.mrb[128].mxu0 %v8723_v48  ;;  %10001 = vmatprep.mubr.bf16.mxu1 %v6586_v51  ;;  %v8732_v6 = vsel %vm1155_vm2, %v8722_v27, %v8731_v41  ;;  %v5806_v24 = vmax.f32 %v5588_v8, 0.0 }
 0x457   : > { %12440 = vmatprep.mubr.bf16.mxu0 %v8732_v6 }
 0x458   : > { %v5807_v52 = vmax.f32 %v5591_v61, 0.0 }
 0x459   : > { %v5306_v23 = vpop.f32.mrb[28].mxu0 }
 0x45a   : > { %v5928_v63 = vpack.c.bf16 %v5807_v52, %v5806_v24  ;;  %v5308_v45 = vpop.f32.mrb[29].mxu0 }
 0x45b   : > { %v5309_v22 = vpop.f32.mrb[30].mxu0 }
 0x45c   : > { %v5997_v56 = vrot.slane %v5928_v63, 4  ;;  %v5311_v57 = vpop.f32.mrb[31].mxu0 }
 0x45d   : > { %10002 = vmatmul.mubr.bf16.gmra.mrb[84].mxu1 %v6209_v26  ;;  %v6218_v26 = vsel %vm565_vm1, %v6208_v33, %v6217_v29 }
 0x45e   : > { %v5998_v28 = vsel %vm992_vm0, %v14552_v4, %v5997_v56  ;;  %v14835_v40 = vsel %vm992_vm0, %v5997_v56, %v14552_v4  ;;  %10009 = vmatprep.mubr.bf16.mxu1 %v6588_v53 }
 0x45f   : > { %6088 = vst [vmem:[#allocation2 + $0x40] sm:$0xff] %v5998_v28  ;;  %6089 = vst [vmem:[#allocation2 + $0x48] sm:$0xff] %v14835_v40  ;;  %v8734_v55 = vshrl.u32 %v5998_v28, 16  ;;  %v8737_v50 = vshll.u32 %v5998_v28, 16  ;;  %v6589_v10 = vrot.slane %v5998_v28, 4  ;;  %v8743_v18 = vshrl.u32 %v14835_v40, 16 }
 0x460   : > { %v8746_v49 = vshll.u32 %v14835_v40, 16  ;;  %v12406_v27 = vpop.f32.mrb[48].mxu1  ;;  %v6591_v56 = vrot.slane %v14835_v40, 4 }
 0x461   : > { %v8736_v12 = vrot.slane %v8734_v55, 4  ;;  %v8739_v51 = vrot.slane %v8737_v50, 5  ;;  %v5314_v31 = vpop.f32.mrb[32].mxu0  ;;  %v6590_v58 = vsel %vm992_vm0, %v6587_v16, %v6589_v10  ;;  %v6222_v11 = vrot.slane %v8734_v55, 3  ;;  %v14853_v6 = vpop.f32.mrb[49].mxu1 }
 0x462   : > { %v12524_v25 = vadd.f32 %v14708_v42, %v5314_v31  ;;  %v5316_v39 = vpop.f32.mrb[33].mxu0  ;;  %v6225_v36 = vrot.slane %v8737_v50, 4  ;;  %v8745_v62 = vrot.slane %v8743_v18, 4  ;;  %v8748_v8 = vrot.slane %v8746_v49, 5 }
 0x463   : > { %v8740_v13 = vor.u32 %v8739_v51, %v8736_v12  ;;  %v5317_v43 = vpop.f32.mrb[34].mxu0  ;;  %v6231_v3 = vrot.slane %v8743_v18, 3  ;;  %v6234_v28 = vrot.slane %v8746_v49, 4  ;;  %v6592_v50 = vsel %vm992_vm0, %v6589_v10, %v6591_v56  ;;  %v13114_v49 = vld [vmem:[%s16382_s3 + $0xd8] sm:$0xff]  }
 0x464   : > { %v5604_v17 = vadd.f32 %v12524_v25, %v14653_v30  ;;  %v12525_v60 = vadd.f32 %v14708_v42, %v5317_v43  ;;  %v5319_v48 = vpop.f32.mrb[35].mxu0  ;;  %v14849_v19 = vor.u32 %v6225_v36, %v6222_v11  ;;  %v8749_v46 = vor.u32 %v8748_v8, %v8745_v62  ;;  %v12407_v30 = vpop.f32.mrb[50].mxu1  ;;  %10241 = vmatpush1.bf16.msra.mxu1 %v13114_v49 }
 0x465   : > { %v8741_v61 = vsel %vm1155_vm2, %v8731_v41, %v8740_v13  ;;  %10010 = vmatmul.mubr.bf16.gmra.mrb[88].mxu1 %v6218_v26  ;;  %v14859_v63 = vpop.f32.mrb[51].mxu1  ;;  %v6235_v12 = vor.u32 %v6234_v28, %v6231_v3  ;;  %10242 = vmatprep.subr.bf16.mxu1 %v14693_v37 }
 0x466   : > { %v5607_v24 = vadd.f32 %v12525_v60, %v14656_v2  ;;  %v6227_v52 = vsel %vm565_vm1, %v6217_v29, %v14849_v19  ;;  %12441 = vmatmul.mubr.bf16.gmra.mrb[132].mxu0 %v8741_v61  ;;  %10017 = vmatprep.mubr.bf16.mxu1 %v6590_v58  ;;  %v8750_v23 = vsel %vm1155_vm2, %v8740_v13, %v8749_v46  ;;  %v5810_v45 = vmax.f32 %v5604_v17, 0.0 }
 0x467   : > { %12444 = vmatprep.mubr.bf16.mxu0 %v8750_v23 }
 0x468   : > { %v5811_v41 = vmax.f32 %v5607_v24, 0.0 }
 0x469   : > { %v5322_v33 = vpop.f32.mrb[36].mxu0  ;;  %v12410_v21 = vpop.f32.mrb[52].mxu1 }
 0x46a   : > { %v5930_v16 = vpack.c.bf16 %v5811_v41, %v5810_v45  ;;  %v5324_v22 = vpop.f32.mrb[37].mxu0  ;;  %v14882_v36 = vpop.f32.mrb[53].mxu1  ;;  %v6236_v45 = vsel %vm565_vm1, %v14849_v19, %v6235_v12 }
 0x46b   : > { %v5325_v2 = vpop.f32.mrb[38].mxu0  ;;  %v12411_v8 = vpop.f32.mrb[54].mxu1 }
 0x46c   : > { %v6001_v57 = vrot.slane %v5930_v16, 4  ;;  %v5327_v15 = vpop.f32.mrb[39].mxu0  ;;  %v14886_v61 = vpop.f32.mrb[55].mxu1 }
 0x46d   : > { %10018 = vmatmul.mubr.bf16.gmra.mrb[92].mxu1 %v6227_v52 }
 0x46e   : > { %v14864_v53 = vsel %vm992_vm0, %v14552_v4, %v6001_v57  ;;  %v14868_v55 = vsel %vm992_vm0, %v6001_v57, %v14552_v4  ;;  %10025 = vmatprep.mubr.bf16.mxu1 %v6592_v50 }
 0x46f   : > { %6090 = vst [vmem:[#allocation2 + $0x50] sm:$0xff] %v14864_v53  ;;  %6091 = vst [vmem:[#allocation2 + $0x58] sm:$0xff] %v14868_v55  ;;  %v8752_v40 = vshrl.u32 %v14864_v53, 16  ;;  %v8755_v29 = vshll.u32 %v14864_v53, 16  ;;  %v6593_v18 = vrot.slane %v14864_v53, 4  ;;  %v8761_v51 = vshrl.u32 %v14868_v55, 16 }
 0x470   : > { %v8764_v10 = vshll.u32 %v14868_v55, 16  ;;  %v6595_v3 = vrot.slane %v14868_v55, 4 }
 0x471   : > { %v8754_v31 = vrot.slane %v8752_v40, 4  ;;  %v8757_v58 = vrot.slane %v8755_v29, 5  ;;  %v5330_v11 = vpop.f32.mrb[40].mxu0  ;;  %v6594_v25 = vsel %vm992_vm0, %v6591_v56, %v6593_v18  ;;  %v6240_v39 = vrot.slane %v8752_v40, 3 }
 0x472   : > { %v12526_v62 = vadd.f32 %v14708_v42, %v5330_v11  ;;  %v5332_v27 = vpop.f32.mrb[41].mxu0  ;;  %v6243_v13 = vrot.slane %v8755_v29, 4  ;;  %v8763_v43 = vrot.slane %v8761_v51, 4  ;;  %v8766_v48 = vrot.slane %v8764_v10, 5 }
 0x473   : > { %v8758_v17 = vor.u32 %v8757_v58, %v8754_v31  ;;  %v5333_v60 = vpop.f32.mrb[42].mxu0  ;;  %v12414_v22 = vpop.f32.mrb[56].mxu1  ;;  %v6249_v40 = vrot.slane %v8761_v51, 3  ;;  %v6252_v29 = vrot.slane %v8764_v10, 4  ;;  %v6596_v31 = vsel %vm992_vm0, %v6593_v18, %v6595_v3  ;;  %v13115_v51 = vld [vmem:[%s16382_s3 + $0xe0] sm:$0xff]  }
 0x474   : > { %v5620_v26 = vadd.f32 %v12526_v62, %v14667_v9  ;;  %v12527_v24 = vadd.f32 %v14708_v42, %v5333_v60  ;;  %v5335_v52 = vpop.f32.mrb[43].mxu0  ;;  %v14890_v30 = vor.u32 %v6243_v13, %v6240_v39  ;;  %v8767_v41 = vor.u32 %v8766_v48, %v8763_v43  ;;  %10243 = vmatpush1.bf16.msra.mxu1 %v13115_v51 }
 0x475   : > { %v8759_v23 = vsel %vm1155_vm2, %v8749_v46, %v8758_v17  ;;  %10026 = vmatmul.mubr.bf16.gmra.mrb[96].mxu1 %v6236_v45  ;;  %v14899_v46 = vpop.f32.mrb[57].mxu1  ;;  %10244 = vmatprep.subr.bf16.mxu1 %v14693_v37 }
 0x476   : > { %v5623_v33 = vadd.f32 %v12527_v24, %v14670_v34  ;;  %v6245_v16 = vsel %vm565_vm1, %v6235_v12, %v14890_v30  ;;  %12445 = vmatmul.mubr.bf16.gmra.mrb[136].mxu0 %v8759_v23  ;;  %10033 = vmatprep.mubr.bf16.mxu1 %v6594_v25  ;;  %v8768_v9 = vsel %vm1155_vm2, %v8758_v17, %v8767_v41  ;;  %v5814_v56 = vmax.f32 %v5620_v26, 0.0  ;;  %v12415_v34 = vpop.f32.mrb[58].mxu1 }
 0x477   : > { %12448 = vmatprep.mubr.bf16.mxu0 %v8768_v9  ;;  %v14902_v53 = vpop.f32.mrb[59].mxu1  ;;  %v6253_v25 = vor.u32 %v6252_v29, %v6249_v40 }
 0x478   : > { %v5815_v2 = vmax.f32 %v5623_v33, 0.0 }
 0x479   : > { %v5338_v57 = vpop.f32.mrb[44].mxu0 }
 0x47a   : > { %v5932_v15 = vpack.c.bf16 %v5815_v2, %v5814_v56  ;;  %v5340_v19 = vpop.f32.mrb[45].mxu0 }
 0x47b   : > { %v5341_v28 = vpop.f32.mrb[46].mxu0  ;;  %v12418_v10 = vpop.f32.mrb[60].mxu1 }
 0x47c   : > { %v6005_v50 = vrot.slane %v5932_v15, 4  ;;  %v5343_v21 = vpop.f32.mrb[47].mxu0  ;;  %v14918_v17 = vpop.f32.mrb[61].mxu1  ;;  %v6254_v15 = vsel %vm565_vm1, %v14890_v30, %v6253_v25 }
 0x47d   : > { %10034 = vmatmul.mubr.bf16.gmra.mrb[100].mxu1 %v6245_v16  ;;  %v12419_v52 = vpop.f32.mrb[62].mxu1 }
 0x47e   : > { %v6006_v49 = vsel %vm992_vm0, %v14552_v4, %v6005_v50  ;;  %v14908_v12 = vsel %vm992_vm0, %v6005_v50, %v14552_v4  ;;  %10041 = vmatprep.mubr.bf16.mxu1 %v6596_v31  ;;  %v14922_v16 = vpop.f32.mrb[63].mxu1 }
 0x47f   : > { %6092 = vst [vmem:[#allocation2 + $0x60] sm:$0xff] %v6006_v49  ;;  %6093 = vst [vmem:[#allocation2 + $0x68] sm:$0xff] %v14908_v12  ;;  %v8770_v55 = vshrl.u32 %v6006_v49, 16  ;;  %v8773_v58 = vshll.u32 %v6006_v49, 16  ;;  %v6597_v11 = vrot.slane %v6006_v49, 4  ;;  %v8779_v39 = vshrl.u32 %v14908_v12, 16 }
 0x480   : > { %v8782_v62 = vshll.u32 %v14908_v12, 16 }
 0x481   : > { %v8772_v27 = vrot.slane %v8770_v55, 4  ;;  %v8775_v13 = vrot.slane %v8773_v58, 5  ;;  %v5346_v18 = vpop.f32.mrb[48].mxu0  ;;  %v6598_v43 = vsel %vm992_vm0, %v6595_v3, %v6597_v11  ;;  %v6258_v8 = vrot.slane %v8770_v55, 3 }
 0x482   : > { %v12528_v60 = vadd.f32 %v14708_v42, %v5346_v18  ;;  %v5348_v48 = vpop.f32.mrb[49].mxu0  ;;  %v6261_v26 = vrot.slane %v8773_v58, 4  ;;  %v8781_v24 = vrot.slane %v8779_v39, 4  ;;  %v8784_v33 = vrot.slane %v8782_v62, 5 }
 0x483   : > { %v8776_v23 = vor.u32 %v8775_v13, %v8772_v27  ;;  %v5349_v45 = vpop.f32.mrb[50].mxu0  ;;  %v6267_v55 = vrot.slane %v8779_v39, 3  ;;  %v13116_v39 = vld [vmem:[%s16382_s3 + $0xe8] sm:$0xff]  }
 0x484   : > { %v5636_v9 = vadd.f32 %v12528_v60, %v14681_v5  ;;  %v12529_v22 = vadd.f32 %v14708_v42, %v5349_v45  ;;  %v5351_v56 = vpop.f32.mrb[51].mxu0  ;;  %v6262_v2 = vor.u32 %v6261_v26, %v6258_v8  ;;  %v8785_v19 = vor.u32 %v8784_v33, %v8781_v24  ;;  %10245 = vmatpush1.bf16.msra.mxu1 %v13116_v39  ;;  %v13117_v39 = vld [vmem:[%s16382_s3 + $0xf0] sm:$0xff]  }
 0x485   : > { %v8777_v57 = vsel %vm1155_vm2, %v8767_v41, %v8776_v23  ;;  %10042 = vmatmul.mubr.bf16.gmra.mrb[104].mxu1 %v6254_v15  ;;  %v6599_v41 = vrot.slane %v14908_v12, 4  ;;  %10246 = vmatprep.subr.bf16.mxu1 %v14693_v37 }
 0x486   : > { %v5639_v3 = vadd.f32 %v12529_v22, %v14684_v47  ;;  %v6263_v34 = vsel %vm565_vm1, %v6253_v25, %v6262_v2  ;;  %12449 = vmatmul.mubr.bf16.gmra.mrb[140].mxu0 %v8777_v57  ;;  %10049 = vmatprep.mubr.bf16.mxu1 %v6598_v43  ;;  %v8786_v28 = vsel %vm1155_vm2, %v8776_v23, %v8785_v19  ;;  %v5818_v5 = vmax.f32 %v5636_v9, 0.0 }
 0x487   : > { %12452 = vmatprep.mubr.bf16.mxu0 %v8786_v28  ;;  %v6270_v47 = vrot.slane %v8782_v62, 4  ;;  %v6600_v10 = vsel %vm992_vm0, %v6597_v11, %v6599_v41 }
 0x488   : > { %v5819_v50 = vmax.f32 %v5639_v3, 0.0  ;;  %10247 = vmatpush1.bf16.msra.mxu1 %v13117_v39 }
 0x489   : > { %v5354_v21 = vpop.f32.mrb[52].mxu0  ;;  %v6271_v62 = vor.u32 %v6270_v47, %v6267_v55  ;;  %10248 = vmatprep.subr.bf16.mxu1 %v14693_v37 }
 0x48a   : > { %v5934_v40 = vpack.c.bf16 %v5819_v50, %v5818_v5  ;;  %v5356_v29 = vpop.f32.mrb[53].mxu0 }
 0x48b   : > { %v5357_v49 = vpop.f32.mrb[54].mxu0 }
 0x48c   : > { %v6009_v30 = vrot.slane %v5934_v40, 4  ;;  %v5359_v31 = vpop.f32.mrb[55].mxu0 }
 0x48d   : > { %10050 = vmatmul.mubr.bf16.gmra.mrb[108].mxu1 %v6263_v34  ;;  %v6272_v34 = vsel %vm565_vm1, %v6262_v2, %v6271_v62 }
 0x48e   : > { %v6010_v58 = vsel %vm992_vm0, %v14552_v4, %v6009_v30  ;;  %v14937_v51 = vsel %vm992_vm0, %v6009_v30, %v14552_v4  ;;  %10057 = vmatprep.mubr.bf16.mxu1 %v6600_v10 }
 0x48f   : > { %6094 = vst [vmem:[#allocation2 + $0x70] sm:$0xff] %v6010_v58  ;;  %6095 = vst [vmem:[#allocation2 + $0x78] sm:$0xff] %v14937_v51  ;;  %v8788_v12 = vshrl.u32 %v6010_v58, 16  ;;  %v8791_v25 = vshll.u32 %v6010_v58, 16  ;;  %v6601_v27 = vrot.slane %v6010_v58, 4  ;;  %v8797_v13 = vshrl.u32 %v14937_v51, 16 }
 0x490   : > { %v8800_v18 = vshll.u32 %v14937_v51, 16 }
 0x491   : > { %v8790_v43 = vrot.slane %v8788_v12, 4  ;;  %v8793_v8 = vrot.slane %v8791_v25, 5  ;;  %v5362_v60 = vpop.f32.mrb[56].mxu0  ;;  %v6602_v11 = vsel %vm992_vm0, %v6599_v41, %v6601_v27  ;;  %v6276_v48 = vrot.slane %v8788_v12, 3 }
 0x492   : > { %v12530_v26 = vadd.f32 %v14708_v42, %v5362_v60  ;;  %v5364_v24 = vpop.f32.mrb[57].mxu0  ;;  %v6279_v52 = vrot.slane %v8791_v25, 4  ;;  %v8799_v23 = vrot.slane %v8797_v13, 4  ;;  %v8802_v9 = vrot.slane %v8800_v18, 5 }
 0x493   : > { %v8794_v45 = vor.u32 %v8793_v8, %v8790_v43  ;;  %v5365_v33 = vpop.f32.mrb[58].mxu0  ;;  %v6285_v55 = vrot.slane %v8797_v13, 3 }
 0x494   : > { %v5652_v22 = vadd.f32 %v12530_v26, %v14697_v20  ;;  %v12531_v56 = vadd.f32 %v14708_v42, %v5365_v33  ;;  %v5367_v57 = vpop.f32.mrb[59].mxu0  ;;  %v6280_v15 = vor.u32 %v6279_v52, %v6276_v48  ;;  %v8803_v28 = vor.u32 %v8802_v9, %v8799_v23 }
 0x495   : > { %v8795_v3 = vsel %vm1155_vm2, %v8785_v19, %v8794_v45  ;;  %10058 = vmatmul.mubr.bf16.gmra.mrb[112].mxu1 %v6272_v34  ;;  %v6603_v19 = vrot.slane %v14937_v51, 4 }
 0x496   : > { %v5655_v5 = vadd.f32 %v12531_v56, %v14700_v59  ;;  %v6281_v50 = vsel %vm565_vm1, %v6271_v62, %v6280_v15  ;;  %12453 = vmatmul.mubr.bf16.gmra.mrb[144].mxu0 %v8795_v3  ;;  %10065 = vmatprep.mubr.bf16.mxu1 %v6602_v11  ;;  %v8804_v21 = vsel %vm1155_vm2, %v8794_v45, %v8803_v28  ;;  %v5822_v40 = vmax.f32 %v5652_v22, 0.0 }
 0x497   : > { %12456 = vmatprep.mubr.bf16.mxu0 %v8804_v21  ;;  %v6288_v59 = vrot.slane %v8800_v18, 4  ;;  %v6604_v10 = vsel %vm992_vm0, %v6601_v27, %v6603_v19 }
 0x498   : > { %v5823_v20 = vmax.f32 %v5655_v5, 0.0 }
 0x499   : > { %v5370_v29 = vpop.f32.mrb[60].mxu0  ;;  %v6289_v62 = vor.u32 %v6288_v59, %v6285_v55 }
 0x49a   : > { %v5936_v41 = vpack.c.bf16 %v5823_v20, %v5822_v40  ;;  %v5372_v49 = vpop.f32.mrb[61].mxu0  ;;  %v13118_v40 = vld [vmem:[%s16382_s3 + $0xf8] sm:$0xff]  }
 0x49b   : > { %v5373_v30 = vpop.f32.mrb[62].mxu0  ;;  %v6290_v34 = vsel %vm565_vm1, %v6280_v15, %v6289_v62  ;;  %10249 = vmatpush1.bf16.msra.mxu1 %v13118_v40 }
 0x49c   : > { %v6013_v2 = vrot.slane %v5936_v41, 4  ;;  %v5375_v31 = vpop.f32.mrb[63].mxu0  ;;  %10507 = vmatprep.subr.bf16.mxu1 %v14693_v37 }
 0x49d   : > { %10066 = vmatmul.mubr.bf16.gmra.mrb[116].mxu1 %v6281_v50 }
 0x49e   : > { %v6014_v47 = vsel %vm992_vm0, %v14552_v4, %v6013_v2  ;;  %v14961_v58 = vsel %vm992_vm0, %v6013_v2, %v14552_v4  ;;  %10073 = vmatprep.mubr.bf16.mxu1 %v6604_v10 }
 0x49f   : > { %6096 = vst [vmem:[#allocation2 + $0x80] sm:$0xff] %v6014_v47  ;;  %6097 = vst [vmem:[#allocation2 + $0x88] sm:$0xff] %v14961_v58  ;;  %v8806_v51 = vshrl.u32 %v6014_v47, 16  ;;  %v8809_v12 = vshll.u32 %v6014_v47, 16  ;;  %v6605_v25 = vrot.slane %v6014_v47, 4  ;;  %v8815_v13 = vshrl.u32 %v14961_v58, 16 }
 0x4a0   : > { %v8818_v18 = vshll.u32 %v14961_v58, 16  ;;  %v6607_v41 = vrot.slane %v14961_v58, 4 }
 0x4a1   : > { %v8808_v43 = vrot.slane %v8806_v51, 4  ;;  %v8811_v8 = vrot.slane %v8809_v12, 5  ;;  %v5378_v60 = vpop.f32.mrb[64].mxu0  ;;  %v6606_v27 = vsel %vm992_vm0, %v6603_v19, %v6605_v25  ;;  %v6294_v11 = vrot.slane %v8806_v51, 3 }
 0x4a2   : > { %v12532_v48 = vadd.f32 %v14708_v42, %v5378_v60  ;;  %v5380_v26 = vpop.f32.mrb[65].mxu0  ;;  %v6297_v24 = vrot.slane %v8809_v12, 4  ;;  %v8817_v52 = vrot.slane %v8815_v13, 4  ;;  %v8820_v33 = vrot.slane %v8818_v18, 5 }
 0x4a3   : > { %v8812_v23 = vor.u32 %v8811_v8, %v8808_v43  ;;  %v5381_v45 = vpop.f32.mrb[66].mxu0  ;;  %v6303_v2 = vrot.slane %v8815_v13, 3  ;;  %v6306_v31 = vrot.slane %v8818_v18, 4  ;;  %v6608_v47 = vsel %vm992_vm0, %v6605_v25, %v6607_v41 }
 0x4a4   : > { %v5668_v9 = vadd.f32 %v12532_v48, %v14719_v54  ;;  %v12533_v22 = vadd.f32 %v14708_v42, %v5381_v45  ;;  %v5383_v56 = vpop.f32.mrb[67].mxu0  ;;  %v6298_v57 = vor.u32 %v6297_v24, %v6294_v11  ;;  %v8821_v5 = vor.u32 %v8820_v33, %v8817_v52 }
 0x4a5   : > { %v8813_v3 = vsel %vm1155_vm2, %v8803_v28, %v8812_v23  ;;  %10074 = vmatmul.mubr.bf16.gmra.mrb[120].mxu1 %v6290_v34  ;;  %v6307_v51 = vor.u32 %v6306_v31, %v6303_v2 }
 0x4a6   : > { %v5671_v50 = vadd.f32 %v12533_v22, %v14723_v14  ;;  %v6299_v21 = vsel %vm565_vm1, %v6289_v62, %v6298_v57  ;;  %12457 = vmatmul.mubr.bf16.gmra.mrb[148].mxu0 %v8813_v3  ;;  %10081 = vmatprep.mubr.bf16.mxu1 %v6606_v27  ;;  %v8822_v54 = vsel %vm1155_vm2, %v8812_v23, %v8821_v5  ;;  %v5826_v20 = vmax.f32 %v5668_v9, 0.0  ;;  %v15001_v23 = vld [vmem:[%s16381_s2] ss:$0 sm:$0xff] }
 0x4a7   : > { %12460 = vmatprep.mubr.bf16.mxu0 %v8822_v54 }
 0x4a8   : > { %v5827_v29 = vmax.f32 %v5671_v50, 0.0 }
 0x4a9   : > { %v5386_v28 = vpop.f32.mrb[68].mxu0 }
 0x4aa   : > { %v5938_v15 = vpack.c.bf16 %v5827_v29, %v5826_v20  ;;  %v5388_v14 = vpop.f32.mrb[69].mxu0 }
 0x4ab   : > { %v5389_v49 = vpop.f32.mrb[70].mxu0 }
 0x4ac   : > { %v6017_v19 = vrot.slane %v5938_v15, 4  ;;  %v5391_v30 = vpop.f32.mrb[71].mxu0 }
 0x4ad   : > { %10082 = vmatmul.mubr.bf16.gmra.mrb[124].mxu1 %v6299_v21 }
 0x4ae   : > { %v6018_v55 = vsel %vm992_vm0, %v14552_v4, %v6017_v19  ;;  %v14989_v59 = vsel %vm992_vm0, %v6017_v19, %v14552_v4  ;;  %10089 = vmatprep.mubr.bf16.mxu1 %v6608_v47 }
 0x4af   : > { %6098 = vst [vmem:[#allocation2 + $0x90] sm:$0xff] %v6018_v55  ;;  %6099 = vst [vmem:[#allocation2 + $0x98] sm:$0xff] %v14989_v59  ;;  %v8824_v37 = vshrl.u32 %v6018_v55, 16  ;;  %v8827_v58 = vshll.u32 %v6018_v55, 16  ;;  %v6609_v10 = vrot.slane %v6018_v55, 4  ;;  %v8833_v12 = vshrl.u32 %v14989_v59, 16 }
 0x4b0   : > { %v8836_v39 = vshll.u32 %v14989_v59, 16 }
 0x4b1   : > { %v8826_v62 = vrot.slane %v8824_v37, 4  ;;  %v8829_v13 = vrot.slane %v8827_v58, 5  ;;  %v5394_v18 = vpop.f32.mrb[72].mxu0  ;;  %v6610_v43 = vsel %vm992_vm0, %v6607_v41, %v6609_v10  ;;  %v6312_v8 = vrot.slane %v8824_v37, 3 }
 0x4b2   : > { %v12534_v25 = vadd.f32 %v14708_v42, %v5394_v18  ;;  %v5396_v60 = vpop.f32.mrb[73].mxu0  ;;  %v6315_v27 = vrot.slane %v8827_v58, 4  ;;  %v8835_v11 = vrot.slane %v8833_v12, 4  ;;  %v8838_v24 = vrot.slane %v8836_v39, 5 }
 0x4b3   : > { %v8830_v48 = vor.u32 %v8829_v13, %v8826_v62  ;;  %v5397_v26 = vpop.f32.mrb[74].mxu0  ;;  %v6308_v42 = vsel %vm565_vm1, %v6298_v57, %v6307_v51  ;;  %v6321_v15 = vrot.slane %v8833_v12, 3 }
 0x4b4   : > { %v5684_v52 = vadd.f32 %v12534_v25, %v14742_v7  ;;  %v12535_v45 = vadd.f32 %v15001_v23, %v5397_v26  ;;  %v5399_v33 = vpop.f32.mrb[75].mxu0  ;;  %v6316_v9 = vor.u32 %v6315_v27, %v6312_v8  ;;  %v8839_v56 = vor.u32 %v8838_v24, %v8835_v11 }
 0x4b5   : > { %v8831_v22 = vsel %vm1155_vm2, %v8821_v5, %v8830_v48  ;;  %10090 = vmatmul.mubr.bf16.gmra.mrb[128].mxu1 %v6308_v42  ;;  %v6611_v5 = vrot.slane %v14989_v59, 4 }
 0x4b6   : > { %v5687_v3 = vadd.f32 %v12535_v45, %v14746_v35  ;;  %v6317_v34 = vsel %vm565_vm1, %v6307_v51, %v6316_v9  ;;  %12461 = vmatmul.mubr.bf16.gmra.mrb[152].mxu0 %v8831_v22  ;;  %10097 = vmatprep.mubr.bf16.mxu1 %v6610_v43  ;;  %v8840_v7 = vsel %vm1155_vm2, %v8830_v48, %v8839_v56  ;;  %v5830_v50 = vmax.f32 %v5684_v52, 0.0 }
 0x4b7   : > { %12464 = vmatprep.mubr.bf16.mxu0 %v8840_v7  ;;  %v6324_v35 = vrot.slane %v8836_v39, 4  ;;  %v6612_v49 = vsel %vm992_vm0, %v6609_v10, %v6611_v5 }
 0x4b8   : > { %v5831_v21 = vmax.f32 %v5687_v3, 0.0 }
 0x4b9   : > { %v5402_v40 = vpop.f32.mrb[76].mxu0  ;;  %v6325_v31 = vor.u32 %v6324_v35, %v6321_v15 }
 0x4ba   : > { %v5940_v54 = vpack.c.bf16 %v5831_v21, %v5830_v50  ;;  %v5404_v20 = vpop.f32.mrb[77].mxu0 }
 0x4bb   : > { %v5405_v29 = vpop.f32.mrb[78].mxu0  ;;  %v6326_v26 = vsel %vm565_vm1, %v6316_v9, %v6325_v31 }
 0x4bc   : > { %v6021_v57 = vrot.slane %v5940_v54, 4  ;;  %v5407_v28 = vpop.f32.mrb[79].mxu0 }
 0x4bd   : > { %10098 = vmatmul.mubr.bf16.gmra.mrb[132].mxu1 %v6317_v34 }
 0x4be   : > { %v6022_v14 = vsel %vm992_vm0, %v14552_v4, %v6021_v57  ;;  %v15014_v41 = vsel %vm992_vm0, %v6021_v57, %v14552_v4  ;;  %10105 = vmatprep.mubr.bf16.mxu1 %v6612_v49 }
 0x4bf   : > { %6100 = vst [vmem:[#allocation2 + $0xa0] sm:$0xff] %v6022_v14  ;;  %6101 = vst [vmem:[#allocation2 + $0xa8] sm:$0xff] %v15014_v41  ;;  %v8842_v19 = vshrl.u32 %v6022_v14, 16  ;;  %v8845_v30 = vshll.u32 %v6022_v14, 16  ;;  %v6613_v2 = vrot.slane %v6022_v14, 4  ;;  %v8851_v55 = vshrl.u32 %v15014_v41, 16 }
 0x4c0   : > { %v8854_v59 = vshll.u32 %v15014_v41, 16 }
 0x4c1   : > { %v8844_v47 = vrot.slane %v8842_v19, 4  ;;  %v8847_v37 = vrot.slane %v8845_v30, 5  ;;  %v5410_v58 = vpop.f32.mrb[80].mxu0  ;;  %v6614_v51 = vsel %vm992_vm0, %v6611_v5, %v6613_v2  ;;  %v6330_v12 = vrot.slane %v8842_v19, 3 }
 0x4c2   : > { %v12536_v10 = vadd.f32 %v15001_v23, %v5410_v58  ;;  %v5412_v39 = vpop.f32.mrb[81].mxu0  ;;  %v6333_v62 = vrot.slane %v8845_v30, 4  ;;  %v8853_v13 = vrot.slane %v8851_v55, 4  ;;  %v8856_v8 = vrot.slane %v8854_v59, 5 }
 0x4c3   : > { %v8848_v18 = vor.u32 %v8847_v37, %v8844_v47  ;;  %v5413_v43 = vpop.f32.mrb[82].mxu0  ;;  %v6339_v21 = vrot.slane %v8851_v55, 3 }
 0x4c4   : > { %v5700_v25 = vadd.f32 %v12536_v10, %v14789_v32  ;;  %v12537_v60 = vadd.f32 %v15001_v23, %v5413_v43  ;;  %v5415_v27 = vpop.f32.mrb[83].mxu0  ;;  %v6334_v11 = vor.u32 %v6333_v62, %v6330_v12  ;;  %v8857_v24 = vor.u32 %v8856_v8, %v8853_v13 }
 0x4c5   : > { %v8849_v48 = vsel %vm1155_vm2, %v8839_v56, %v8848_v18  ;;  %10106 = vmatmul.mubr.bf16.gmra.mrb[136].mxu1 %v6326_v26  ;;  %v6615_v56 = vrot.slane %v15014_v41, 4 }
 0x4c6   : > { %v5703_v52 = vadd.f32 %v12537_v60, %v14792_v38  ;;  %v6335_v45 = vsel %vm565_vm1, %v6325_v31, %v6334_v11  ;;  %12465 = vmatmul.mubr.bf16.gmra.mrb[156].mxu0 %v8849_v48  ;;  %10113 = vmatprep.mubr.bf16.mxu1 %v6614_v51  ;;  %v8858_v33 = vsel %vm1155_vm2, %v8848_v18, %v8857_v24  ;;  %v5834_v22 = vmax.f32 %v5700_v25, 0.0 }
 0x4c7   : > { %12468 = vmatprep.mubr.bf16.mxu0 %v8858_v33  ;;  %v6342_v38 = vrot.slane %v8854_v59, 4  ;;  %v6616_v20 = vsel %vm992_vm0, %v6613_v2, %v6615_v56 }
 0x4c8   : > { %v5835_v32 = vmax.f32 %v5703_v52, 0.0 }
 0x4c9   : > { %v5418_v42 = vpop.f32.mrb[84].mxu0  ;;  %v6343_v28 = vor.u32 %v6342_v38, %v6339_v21 }
 0x4ca   : > { %v5942_v3 = vpack.c.bf16 %v5835_v32, %v5834_v22  ;;  %v5420_v34 = vpop.f32.mrb[85].mxu0 }
 0x4cb   : > { %v5421_v7 = vpop.f32.mrb[86].mxu0  ;;  %v6344_v13 = vsel %vm565_vm1, %v6334_v11, %v6343_v28 }
 0x4cc   : > { %v6025_v9 = vrot.slane %v5942_v3, 4  ;;  %v5423_v50 = vpop.f32.mrb[87].mxu0 }
 0x4cd   : > { %10114 = vmatmul.mubr.bf16.gmra.mrb[140].mxu1 %v6335_v45 }
 0x4ce   : > { %v6026_v40 = vsel %vm992_vm0, %v14552_v4, %v6025_v9  ;;  %v15034_v54 = vsel %vm992_vm0, %v6025_v9, %v14552_v4  ;;  %10121 = vmatprep.mubr.bf16.mxu1 %v6616_v20 }
 0x4cf   : > { %6102 = vst [vmem:[#allocation2 + $0xb0] sm:$0xff] %v6026_v40  ;;  %6103 = vst [vmem:[#allocation2 + $0xb8] sm:$0xff] %v15034_v54  ;;  %v8860_v5 = vshrl.u32 %v6026_v40, 16  ;;  %v8863_v29 = vshll.u32 %v6026_v40, 16  ;;  %v6617_v57 = vrot.slane %v6026_v40, 4  ;;  %v8869_v15 = vshrl.u32 %v15034_v54, 16 }
 0x4d0   : > { %v8872_v35 = vshll.u32 %v15034_v54, 16 }
 0x4d1   : > { %v8862_v14 = vrot.slane %v8860_v5, 4  ;;  %v8865_v41 = vrot.slane %v8863_v29, 5  ;;  %v5426_v49 = vpop.f32.mrb[88].mxu0  ;;  %v6618_v19 = vsel %vm992_vm0, %v6615_v56, %v6617_v57  ;;  %v6348_v30 = vrot.slane %v8860_v5, 3 }
 0x4d2   : > { %v12538_v2 = vadd.f32 %v15001_v23, %v5426_v49  ;;  %v5428_v31 = vpop.f32.mrb[89].mxu0  ;;  %v6351_v55 = vrot.slane %v8863_v29, 4  ;;  %v8871_v59 = vrot.slane %v8869_v15, 4  ;;  %v8874_v58 = vrot.slane %v8872_v35, 5 }
 0x4d3   : > { %v8866_v47 = vor.u32 %v8865_v41, %v8862_v14  ;;  %v5429_v37 = vpop.f32.mrb[90].mxu0  ;;  %v6357_v33 = vrot.slane %v8869_v15, 3 }
 0x4d4   : > { %v5716_v51 = vadd.f32 %v12538_v2, %v14823_v44  ;;  %v12539_v12 = vadd.f32 %v15001_v23, %v5429_v37  ;;  %v5431_v10 = vpop.f32.mrb[91].mxu0  ;;  %v6352_v39 = vor.u32 %v6351_v55, %v6348_v30  ;;  %v8875_v18 = vor.u32 %v8874_v58, %v8871_v59 }
 0x4d5   : > { %v8867_v62 = vsel %vm1155_vm2, %v8857_v24, %v8866_v47  ;;  %10122 = vmatmul.mubr.bf16.gmra.mrb[144].mxu1 %v6344_v13  ;;  %v6619_v24 = vrot.slane %v15034_v54, 4 }
 0x4d6   : > { %v5719_v43 = vadd.f32 %v12539_v12, %v14828_v1  ;;  %v6353_v8 = vsel %vm565_vm1, %v6343_v28, %v6352_v39  ;;  %12469 = vmatmul.mubr.bf16.gmra.mrb[160].mxu0 %v8867_v62  ;;  %10129 = vmatprep.mubr.bf16.mxu1 %v6618_v19  ;;  %v8876_v25 = vsel %vm1155_vm2, %v8866_v47, %v8875_v18  ;;  %v5838_v60 = vmax.f32 %v5716_v51, 0.0 }
 0x4d7   : > { %12472 = vmatprep.mubr.bf16.mxu0 %v8876_v25  ;;  %v6360_v1 = vrot.slane %v8872_v35, 4  ;;  %v6620_v42 = vsel %vm992_vm0, %v6617_v57, %v6619_v24 }
 0x4d8   : > { %v5839_v44 = vmax.f32 %v5719_v43, 0.0 }
 0x4d9   : > { %v5434_v27 = vpop.f32.mrb[92].mxu0  ;;  %v6361_v7 = vor.u32 %v6360_v1, %v6357_v33 }
 0x4da   : > { %v5944_v48 = vpack.c.bf16 %v5839_v44, %v5838_v60  ;;  %v5436_v26 = vpop.f32.mrb[93].mxu0 }
 0x4db   : > { %v5437_v52 = vpop.f32.mrb[94].mxu0  ;;  %v6362_v31 = vsel %vm565_vm1, %v6352_v39, %v6361_v7 }
 0x4dc   : > { %v6029_v11 = vrot.slane %v5944_v48, 4  ;;  %v5439_v45 = vpop.f32.mrb[95].mxu0 }
 0x4dd   : > { %10130 = vmatmul.mubr.bf16.gmra.mrb[148].mxu1 %v6353_v8 }
 0x4de   : > { %v6030_v22 = vsel %vm992_vm0, %v14552_v4, %v6029_v11  ;;  %v15054_v32 = vsel %vm992_vm0, %v6029_v11, %v14552_v4  ;;  %10137 = vmatprep.mubr.bf16.mxu1 %v6620_v42 }
 0x4df   : > { %6104 = vst [vmem:[#allocation2 + $0xc0] sm:$0xff] %v6030_v22  ;;  %6105 = vst [vmem:[#allocation2 + $0xc8] sm:$0xff] %v15054_v32  ;;  %v8878_v3 = vshrl.u32 %v6030_v22, 16  ;;  %v8881_v34 = vshll.u32 %v6030_v22, 16  ;;  %v6621_v56 = vrot.slane %v6030_v22, 4  ;;  %v8887_v9 = vshrl.u32 %v15054_v32, 16 }
 0x4e0   : > { %v8890_v50 = vshll.u32 %v15054_v32, 16  ;;  %v6623_v62 = vrot.slane %v15054_v32, 4 }
 0x4e1   : > { %v8880_v21 = vrot.slane %v8878_v3, 4  ;;  %v8883_v38 = vrot.slane %v8881_v34, 5  ;;  %v5442_v40 = vpop.f32.mrb[96].mxu0  ;;  %v6622_v54 = vsel %vm992_vm0, %v6619_v24, %v6621_v56  ;;  %v6366_v20 = vrot.slane %v8878_v3, 3 }
 0x4e2   : > { %v12540_v5 = vadd.f32 %v15001_v23, %v5442_v40  ;;  %v5444_v29 = vpop.f32.mrb[97].mxu0  ;;  %v6369_v57 = vrot.slane %v8881_v34, 4  ;;  %v8889_v28 = vrot.slane %v8887_v9, 4  ;;  %v8892_v14 = vrot.slane %v8890_v50, 5 }
 0x4e3   : > { %v8884_v15 = vor.u32 %v8883_v38, %v8880_v21  ;;  %v5445_v35 = vpop.f32.mrb[98].mxu0  ;;  %v6375_v43 = vrot.slane %v8887_v9, 3  ;;  %v6624_v60 = vsel %vm992_vm0, %v6621_v56, %v6623_v62 }
 0x4e4   : > { %v5732_v41 = vadd.f32 %v12540_v5, %v14853_v6  ;;  %v12541_v49 = vadd.f32 %v15001_v23, %v5445_v35  ;;  %v5447_v19 = vpop.f32.mrb[99].mxu0  ;;  %v6370_v30 = vor.u32 %v6369_v57, %v6366_v20  ;;  %v8893_v55 = vor.u32 %v8892_v14, %v8889_v28 }
 0x4e5   : > { %v8885_v2 = vsel %vm1155_vm2, %v8875_v18, %v8884_v15  ;;  %10138 = vmatmul.mubr.bf16.gmra.mrb[152].mxu1 %v6362_v31 }
 0x4e6   : > { %v5735_v59 = vadd.f32 %v12541_v49, %v14859_v63  ;;  %v6371_v47 = vsel %vm565_vm1, %v6361_v7, %v6370_v30  ;;  %12473 = vmatmul.mubr.bf16.gmra.mrb[164].mxu0 %v8885_v2  ;;  %10145 = vmatprep.mubr.bf16.mxu1 %v6622_v54  ;;  %v8894_v37 = vsel %vm1155_vm2, %v8884_v15, %v8893_v55  ;;  %v5842_v58 = vmax.f32 %v5732_v41, 0.0 }
 0x4e7   : > { %12476 = vmatprep.mubr.bf16.mxu0 %v8894_v37  ;;  %v6378_v63 = vrot.slane %v8890_v50, 4 }
 0x4e8   : > { %v5843_v6 = vmax.f32 %v5735_v59, 0.0 }
 0x4e9   : > { %v5450_v51 = vpop.f32.mrb[100].mxu0  ;;  %v6379_v26 = vor.u32 %v6378_v63, %v6375_v43 }
 0x4ea   : > { %v5946_v12 = vpack.c.bf16 %v5843_v6, %v5842_v58  ;;  %v5452_v10 = vpop.f32.mrb[101].mxu0 }
 0x4eb   : > { %v5453_v13 = vpop.f32.mrb[102].mxu0  ;;  %v6380_v20 = vsel %vm565_vm1, %v6370_v30, %v6379_v26 }
 0x4ec   : > { %v6033_v39 = vrot.slane %v5946_v12, 4  ;;  %v5455_v18 = vpop.f32.mrb[103].mxu0 }
 0x4ed   : > { %10146 = vmatmul.mubr.bf16.gmra.mrb[156].mxu1 %v6371_v47 }
 0x4ee   : > { %v6034_v8 = vsel %vm992_vm0, %v14552_v4, %v6033_v39  ;;  %v15074_v25 = vsel %vm992_vm0, %v6033_v39, %v14552_v4  ;;  %10153 = vmatprep.mubr.bf16.mxu1 %v6624_v60 }
 0x4ef   : > { %6106 = vst [vmem:[#allocation2 + $0xd0] sm:$0xff] %v6034_v8  ;;  %6107 = vst [vmem:[#allocation2 + $0xd8] sm:$0xff] %v15074_v25  ;;  %v8896_v44 = vshrl.u32 %v6034_v8, 16  ;;  %v8899_v27 = vshll.u32 %v6034_v8, 16  ;;  %v6625_v48 = vrot.slane %v6034_v8, 4  ;;  %v8905_v24 = vshrl.u32 %v15074_v25, 16 }
 0x4f0   : > { %v8908_v52 = vshll.u32 %v15074_v25, 16  ;;  %v6627_v49 = vrot.slane %v15074_v25, 4 }
 0x4f1   : > { %v8898_v11 = vrot.slane %v8896_v44, 4  ;;  %v8901_v45 = vrot.slane %v8899_v27, 5  ;;  %v5458_v33 = vpop.f32.mrb[104].mxu0  ;;  %v6626_v1 = vsel %vm992_vm0, %v6623_v62, %v6625_v48  ;;  %v6384_v22 = vrot.slane %v8896_v44, 3 }
 0x4f2   : > { %v12542_v32 = vadd.f32 %v15001_v23, %v5458_v33  ;;  %v5460_v42 = vpop.f32.mrb[105].mxu0  ;;  %v6387_v3 = vrot.slane %v8899_v27, 4  ;;  %v8907_v34 = vrot.slane %v8905_v24, 4  ;;  %v8910_v9 = vrot.slane %v8908_v52, 5 }
 0x4f3   : > { %v8902_v56 = vor.u32 %v8901_v45, %v8898_v11  ;;  %v5461_v7 = vpop.f32.mrb[106].mxu0  ;;  %v6393_v31 = vrot.slane %v8905_v24, 3  ;;  %v6628_v47 = vsel %vm992_vm0, %v6625_v48, %v6627_v49 }
 0x4f4   : > { %v5748_v50 = vadd.f32 %v12542_v32, %v14882_v36  ;;  %v12543_v21 = vadd.f32 %v15001_v23, %v5461_v7  ;;  %v5463_v38 = vpop.f32.mrb[107].mxu0  ;;  %v6388_v40 = vor.u32 %v6387_v3, %v6384_v22  ;;  %v8911_v5 = vor.u32 %v8910_v9, %v8907_v34 }
 0x4f5   : > { %v8903_v54 = vsel %vm1155_vm2, %v8893_v55, %v8902_v56  ;;  %10154 = vmatmul.mubr.bf16.gmra.mrb[160].mxu1 %v6380_v20 }
 0x4f6   : > { %v5751_v29 = vadd.f32 %v12543_v21, %v14886_v61  ;;  %v6389_v57 = vsel %vm565_vm1, %v6379_v26, %v6388_v40  ;;  %12477 = vmatmul.mubr.bf16.gmra.mrb[168].mxu0 %v8903_v54  ;;  %10161 = vmatprep.mubr.bf16.mxu1 %v6626_v1  ;;  %v8912_v28 = vsel %vm1155_vm2, %v8902_v56, %v8911_v5  ;;  %v5846_v15 = vmax.f32 %v5748_v50, 0.0 }
 0x4f7   : > { %12480 = vmatprep.mubr.bf16.mxu0 %v8912_v28  ;;  %v6396_v61 = vrot.slane %v8908_v52, 4 }
 0x4f8   : > { %v5847_v36 = vmax.f32 %v5751_v29, 0.0 }
 0x4f9   : > { %v5466_v35 = vpop.f32.mrb[108].mxu0  ;;  %v6397_v51 = vor.u32 %v6396_v61, %v6393_v31 }
 0x4fa   : > { %v5948_v14 = vpack.c.bf16 %v5847_v36, %v5846_v15  ;;  %v5468_v41 = vpop.f32.mrb[109].mxu0 }
 0x4fb   : > { %v5469_v19 = vpop.f32.mrb[110].mxu0  ;;  %v6398_v33 = vsel %vm565_vm1, %v6388_v40, %v6397_v51 }
 0x4fc   : > { %v6037_v30 = vrot.slane %v5948_v14, 4  ;;  %v5471_v2 = vpop.f32.mrb[111].mxu0 }
 0x4fd   : > { %10162 = vmatmul.mubr.bf16.gmra.mrb[164].mxu1 %v6389_v57 }
 0x4fe   : > { %v6038_v55 = vsel %vm992_vm0, %v14552_v4, %v6037_v30  ;;  %v15094_v59 = vsel %vm992_vm0, %v6037_v30, %v14552_v4  ;;  %10169 = vmatprep.mubr.bf16.mxu1 %v6628_v47 }
 0x4ff   : > { %6108 = vst [vmem:[#allocation2 + $0xe0] sm:$0xff] %v6038_v55  ;;  %6109 = vst [vmem:[#allocation2 + $0xe8] sm:$0xff] %v15094_v59  ;;  %v8914_v37 = vshrl.u32 %v6038_v55, 16  ;;  %v8917_v58 = vshll.u32 %v6038_v55, 16  ;;  %v6629_v6 = vrot.slane %v6038_v55, 4  ;;  %v8923_v12 = vshrl.u32 %v15094_v59, 16 }
 0x500   : > { %v8926_v10 = vshll.u32 %v15094_v59, 16  ;;  %v6631_v9 = vrot.slane %v15094_v59, 4 }
 0x501   : > { %v8916_v62 = vrot.slane %v8914_v37, 4  ;;  %v8919_v13 = vrot.slane %v8917_v58, 5  ;;  %v5474_v39 = vpop.f32.mrb[112].mxu0  ;;  %v6630_v18 = vsel %vm992_vm0, %v6627_v49, %v6629_v6  ;;  %v6402_v43 = vrot.slane %v8914_v37, 3 }
 0x502   : > { %v12544_v63 = vadd.f32 %v15001_v23, %v5474_v39  ;;  %v5476_v8 = vpop.f32.mrb[113].mxu0  ;;  %v6405_v25 = vrot.slane %v8917_v58, 4  ;;  %v8925_v60 = vrot.slane %v8923_v12, 4  ;;  %v8928_v48 = vrot.slane %v8926_v10, 5 }
 0x503   : > { %v8920_v44 = vor.u32 %v8919_v13, %v8916_v62  ;;  %v5477_v27 = vpop.f32.mrb[114].mxu0  ;;  %v6411_v40 = vrot.slane %v8923_v12, 3 }
 0x504   : > { %v5764_v26 = vadd.f32 %v12544_v63, %v14899_v46  ;;  %v12545_v24 = vadd.f32 %v15001_v23, %v5477_v27  ;;  %v5479_v52 = vpop.f32.mrb[115].mxu0  ;;  %v6406_v11 = vor.u32 %v6405_v25, %v6402_v43  ;;  %v8929_v1 = vor.u32 %v8928_v48, %v8925_v60 }
 0x505   : > { %v8921_v45 = vsel %vm1155_vm2, %v8911_v5, %v8920_v44  ;;  %10170 = vmatmul.mubr.bf16.gmra.mrb[168].mxu1 %v6398_v33  ;;  %v6632_v5 = vsel %vm992_vm0, %v6629_v6, %v6631_v9  ;;  %v7096_v33 = vld [vmem:[#allocation2 + $0x10] sm:$0xf8] }
 0x506   : > { %v5767_v22 = vadd.f32 %v12545_v24, %v14902_v53  ;;  %v6407_v32 = vsel %vm565_vm1, %v6397_v51, %v6406_v11  ;;  %12481 = vmatmul.mubr.bf16.gmra.mrb[172].mxu0 %v8921_v45  ;;  %10177 = vmatprep.mubr.bf16.mxu1 %v6630_v18  ;;  %v8930_v42 = vsel %vm1155_vm2, %v8920_v44, %v8929_v1  ;;  %v5850_v3 = vmax.f32 %v5764_v26, 0.0 }
 0x507   : > { %12484 = vmatprep.mubr.bf16.mxu0 %v8930_v42  ;;  %v6414_v53 = vrot.slane %v8926_v10, 4  ;;  %v15135_v42 = vld [vmem:[#allocation2 + $0x18] sm:$0xff] }
 0x508   : > { %v5851_v46 = vmax.f32 %v5767_v22, 0.0 }
 0x509   : > { %v5482_v34 = vpop.f32.mrb[116].mxu0  ;;  %v6415_v15 = vor.u32 %v6414_v53, %v6411_v40 }
 0x50a   : > { %v5950_v56 = vpack.c.bf16 %v5851_v46, %v5850_v3  ;;  %v5484_v7 = vpop.f32.mrb[117].mxu0  ;;  %v7130_v34 = vshrl.u32 %v7096_v33, 16 }
 0x50b   : > { %v5485_v50 = vpop.f32.mrb[118].mxu0  ;;  %v6416_v43 = vsel %vm565_vm1, %v6406_v11, %v6415_v15 }
 0x50c   : > { %v6041_v21 = vrot.slane %v5950_v56, 4  ;;  %v5487_v38 = vpop.f32.mrb[119].mxu0  ;;  %v7133_v56 = vshll.u32 %v7096_v33, 16 }
 0x50d   : > { %10178 = vmatmul.mubr.bf16.gmra.mrb[172].mxu1 %v6407_v32  ;;  %v7138_v38 = vshrl.u32 %v15135_v42, 16 }
 0x50e   : > { %v6042_v54 = vsel %vm992_vm0, %v14552_v4, %v6041_v21  ;;  %v15114_v20 = vsel %vm992_vm0, %v6041_v21, %v14552_v4  ;;  %10185 = vmatprep.mubr.bf16.mxu1 %v6632_v5 }
 0x50f   : > { %6110 = vst [vmem:[#allocation2 + $0xf0] sm:$0xff] %v6042_v54  ;;  %6111 = vst [vmem:[#allocation2 + $0xf8] sm:$0xff] %v15114_v20  ;;  %v8932_v29 = vshrl.u32 %v6042_v54, 16  ;;  %v8935_v57 = vshll.u32 %v6042_v54, 16  ;;  %v6633_v28 = vrot.slane %v6042_v54, 4  ;;  %v8941_v36 = vshrl.u32 %v15114_v20, 16 }
 0x510   : > { %v8944_v35 = vshll.u32 %v15114_v20, 16  ;;  %v9971_v49 = vpop.f32.mrb[68].mxu1  ;;  %v6635_v48 = vrot.slane %v15114_v20, 4  ;;  %v6703_v20 = vld [vmem:[#allocation2] sm:$0xf0] }
 0x511   : > { %v8934_v14 = vrot.slane %v8932_v29, 4  ;;  %v8937_v41 = vrot.slane %v8935_v57, 5  ;;  %v5490_v19 = vpop.f32.mrb[120].mxu0  ;;  %v6634_v30 = vsel %vm992_vm0, %v6631_v9, %v6633_v28  ;;  %v6420_v2 = vrot.slane %v8932_v29, 3  ;;  %v9973_v61 = vpop.f32.mrb[69].mxu1 }
 0x512   : > { %v12546_v31 = vadd.f32 %v15001_v23, %v5490_v19  ;;  %v5492_v55 = vpop.f32.mrb[121].mxu0  ;;  %v6423_v59 = vrot.slane %v8935_v57, 4  ;;  %v8943_v47 = vrot.slane %v8941_v36, 4  ;;  %v9974_v58 = vpop.f32.mrb[70].mxu1  ;;  %v8946_v51 = vrot.slane %v8944_v35, 5  ;;  %v15148_v61 = vld [vmem:[#allocation2 + $0x20] sm:$0xff] }
 0x513   : > { %v8938_v37 = vor.u32 %v8937_v41, %v8934_v14  ;;  %v5493_v6 = vpop.f32.mrb[122].mxu0  ;;  %v9976_v62 = vpop.f32.mrb[71].mxu1  ;;  %v6429_v45 = vrot.slane %v8941_v36, 3  ;;  %v6636_v32 = vsel %vm992_vm0, %v6633_v28, %v6635_v48  ;;  %v7132_v29 = vrot.slane %v7130_v34, 3  ;;  %v15150_v55 = vld [vmem:[#allocation2] sm:$0xff] }
 0x514   : > { %v5780_v12 = vadd.f32 %v12546_v31, %v14918_v17  ;;  %v12547_v10 = vadd.f32 %v15001_v23, %v5493_v6  ;;  %v5495_v13 = vpop.f32.mrb[123].mxu0  ;;  %v6424_v39 = vor.u32 %v6423_v59, %v6420_v2  ;;  %v8947_v63 = vor.u32 %v8946_v51, %v8943_v47 }
 0x515   : > { %v8939_v18 = vsel %vm1155_vm2, %v8929_v1, %v8938_v37  ;;  %10186 = vmatmul.mubr.bf16.gmra.mrb[176].mxu1 %v6416_v43  ;;  %v7140_v36 = vrot.slane %v7138_v38, 3  ;;  %v6737_v49 = vshrl.u32 %v6703_v20, 16  ;;  %v6740_v31 = vshll.u32 %v6703_v20, 16  ;;  %v15180_v20 = vld [vmem:[#allocation2 + $0x30] sm:$0xff] }
 0x516   : > { %v5783_v8 = vadd.f32 %v12547_v10, %v14922_v16  ;;  %v6425_v25 = vsel %vm565_vm1, %v6415_v15, %v6424_v39  ;;  %12485 = vmatmul.mubr.bf16.gmra.mrb[176].mxu0 %v8939_v18  ;;  %10193 = vmatprep.mubr.bf16.mxu1 %v6634_v30  ;;  %v8948_v60 = vsel %vm1155_vm2, %v8938_v37, %v8947_v63  ;;  %v5854_v17 = vmax.f32 %v5780_v12, 0.0 }
 0x517   : > { %12488 = vmatprep.mubr.bf16.mxu0 %v8948_v60  ;;  %v6432_v16 = vrot.slane %v8944_v35, 4  ;;  %v7135_v15 = vrot.slane %v7133_v56, 4  ;;  %v6745_v59 = vshrl.u32 %v15150_v55, 16  ;;  %v6748_v51 = vshll.u32 %v15150_v55, 16  ;;  %v13119_v56 = vld [vmem:[%s16382_s3 + $0x100] sm:$0xff]  }
 0x518   : > { %v5855_v44 = vmax.f32 %v5783_v8, 0.0  ;;  %v7147_v13 = vshrl.u32 %v15148_v61, 16  ;;  %v6742_v8 = vrot.slane %v6740_v31, 5 }
 0x519   : > { %v5498_v23 = vpop.f32.mrb[124].mxu0  ;;  %v6433_v21 = vor.u32 %v6432_v16, %v6429_v45  ;;  %v7136_v12 = vor.u32 %v7135_v15, %v7132_v29 }
 0x51a   : > { %v5952_v27 = vpack.c.bf16 %v5855_v44, %v5854_v17  ;;  %v5500_v26 = vpop.f32.mrb[125].mxu0  ;;  %v6747_v17 = vrot.slane %v6745_v59, 4  ;;  %v6750_v44 = vrot.slane %v6748_v51, 5 }
 0x51b   : > { %v5501_v24 = vpop.f32.mrb[126].mxu0  ;;  %v6434_v28 = vsel %vm565_vm1, %v6424_v39, %v6433_v21  ;;  %v7150_v39 = vshll.u32 %v15148_v61, 16  ;;  %v6705_v26 = vld [vmem:[#allocation2 + $0x10] sm:$0xff] }
 0x51c   : > { %v6045_v52 = vrot.slane %v5952_v27, 4  ;;  %v5503_v11 = vpop.f32.mrb[127].mxu0  ;;  %v7149_v27 = vrot.slane %v7147_v13, 3  ;;  %v6751_v45 = vor.u32 %v6750_v44, %v6747_v17  ;;  %v6754_v16 = vshrl.u32 %v6705_v26, 16 }
 0x51d   : > { %10194 = vmatmul.mubr.bf16.gmra.mrb[180].mxu1 %v6425_v25  ;;  %v6757_v33 = vshll.u32 %v6705_v26, 16 }
 0x51e   : > { %v6046_v1 = vsel %vm992_vm0, %v14552_v4, %v6045_v52  ;;  %v6048_v22 = vsel %vm992_vm0, %v6045_v52, %v14552_v4  ;;  %10201 = vmatprep.mubr.bf16.mxu1 %v6636_v32  ;;  %v7141_v4 = vshll.u32 %v15135_v42, 16  ;;  %v15167_v52 = vld [vmem:[#allocation2 + $0x28] sm:$0xff] }
 0x51f   : > { %6112 = vst [vmem:[#allocation2 + $0x100] sm:$0xff] %v6046_v1  ;;  %6113 = vst [vmem:[#allocation2 + $0x108] sm:$0xff] %v6048_v22  ;;  %v8950_v3 = vshrl.u32 %v6046_v1, 16  ;;  %v8953_v46 = vshll.u32 %v6046_v1, 16  ;;  %v7156_v32 = vshrl.u32 %v15167_v52, 16 }
 0x520   : > { %v9987_v50 = vpop.f32.mrb[76].mxu1  ;;  %v7143_v41 = vrot.slane %v7141_v4, 4 }
 0x521   : > { %v8952_v7 = vrot.slane %v8950_v3, 4  ;;  %v8955_v9 = vrot.slane %v8953_v46, 5  ;;  %v9989_v40 = vpop.f32.mrb[77].mxu1  ;;  %v7159_v3 = vshll.u32 %v15167_v52, 16  ;;  %v6759_v50 = vrot.slane %v6757_v33, 5 }
 0x522   : > { %v9990_v54 = vpop.f32.mrb[78].mxu1  ;;  %v7144_v10 = vor.u32 %v7143_v41, %v7140_v36  ;;  %v7158_v40 = vrot.slane %v7156_v32, 3  ;;  %v7165_v36 = vshrl.u32 %v15180_v20, 16  ;;  %v13121_v41 = vld [vmem:[%s16382_s3 + $0x110] sm:$0xff]  }
 0x523   : > { %v15139_v53 = vor.u32 %v8955_v9, %v8952_v7  ;;  %v9992_v5 = vpop.f32.mrb[79].mxu1  ;;  %v6756_v9 = vrot.slane %v6754_v16, 4  ;;  %v7161_v54 = vrot.slane %v7159_v3, 4  ;;  %v6783_v16 = vrot.slane %v7156_v32, 4 }
 0x524   : > { %v7145_v23 = vsel %vm565_vm1, %v7136_v12, %v7144_v10  ;;  %v13120_v5 = vld [vmem:[%s16382_s3 + $0x108] sm:$0xff]   ;;  %v7167_v59 = vrot.slane %v7165_v36, 3  ;;  %v6786_v33 = vrot.slane %v7159_v3, 5 }
 0x525   : > { %16471 = vst [vmem:[#allocation4_spill] sm:$0xff] %v15139_v53  ;;  %v8957_v57 = vsel %vm1155_vm2, %v8947_v63, %v15139_v53  ;;  %10202 = vmatmul.mubr.bf16.gmra.mrb[184].mxu1 %v6434_v28  ;;  %v6739_v63 = vrot.slane %v6737_v49, 4  ;;  %v6760_v29 = vor.u32 %v6759_v50, %v6756_v9  ;;  %v7162_v28 = vor.u32 %v7161_v54, %v7158_v40  ;;  %v13126_v40 = vld [vmem:[%s16382_s3 + $0x138] sm:$0xff]   ;;  %v15265_v54 = vld [vmem:[#allocation2 + $0x88] sm:$0xff] }
 0x526   : > { %v6540_v35 = vld [vmem:[#allocation2 + $0x100] sm:$0xf]  ;;  %12489 = vmatmul.mubr.bf16.gmra.mrb[180].mxu0 %v8957_v57  ;;  %v15256_v9 = vor.u32 %v6786_v33, %v6783_v16  ;;  %v6792_v50 = vrot.slane %v7165_v36, 4  ;;  %v15276_v36 = vld [vmem:[#allocation2 + $0x98] sm:$0xff] }
 0x527   : > { %v6147_v14 = vld [vmem:[#allocation2 + $0x100] sm:$0xf]  ;;  %v6637_v19 = vrot.slane %v6540_v35, 4  ;;  %v6743_v24 = vor.u32 %v6742_v8, %v6739_v63  ;;  %v7168_v35 = vshll.u32 %v15180_v20, 16  ;;  %v6774_v8 = vrot.slane %v7147_v13, 4 }
 0x528   : > { %v6436_v30 = vshrl.u32 %v6147_v14, 16  ;;  %v6439_v2 = vshll.u32 %v6147_v14, 16 }
 0x529   : > { %v6638_v47 = vsel %vm992_vm0, %v6635_v48, %v6637_v19  ;;  %v12438_v6 = vpop.f32.mrb[128].mxu0  ;;  %v7152_v48 = vrot.slane %v7150_v39, 4  ;;  %v6752_v34 = vsel %vm1155_vm2, %v6743_v24, %v6751_v45  ;;  %v6761_v19 = vsel %vm1155_vm2, %v6751_v45, %v6760_v29  ;;  %v15234_v24 = vld [vmem:[#allocation2 + $0x48] sm:$0xff] }
 0x52a   : > { %v6438_v37 = vrot.slane %v6436_v30, 3  ;;  %v6441_v58 = vrot.slane %v6439_v2, 4  ;;  %10209 = vmatprep.mubr.bf16.mxu1 %v6638_v47  ;;  %v15155_v62 = vpop.f32.mrb[129].mxu0  ;;  %v6765_v30 = vrot.slane %v7138_v38, 4  ;;  %v6768_v2 = vrot.slane %v7141_v4, 5  ;;  %v13122_v38 = vld [vmem:[%s16382_s3 + $0x118] sm:$0xff]  }
 0x52b   : > { %16472 = vst [vmem:[#allocation5_spill] sm:$0xff] %v15155_v62  ;;  %v12439_v43 = vpop.f32.mrb[130].mxu0  ;;  %v7153_v22 = vor.u32 %v7152_v48, %v7149_v27  ;;  %v7170_v47 = vrot.slane %v7168_v35, 4  ;;  %v15226_v27 = vld [vmem:[#allocation2 + $0x40] sm:$0xff]  ;;  %v13124_v48 = vld [vmem:[%s16382_s3 + $0x128] sm:$0xff]  }
 0x52c   : > { %v6442_v18 = vor.u32 %v6441_v58, %v6438_v37  ;;  %v15159_v25 = vpop.f32.mrb[131].mxu0  ;;  %v15206_v37 = vld [vmem:[#allocation2 + $0x38] sm:$0xff]  ;;  %v6769_v4 = vor.u32 %v6768_v2, %v6765_v30  ;;  %v7186_v26 = vshll.u32 %v15226_v27, 16  ;;  %v15283_v30 = vld [vmem:[#allocation2 + $0xa0] sm:$0xff] }
 0x52d   : > { %16473 = vst [vmem:[#allocation6_spill] sm:$0xff] %v15159_v25  ;;  %v7163_v31 = vsel %vm565_vm1, %v7153_v22, %v7162_v28  ;;  %v7171_v6 = vor.u32 %v7170_v47, %v7167_v59  ;;  %v7174_v51 = vshrl.u32 %v15206_v37, 16  ;;  %v7177_v12 = vshll.u32 %v15206_v37, 16  ;;  %v13127_v47 = vld [vmem:[%s16382_s3 + $0x140] sm:$0xff]  }
 0x52e   : > { %v6443_v60 = vsel %vm565_vm1, %v6433_v21, %v6442_v18  ;;  %v7154_v21 = vsel %vm565_vm1, %v7144_v10, %v7153_v22  ;;  %v13123_v18 = vld [vmem:[%s16382_s3 + $0x120] sm:$0xff]   ;;  %v6770_v63 = vsel %vm1155_vm2, %v6760_v29, %v6769_v4  ;;  %v13125_v22 = vld [vmem:[%s16382_s3 + $0x130] sm:$0xff]   ;;  %v7188_v32 = vrot.slane %v7186_v26, 4 }
 0x52f   : > { %10210 = vmatmul.mubr.bf16.gmra.mrb[188].mxu1 %v6443_v60  ;;  %v6777_v60 = vrot.slane %v7150_v39, 5  ;;  %v7172_v17 = vsel %vm565_vm1, %v7162_v28, %v7171_v6  ;;  %v7176_v44 = vrot.slane %v7174_v51, 3  ;;  %v7183_v39 = vshrl.u32 %v15226_v27, 16 }
 0x530   : > { %10250 = vmatprep.mubr.bf16.mxu1 %v7145_v23  ;;  %v10003_v11 = vpop.f32.mrb[84].mxu1  ;;  %v7179_v23 = vrot.slane %v7177_v12, 4  ;;  %v15287_v59 = vrot.slane %v7174_v51, 4  ;;  %v16401_v51 = vshrl.u32 %v15276_v36, 16 }
 0x531   : > { %v10005_v1 = vpop.f32.mrb[85].mxu1  ;;  %v6778_v13 = vor.u32 %v6777_v60, %v6774_v8  ;;  %v7185_v52 = vrot.slane %v7183_v39, 3  ;;  %v16399_v60 = vshrl.u32 %v15283_v30, 16 }
 0x532   : > { %v10006_v46 = vpop.f32.mrb[86].mxu1  ;;  %v7180_v11 = vor.u32 %v7179_v23, %v7176_v44  ;;  %v15309_v44 = vld [vmem:[#allocation2 + $0xb8] sm:$0xff] }
 0x533   : > { %v10008_v7 = vpop.f32.mrb[87].mxu1  ;;  %v15274_v20 = vor.u32 %v7188_v32, %v7185_v52  ;;  %v8247_v32 = vrot.slane %v16401_v51, 3 }
 0x534   : > { %v6779_v7 = vsel %vm1155_vm2, %v6769_v4, %v6778_v13  ;;  %v7181_v3 = vsel %vm565_vm1, %v7171_v6, %v7180_v11  ;;  %v15294_v4 = vld [vmem:[#allocation2 + $0xa8] sm:$0xff] }
 0x537   : > { %10251 = vmatmul.mubr.bf16.vlgmr.msra.gmra.mrb[64].mxu1 %v6752_v34  ;;  %v7192_v34 = vshrl.u32 %v15234_v24, 16 }
 0x538   : > { %10258 = vmatprep.mubr.bf16.mxu1 %v7154_v21  ;;  %10508 = vmatpush1.bf16.msra.mxu1 %v13119_v56  ;;  %v7195_v56 = vshll.u32 %v15234_v24, 16  ;;  %v6795_v21 = vrot.slane %v7168_v35, 5 }
 0x539   : > { %10509 = vmatprep.subr.bf16.mxu1 %v15150_v55  ;;  %v12442_v57 = vpop.f32.mrb[132].mxu0 }
 0x53a   : > { %v15186_v15 = vpop.f32.mrb[133].mxu0  ;;  %v7197_v29 = vrot.slane %v7195_v56, 4  ;;  %v15272_v57 = vld [vmem:[#allocation2 + $0x90] sm:$0xff] }
 0x53b   : > { %16474 = vst [vmem:[#allocation7_spill] sm:$0xff] %v15186_v15  ;;  %v12443_v14 = vpop.f32.mrb[134].mxu0 }
 0x53c   : > { %10510 = vmatpush1.bf16.msra.mxu1 %v13120_v5  ;;  %v15193_v49 = vpop.f32.mrb[135].mxu0  ;;  %v7194_v5 = vrot.slane %v7192_v34, 3  ;;  %v6788_v14 = vsel %vm1155_vm2, %v6778_v13, %v15256_v9  ;;  %v16392_v13 = vshll.u32 %v15294_v4, 16 }
 0x53d   : > { %16475 = vst [vmem:[#allocation8_spill] sm:$0xff] %v15193_v49  ;;  %10511 = vmatprep.subr.bf16.mxu1 %v15150_v55 }
 0x53e   : > { %v15296_v6 = vor.u32 %v7197_v29, %v7194_v5  ;;  %v8256_v5 = vrot.slane %v16399_v60, 3  ;;  %v15449_v60 = vld [vmem:[#allocation2 + $0x68] sm:$0xff] }
 0x53f   : > { %10259 = vmatmul.mubr.bf16.gmra.mrb[192].mxu1 %v6761_v19  ;;  %v16405_v19 = vshrl.u32 %v15265_v54, 16 }
 0x540   : > { %10266 = vmatprep.mubr.bf16.mxu1 %v7163_v31  ;;  %10512 = vmatpush1.bf16.msra.mxu1 %v13121_v41  ;;  %v10019_v42 = vpop.f32.mrb[92].mxu1  ;;  %v15280_v41 = vld [vmem:[#allocation2 + $0x50] sm:$0xff]  ;;  %v15285_v31 = vor.u32 %v6795_v21, %v6792_v50  ;;  %v16388_v21 = vshll.u32 %v15309_v44, 16 }
 0x541   : > { %10513 = vmatprep.subr.bf16.mxu1 %v15150_v55  ;;  %v10021_v58 = vpop.f32.mrb[93].mxu1  ;;  %v16403_v42 = vshrl.u32 %v15272_v57, 16  ;;  %v7201_v8 = vshrl.u32 %v15280_v41, 16  ;;  %v7204_v23 = vshll.u32 %v15280_v41, 16 }
 0x542   : > { %v10022_v10 = vpop.f32.mrb[94].mxu1 }
 0x543   : > { %v10024_v43 = vpop.f32.mrb[95].mxu1  ;;  %v16402_v10 = vshll.u32 %v15272_v57, 16 }
 0x544   : > { %10514 = vmatpush1.bf16.msra.mxu1 %v13122_v38  ;;  %v16404_v38 = vshll.u32 %v15265_v54, 16  ;;  %v15302_v43 = vld [vmem:[#allocation2 + $0xb0] sm:$0xff] }
 0x545   : > { %10515 = vmatprep.subr.bf16.mxu1 %v15150_v55  ;;  %v16391_v16 = vshrl.u32 %v15302_v43, 16  ;;  %v16390_v33 = vshll.u32 %v15302_v43, 16  ;;  %v8241_v52 = vrot.slane %v16402_v10, 4 }
 0x547   : > { %10267 = vmatmul.mubr.bf16.gmra.mrb[72].mxu1 %v6770_v63  ;;  %v7190_v63 = vsel %vm565_vm1, %v7180_v11, %v15274_v20  ;;  %v13128_v11 = vld [vmem:[%s16382_s3 + $0x148] sm:$0xff]  }
 0x548   : > { %10274 = vmatprep.mubr.bf16.mxu1 %v7172_v17  ;;  %10516 = vmatpush1.bf16.msra.mxu1 %v13123_v18  ;;  %v16400_v18 = vshll.u32 %v15276_v36, 16  ;;  %v16394_v17 = vshll.u32 %v15283_v30, 16 }
 0x549   : > { %10517 = vmatprep.subr.bf16.mxu1 %v15150_v55  ;;  %v12446_v61 = vpop.f32.mrb[136].mxu0 }
 0x54a   : > { %v15236_v45 = vpop.f32.mrb[137].mxu0  ;;  %v8229_v61 = vrot.slane %v16405_v19, 3  ;;  %v8259_v29 = vrot.slane %v16394_v17, 4 }
 0x54b   : > { %16476 = vst [vmem:[#allocation9_spill] sm:$0xff] %v15236_v45  ;;  %v12447_v1 = vpop.f32.mrb[138].mxu0 }
 0x54c   : > { %10518 = vmatpush1.bf16.msra.mxu1 %v13124_v48  ;;  %v15245_v46 = vpop.f32.mrb[139].mxu0  ;;  %v16393_v48 = vshrl.u32 %v15294_v4, 16  ;;  %v8232_v1 = vrot.slane %v16404_v38, 4 }
 0x54d   : > { %16477 = vst [vmem:[#allocation10_spill] sm:$0xff] %v15245_v46  ;;  %10519 = vmatprep.subr.bf16.mxu1 %v15150_v55 }
 0x54f   : > { %10275 = vmatmul.mubr.bf16.gmra.mrb[196].mxu1 %v6779_v7  ;;  %v16389_v7 = vshrl.u32 %v15309_v44, 16 }
 0x550   : > { %10282 = vmatprep.mubr.bf16.mxu1 %v7181_v3  ;;  %10520 = vmatpush1.bf16.msra.mxu1 %v13125_v22  ;;  %v10035_v28 = vpop.f32.mrb[100].mxu1  ;;  %v8238_v22 = vrot.slane %v16403_v42, 3  ;;  %v8250_v3 = vrot.slane %v16400_v18, 4  ;;  %v6831_v18 = vrot.slane %v7204_v23, 5 }
 0x551   : > { %10521 = vmatprep.subr.bf16.mxu1 %v15150_v55  ;;  %v10037_v35 = vpop.f32.mrb[101].mxu1 }
 0x552   : > { %v10038_v2 = vpop.f32.mrb[102].mxu1  ;;  %v8242_v35 = vor.u32 %v8241_v52, %v8238_v22  ;;  %v8274_v22 = vrot.slane %v16391_v16, 3  ;;  %v8277_v52 = vrot.slane %v16390_v33, 4  ;;  %v15397_v16 = vld [vmem:[#allocation2 + $0xc0] sm:$0xff] }
 0x553   : > { %v10040_v58 = vpop.f32.mrb[103].mxu1  ;;  %v8265_v2 = vrot.slane %v16393_v48, 3  ;;  %v16395_v27 = vshrl.u32 %v15397_v16, 16 }
 0x554   : > { %10522 = vmatpush1.bf16.msra.mxu1 %v13126_v40  ;;  %v15334_v40 = vor.u32 %v8232_v1, %v8229_v61  ;;  %v13129_v61 = vld [vmem:[%s16382_s3 + $0x150] sm:$0xff]   ;;  %v8260_v1 = vor.u32 %v8259_v29, %v8256_v5  ;;  %v8278_v29 = vor.u32 %v8277_v52, %v8274_v22 }
 0x555   : > { %10523 = vmatprep.subr.bf16.mxu1 %v15150_v55  ;;  %v8292_v48 = vrot.slane %v16395_v27, 3 }
 0x556   : > { %v15360_v37 = vsel %vm565_vm1, %v15334_v40, %v8242_v35 }
 0x557   : > { %10283 = vmatmul.mubr.bf16.gmra.mrb[80].mxu1 %v6788_v14  ;;  %v8251_v14 = vor.u32 %v8250_v3, %v8247_v32  ;;  %v8283_v3 = vrot.slane %v16389_v7, 3 }
 0x558   : > { %10290 = vmatprep.mubr.bf16.mxu1 %v7190_v63  ;;  %10524 = vmatpush1.bf16.msra.mxu1 %v13127_v47  ;;  %v8268_v47 = vrot.slane %v16392_v13, 4  ;;  %v6804_v63 = vrot.slane %v7177_v12, 5 }
 0x559   : > { %10525 = vmatprep.subr.bf16.mxu1 %v15150_v55  ;;  %v12450_v50 = vpop.f32.mrb[140].mxu0  ;;  %v15363_v12 = vsel %vm565_vm1, %v8242_v35, %v8251_v14  ;;  %v15371_v5 = vsel %vm565_vm1, %v8251_v14, %v8260_v1  ;;  %v7199_v35 = vsel %vm565_vm1, %v15274_v20, %v15296_v6  ;;  %v15385_v14 = vld [vmem:[#allocation2 + $0x58] sm:$0xff] }
 0x55a   : > { %v15340_v28 = vpop.f32.mrb[141].mxu0  ;;  %v6797_v50 = vsel %vm1155_vm2, %v15256_v9, %v15285_v31 }
 0x55b   : > { %16478 = vst [vmem:[#allocation11_spill] sm:$0xff] %v15340_v28  ;;  %v12451_v58 = vpop.f32.mrb[142].mxu0 }
 0x55c   : > { %10526 = vmatpush1.bf16.msra.mxu1 %v13128_v11  ;;  %v15355_v32 = vpop.f32.mrb[143].mxu0  ;;  %v8269_v11 = vor.u32 %v8268_v47, %v8265_v2  ;;  %v8286_v58 = vrot.slane %v16388_v21, 4  ;;  %v7203_v2 = vrot.slane %v7201_v8, 3  ;;  %v7206_v47 = vrot.slane %v7204_v23, 4 }
 0x55d   : > { %16479 = vst [vmem:[#allocation12_spill] sm:$0xff] %v15355_v32  ;;  %10527 = vmatprep.subr.bf16.mxu1 %v15150_v55 }
 0x55e   : > { %v15383_v9 = vsel %vm565_vm1, %v8260_v1, %v8269_v11  ;;  %v15388_v22 = vsel %vm565_vm1, %v8269_v11, %v8278_v29  ;;  %v8287_v52 = vor.u32 %v8286_v58, %v8283_v3  ;;  %v7207_v7 = vor.u32 %v7206_v47, %v7203_v2  ;;  %v15399_v11 = vld [vmem:[#allocation2 + $0xc8] sm:$0xff]  ;;  %v15413_v58 = vld [vmem:[#allocation2 + $0x60] sm:$0xff] }
 0x55f   : > { %10291 = vmatmul.mubr.bf16.gmra.mrb[200].mxu1 %v6797_v50  ;;  %v6805_v50 = vor.u32 %v6804_v63, %v15287_v59  ;;  %v7210_v1 = vshrl.u32 %v15385_v14, 16  ;;  %v6810_v59 = vrot.slane %v7183_v39, 4  ;;  %v13130_v39 = vld [vmem:[%s16382_s3 + $0x158] sm:$0xff]  }
 0x560   : > { %10298 = vmatprep.mubr.bf16.mxu1 %v7199_v35  ;;  %10528 = vmatpush1.bf16.msra.mxu1 %v13129_v61  ;;  %v10051_v20 = vpop.f32.mrb[108].mxu1  ;;  %v15393_v0 = vsel %vm565_vm1, %v8278_v29, %v8287_v52  ;;  %v7213_v35 = vshll.u32 %v15385_v14, 16  ;;  %v7208_v63 = vsel %vm565_vm1, %v15296_v6, %v7207_v7  ;;  %v16398_v6 = vshll.u32 %v15399_v11, 16 }
 0x561   : > { %10529 = vmatprep.subr.bf16.mxu1 %v15150_v55  ;;  %v10053_v21 = vpop.f32.mrb[109].mxu1  ;;  %v6806_v3 = vsel %vm1155_vm2, %v15285_v31, %v6805_v50  ;;  %v16397_v31 = vshrl.u32 %v15399_v11, 16 }
 0x562   : > { %v10054_v33 = vpop.f32.mrb[110].mxu1  ;;  %v6813_v21 = vrot.slane %v7186_v26, 5  ;;  %v7215_v29 = vrot.slane %v7213_v35, 4  ;;  %v16396_v26 = vshll.u32 %v15397_v16, 16 }
 0x563   : > { %v10056_v61 = vpop.f32.mrb[111].mxu1  ;;  %v7212_v33 = vrot.slane %v7210_v1, 3 }
 0x564   : > { %v6814_v2 = vor.u32 %v6813_v21, %v6810_v59  ;;  %10530 = vmatpush1.bf16.msra.mxu1 %v13130_v39  ;;  %v8295_v17 = vrot.slane %v16396_v26, 4  ;;  %v8301_v59 = vrot.slane %v16397_v31, 3  ;;  %v8304_v21 = vrot.slane %v16398_v6, 4 }
 0x565   : > { %v7216_v20 = vor.u32 %v7215_v29, %v7212_v33  ;;  %10531 = vmatprep.subr.bf16.mxu1 %v15150_v55  ;;  %v6819_v29 = vrot.slane %v7192_v34, 4 }
 0x566   : > { %v6815_v39 = vsel %vm1155_vm2, %v6805_v50, %v6814_v2  ;;  %v15442_v27 = vor.u32 %v8304_v21, %v8301_v59  ;;  %v7228_v50 = vshrl.u32 %v15449_v60, 16  ;;  %v7231_v59 = vshll.u32 %v15449_v60, 16 }
 0x567   : > { %10299 = vmatmul.mubr.bf16.gmra.mrb[88].mxu1 %v6806_v3  ;;  %v7219_v3 = vshrl.u32 %v15413_v58, 16  ;;  %v7217_v26 = vsel %vm565_vm1, %v7207_v7, %v7216_v20 }
 0x568   : > { %10306 = vmatprep.mubr.bf16.mxu1 %v7208_v63  ;;  %v7222_v63 = vshll.u32 %v15413_v58, 16  ;;  %16482 = vst [vmem:[#allocation15_spill] sm:$0xff] %v15442_v27 }
 0x569   : > { %v12454_v47 = vpop.f32.mrb[144].mxu0  ;;  %v7221_v31 = vrot.slane %v7219_v3, 3 }
 0x56a   : > { %v15422_v61 = vpop.f32.mrb[145].mxu0  ;;  %v8296_v47 = vor.u32 %v8295_v17, %v8292_v48  ;;  %v7224_v6 = vrot.slane %v7222_v63, 4 }
 0x56b   : > { %16480 = vst [vmem:[#allocation13_spill] sm:$0xff] %v15422_v61  ;;  %v12455_v13 = vpop.f32.mrb[146].mxu0 }
 0x56c   : > { %v15435_v33 = vpop.f32.mrb[147].mxu0  ;;  %v6822_v13 = vrot.slane %v7195_v56, 5  ;;  %v15452_v34 = vsel %vm565_vm1, %v8287_v52, %v8296_v47  ;;  %v15456_v24 = vsel %vm565_vm1, %v8296_v47, %v15442_v27  ;;  %v7225_v7 = vor.u32 %v7224_v6, %v7221_v31 }
 0x56d   : > { %16481 = vst [vmem:[#allocation14_spill] sm:$0xff] %v15435_v33  ;;  %v6828_v52 = vrot.slane %v7201_v8, 4  ;;  %v7230_v31 = vrot.slane %v7228_v50, 3  ;;  %v7233_v6 = vrot.slane %v7231_v59, 4 }
 0x56e   : > { %v6823_v17 = vor.u32 %v6822_v13, %v6819_v29  ;;  %v7226_v47 = vsel %vm565_vm1, %v7216_v20, %v7225_v7  ;;  %v15468_v29 = vld [vmem:[#allocation2 + $0x70] sm:$0xff] }
 0x56f   : > { %10307 = vmatmul.mubr.bf16.gmra.mrb[204].mxu1 %v6815_v39  ;;  %v6832_v13 = vor.u32 %v6831_v18, %v6828_v52  ;;  %v7234_v8 = vor.u32 %v7233_v6, %v7230_v31  ;;  %v7237_v23 = vshrl.u32 %v15468_v29, 16  ;;  %v7240_v20 = vshll.u32 %v15468_v29, 16  ;;  %v15486_v6 = vld [vmem:[#allocation2 + $0x78] sm:$0xff] }
 0x570   : > { %10314 = vmatprep.mubr.bf16.mxu1 %v7217_v26  ;;  %v10067_v56 = vpop.f32.mrb[116].mxu1  ;;  %v6824_v26 = vsel %vm1155_vm2, %v6814_v2, %v6823_v17  ;;  %v13131_v2 = vld [vmem:[%s16382_s3 + $0x160] sm:$0xff]   ;;  %v6840_v18 = vrot.slane %v7213_v35, 5  ;;  %v7249_v51 = vshll.u32 %v15486_v6, 16  ;;  %v6846_v35 = vrot.slane %v7219_v3, 4 }
 0x571   : > { %v10069_v48 = vpop.f32.mrb[117].mxu1  ;;  %10532 = vmatpush1.bf16.msra.mxu1 %v13131_v2  ;;  %v7235_v52 = vsel %vm565_vm1, %v7225_v7, %v7234_v8  ;;  %v7242_v31 = vrot.slane %v7240_v20, 4  ;;  %v6849_v7 = vrot.slane %v7222_v63, 5 }
 0x572   : > { %v10070_v21 = vpop.f32.mrb[118].mxu1  ;;  %10533 = vmatprep.subr.bf16.mxu1 %v15150_v55 }
 0x573   : > { %v10072_v39 = vpop.f32.mrb[119].mxu1 }
 0x574   : > { %v6833_v39 = vsel %vm1155_vm2, %v6823_v17, %v6832_v13  ;;  %v7246_v17 = vshrl.u32 %v15486_v6, 16 }
 0x577   : > { %10315 = vmatmul.mubr.bf16.gmra.mrb[96].mxu1 %v6824_v26  ;;  %v6837_v26 = vrot.slane %v7210_v1, 4 }
 0x578   : > { %10322 = vmatprep.mubr.bf16.mxu1 %v7226_v47  ;;  %v7239_v47 = vrot.slane %v7237_v23, 3 }
 0x579   : > { %v12458_v56 = vpop.f32.mrb[148].mxu0  ;;  %v6841_v2 = vor.u32 %v6840_v18, %v6837_v26  ;;  %v7248_v26 = vrot.slane %v7246_v17, 3  ;;  %v7251_v18 = vrot.slane %v7249_v51, 4 }
 0x57a   : > { %v15473_v41 = vpop.f32.mrb[149].mxu0 }
 0x57b   : > { %16483 = vst [vmem:[#allocation16_spill] sm:$0xff] %v15473_v41  ;;  %v12459_v48 = vpop.f32.mrb[150].mxu0  ;;  %v6842_v14 = vsel %vm1155_vm2, %v6832_v13, %v6841_v2  ;;  %v6850_v13 = vor.u32 %v6849_v7, %v6846_v35  ;;  %v7252_v3 = vor.u32 %v7251_v18, %v7248_v26  ;;  %v15514_v26 = vld [vmem:[#allocation2 + $0x88] sm:$0xff] }
 0x57c   : > { %v15478_v21 = vpop.f32.mrb[151].mxu0  ;;  %v7243_v48 = vor.u32 %v7242_v31, %v7239_v47 }
 0x57d   : > { %16484 = vst [vmem:[#allocation17_spill] sm:$0xff] %v15478_v21 }
 0x57e   : > { %v7253_v35 = vsel %vm565_vm1, %v7243_v48, %v7252_v3 }
 0x57f   : > { %10323 = vmatmul.mubr.bf16.gmra.mrb[208].mxu1 %v6833_v39  ;;  %v7244_v39 = vsel %vm565_vm1, %v7234_v8, %v7243_v48 }
 0x580   : > { %10330 = vmatprep.mubr.bf16.mxu1 %v7235_v52  ;;  %v10083_v29 = vpop.f32.mrb[124].mxu1  ;;  %v15498_v52 = vld [vmem:[#allocation2 + $0x80] sm:$0xff] }
 0x581   : > { %v10085_v56 = vpop.f32.mrb[125].mxu1  ;;  %v7255_v63 = vshrl.u32 %v15498_v52, 16  ;;  %v7258_v8 = vshll.u32 %v15498_v52, 16 }
 0x582   : > { %v10086_v1 = vpop.f32.mrb[126].mxu1  ;;  %v6851_v56 = vsel %vm1155_vm2, %v6841_v2, %v6850_v13  ;;  %v7267_v2 = vshll.u32 %v15514_v26, 16 }
 0x583   : > { %v10088_v10 = vpop.f32.mrb[127].mxu1  ;;  %v6855_v1 = vrot.slane %v7228_v50, 4  ;;  %v7257_v7 = vrot.slane %v7255_v63, 3 }
 0x584   : > { %v13132_v10 = vld [vmem:[%s16382_s3 + $0x168] sm:$0xff]  }
 0x585   : > { %10534 = vmatpush1.bf16.msra.mxu1 %v13132_v10 }
 0x586   : > { %10535 = vmatprep.subr.bf16.mxu1 %v15150_v55 }
 0x587   : > { %10331 = vmatmul.mubr.bf16.gmra.mrb[104].mxu1 %v6842_v14  ;;  %v6858_v14 = vrot.slane %v7231_v59, 5  ;;  %v6864_v59 = vrot.slane %v7237_v23, 4 }
 0x588   : > { %10338 = vmatprep.mubr.bf16.mxu1 %v7244_v39  ;;  %v7260_v39 = vrot.slane %v7258_v8, 4 }
 0x589   : > { %v12462_v47 = vpop.f32.mrb[152].mxu0  ;;  %v6859_v52 = vor.u32 %v6858_v14, %v6855_v1  ;;  %v15522_v1 = vld [vmem:[#allocation2 + $0x90] sm:$0xff] }
 0x58a   : > { %v15503_v58 = vpop.f32.mrb[153].mxu0  ;;  %v7261_v47 = vor.u32 %v7260_v39, %v7257_v7  ;;  %v13133_v14 = vld [vmem:[%s16382_s3 + $0x170] sm:$0xff]  }
 0x58b   : > { %16485 = vst [vmem:[#allocation18_spill] sm:$0xff] %v15503_v58  ;;  %v12463_v31 = vpop.f32.mrb[154].mxu0  ;;  %v6860_v50 = vsel %vm1155_vm2, %v6850_v13, %v6859_v52  ;;  %10536 = vmatpush1.bf16.msra.mxu1 %v13133_v14 }
 0x58c   : > { %v15508_v29 = vpop.f32.mrb[155].mxu0  ;;  %v16406_v31 = vshrl.u32 %v15514_v26, 16  ;;  %v7262_v48 = vsel %vm565_vm1, %v7252_v3, %v7261_v47  ;;  %v7276_v3 = vshll.u32 %v15522_v1, 16  ;;  %10537 = vmatprep.subr.bf16.mxu1 %v15150_v55 }
 0x58d   : > { %16486 = vst [vmem:[#allocation19_spill] sm:$0xff] %v15508_v29 }
 0x58f   : > { %10339 = vmatmul.mubr.bf16.gmra.mrb[212].mxu1 %v6851_v56  ;;  %v6867_v56 = vrot.slane %v7240_v20, 5  ;;  %v7273_v20 = vshrl.u32 %v15522_v1, 16 }
 0x590   : > { %10346 = vmatprep.mubr.bf16.mxu1 %v7253_v35  ;;  %v10099_v18 = vpop.f32.mrb[132].mxu1  ;;  %v7266_v35 = vrot.slane %v16406_v31, 3 }
 0x591   : > { %v10101_v10 = vpop.f32.mrb[133].mxu1  ;;  %v7269_v18 = vrot.slane %v7267_v2, 4 }
 0x592   : > { %v10102_v42 = vpop.f32.mrb[134].mxu1 }
 0x593   : > { %v10104_v60 = vpop.f32.mrb[135].mxu1  ;;  %v6868_v42 = vor.u32 %v6867_v56, %v6864_v59  ;;  %v7270_v13 = vor.u32 %v7269_v18, %v7266_v35  ;;  %v6876_v59 = vrot.slane %v7249_v51, 5  ;;  %v7278_v35 = vrot.slane %v7276_v3, 4  ;;  %v15538_v18 = vld [vmem:[#allocation2 + $0x98] sm:$0xff] }
 0x594   : > { %v7282_v38 = vshrl.u32 %v15538_v18, 16 }
 0x595   : > { %v6869_v60 = vsel %vm1155_vm2, %v6859_v52, %v6868_v42  ;;  %v7271_v56 = vsel %vm565_vm1, %v7261_v47, %v7270_v13  ;;  %v7285_v52 = vshll.u32 %v15538_v18, 16 }
 0x597   : > { %10347 = vmatmul.mubr.bf16.gmra.mrb[112].mxu1 %v6860_v50  ;;  %v6873_v50 = vrot.slane %v7246_v17, 4  ;;  %v6882_v17 = vrot.slane %v7255_v63, 4  ;;  %v7287_v31 = vrot.slane %v7285_v52, 4 }
 0x598   : > { %10354 = vmatprep.mubr.bf16.mxu1 %v7262_v48  ;;  %v7275_v48 = vrot.slane %v7273_v20, 3 }
 0x599   : > { %v12466_v7 = vpop.f32.mrb[156].mxu0  ;;  %v6877_v14 = vor.u32 %v6876_v59, %v6873_v50  ;;  %v13134_v50 = vld [vmem:[%s16382_s3 + $0x178] sm:$0xff]  }
 0x59a   : > { %v15527_v23 = vpop.f32.mrb[157].mxu0  ;;  %10538 = vmatpush1.bf16.msra.mxu1 %v13134_v50 }
 0x59b   : > { %16487 = vst [vmem:[#allocation20_spill] sm:$0xff] %v15527_v23  ;;  %v12467_v39 = vpop.f32.mrb[158].mxu0  ;;  %v6878_v51 = vsel %vm1155_vm2, %v6868_v42, %v6877_v14  ;;  %10796 = vmatprep.subr.bf16.mxu1 %v15150_v55 }
 0x59c   : > { %v15532_v10 = vpop.f32.mrb[159].mxu0  ;;  %v7279_v39 = vor.u32 %v7278_v35, %v7275_v48 }
 0x59d   : > { %16488 = vst [vmem:[#allocation21_spill] sm:$0xff] %v15532_v10 }
 0x59e   : > { %v7280_v47 = vsel %vm565_vm1, %v7270_v13, %v7279_v39 }
 0x59f   : > { %10355 = vmatmul.mubr.bf16.gmra.mrb[216].mxu1 %v6869_v60  ;;  %v6885_v60 = vrot.slane %v7258_v8, 5 }
 0x5a0   : > { %10362 = vmatprep.mubr.bf16.mxu1 %v7271_v56  ;;  %v10115_v1 = vpop.f32.mrb[140].mxu1  ;;  %v7284_v56 = vrot.slane %v7282_v38, 3 }
 0x5a1   : > { %v10117_v7 = vpop.f32.mrb[141].mxu1  ;;  %v15544_v1 = vld [vmem:[#allocation2 + $0xa0] sm:$0xff]  ;;  %v6886_v59 = vor.u32 %v6885_v60, %v6882_v17 }
 0x5a2   : > { %v10118_v19 = vpop.f32.mrb[142].mxu1  ;;  %v7291_v63 = vshrl.u32 %v15544_v1, 16  ;;  %v7294_v8 = vshll.u32 %v15544_v1, 16  ;;  %v16491_v7 = vshrl.u32 %v15514_v26, 16  ;;  %v6900_v26 = vrot.slane %v7273_v20, 4 }
 0x5a3   : > { %v10120_v6 = vpop.f32.mrb[143].mxu1  ;;  %v7288_v19 = vor.u32 %v7287_v31, %v7284_v56  ;;  %v6887_v18 = vsel %vm1155_vm2, %v6877_v14, %v6886_v59 }
 0x5a4   : > { %v6891_v6 = vrot.slane %v16491_v7, 4  ;;  %v7293_v17 = vrot.slane %v7291_v63, 3  ;;  %v7296_v60 = vrot.slane %v7294_v8, 4  ;;  %v6903_v7 = vrot.slane %v7276_v3, 5 }
 0x5a5   : > { %v7289_v31 = vsel %vm565_vm1, %v7279_v39, %v7288_v19  ;;  %v6909_v3 = vrot.slane %v7282_v38, 4  ;;  %v6921_v38 = vrot.slane %v7294_v8, 5 }
 0x5a6   : > { %v7297_v55 = vor.u32 %v7296_v60, %v7293_v17  ;;  %v6904_v10 = vor.u32 %v6903_v7, %v6900_v26 }
 0x5a7   : > { %10363 = vmatmul.mubr.bf16.gmra.mrb[120].mxu1 %v6878_v51  ;;  %v6894_v51 = vrot.slane %v7267_v2, 5 }
 0x5a8   : > { %10370 = vmatprep.mubr.bf16.mxu1 %v7280_v47  ;;  %v7115_v47 = vld [vmem:[#allocation2 + $0xa8] sm:$0xff]  ;;  %v7298_v2 = vsel %vm565_vm1, %v7288_v19, %v7297_v55 }
 0x5a9   : > { %v12470_v48 = vpop.f32.mrb[160].mxu0  ;;  %v6895_v1 = vor.u32 %v6894_v51, %v6891_v6 }
 0x5aa   : > { %v15549_v35 = vpop.f32.mrb[161].mxu0  ;;  %v7300_v48 = vshrl.u32 %v7115_v47, 16 }
 0x5ab   : > { %16489 = vst [vmem:[#allocation22_spill] sm:$0xff] %v15549_v35  ;;  %v12471_v42 = vpop.f32.mrb[162].mxu0  ;;  %v6896_v14 = vsel %vm1155_vm2, %v6886_v59, %v6895_v1  ;;  %v6905_v20 = vsel %vm1155_vm2, %v6895_v1, %v6904_v10  ;;  %v6912_v59 = vrot.slane %v7285_v52, 5  ;;  %v6918_v1 = vrot.slane %v7291_v63, 4 }
 0x5ac   : > { %v15554_v13 = vpop.f32.mrb[163].mxu0  ;;  %v7303_v42 = vshll.u32 %v7115_v47, 16  ;;  %v7302_v39 = vrot.slane %v7300_v48, 3  ;;  %v6927_v63 = vrot.slane %v7300_v48, 4 }
 0x5ad   : > { %16490 = vst [vmem:[#allocation23_spill] sm:$0xff] %v15554_v13  ;;  %v6913_v7 = vor.u32 %v6912_v59, %v6909_v3 }
 0x5ae   : > { %v6930_v8 = vrot.slane %v7303_v42, 5 }
 0x5af   : > { %10371 = vmatmul.mubr.bf16.gmra.mrb[220].mxu1 %v6887_v18  ;;  %v7305_v18 = vrot.slane %v7303_v42, 4 }
 0x5b0   : > { %10378 = vmatprep.mubr.bf16.mxu1 %v7289_v31  ;;  %v10131_v56 = vpop.f32.mrb[148].mxu1  ;;  %v7116_v31 = vld [vmem:[#allocation2 + $0xb0] sm:$0xff] }
 0x5b1   : > { %v10133_v50 = vpop.f32.mrb[149].mxu1  ;;  %v7306_v6 = vor.u32 %v7305_v18, %v7302_v39  ;;  %v7309_v17 = vshrl.u32 %v7116_v31, 16  ;;  %v7312_v60 = vshll.u32 %v7116_v31, 16 }
 0x5b2   : > { %v10134_v13 = vpop.f32.mrb[150].mxu1 }
 0x5b3   : > { %v10136_v35 = vpop.f32.mrb[151].mxu1  ;;  %v7307_v19 = vsel %vm565_vm1, %v7297_v55, %v7306_v6  ;;  %v7311_v47 = vrot.slane %v7309_v17, 3  ;;  %v7314_v50 = vrot.slane %v7312_v60, 4  ;;  %v6939_v48 = vrot.slane %v7312_v60, 5 }
 0x5b5   : > { %v7315_v39 = vor.u32 %v7314_v50, %v7311_v47 }
 0x5b7   : > { %10379 = vmatmul.mubr.bf16.gmra.mrb[128].mxu1 %v6896_v14  ;;  %v7117_v14 = vld [vmem:[#allocation2 + $0xb8] sm:$0xff]  ;;  %v7316_v52 = vsel %vm565_vm1, %v7306_v6, %v7315_v39 }
 0x5b8   : > { %10386 = vmatprep.mubr.bf16.mxu1 %v7298_v2  ;;  %v7318_v18 = vshrl.u32 %v7117_v14, 16  ;;  %v7321_v31 = vshll.u32 %v7117_v14, 16 }
 0x5b9   : > { %v12474_v56 = vpop.f32.mrb[164].mxu0 }
 0x5ba   : > { %v15562_v51 = vpop.f32.mrb[165].mxu0  ;;  %v7320_v55 = vrot.slane %v7318_v18, 3  ;;  %v6948_v60 = vrot.slane %v7321_v31, 5 }
 0x5bb   : > { %16492 = vst [vmem:[#allocation24_spill] sm:$0xff] %v15562_v51  ;;  %v12475_v13 = vpop.f32.mrb[166].mxu0  ;;  %v6922_v51 = vor.u32 %v6921_v38, %v6918_v1  ;;  %v6931_v38 = vor.u32 %v6930_v8, %v6927_v63 }
 0x5bc   : > { %v15564_v35 = vpop.f32.mrb[167].mxu0 }
 0x5bd   : > { %16493 = vst [vmem:[#allocation25_spill] sm:$0xff] %v15564_v35  ;;  %v6914_v35 = vsel %vm1155_vm2, %v6904_v10, %v6913_v7  ;;  %v6923_v10 = vsel %vm1155_vm2, %v6913_v7, %v6922_v51  ;;  %v6936_v7 = vrot.slane %v7309_v17, 4  ;;  %v6945_v17 = vrot.slane %v7318_v18, 4 }
 0x5bf   : > { %10387 = vmatmul.mubr.bf16.gmra.mrb[224].mxu1 %v6905_v20  ;;  %v7323_v20 = vrot.slane %v7321_v31, 4 }
 0x5c0   : > { %10394 = vmatprep.mubr.bf16.mxu1 %v7307_v19  ;;  %v10147_v26 = vpop.f32.mrb[156].mxu1  ;;  %v7118_v19 = vld [vmem:[#allocation2 + $0xc0] sm:$0xff] }
 0x5c1   : > { %v10149_v2 = vpop.f32.mrb[157].mxu1  ;;  %v7324_v3 = vor.u32 %v7323_v20, %v7320_v55  ;;  %v7327_v47 = vshrl.u32 %v7118_v19, 16  ;;  %v7330_v50 = vshll.u32 %v7118_v19, 16 }
 0x5c2   : > { %v10150_v56 = vpop.f32.mrb[158].mxu1 }
 0x5c3   : > { %v10152_v13 = vpop.f32.mrb[159].mxu1  ;;  %v7325_v6 = vsel %vm565_vm1, %v7315_v39, %v7324_v3  ;;  %v7332_v56 = vrot.slane %v7330_v50, 4  ;;  %v6957_v18 = vrot.slane %v7330_v50, 5 }
 0x5c4   : > { %v7119_v13 = vld [vmem:[#allocation2 + $0xc8] sm:$0xff] }
 0x5c5   : > { %v7336_v20 = vshrl.u32 %v7119_v13, 16  ;;  %v7339_v19 = vshll.u32 %v7119_v13, 16 }
 0x5c7   : > { %10395 = vmatmul.mubr.bf16.gmra.mrb[136].mxu1 %v6914_v35  ;;  %v7329_v35 = vrot.slane %v7327_v47, 3  ;;  %v7338_v39 = vrot.slane %v7336_v20, 3  ;;  %v6966_v50 = vrot.slane %v7339_v19, 5 }
 0x5c8   : > { %10402 = vmatprep.mubr.bf16.mxu1 %v7316_v52 }
 0x5c9   : > { %v12478_v26 = vpop.f32.mrb[168].mxu0  ;;  %v7333_v55 = vor.u32 %v7332_v56, %v7329_v35 }
 0x5ca   : > { %v15570_v59 = vpop.f32.mrb[169].mxu0 }
 0x5cb   : > { %16494 = vst [vmem:[#allocation26_spill] sm:$0xff] %v15570_v59  ;;  %v12479_v14 = vpop.f32.mrb[170].mxu0  ;;  %v7334_v42 = vsel %vm565_vm1, %v7324_v3, %v7333_v55  ;;  %v6940_v59 = vor.u32 %v6939_v48, %v6936_v7  ;;  %v6949_v48 = vor.u32 %v6948_v60, %v6945_v17 }
 0x5cc   : > { %v15572_v2 = vpop.f32.mrb[171].mxu0 }
 0x5cd   : > { %16495 = vst [vmem:[#allocation27_spill] sm:$0xff] %v15572_v2  ;;  %v6932_v2 = vsel %vm1155_vm2, %v6922_v51, %v6931_v38  ;;  %v6941_v51 = vsel %vm1155_vm2, %v6931_v38, %v6940_v59  ;;  %v6954_v38 = vrot.slane %v7327_v47, 4  ;;  %v6963_v47 = vrot.slane %v7336_v20, 4 }
 0x5cf   : > { %10403 = vmatmul.mubr.bf16.gmra.mrb[228].mxu1 %v6923_v10  ;;  %v7341_v10 = vrot.slane %v7339_v19, 4 }
 0x5d0   : > { %10410 = vmatprep.mubr.bf16.mxu1 %v7325_v6  ;;  %v10163_v1 = vpop.f32.mrb[164].mxu1  ;;  %v7120_v6 = vld [vmem:[#allocation2 + $0xd0] sm:$0xff] }
 0x5d1   : > { %v10165_v52 = vpop.f32.mrb[165].mxu1  ;;  %v7342_v63 = vor.u32 %v7341_v10, %v7338_v39  ;;  %v7345_v35 = vshrl.u32 %v7120_v6, 16  ;;  %v7348_v56 = vshll.u32 %v7120_v6, 16 }
 0x5d2   : > { %v10166_v26 = vpop.f32.mrb[166].mxu1 }
 0x5d3   : > { %v10168_v14 = vpop.f32.mrb[167].mxu1  ;;  %v7343_v3 = vsel %vm565_vm1, %v7333_v55, %v7342_v63  ;;  %v7350_v26 = vrot.slane %v7348_v56, 4  ;;  %v6975_v20 = vrot.slane %v7348_v56, 5 }
 0x5d4   : > { %v7121_v14 = vld [vmem:[#allocation2 + $0xd8] sm:$0xff] }
 0x5d5   : > { %v7354_v10 = vshrl.u32 %v7121_v14, 16  ;;  %v7357_v6 = vshll.u32 %v7121_v14, 16 }
 0x5d7   : > { %10411 = vmatmul.mubr.bf16.gmra.mrb[144].mxu1 %v6932_v2  ;;  %v7347_v2 = vrot.slane %v7345_v35, 3  ;;  %v7356_v55 = vrot.slane %v7354_v10, 3  ;;  %v6984_v56 = vrot.slane %v7357_v6, 5 }
 0x5d8   : > { %10418 = vmatprep.mubr.bf16.mxu1 %v7334_v42 }
 0x5d9   : > { %v12482_v1 = vpop.f32.mrb[172].mxu0  ;;  %v7351_v39 = vor.u32 %v7350_v26, %v7347_v2 }
 0x5da   : > { %v15578_v8 = vpop.f32.mrb[173].mxu0 }
 0x5db   : > { %16496 = vst [vmem:[#allocation28_spill] sm:$0xff] %v15578_v8  ;;  %v12483_v13 = vpop.f32.mrb[174].mxu0  ;;  %v7352_v31 = vsel %vm565_vm1, %v7342_v63, %v7351_v39  ;;  %v6958_v8 = vor.u32 %v6957_v18, %v6954_v38  ;;  %v6967_v18 = vor.u32 %v6966_v50, %v6963_v47 }
 0x5dc   : > { %v15580_v52 = vpop.f32.mrb[175].mxu0 }
 0x5dd   : > { %16497 = vst [vmem:[#allocation29_spill] sm:$0xff] %v15580_v52  ;;  %v6950_v52 = vsel %vm1155_vm2, %v6940_v59, %v6949_v48  ;;  %v6959_v59 = vsel %vm1155_vm2, %v6949_v48, %v6958_v8  ;;  %v6972_v48 = vrot.slane %v7345_v35, 4  ;;  %v6981_v35 = vrot.slane %v7354_v10, 4 }
 0x5df   : > { %10419 = vmatmul.mubr.bf16.gmra.mrb[232].mxu1 %v6941_v51  ;;  %v7359_v51 = vrot.slane %v7357_v6, 4 }
 0x5e0   : > { %10426 = vmatprep.mubr.bf16.mxu1 %v7343_v3  ;;  %v10179_v7 = vpop.f32.mrb[172].mxu1  ;;  %v7122_v3 = vld [vmem:[#allocation2 + $0xe0] sm:$0xff] }
 0x5e1   : > { %v10181_v42 = vpop.f32.mrb[173].mxu1  ;;  %v7360_v17 = vor.u32 %v7359_v51, %v7356_v55  ;;  %v7363_v2 = vshrl.u32 %v7122_v3, 16  ;;  %v7366_v26 = vshll.u32 %v7122_v3, 16 }
 0x5e2   : > { %v10182_v1 = vpop.f32.mrb[174].mxu1 }
 0x5e3   : > { %v10184_v13 = vpop.f32.mrb[175].mxu1  ;;  %v7361_v63 = vsel %vm565_vm1, %v7351_v39, %v7360_v17  ;;  %v7368_v1 = vrot.slane %v7366_v26, 4  ;;  %v6993_v10 = vrot.slane %v7366_v26, 5 }
 0x5e4   : > { %v7123_v13 = vld [vmem:[#allocation2 + $0xe8] sm:$0xff] }
 0x5e5   : > { %v7372_v51 = vshrl.u32 %v7123_v13, 16  ;;  %v7375_v3 = vshll.u32 %v7123_v13, 16 }
 0x5e7   : > { %10427 = vmatmul.mubr.bf16.gmra.mrb[152].mxu1 %v6950_v52  ;;  %v7365_v52 = vrot.slane %v7363_v2, 3  ;;  %v7374_v39 = vrot.slane %v7372_v51, 3 }
 0x5e8   : > { %10434 = vmatprep.mubr.bf16.mxu1 %v7352_v31 }
 0x5e9   : > { %v12486_v7 = vpop.f32.mrb[176].mxu0  ;;  %v7369_v55 = vor.u32 %v7368_v1, %v7365_v52 }
 0x5ea   : > { %v15586_v60 = vpop.f32.mrb[177].mxu0 }
 0x5eb   : > { %16498 = vst [vmem:[#allocation30_spill] sm:$0xff] %v15586_v60  ;;  %v12487_v14 = vpop.f32.mrb[178].mxu0  ;;  %v7370_v19 = vsel %vm565_vm1, %v7360_v17, %v7369_v55  ;;  %v6976_v60 = vor.u32 %v6975_v20, %v6972_v48  ;;  %v6985_v20 = vor.u32 %v6984_v56, %v6981_v35 }
 0x5ec   : > { %v15588_v42 = vpop.f32.mrb[179].mxu0 }
 0x5ed   : > { %16499 = vst [vmem:[#allocation31_spill] sm:$0xff] %v15588_v42  ;;  %v6968_v42 = vsel %vm1155_vm2, %v6958_v8, %v6967_v18  ;;  %v6977_v8 = vsel %vm1155_vm2, %v6967_v18, %v6976_v60  ;;  %v6990_v18 = vrot.slane %v7363_v2, 4 }
 0x5ef   : > { %10435 = vmatmul.mubr.bf16.gmra.mrb[236].mxu1 %v6959_v59  ;;  %v7377_v59 = vrot.slane %v7375_v3, 4 }
 0x5f0   : > { %10442 = vmatprep.mubr.bf16.mxu1 %v7361_v63  ;;  %v10195_v38 = vpop.f32.mrb[180].mxu1  ;;  %v7124_v63 = vld [vmem:[#allocation2 + $0xf0] sm:$0xff] }
 0x5f1   : > { %v10197_v31 = vpop.f32.mrb[181].mxu1  ;;  %v7378_v47 = vor.u32 %v7377_v59, %v7374_v39  ;;  %v7381_v52 = vshrl.u32 %v7124_v63, 16  ;;  %v7384_v1 = vshll.u32 %v7124_v63, 16 }
 0x5f2   : > { %v10198_v7 = vpop.f32.mrb[182].mxu1 }
 0x5f3   : > { %v10200_v14 = vpop.f32.mrb[183].mxu1  ;;  %v7379_v17 = vsel %vm565_vm1, %v7369_v55, %v7378_v47  ;;  %v7386_v7 = vrot.slane %v7384_v1, 4 }
 0x5f4   : > { %v7125_v14 = vld [vmem:[#allocation2 + $0xf8] sm:$0xff] }
 0x5f5   : > { %v7390_v59 = vshrl.u32 %v7125_v14, 16  ;;  %v7393_v63 = vshll.u32 %v7125_v14, 16  ;;  %v7002_v14 = vrot.slane %v7375_v3, 5 }
 0x5f7   : > { %10443 = vmatmul.mubr.bf16.gmra.mrb[160].mxu1 %v6968_v42  ;;  %v7383_v42 = vrot.slane %v7381_v52, 3  ;;  %v7392_v55 = vrot.slane %v7390_v59, 3 }
 0x5f8   : > { %10450 = vmatprep.mubr.bf16.mxu1 %v7370_v19 }
 0x5f9   : > { %v12490_v38 = vpop.f32.mrb[180].mxu0  ;;  %v7387_v39 = vor.u32 %v7386_v7, %v7383_v42  ;;  %v6999_v7 = vrot.slane %v7372_v51, 4  ;;  %v7011_v51 = vrot.slane %v7384_v1, 5 }
 0x5fa   : > { %v15594_v50 = vpop.f32.mrb[181].mxu0 }
 0x5fb   : > { %16500 = vst [vmem:[#allocation32_spill] sm:$0xff] %v15594_v50  ;;  %v12491_v13 = vpop.f32.mrb[182].mxu0  ;;  %v7388_v6 = vsel %vm565_vm1, %v7378_v47, %v7387_v39  ;;  %v6994_v50 = vor.u32 %v6993_v10, %v6990_v18 }
 0x5fc   : > { %v15596_v31 = vpop.f32.mrb[183].mxu0 }
 0x5fd   : > { %16501 = vst [vmem:[#allocation33_spill] sm:$0xff] %v15596_v31  ;;  %v6986_v31 = vsel %vm1155_vm2, %v6976_v60, %v6985_v20  ;;  %v6995_v42 = vsel %vm1155_vm2, %v6985_v20, %v6994_v50  ;;  %v7008_v20 = vrot.slane %v7381_v52, 4 }
 0x5ff   : > { %10451 = vmatmul.mubr.bf16.gmra.mrb[240].mxu1 %v6977_v8  ;;  %v7395_v8 = vrot.slane %v7393_v63, 4 }
 0x600   : > { %10458 = vmatprep.mubr.bf16.mxu1 %v7379_v17  ;;  %v7126_v17 = vld [vmem:[#allocation2 + $0x100] sm:$0xff] }
 0x601   : > { %v7399_v35 = vshrl.u32 %v7126_v17, 16  ;;  %v7402_v56 = vshll.u32 %v7126_v17, 16 }
 0x602   : > { %v10211_v48 = vpop.f32.mrb[188].mxu1 }
 0x603   : > { %v10213_v19 = vpop.f32.mrb[189].mxu1  ;;  %v7396_v48 = vor.u32 %v7395_v8, %v7392_v55  ;;  %v7401_v2 = vrot.slane %v7399_v35, 3  ;;  %v7404_v26 = vrot.slane %v7402_v56, 4  ;;  %v7128_v35 = vld [vmem:[#allocation2 + $0x110] sm:$0xf]  ;;  %v7012_v56 = vor.u32 %v7011_v51, %v7008_v20 }
 0x604   : > { %v10214_v38 = vpop.f32.mrb[190].mxu1  ;;  %v7003_v19 = vor.u32 %v7002_v14, %v6999_v7  ;;  %v7417_v7 = vshrl.u32 %v7128_v35, 16  ;;  %v7420_v14 = vshll.u32 %v7128_v35, 16 }
 0x605   : > { %v10216_v13 = vpop.f32.mrb[191].mxu1  ;;  %v7397_v60 = vsel %vm565_vm1, %v7387_v39, %v7396_v48 }
 0x606   : > { %v7405_v13 = vor.u32 %v7404_v26, %v7401_v2  ;;  %v7004_v8 = vsel %vm1155_vm2, %v6994_v50, %v7003_v19  ;;  %v7017_v2 = vrot.slane %v7390_v59, 4  ;;  %v7020_v26 = vrot.slane %v7393_v63, 5 }
 0x607   : > { %10459 = vmatmul.mubr.bf16.gmra.mrb[168].mxu1 %v6986_v31  ;;  %v7127_v31 = vld [vmem:[#allocation2 + $0x108] sm:$0xff]  ;;  %v7419_v52 = vrot.slane %v7417_v7, 3  ;;  %v7422_v1 = vrot.slane %v7420_v14, 4 }
 0x608   : > { %10466 = vmatprep.mubr.bf16.mxu1 %v7388_v6  ;;  %v7408_v6 = vshrl.u32 %v7127_v31, 16  ;;  %v7411_v18 = vshll.u32 %v7127_v31, 16  ;;  %v7406_v3 = vsel %vm565_vm1, %v7396_v48, %v7405_v13  ;;  %v6735_v31 = vld [vmem:[#allocation2 + $0x100] sm:$0x1f]  ;;  %v15608_v48 = vld [vmem:[#allocation2 + $0x18] sm:$0xff] }
 0x609   : > { %v7423_v20 = vor.u32 %v7422_v1, %v7419_v52  ;;  %v7726_v59 = vshrl.u32 %v15608_v48, 16  ;;  %v7729_v63 = vshll.u32 %v15608_v48, 16 }
 0x60a   : > { %v7410_v39 = vrot.slane %v7408_v6, 3  ;;  %v7413_v17 = vrot.slane %v7411_v18, 4  ;;  %v7021_v6 = vor.u32 %v7020_v26, %v7017_v2  ;;  %v7024_v18 = vshrl.u32 %v6735_v31, 16  ;;  %v15614_v26 = vld [vmem:[#allocation2 + $0x20] sm:$0xff] }
 0x60b   : > { %v7731_v2 = vrot.slane %v7729_v63, 5 }
 0x60f   : > { %10467 = vmatmul.mubr.bf16.gmra.mrb[244].mxu1 %v6995_v42  ;;  %v7414_v42 = vor.u32 %v7413_v17, %v7410_v39  ;;  %v7026_v39 = vrot.slane %v7024_v18, 4  ;;  %v7489_v18 = vld [vmem:[#allocation2 + $0x10] sm:$0xf0] }
 0x610   : > { %10474 = vmatprep.mubr.bf16.mxu1 %v7397_v60  ;;  %v7013_v60 = vsel %vm1155_vm2, %v7003_v19, %v7012_v56 }
 0x611   : > { %v7415_v50 = vsel %vm565_vm1, %v7405_v13, %v7414_v42  ;;  %v7424_v7 = vsel %vm565_vm1, %v7414_v42, %v7423_v20  ;;  %v7555_v20 = vrot.slane %v7489_v18, 4 }
 0x612   : > { %v10260_v47 = vpop.f32.mrb[192].mxu1 }
 0x613   : > { %v10262_v38 = vpop.f32.mrb[193].mxu1  ;;  %v7684_v47 = vld [vmem:[#allocation2 + $0x10] sm:$0xf0] }
 0x614   : > { %v10263_v10 = vpop.f32.mrb[194].mxu1  ;;  %v7721_v19 = vshll.u32 %v7684_v47, 16 }
 0x615   : > { %v10265_v55 = vpop.f32.mrb[195].mxu1  ;;  %v7027_v10 = vshll.u32 %v6735_v31, 16  ;;  %v7735_v31 = vshrl.u32 %v15614_v26, 16 }
 0x616   : > { %v7718_v55 = vshrl.u32 %v7684_v47, 16  ;;  %v7723_v14 = vrot.slane %v7721_v19, 5  ;;  %v7738_v47 = vshll.u32 %v15614_v26, 16  ;;  %v7556_v19 = vrot.slane %v15608_v48, 4 }
 0x617   : > { %10475 = vmatmul.mubr.bf16.gmra.mrb[176].mxu1 %v7004_v8  ;;  %v7029_v17 = vrot.slane %v7027_v10, 5  ;;  %v7737_v42 = vrot.slane %v7735_v31, 4 }
 0x618   : > { %10482 = vmatprep.mubr.bf16.mxu1 %v7406_v3  ;;  %v7022_v3 = vsel %vm1155_vm2, %v7012_v56, %v7021_v6  ;;  %v7720_v35 = vrot.slane %v7718_v55, 4  ;;  %v7740_v10 = vrot.slane %v7738_v47, 5  ;;  %v15620_v55 = vld [vmem:[#allocation2 + $0x28] sm:$0xff]  ;;  %v13137_v47 = vld [vmem:[%s16382_s3 + $0x190] sm:$0xff]  }
 0x61a   : > { %v7724_v52 = vor.u32 %v7723_v14, %v7720_v35  ;;  %v7741_v63 = vor.u32 %v7740_v10, %v7737_v42  ;;  %v15634_v14 = vld [vmem:[#allocation2 + $0x30] sm:$0xff]  ;;  %v15655_v42 = vld [vmem:[#allocation2 + $0x38] sm:$0xff] }
 0x61b   : > { %v16413_v31 = vshll.u32 %v15634_v14, 16  ;;  %v13138_v10 = vld [vmem:[%s16382_s3 + $0x198] sm:$0xff]  }
 0x61d   : > { %v7758_v18 = vrot.slane %v16413_v31, 5 }
 0x61f   : > { %10483 = vmatmul.mubr.bf16.gmra.mrb[248].mxu1 %v7013_v60  ;;  %v7728_v60 = vrot.slane %v7726_v59, 4 }
 0x620   : > { %10490 = vmatprep.mubr.bf16.mxu1 %v7415_v50  ;;  %v7030_v50 = vor.u32 %v7029_v17, %v7026_v39  ;;  %v7557_v17 = vsel %vm992_vm0, %v7555_v20, %v7556_v19  ;;  %v15662_v20 = vrot.slane %v15620_v55, 4 }
 0x621   : > { %v7732_v1 = vor.u32 %v7731_v2, %v7728_v60  ;;  %v13136_v60 = vld [vmem:[%s16382_s3 + $0x188] sm:$0xff]   ;;  %v15639_v2 = vld [vmem:[#allocation2] sm:$0xff] }
 0x622   : > { %v10276_v38 = vpop.f32.mrb[196].mxu1  ;;  %v7031_v56 = vsel %vm1155_vm2, %v7021_v6, %v7030_v50  ;;  %v7558_v50 = vrot.slane %v15614_v26, 4 }
 0x623   : > { %v10278_v8 = vpop.f32.mrb[197].mxu1  ;;  %v7733_v38 = vsel %vm1155_vm2, %v7724_v52, %v7732_v1  ;;  %v7742_v35 = vsel %vm1155_vm2, %v7732_v1, %v7741_v63  ;;  %v16414_v1 = vshrl.u32 %v15634_v14, 16 }
 0x624   : > { %v10279_v13 = vpop.f32.mrb[198].mxu1 }
 0x625   : > { %v10281_v51 = vpop.f32.mrb[199].mxu1  ;;  %v16420_v13 = vshrl.u32 %v15620_v55, 16  ;;  %v7755_v26 = vrot.slane %v16414_v1, 4 }
 0x626   : > { %v16416_v51 = vshll.u32 %v15620_v55, 16 }
 0x627   : > { %10491 = vmatmul.mubr.bf16.gmra.mrb[184].mxu1 %v7022_v3  ;;  %v13135_v3 = vld [vmem:[%s16382_s3 + $0x180] sm:$0xff]   ;;  %v7746_v48 = vrot.slane %v16420_v13, 4 }
 0x628   : > { %10498 = vmatprep.mubr.bf16.mxu1 %v7424_v7  ;;  %v7749_v7 = vrot.slane %v16416_v51, 5 }
 0x62a   : > { %v7750_v52 = vor.u32 %v7749_v7, %v7746_v48 }
 0x62f   : > { %10499 = vmatmul.mubr.bf16.gmra.mrb[252].mxu1 %v7031_v56  ;;  %v7559_v56 = vsel %vm992_vm0, %v7556_v19, %v7558_v50 }
 0x630   : > { %10539 = vmatprep.mubr.bf16.mxu1 %v7733_v38  ;;  %v7751_v38 = vsel %vm1155_vm2, %v7741_v63, %v7750_v52  ;;  %v16412_v63 = vshrl.u32 %v15655_v42, 16 }
 0x632   : > { %v10292_v8 = vpop.f32.mrb[200].mxu1  ;;  %v7764_v7 = vrot.slane %v16412_v63, 4 }
 0x633   : > { %v10294_v59 = vpop.f32.mrb[201].mxu1 }
 0x634   : > { %v10295_v6 = vpop.f32.mrb[202].mxu1  ;;  %v7759_v59 = vor.u32 %v7758_v18, %v7755_v26  ;;  %v13141_v18 = vld [vmem:[%s16382_s3 + $0x1b0] sm:$0xff]  }
 0x635   : > { %v10297_v39 = vpop.f32.mrb[203].mxu1  ;;  %v16411_v6 = vshll.u32 %v15655_v42, 16 }
 0x636   : > { %v13139_v39 = vld [vmem:[%s16382_s3 + $0x1a0] sm:$0xff]   ;;  %v7760_v48 = vsel %vm1155_vm2, %v7750_v52, %v7759_v59 }
 0x637   : > { %10540 = vmatmul.mubr.bf16.vlgmr.msra.gmra.mrb[64].mxu1 %v7557_v17 }
 0x638   : > { %10547 = vmatprep.mubr.bf16.mxu1 %v7742_v35  ;;  %10797 = vmatpush1.bf16.msra.mxu1 %v13135_v3  ;;  %v7561_v35 = vsel %vm992_vm0, %v7558_v50, %v15662_v20  ;;  %v7562_v50 = vrot.slane %v15634_v14, 4 }
 0x639   : > { %10798 = vmatprep.subr.bf16.mxu1 %v15639_v2 }
 0x63c   : > { %10799 = vmatpush1.bf16.msra.mxu1 %v13136_v60  ;;  %v7767_v60 = vrot.slane %v16411_v6, 5 }
 0x63d   : > { %10800 = vmatprep.subr.bf16.mxu1 %v15639_v2 }
 0x63f   : > { %10548 = vmatmul.mubr.bf16.gmra.mrb[0].mxu1 %v7559_v56  ;;  %v13140_v56 = vld [vmem:[%s16382_s3 + $0x1a8] sm:$0xff]  }
 0x640   : > { %10555 = vmatprep.mubr.bf16.mxu1 %v7751_v38  ;;  %10801 = vmatpush1.bf16.msra.mxu1 %v13137_v47  ;;  %v15677_v47 = vld [vmem:[#allocation2 + $0x40] sm:$0xff]  ;;  %v7768_v38 = vor.u32 %v7767_v60, %v7764_v7 }
 0x641   : > { %10802 = vmatprep.subr.bf16.mxu1 %v15639_v2  ;;  %v16408_v52 = vshrl.u32 %v15677_v47, 16  ;;  %v16407_v26 = vshll.u32 %v15677_v47, 16 }
 0x642   : > { %v10308_v8 = vpop.f32.mrb[204].mxu1 }
 0x643   : > { %v10310_v19 = vpop.f32.mrb[205].mxu1  ;;  %v7769_v8 = vsel %vm1155_vm2, %v7759_v59, %v7768_v38 }
 0x644   : > { %v10311_v3 = vpop.f32.mrb[206].mxu1  ;;  %10803 = vmatpush1.bf16.msra.mxu1 %v13138_v10  ;;  %v15692_v10 = vsel %vm992_vm0, %v15662_v20, %v7562_v50  ;;  %v7773_v19 = vrot.slane %v16408_v52, 4 }
 0x645   : > { %v10313_v17 = vpop.f32.mrb[207].mxu1  ;;  %10804 = vmatprep.subr.bf16.mxu1 %v15639_v2  ;;  %v7776_v3 = vrot.slane %v16407_v26, 5 }
 0x646   : > { %v13142_v17 = vld [vmem:[%s16382_s3 + $0x1b8] sm:$0xff]  }
 0x647   : > { %10556 = vmatmul.mubr.bf16.gmra.mrb[72].mxu1 %v7561_v35  ;;  %v7777_v7 = vor.u32 %v7776_v3, %v7773_v19 }
 0x648   : > { %10563 = vmatprep.mubr.bf16.mxu1 %v7760_v48  ;;  %10805 = vmatpush1.bf16.msra.mxu1 %v13139_v39  ;;  %v15700_v39 = vld [vmem:[#allocation2 + $0x48] sm:$0xff]  ;;  %v7564_v48 = vrot.slane %v15655_v42, 4 }
 0x649   : > { %10806 = vmatprep.subr.bf16.mxu1 %v15639_v2  ;;  %v16410_v60 = vshrl.u32 %v15700_v39, 16  ;;  %v7778_v19 = vsel %vm1155_vm2, %v7768_v38, %v7777_v7 }
 0x64a   : > { %v15714_v52 = vsel %vm992_vm0, %v7562_v50, %v7564_v48  ;;  %v7566_v50 = vrot.slane %v15677_v47, 4 }
 0x64b   : > { %v7782_v3 = vrot.slane %v16410_v60, 4 }
 0x64c   : > { %10807 = vmatpush1.bf16.msra.mxu1 %v13140_v56  ;;  %v16409_v56 = vshll.u32 %v15700_v39, 16 }
 0x64d   : > { %10808 = vmatprep.subr.bf16.mxu1 %v15639_v2 }
 0x64f   : > { %10564 = vmatmul.mubr.bf16.gmra.mrb[4].mxu1 %v15692_v10 }
 0x650   : > { %10571 = vmatprep.mubr.bf16.mxu1 %v7769_v8  ;;  %10809 = vmatpush1.bf16.msra.mxu1 %v13141_v18  ;;  %v13143_v18 = vld [vmem:[%s16382_s3 + $0x1c0] sm:$0xff]  }
 0x651   : > { %10810 = vmatprep.subr.bf16.mxu1 %v15639_v2 }
 0x652   : > { %v10324_v35 = vpop.f32.mrb[208].mxu1 }
 0x653   : > { %v10326_v59 = vpop.f32.mrb[209].mxu1  ;;  %v13144_v35 = vld [vmem:[%s16382_s3 + $0x1c8] sm:$0xff]  }
 0x654   : > { %v10327_v26 = vpop.f32.mrb[210].mxu1  ;;  %10811 = vmatpush1.bf16.msra.mxu1 %v13142_v17  ;;  %v15722_v17 = vld [vmem:[#allocation2 + $0x50] sm:$0xff] }
 0x655   : > { %v10329_v8 = vpop.f32.mrb[211].mxu1  ;;  %10812 = vmatprep.subr.bf16.mxu1 %v15639_v2  ;;  %v7785_v26 = vrot.slane %v16409_v56, 5  ;;  %v16415_v38 = vshrl.u32 %v15722_v17, 16 }
 0x656   : > { %v16419_v8 = vshll.u32 %v15722_v17, 16 }
 0x657   : > { %10572 = vmatmul.mubr.bf16.gmra.mrb[80].mxu1 %v15714_v52  ;;  %v7786_v59 = vor.u32 %v7785_v26, %v7782_v3  ;;  %v7791_v3 = vrot.slane %v16415_v38, 4 }
 0x658   : > { %10579 = vmatprep.mubr.bf16.mxu1 %v7778_v19  ;;  %10813 = vmatpush1.bf16.msra.mxu1 %v13143_v18  ;;  %v13145_v19 = vld [vmem:[%s16382_s3 + $0x1d0] sm:$0xff]   ;;  %v15736_v18 = vsel %vm992_vm0, %v7564_v48, %v7566_v50  ;;  %v7794_v26 = vrot.slane %v16419_v8, 5  ;;  %v7568_v48 = vrot.slane %v15700_v39, 4 }
 0x659   : > { %10814 = vmatprep.subr.bf16.mxu1 %v15639_v2  ;;  %v7787_v56 = vsel %vm1155_vm2, %v7777_v7, %v7786_v59 }
 0x65a   : > { %v7795_v63 = vor.u32 %v7794_v26, %v7791_v3  ;;  %v15751_v51 = vsel %vm992_vm0, %v7566_v50, %v7568_v48  ;;  %v7570_v50 = vrot.slane %v15722_v17, 4 }
 0x65c   : > { %10815 = vmatpush1.bf16.msra.mxu1 %v13144_v35  ;;  %v15744_v35 = vld [vmem:[#allocation2 + $0x58] sm:$0xff]  ;;  %v15769_v26 = vsel %vm992_vm0, %v7568_v48, %v7570_v50 }
 0x65d   : > { %10816 = vmatprep.subr.bf16.mxu1 %v15639_v2  ;;  %v16418_v31 = vshrl.u32 %v15744_v35, 16  ;;  %v16417_v7 = vshll.u32 %v15744_v35, 16 }
 0x65f   : > { %10580 = vmatmul.mubr.bf16.gmra.mrb[8].mxu1 %v15736_v18 }
 0x660   : > { %10587 = vmatprep.mubr.bf16.mxu1 %v7787_v56  ;;  %10817 = vmatpush1.bf16.msra.mxu1 %v13145_v19  ;;  %v7796_v56 = vsel %vm1155_vm2, %v7786_v59, %v7795_v63  ;;  %v15759_v19 = vld [vmem:[#allocation2 + $0x60] sm:$0xff] }
 0x661   : > { %10818 = vmatprep.subr.bf16.mxu1 %v15639_v2  ;;  %v16424_v3 = vshrl.u32 %v15759_v19, 16  ;;  %v16423_v59 = vshll.u32 %v15759_v19, 16 }
 0x662   : > { %v10340_v60 = vpop.f32.mrb[212].mxu1 }
 0x663   : > { %v10342_v6 = vpop.f32.mrb[213].mxu1  ;;  %v7800_v60 = vrot.slane %v16418_v31, 4  ;;  %v7572_v31 = vrot.slane %v15744_v35, 4 }
 0x664   : > { %v10343_v1 = vpop.f32.mrb[214].mxu1  ;;  %v7803_v6 = vrot.slane %v16417_v7, 5  ;;  %v7809_v7 = vrot.slane %v16424_v3, 4 }
 0x665   : > { %v10345_v38 = vpop.f32.mrb[215].mxu1  ;;  %v13146_v1 = vld [vmem:[%s16382_s3 + $0x1d8] sm:$0xff]   ;;  %v15783_v58 = vsel %vm992_vm0, %v7570_v50, %v7572_v31  ;;  %v7574_v50 = vrot.slane %v15759_v19, 4 }
 0x666   : > { %10819 = vmatpush1.bf16.msra.mxu1 %v13146_v1  ;;  %v7804_v38 = vor.u32 %v7803_v6, %v7800_v60  ;;  %v7812_v1 = vrot.slane %v16423_v59, 5  ;;  %v15777_v60 = vld [vmem:[#allocation2 + $0x68] sm:$0xff] }
 0x667   : > { %10588 = vmatmul.mubr.bf16.gmra.mrb[88].mxu1 %v15751_v51  ;;  %10820 = vmatprep.subr.bf16.mxu1 %v15639_v2  ;;  %v16421_v48 = vshrl.u32 %v15777_v60, 16  ;;  %v16422_v23 = vshll.u32 %v15777_v60, 16  ;;  %v7576_v59 = vrot.slane %v15777_v60, 4 }
 0x668   : > { %10595 = vmatprep.mubr.bf16.mxu1 %v7796_v56  ;;  %v7805_v56 = vsel %vm1155_vm2, %v7795_v63, %v7804_v38  ;;  %v7813_v13 = vor.u32 %v7812_v1, %v7809_v7  ;;  %v15791_v7 = vld [vmem:[#allocation2 + $0x70] sm:$0xff] }
 0x669   : > { %v15815_v61 = vsel %vm992_vm0, %v7574_v50, %v7576_v59 }
 0x66f   : > { %10596 = vmatmul.mubr.bf16.gmra.mrb[12].mxu1 %v15769_v26 }
 0x670   : > { %10603 = vmatprep.mubr.bf16.mxu1 %v7805_v56  ;;  %v7814_v56 = vsel %vm1155_vm2, %v7804_v38, %v7813_v13  ;;  %v16427_v38 = vshll.u32 %v15791_v7, 16 }
 0x672   : > { %v10356_v6 = vpop.f32.mrb[216].mxu1 }
 0x673   : > { %v10358_v8 = vpop.f32.mrb[217].mxu1  ;;  %v7818_v6 = vrot.slane %v16421_v48, 4  ;;  %v15801_v48 = vsel %vm992_vm0, %v7572_v31, %v7574_v50  ;;  %v7578_v50 = vrot.slane %v15791_v7, 4 }
 0x674   : > { %v10359_v29 = vpop.f32.mrb[218].mxu1  ;;  %v7821_v8 = vrot.slane %v16422_v23, 5 }
 0x675   : > { %v10361_v63 = vpop.f32.mrb[219].mxu1  ;;  %v13147_v29 = vld [vmem:[%s16382_s3 + $0x1e0] sm:$0xff]  }
 0x676   : > { %10821 = vmatpush1.bf16.msra.mxu1 %v13147_v29  ;;  %v7822_v1 = vor.u32 %v7821_v8, %v7818_v6  ;;  %v16428_v63 = vshrl.u32 %v15791_v7, 16  ;;  %v7830_v29 = vrot.slane %v16427_v38, 5  ;;  %v15809_v6 = vld [vmem:[#allocation2 + $0x78] sm:$0xff] }
 0x677   : > { %10604 = vmatmul.mubr.bf16.gmra.mrb[96].mxu1 %v15783_v58  ;;  %10822 = vmatprep.subr.bf16.mxu1 %v15639_v2  ;;  %v16425_v31 = vshrl.u32 %v15809_v6, 16  ;;  %v16426_v41 = vshll.u32 %v15809_v6, 16 }
 0x678   : > { %10611 = vmatprep.mubr.bf16.mxu1 %v7814_v56  ;;  %v7823_v56 = vsel %vm1155_vm2, %v7813_v13, %v7822_v1  ;;  %v7827_v23 = vrot.slane %v16428_v63, 4 }
 0x67a   : > { %v7831_v21 = vor.u32 %v7830_v29, %v7827_v23  ;;  %v15823_v23 = vld [vmem:[#allocation2 + $0x80] sm:$0xff] }
 0x67f   : > { %10612 = vmatmul.mubr.bf16.gmra.mrb[16].mxu1 %v15801_v48 }
 0x680   : > { %10619 = vmatprep.mubr.bf16.mxu1 %v7823_v56  ;;  %v7832_v56 = vsel %vm1155_vm2, %v7822_v1, %v7831_v21  ;;  %v16431_v1 = vshll.u32 %v15823_v23, 16 }
 0x682   : > { %v10372_v8 = vpop.f32.mrb[220].mxu1 }
 0x683   : > { %v10374_v3 = vpop.f32.mrb[221].mxu1  ;;  %v7836_v8 = vrot.slane %v16425_v31, 4  ;;  %v15833_v31 = vsel %vm992_vm0, %v7576_v59, %v7578_v50 }
 0x684   : > { %v10375_v33 = vpop.f32.mrb[222].mxu1  ;;  %v7839_v3 = vrot.slane %v16426_v41, 5 }
 0x685   : > { %v10377_v13 = vpop.f32.mrb[223].mxu1  ;;  %v13148_v33 = vld [vmem:[%s16382_s3 + $0x1e8] sm:$0xff]  }
 0x686   : > { %10823 = vmatpush1.bf16.msra.mxu1 %v13148_v33  ;;  %v7840_v29 = vor.u32 %v7839_v3, %v7836_v8  ;;  %v16429_v13 = vshrl.u32 %v15823_v23, 16  ;;  %v7848_v33 = vrot.slane %v16431_v1, 5  ;;  %v7580_v3 = vrot.slane %v15809_v6, 4 }
 0x687   : > { %10620 = vmatmul.mubr.bf16.gmra.mrb[104].mxu1 %v15815_v61  ;;  %10824 = vmatprep.subr.bf16.mxu1 %v15639_v2  ;;  %v16503_v1 = vshll.u32 %v15265_v54, 16 }
 0x688   : > { %10627 = vmatprep.mubr.bf16.mxu1 %v7832_v56  ;;  %v7841_v56 = vsel %vm1155_vm2, %v7831_v21, %v7840_v29  ;;  %v7845_v41 = vrot.slane %v16429_v13, 4  ;;  %v15843_v59 = vsel %vm992_vm0, %v7578_v50, %v7580_v3  ;;  %v16502_v13 = vshrl.u32 %v15265_v54, 16 }
 0x689   : > { %v16504_v54 = vshrl.u32 %v15272_v57, 16 }
 0x68a   : > { %v7849_v63 = vor.u32 %v7848_v33, %v7845_v41  ;;  %v7854_v53 = vrot.slane %v16502_v13, 4  ;;  %v13149_v41 = vld [vmem:[%s16382_s3 + $0x1f0] sm:$0xff]   ;;  %v16505_v13 = vshll.u32 %v15272_v57, 16  ;;  %v16507_v57 = vshll.u32 %v15276_v36, 16 }
 0x68b   : > { %10825 = vmatpush1.bf16.msra.mxu1 %v13149_v41 }
 0x68c   : > { %v7850_v21 = vsel %vm1155_vm2, %v7840_v29, %v7849_v63  ;;  %10826 = vmatprep.subr.bf16.mxu1 %v15639_v2  ;;  %v7863_v29 = vrot.slane %v16504_v54, 4  ;;  %v16506_v54 = vshrl.u32 %v15276_v36, 16 }
 0x68e   : > { %v7872_v46 = vrot.slane %v16506_v54, 4 }
 0x68f   : > { %10628 = vmatmul.mubr.bf16.gmra.mrb[20].mxu1 %v15833_v31 }
 0x690   : > { %10635 = vmatprep.mubr.bf16.mxu1 %v7841_v56  ;;  %v7857_v56 = vrot.slane %v16503_v1, 5  ;;  %v7866_v1 = vrot.slane %v16505_v13, 5  ;;  %v13160_v13 = vld [vmem:[#allocation2 + $0x90] sm:$0xff] }
 0x692   : > { %v10388_v8 = vpop.f32.mrb[224].mxu1 }
 0x693   : > { %v10390_v38 = vpop.f32.mrb[225].mxu1  ;;  %v13159_v8 = vld [vmem:[#allocation2 + $0x88] sm:$0xff] }
 0x694   : > { %v10391_v32 = vpop.f32.mrb[226].mxu1 }
 0x695   : > { %v10393_v28 = vpop.f32.mrb[227].mxu1  ;;  %v7858_v32 = vor.u32 %v7857_v56, %v7854_v53  ;;  %v7867_v56 = vor.u32 %v7866_v1, %v7863_v29  ;;  %v13150_v29 = vld [vmem:[%s16382_s3 + $0x1f8] sm:$0xff]   ;;  %v7586_v1 = vrot.slane %v13160_v13, 4 }
 0x696   : > { %v7582_v28 = vrot.slane %v15823_v23, 4  ;;  %10827 = vmatpush1.bf16.msra.mxu1 %v13150_v29 }
 0x697   : > { %10636 = vmatmul.mubr.bf16.gmra.mrb[112].mxu1 %v15843_v59  ;;  %v7859_v50 = vsel %vm1155_vm2, %v7849_v63, %v7858_v32  ;;  %v7868_v63 = vsel %vm1155_vm2, %v7858_v32, %v7867_v56 }
 0x698   : > { %10643 = vmatprep.mubr.bf16.mxu1 %v7850_v21  ;;  %v15857_v38 = vsel %vm992_vm0, %v7580_v3, %v7582_v28  ;;  %v7584_v21 = vrot.slane %v13159_v8, 4  ;;  %v16508_v8 = vshrl.u32 %v15283_v30, 16 }
 0x69a   : > { %v15866_v3 = vsel %vm992_vm0, %v7582_v28, %v7584_v21  ;;  %v15884_v32 = vsel %vm992_vm0, %v7584_v21, %v7586_v1 }
 0x69f   : > { %10644 = vmatmul.mubr.bf16.gmra.mrb[24].mxu1 %v15857_v38 }
 0x6a0   : > { %10651 = vmatprep.mubr.bf16.mxu1 %v7859_v50  ;;  %v7875_v50 = vrot.slane %v16507_v57, 5 }
 0x6a2   : > { %v10404_v33 = vpop.f32.mrb[228].mxu1  ;;  %v7876_v28 = vor.u32 %v7875_v50, %v7872_v46 }
 0x6a3   : > { %v10406_v53 = vpop.f32.mrb[229].mxu1  ;;  %v15880_v33 = vld [vmem:[%s16382_s3 + $0x200] sm:$0xff]  }
 0x6a4   : > { %v10407_v2 = vpop.f32.mrb[230].mxu1  ;;  %12500 = vmatprep.subr.bf16.mxu1 %v15880_v33  ;;  %v7877_v36 = vsel %vm1155_vm2, %v7867_v56, %v7876_v28  ;;  %v7881_v53 = vrot.slane %v16508_v8, 4  ;;  %v16510_v8 = vshrl.u32 %v15294_v4, 16 }
 0x6a5   : > { %v10409_v41 = vpop.f32.mrb[231].mxu1  ;;  %v16509_v2 = vshll.u32 %v15283_v30, 16  ;;  %v16511_v30 = vshll.u32 %v15294_v4, 16 }
 0x6a6   : > { %v7890_v45 = vrot.slane %v16510_v8, 4 }
 0x6a7   : > { %10652 = vmatmul.mubr.bf16.gmra.mrb[120].mxu1 %v15866_v3  ;;  %v7884_v46 = vrot.slane %v16509_v2, 5  ;;  %v13163_v2 = vld [vmem:[#allocation2 + $0xa0] sm:$0xff] }
 0x6a8   : > { %10659 = vmatprep.mubr.bf16.mxu1 %v7868_v63  ;;  %v13162_v63 = vld [vmem:[#allocation2 + $0x98] sm:$0xff] }
 0x6a9   : > { %v7588_v54 = vrot.slane %v13162_v63, 4  ;;  %v7885_v50 = vor.u32 %v7884_v46, %v7881_v53  ;;  %v16512_v46 = vshrl.u32 %v15302_v43, 16 }
 0x6ab   : > { %v15893_v21 = vsel %vm992_vm0, %v7586_v1, %v7588_v54  ;;  %v7886_v56 = vsel %vm1155_vm2, %v7876_v28, %v7885_v50  ;;  %v7899_v28 = vrot.slane %v16512_v46, 4 }
 0x6af   : > { %10660 = vmatmul.mubr.bf16.gmra.mrb[28].mxu1 %v15884_v32 }
 0x6b0   : > { %10667 = vmatprep.mubr.bf16.mxu1 %v7877_v36  ;;  %v7893_v36 = vrot.slane %v16511_v30, 5 }
 0x6b2   : > { %v10420_v41 = vpop.f32.mrb[232].mxu1  ;;  %v7894_v63 = vor.u32 %v7893_v36, %v7890_v45 }
 0x6b3   : > { %v10422_v57 = vpop.f32.mrb[233].mxu1  ;;  %v7590_v41 = vrot.slane %v13163_v2, 4  ;;  %v16514_v2 = vshrl.u32 %v15309_v44, 16 }
 0x6b4   : > { %v10423_v29 = vpop.f32.mrb[234].mxu1  ;;  %v7895_v1 = vsel %vm1155_vm2, %v7885_v50, %v7894_v63  ;;  %v16513_v57 = vshll.u32 %v15302_v43, 16  ;;  %v16515_v43 = vshll.u32 %v15309_v44, 16 }
 0x6b5   : > { %v10425_v13 = vpop.f32.mrb[235].mxu1  ;;  %v15902_v53 = vsel %vm992_vm0, %v7588_v54, %v7590_v41  ;;  %v7908_v46 = vrot.slane %v16514_v2, 4 }
 0x6b6   : > { %v7902_v29 = vrot.slane %v16513_v57, 5  ;;  %v13164_v13 = vld [vmem:[#allocation2 + $0xa8] sm:$0xff]  ;;  %v13165_v57 = vld [vmem:[#allocation2 + $0xb0] sm:$0xff] }
 0x6b7   : > { %10668 = vmatmul.mubr.bf16.gmra.mrb[128].mxu1 %v15893_v21 }
 0x6b8   : > { %10675 = vmatprep.mubr.bf16.mxu1 %v7886_v56  ;;  %v7592_v56 = vrot.slane %v13164_v13, 4  ;;  %v7903_v30 = vor.u32 %v7902_v29, %v7899_v28  ;;  %v16516_v29 = vshrl.u32 %v15397_v16, 16 }
 0x6ba   : > { %v15911_v54 = vsel %vm992_vm0, %v7590_v41, %v7592_v56  ;;  %v7904_v50 = vsel %vm1155_vm2, %v7894_v63, %v7903_v30  ;;  %v7917_v63 = vrot.slane %v16516_v29, 4 }
 0x6bf   : > { %10676 = vmatmul.mubr.bf16.gmra.mrb[32].mxu1 %v15902_v53 }
 0x6c0   : > { %10683 = vmatprep.mubr.bf16.mxu1 %v7895_v1  ;;  %v7911_v1 = vrot.slane %v16515_v43, 5 }
 0x6c2   : > { %v10436_v4 = vpop.f32.mrb[236].mxu1  ;;  %v7912_v13 = vor.u32 %v7911_v1, %v7908_v46 }
 0x6c3   : > { %v10438_v8 = vpop.f32.mrb[237].mxu1  ;;  %v7594_v4 = vrot.slane %v13165_v57, 4  ;;  %v16518_v57 = vshrl.u32 %v15399_v11, 16 }
 0x6c4   : > { %v10439_v45 = vpop.f32.mrb[238].mxu1  ;;  %v7913_v41 = vsel %vm1155_vm2, %v7903_v30, %v7912_v13  ;;  %v16517_v8 = vshll.u32 %v15397_v16, 16  ;;  %v16519_v16 = vshll.u32 %v15399_v11, 16 }
 0x6c5   : > { %v10441_v36 = vpop.f32.mrb[239].mxu1  ;;  %v15920_v28 = vsel %vm992_vm0, %v7592_v56, %v7594_v4  ;;  %v7926_v29 = vrot.slane %v16518_v57, 4  ;;  %v13168_v57 = vld [vmem:[#allocation2 + $0xc8] sm:$0xff] }
 0x6c6   : > { %v7920_v45 = vrot.slane %v16517_v8, 5  ;;  %v13166_v36 = vld [vmem:[#allocation2 + $0xb8] sm:$0xff]  ;;  %v15937_v8 = vld [vmem:[#allocation2 + $0xd0] sm:$0xff] }
 0x6c7   : > { %10684 = vmatmul.mubr.bf16.gmra.mrb[136].mxu1 %v15911_v54 }
 0x6c8   : > { %10691 = vmatprep.mubr.bf16.mxu1 %v7904_v50  ;;  %v7596_v50 = vrot.slane %v13166_v36, 4  ;;  %v7921_v43 = vor.u32 %v7920_v45, %v7917_v63  ;;  %v16435_v36 = vshrl.u32 %v15937_v8, 16 }
 0x6ca   : > { %v15929_v56 = vsel %vm992_vm0, %v7594_v4, %v7596_v50  ;;  %v7922_v30 = vsel %vm1155_vm2, %v7912_v13, %v7921_v43  ;;  %v16434_v4 = vshll.u32 %v15937_v8, 16  ;;  %v7935_v11 = vrot.slane %v16435_v36, 4 }
 0x6cf   : > { %10692 = vmatmul.mubr.bf16.gmra.mrb[36].mxu1 %v15920_v28 }
 0x6d0   : > { %10699 = vmatprep.mubr.bf16.mxu1 %v7913_v41  ;;  %v7929_v41 = vrot.slane %v16519_v16, 5 }
 0x6d2   : > { %v10452_v44 = vpop.f32.mrb[240].mxu1  ;;  %v7930_v45 = vor.u32 %v7929_v41, %v7926_v29  ;;  %v7600_v29 = vrot.slane %v13168_v57, 4 }
 0x6d3   : > { %v10454_v2 = vpop.f32.mrb[241].mxu1  ;;  %v13167_v44 = vld [vmem:[#allocation2 + $0xc0] sm:$0xff] }
 0x6d4   : > { %v10455_v46 = vpop.f32.mrb[242].mxu1  ;;  %v7598_v63 = vrot.slane %v13167_v44, 4  ;;  %v7931_v13 = vsel %vm1155_vm2, %v7921_v43, %v7930_v45 }
 0x6d5   : > { %v10457_v1 = vpop.f32.mrb[243].mxu1  ;;  %v7938_v46 = vrot.slane %v16434_v4, 5 }
 0x6d6   : > { %v15942_v2 = vsel %vm992_vm0, %v7596_v50, %v7598_v63  ;;  %v15950_v1 = vld [vmem:[#allocation2 + $0xd8] sm:$0xff]  ;;  %v15955_v15 = vsel %vm992_vm0, %v7598_v63, %v7600_v29 }
 0x6d7   : > { %10700 = vmatmul.mubr.bf16.gmra.mrb[144].mxu1 %v15929_v56  ;;  %16520 = vst [vmem:[#allocation34_spill] sm:$0xff] %v15950_v1  ;;  %v7939_v41 = vor.u32 %v7938_v46, %v7935_v11  ;;  %v16433_v50 = vshrl.u32 %v15950_v1, 16  ;;  %v16432_v44 = vshll.u32 %v15950_v1, 16  ;;  %v15963_v11 = vld [vmem:[#allocation2 + $0xe0] sm:$0xff]  ;;  %v7602_v46 = vrot.slane %v15937_v8, 4 }
 0x6d8   : > { %10707 = vmatprep.mubr.bf16.mxu1 %v7922_v30  ;;  %16521 = vst [vmem:[#allocation35_spill] sm:$0xff] %v15963_v11  ;;  %v16437_v63 = vshll.u32 %v15963_v11, 16 }
 0x6d9   : > { %v7947_v57 = vrot.slane %v16432_v44, 5 }
 0x6df   : > { %10708 = vmatmul.mubr.bf16.gmra.mrb[40].mxu1 %v15942_v2 }
 0x6e0   : > { %10715 = vmatprep.mubr.bf16.mxu1 %v7931_v13  ;;  %v7940_v13 = vsel %vm1155_vm2, %v7930_v45, %v7939_v41 }
 0x6e2   : > { %v10468_v30 = vpop.f32.mrb[244].mxu1 }
 0x6e3   : > { %v10470_v16 = vpop.f32.mrb[245].mxu1  ;;  %v7944_v30 = vrot.slane %v16433_v50, 4  ;;  %v15977_v50 = vld [vmem:[#allocation2 + $0xe8] sm:$0xff] }
 0x6e4   : > { %v10471_v49 = vpop.f32.mrb[246].mxu1  ;;  %v16440_v16 = vshrl.u32 %v15963_v11, 16  ;;  %16522 = vst [vmem:[#allocation36_spill] sm:$0xff] %v15977_v50  ;;  %v16438_v25 = vshll.u32 %v15977_v50, 16 }
 0x6e5   : > { %v10473_v43 = vpop.f32.mrb[247].mxu1  ;;  %v7948_v49 = vor.u32 %v7947_v57, %v7944_v30  ;;  %v7604_v57 = vrot.slane %v15950_v1, 4 }
 0x6e6   : > { %v15969_v43 = vsel %vm992_vm0, %v7600_v29, %v7602_v46  ;;  %v7953_v44 = vrot.slane %v16440_v16, 4  ;;  %v16439_v29 = vshrl.u32 %v15977_v50, 16 }
 0x6e7   : > { %10716 = vmatmul.mubr.bf16.gmra.mrb[152].mxu1 %v15955_v15  ;;  %v7949_v45 = vsel %vm1155_vm2, %v7939_v41, %v7948_v49  ;;  %v15983_v27 = vsel %vm992_vm0, %v7602_v46, %v7604_v57 }
 0x6e8   : > { %10723 = vmatprep.mubr.bf16.mxu1 %v7940_v13  ;;  %v7956_v13 = vrot.slane %v16437_v63, 5  ;;  %16523 = vst [vmem:[#allocation37_spill] sm:$0xff] %v15983_v27 }
 0x6ea   : > { %v7957_v36 = vor.u32 %v7956_v13, %v7953_v44  ;;  %v15991_v44 = vld [vmem:[#allocation2 + $0xf0] sm:$0xff]  ;;  %v7606_v13 = vrot.slane %v15963_v11, 4 }
 0x6eb   : > { %16524 = vst [vmem:[#allocation38_spill] sm:$0xff] %v15991_v44  ;;  %v16447_v46 = vshll.u32 %v15991_v44, 16 }
 0x6ec   : > { %v15997_v63 = vsel %vm992_vm0, %v7604_v57, %v7606_v13 }
 0x6ed   : > { %16525 = vst [vmem:[#allocation39_spill] sm:$0xff] %v15997_v63 }
 0x6ef   : > { %10724 = vmatmul.mubr.bf16.gmra.mrb[44].mxu1 %v15969_v43 }
 0x6f0   : > { %10731 = vmatprep.mubr.bf16.mxu1 %v7949_v45  ;;  %v7958_v45 = vsel %vm1155_vm2, %v7948_v49, %v7957_v36 }
 0x6f2   : > { %v10484_v30 = vpop.f32.mrb[248].mxu1 }
 0x6f3   : > { %v10486_v4 = vpop.f32.mrb[249].mxu1  ;;  %v7962_v30 = vrot.slane %v16439_v29, 4  ;;  %v16005_v29 = vld [vmem:[#allocation2 + $0xf8] sm:$0xff] }
 0x6f4   : > { %v10487_v62 = vpop.f32.mrb[250].mxu1  ;;  %v7965_v4 = vrot.slane %v16438_v25, 5  ;;  %16526 = vst [vmem:[#allocation40_spill] sm:$0xff] %v16005_v29  ;;  %v16449_v57 = vshrl.u32 %v16005_v29, 16 }
 0x6f5   : > { %v10489_v41 = vpop.f32.mrb[251].mxu1 }
 0x6f6   : > { %v7966_v62 = vor.u32 %v7965_v4, %v7962_v30  ;;  %v16450_v41 = vshrl.u32 %v15991_v44, 16  ;;  %v7608_v4 = vrot.slane %v15977_v50, 4 }
 0x6f7   : > { %10732 = vmatmul.mubr.bf16.gmra.mrb[160].mxu1 %v15983_v27 }
 0x6f8   : > { %10739 = vmatprep.mubr.bf16.mxu1 %v7958_v45  ;;  %v7967_v49 = vsel %vm1155_vm2, %v7957_v36, %v7966_v62  ;;  %v7971_v25 = vrot.slane %v16450_v41, 4  ;;  %v7974_v45 = vrot.slane %v16447_v46, 5  ;;  %v16011_v1 = vsel %vm992_vm0, %v7606_v13, %v7608_v4 }
 0x6f9   : > { %16527 = vst [vmem:[#allocation41_spill] sm:$0xff] %v16011_v1 }
 0x6fa   : > { %v7975_v11 = vor.u32 %v7974_v45, %v7971_v25  ;;  %v16019_v25 = vld [vmem:[#allocation2 + $0x100] sm:$0xff]  ;;  %v7610_v45 = vrot.slane %v15991_v44, 4 }
 0x6fb   : > { %16528 = vst [vmem:[#allocation42_spill] sm:$0xff] %v16019_v25  ;;  %v16457_v13 = vshll.u32 %v16019_v25, 16 }
 0x6fc   : > { %v16025_v46 = vsel %vm992_vm0, %v7608_v4, %v7610_v45 }
 0x6fd   : > { %16529 = vst [vmem:[#allocation43_spill] sm:$0xff] %v16025_v46 }
 0x6ff   : > { %10740 = vmatmul.mubr.bf16.gmra.mrb[48].mxu1 %v15997_v63  ;;  %v16448_v63 = vshll.u32 %v16005_v29, 16 }
 0x700   : > { %10747 = vmatprep.mubr.bf16.mxu1 %v7967_v49  ;;  %v7976_v49 = vsel %vm1155_vm2, %v7966_v62, %v7975_v11 }
 0x702   : > { %v10500_v30 = vpop.f32.mrb[252].mxu1 }
 0x703   : > { %v10502_v16 = vpop.f32.mrb[253].mxu1  ;;  %v7980_v30 = vrot.slane %v16449_v57, 4  ;;  %v16033_v57 = vld [vmem:[#allocation2 + $0x108] sm:$0xff] }
 0x704   : > { %v10503_v27 = vpop.f32.mrb[254].mxu1  ;;  %v7983_v16 = vrot.slane %v16448_v63, 5  ;;  %16530 = vst [vmem:[#allocation44_spill] sm:$0xff] %v16033_v57  ;;  %v16460_v4 = vshrl.u32 %v16033_v57, 16 }
 0x705   : > { %v10505_v36 = vpop.f32.mrb[255].mxu1 }
 0x706   : > { %v7984_v27 = vor.u32 %v7983_v16, %v7980_v30  ;;  %v16458_v36 = vshrl.u32 %v16019_v25, 16  ;;  %v7612_v16 = vrot.slane %v16005_v29, 4 }
 0x707   : > { %10748 = vmatmul.mubr.bf16.gmra.mrb[168].mxu1 %v16011_v1 }
 0x708   : > { %10755 = vmatprep.mubr.bf16.mxu1 %v7976_v49  ;;  %v7985_v62 = vsel %vm1155_vm2, %v7975_v11, %v7984_v27  ;;  %v7989_v63 = vrot.slane %v16458_v36, 4  ;;  %v7992_v49 = vrot.slane %v16457_v13, 5  ;;  %v16039_v50 = vsel %vm992_vm0, %v7610_v45, %v7612_v16 }
 0x709   : > { %16531 = vst [vmem:[#allocation45_spill] sm:$0xff] %v16039_v50 }
 0x70a   : > { %v7993_v44 = vor.u32 %v7992_v49, %v7989_v63  ;;  %v7716_v63 = vld [vmem:[#allocation2 + $0x110] sm:$0x1f]  ;;  %v7614_v49 = vrot.slane %v16019_v25, 4 }
 0x70c   : > { %v16049_v45 = vsel %vm992_vm0, %v7612_v16, %v7614_v49 }
 0x70d   : > { %16532 = vst [vmem:[#allocation46_spill] sm:$0xff] %v16049_v45 }
 0x70f   : > { %10756 = vmatmul.mubr.bf16.gmra.mrb[52].mxu1 %v16025_v46  ;;  %v16461_v46 = vshll.u32 %v16033_v57, 16 }
 0x710   : > { %10763 = vmatprep.mubr.bf16.mxu1 %v7985_v62  ;;  %v7994_v62 = vsel %vm1155_vm2, %v7984_v27, %v7993_v44 }
 0x712   : > { %v10549_v30 = vpop.f32.mrb[0].mxu1 }
 0x713   : > { %v10551_v41 = vpop.f32.mrb[1].mxu1  ;;  %v7998_v30 = vrot.slane %v16460_v4, 4 }
 0x714   : > { %v10552_v1 = vpop.f32.mrb[2].mxu1  ;;  %v8001_v41 = vrot.slane %v16461_v46, 5  ;;  %v16054_v46 = vrot.slane %v16033_v57, 4 }
 0x715   : > { %v10554_v11 = vpop.f32.mrb[3].mxu1  ;;  %v8005_v1 = vshrl.u32 %v7716_v63, 16 }
 0x716   : > { %v8002_v13 = vor.u32 %v8001_v41, %v7998_v30  ;;  %v8008_v11 = vshll.u32 %v7716_v63, 16  ;;  %v7521_v41 = vld [vmem:[#allocation2 + $0x110] sm:$0xf]  ;;  %v16058_v16 = vsel %vm992_vm0, %v7614_v49, %v16054_v46  ;;  %v8077_v63 = vld [vmem:[#allocation2 + $0x20] sm:$0xf8] }
 0x717   : > { %10764 = vmatmul.mubr.bf16.gmra.mrb[176].mxu1 %v16039_v50  ;;  %v8007_v36 = vrot.slane %v8005_v1, 4  ;;  %16533 = vst [vmem:[#allocation47_spill] sm:$0xff] %v16058_v16  ;;  %v8470_v1 = vld [vmem:[#allocation2 + $0x20] sm:$0xf0] }
 0x718   : > { %10771 = vmatprep.mubr.bf16.mxu1 %v7994_v62  ;;  %v8003_v27 = vsel %vm1155_vm2, %v7993_v44, %v8002_v13  ;;  %v8010_v50 = vrot.slane %v8008_v11, 5  ;;  %v8111_v11 = vshrl.u32 %v8077_v63, 16  ;;  %v8536_v57 = vrot.slane %v8470_v1, 4 }
 0x71a   : > { %v8011_v29 = vor.u32 %v8010_v50, %v8007_v36 }
 0x71c   : > { %v8012_v44 = vsel %vm1155_vm2, %v8002_v13, %v8011_v29  ;;  %v8538_v29 = vsel %vm992_vm0, %v8536_v57, %v15662_v20  ;;  %v13169_v20 = vld [vmem:[%s16382_s3 + $0x208] sm:$0xff]  }
 0x71f   : > { %10772 = vmatmul.mubr.bf16.gmra.mrb[56].mxu1 %v16049_v45 }
 0x720   : > { %10779 = vmatprep.mubr.bf16.mxu1 %v8003_v27  ;;  %v8114_v27 = vshll.u32 %v8077_v63, 16 }
 0x722   : > { %v10565_v4 = vpop.f32.mrb[4].mxu1  ;;  %v8116_v36 = vrot.slane %v8114_v27, 4 }
 0x723   : > { %v10567_v62 = vpop.f32.mrb[5].mxu1  ;;  %v7618_v4 = vrot.slane %v7521_v41, 4 }
 0x724   : > { %v10568_v25 = vpop.f32.mrb[6].mxu1  ;;  %v16534_v62 = vshrl.u32 %v15620_v55, 16 }
 0x725   : > { %v10570_v30 = vpop.f32.mrb[7].mxu1  ;;  %v7619_v50 = vsel %vm992_vm0, %v16054_v46, %v7618_v4  ;;  %v8113_v25 = vrot.slane %v8111_v11, 3  ;;  %v16536_v11 = vshrl.u32 %v15634_v14, 16 }
 0x726   : > { %v8121_v49 = vrot.slane %v16534_v62, 3  ;;  %v16535_v30 = vshll.u32 %v15620_v55, 16  ;;  %v16537_v62 = vshll.u32 %v15634_v14, 16 }
 0x727   : > { %10780 = vmatmul.mubr.bf16.gmra.mrb[184].mxu1 %v16058_v16  ;;  %v8117_v41 = vor.u32 %v8116_v36, %v8113_v25  ;;  %v8130_v27 = vrot.slane %v16536_v11, 3  ;;  %v13171_v25 = vld [vmem:[%s16382_s3 + $0x218] sm:$0xff]  }
 0x728   : > { %10787 = vmatprep.mubr.bf16.mxu1 %v8012_v44  ;;  %v8124_v16 = vrot.slane %v16535_v30, 4  ;;  %v8133_v55 = vrot.slane %v16537_v62, 4 }
 0x72a   : > { %v8125_v44 = vor.u32 %v8124_v16, %v8121_v49  ;;  %v8134_v57 = vor.u32 %v8133_v55, %v8130_v27  ;;  %v16538_v16 = vshrl.u32 %v15655_v42, 16  ;;  %v13174_v27 = vld [vmem:[%s16382_s3 + $0x230] sm:$0xff]  }
 0x72c   : > { %v8126_v4 = vsel %vm565_vm1, %v8117_v41, %v8125_v44  ;;  %v8135_v14 = vsel %vm565_vm1, %v8125_v44, %v8134_v57 }
 0x72f   : > { %10788 = vmatmul.mubr.bf16.gmra.mrb[60].mxu1 %v7619_v50  ;;  %v8139_v50 = vrot.slane %v16538_v16, 3 }
 0x730   : > { %10828 = vmatprep.mubr.bf16.mxu1 %v8538_v29 }
 0x732   : > { %v10581_v13 = vpop.f32.mrb[8].mxu1 }
 0x733   : > { %v10583_v63 = vpop.f32.mrb[9].mxu1 }
 0x734   : > { %v10584_v1 = vpop.f32.mrb[10].mxu1  ;;  %v16541_v63 = vshll.u32 %v15677_v47, 16 }
 0x735   : > { %v10586_v45 = vpop.f32.mrb[11].mxu1 }
 0x736   : > { %v13170_v45 = vld [vmem:[%s16382_s3 + $0x210] sm:$0xff]   ;;  %v8151_v1 = vrot.slane %v16541_v63, 4 }
 0x737   : > { %10829 = vmatmul.mubr.bf16.vlgmr.msra.gmra.mrb[64].mxu1 %v8126_v4  ;;  %v13173_v4 = vld [vmem:[%s16382_s3 + $0x228] sm:$0xff]  }
 0x738   : > { %10836 = vmatprep.mubr.bf16.mxu1 %v15692_v10  ;;  %12508 = vmatpush3.bf16.msra.mxu1 %v15880_v33  ;;  %v16539_v10 = vshll.u32 %v15655_v42, 16  ;;  %v13172_v42 = vld [vmem:[%s16382_s3 + $0x220] sm:$0xff]  }
 0x739   : > { %12501 = vmatprep.subr.bf16.mxu1 %v13169_v20 }
 0x73a   : > { %v8142_v33 = vrot.slane %v16539_v10, 4 }
 0x73c   : > { %12509 = vmatpush3.bf16.msra.mxu1 %v13169_v20  ;;  %v8143_v49 = vor.u32 %v8142_v33, %v8139_v50 }
 0x73d   : > { %12502 = vmatprep.subr.bf16.mxu1 %v13170_v45 }
 0x73e   : > { %v8144_v41 = vsel %vm565_vm1, %v8134_v57, %v8143_v49  ;;  %v13175_v57 = vld [vmem:[%s16382_s3 + $0x238] sm:$0xff]  }
 0x73f   : > { %10837 = vmatmul.mubr.bf16.gmra.mrb[68].mxu1 %v8135_v14 }
 0x740   : > { %10844 = vmatprep.mubr.bf16.mxu1 %v15714_v52  ;;  %12510 = vmatpush3.bf16.msra.mxu1 %v13170_v45  ;;  %v16540_v52 = vshrl.u32 %v15677_v47, 16  ;;  %v16542_v47 = vshrl.u32 %v15700_v39, 16 }
 0x741   : > { %12503 = vmatprep.subr.bf16.mxu1 %v13171_v25 }
 0x742   : > { %v10597_v36 = vpop.f32.mrb[12].mxu1  ;;  %v8148_v44 = vrot.slane %v16540_v52, 3  ;;  %v8157_v55 = vrot.slane %v16542_v47, 3 }
 0x743   : > { %v10599_v30 = vpop.f32.mrb[13].mxu1  ;;  %v16545_v36 = vshll.u32 %v15722_v17, 16 }
 0x744   : > { %v10600_v29 = vpop.f32.mrb[14].mxu1  ;;  %12511 = vmatpush3.bf16.msra.mxu1 %v13171_v25  ;;  %v8152_v11 = vor.u32 %v8151_v1, %v8148_v44 }
 0x745   : > { %v10602_v13 = vpop.f32.mrb[15].mxu1  ;;  %12504 = vmatprep.subr.bf16.mxu1 %v13172_v42  ;;  %v16546_v29 = vshrl.u32 %v15744_v35, 16 }
 0x746   : > { %v8153_v62 = vsel %vm565_vm1, %v8143_v49, %v8152_v11 }
 0x747   : > { %10845 = vmatmul.mubr.bf16.gmra.mrb[72].mxu1 %v8144_v41  ;;  %v8175_v13 = vrot.slane %v16546_v29, 3 }
 0x748   : > { %10852 = vmatprep.mubr.bf16.mxu1 %v15736_v18  ;;  %12512 = vmatpush3.bf16.msra.mxu1 %v13172_v42  ;;  %v16543_v18 = vshll.u32 %v15700_v39, 16  ;;  %v16544_v39 = vshrl.u32 %v15722_v17, 16  ;;  %v16547_v42 = vshll.u32 %v15744_v35, 16 }
 0x749   : > { %12505 = vmatprep.subr.bf16.mxu1 %v13173_v4 }
 0x74a   : > { %v8160_v20 = vrot.slane %v16543_v18, 4  ;;  %v8166_v25 = vrot.slane %v16544_v39, 3  ;;  %v8178_v41 = vrot.slane %v16547_v42, 4  ;;  %v16551_v18 = vshll.u32 %v15777_v60, 16 }
 0x74c   : > { %12513 = vmatpush3.bf16.msra.mxu1 %v13173_v4  ;;  %v8161_v14 = vor.u32 %v8160_v20, %v8157_v55  ;;  %v8179_v44 = vor.u32 %v8178_v41, %v8175_v13  ;;  %v8196_v20 = vrot.slane %v16551_v18, 4  ;;  %v16556_v41 = vshrl.u32 %v15823_v23, 16 }
 0x74d   : > { %12506 = vmatprep.subr.bf16.mxu1 %v13174_v27 }
 0x74e   : > { %v8162_v33 = vsel %vm565_vm1, %v8152_v11, %v8161_v14 }
 0x74f   : > { %10853 = vmatmul.mubr.bf16.gmra.mrb[76].mxu1 %v8153_v62 }
 0x750   : > { %10860 = vmatprep.mubr.bf16.mxu1 %v15751_v51  ;;  %12514 = vmatpush3.bf16.msra.mxu1 %v13174_v27  ;;  %v8169_v51 = vrot.slane %v16545_v36, 4  ;;  %v16549_v27 = vshll.u32 %v15759_v19, 16 }
 0x751   : > { %12507 = vmatprep.subr.bf16.mxu1 %v13175_v57 }
 0x752   : > { %v10613_v45 = vpop.f32.mrb[16].mxu1  ;;  %v8170_v49 = vor.u32 %v8169_v51, %v8166_v25  ;;  %v8187_v62 = vrot.slane %v16549_v27, 4  ;;  %v16555_v51 = vshll.u32 %v15809_v6, 16 }
 0x753   : > { %v10615_v16 = vpop.f32.mrb[17].mxu1 }
 0x754   : > { %v10616_v50 = vpop.f32.mrb[18].mxu1  ;;  %12515 = vmatpush3.bf16.msra.mxu1 %v13175_v57  ;;  %v8171_v30 = vsel %vm565_vm1, %v8161_v14, %v8170_v49  ;;  %v8180_v4 = vsel %vm565_vm1, %v8170_v49, %v8179_v44  ;;  %v8214_v49 = vrot.slane %v16555_v51, 4 }
 0x755   : > { %v10618_v10 = vpop.f32.mrb[19].mxu1 }
 0x757   : > { %10861 = vmatmul.mubr.bf16.gmra.mrb[80].mxu1 %v8162_v33  ;;  %v16553_v33 = vshll.u32 %v15791_v7, 16 }
 0x758   : > { %10868 = vmatprep.mubr.bf16.mxu1 %v15769_v26  ;;  %v16548_v26 = vshrl.u32 %v15759_v19, 16 }
 0x759   : > { %v8205_v39 = vrot.slane %v16553_v33, 4  ;;  %v16566_v33 = vld [vmem:[#allocation35_spill] sm:$0xff] }
 0x75a   : > { %v8184_v11 = vrot.slane %v16548_v26, 3 }
 0x75c   : > { %v8188_v35 = vor.u32 %v8187_v62, %v8184_v11 }
 0x75e   : > { %v8189_v47 = vsel %vm565_vm1, %v8179_v44, %v8188_v35  ;;  %v16557_v44 = vshll.u32 %v15823_v23, 16 }
 0x75f   : > { %10869 = vmatmul.mubr.bf16.gmra.mrb[84].mxu1 %v8171_v30 }
 0x760   : > { %10876 = vmatprep.mubr.bf16.mxu1 %v15783_v58  ;;  %v16550_v58 = vshrl.u32 %v15777_v60, 16 }
 0x762   : > { %v10629_v52 = vpop.f32.mrb[20].mxu1  ;;  %v8193_v55 = vrot.slane %v16550_v58, 3 }
 0x763   : > { %v10631_v63 = vpop.f32.mrb[21].mxu1  ;;  %v8220_v52 = vrot.slane %v16556_v41, 3 }
 0x764   : > { %v10632_v17 = vpop.f32.mrb[22].mxu1  ;;  %v8197_v45 = vor.u32 %v8196_v20, %v8193_v55  ;;  %v8223_v63 = vrot.slane %v16557_v44, 4 }
 0x765   : > { %v10634_v1 = vpop.f32.mrb[23].mxu1  ;;  %v16558_v17 = vmov 0.0|0.0  }
 0x766   : > { %v8198_v50 = vsel %vm565_vm1, %v8188_v35, %v8197_v45  ;;  %v12068_v1 = vcombine.high %v16558_v17, %v16558_v17 }
 0x767   : > { %10877 = vmatmul.mubr.bf16.gmra.mrb[88].mxu1 %v8180_v4 }
 0x768   : > { %10884 = vmatprep.mubr.bf16.mxu1 %v15801_v48  ;;  %v16552_v48 = vshrl.u32 %v15791_v7, 16  ;;  %11761 = vst [vmem:[%s16168_s29 + $0xc] sm:$0xf] %v12068_v1  ;;  %11765 = vst [vmem:[%s16168_s29 + $0x1c] sm:$0xf] %v12068_v1 }
 0x769   : > { %11769 = vst [vmem:[%s16168_s29 + $0x2c] sm:$0xf] %v12068_v1  ;;  %11773 = vst [vmem:[%s16168_s29 + $0x3c] sm:$0xf] %v12068_v1 }
 0x76a   : > { %v8202_v10 = vrot.slane %v16552_v48, 3  ;;  %11777 = vst [vmem:[%s16168_s29 + $0x4c] sm:$0xf] %v12068_v1  ;;  %11781 = vst [vmem:[%s16168_s29 + $0x5c] sm:$0xf] %v12068_v1 }
 0x76b   : > { %11785 = vst [vmem:[%s16168_s29 + $0x6c] sm:$0xf] %v12068_v1  ;;  %11789 = vst [vmem:[%s16168_s29 + $0x7c] sm:$0xf] %v12068_v1 }
 0x76c   : > { %v8206_v60 = vor.u32 %v8205_v39, %v8202_v10  ;;  %11793 = vst [vmem:[%s16168_s29 + $0x8c] sm:$0xf] %v12068_v1  ;;  %11797 = vst [vmem:[%s16168_s29 + $0x9c] sm:$0xf] %v12068_v1  ;;  %v16567_v39 = vshrl.u32 %v16566_v33, 16 }
 0x76d   : > { %11801 = vst [vmem:[%s16168_s29 + $0xac] sm:$0xf] %v12068_v1  ;;  %11805 = vst [vmem:[%s16168_s29 + $0xbc] sm:$0xf] %v12068_v1 }
 0x76e   : > { %v8207_v25 = vsel %vm565_vm1, %v8197_v45, %v8206_v60  ;;  %11809 = vst [vmem:[%s16168_s29 + $0xcc] sm:$0xf] %v12068_v1  ;;  %11813 = vst [vmem:[%s16168_s29 + $0xdc] sm:$0xf] %v12068_v1 }
 0x76f   : > { %10885 = vmatmul.mubr.bf16.gmra.mrb[92].mxu1 %v8189_v47  ;;  %11817 = vst [vmem:[%s16168_s29 + $0xec] sm:$0xf] %v12068_v1  ;;  %11821 = vst [vmem:[%s16168_s29 + $0xfc] sm:$0xf] %v12068_v1 }
 0x770   : > { %10892 = vmatprep.mubr.bf16.mxu1 %v15815_v61  ;;  %v16554_v61 = vshrl.u32 %v15809_v6, 16  ;;  %v8224_v6 = vor.u32 %v8223_v63, %v8220_v52 }
 0x772   : > { %v10645_v57 = vpop.f32.mrb[24].mxu1  ;;  %v8211_v36 = vrot.slane %v16554_v61, 3  ;;  %v8234_v11 = vsel %vm565_vm1, %v8224_v6, %v15334_v40 }
 0x773   : > { %v10647_v14 = vpop.f32.mrb[25].mxu1  ;;  %v16562_v57 = vld [vmem:[#allocation34_spill] sm:$0xff] }
 0x774   : > { %v10648_v19 = vpop.f32.mrb[26].mxu1  ;;  %v8215_v29 = vor.u32 %v8214_v49, %v8211_v36  ;;  %v16564_v14 = vshll.u32 %v16562_v57, 16  ;;  %v16569_v36 = vld [vmem:[#allocation39_spill] sm:$0xff] }
 0x775   : > { %v10650_v16 = vpop.f32.mrb[27].mxu1 }
 0x776   : > { %v8225_v4 = vsel %vm565_vm1, %v8215_v29, %v8224_v6  ;;  %v8322_v19 = vrot.slane %v16564_v14, 4  ;;  %v16565_v16 = vld [vmem:[#allocation37_spill] sm:$0xff] }
 0x777   : > { %10893 = vmatmul.mubr.bf16.gmra.mrb[96].mxu1 %v8198_v50 }
 0x778   : > { %10900 = vmatprep.mubr.bf16.mxu1 %v15833_v31  ;;  %v8216_v31 = vsel %vm565_vm1, %v8206_v60, %v8215_v29  ;;  %v8328_v60 = vrot.slane %v16567_v39, 3  ;;  %v16277_v39 = vld [vmem:[#allocation2 + $0x110] sm:$0xff] }
 0x77f   : > { %10901 = vmatmul.mubr.bf16.gmra.mrb[100].mxu1 %v8207_v25  ;;  %v16568_v25 = vshll.u32 %v16566_v33, 16 }
 0x780   : > { %10908 = vmatprep.mubr.bf16.mxu1 %v15843_v59  ;;  %v12067_v59 = vcombine.low %v16558_v17, %v16558_v17 }
 0x781   : > { %v8331_v61 = vrot.slane %v16568_v25, 4 }
 0x782   : > { %v10661_v30 = vpop.f32.mrb[28].mxu1  ;;  %11760 = vst [vmem:[%s16168_s29 + $0x8] sm:$0xf] %v12067_v59  ;;  %11764 = vst [vmem:[%s16168_s29 + $0x18] sm:$0xf] %v12067_v59 }
 0x783   : > { %v10663_v7 = vpop.f32.mrb[29].mxu1  ;;  %11768 = vst [vmem:[%s16168_s29 + $0x28] sm:$0xf] %v12067_v59  ;;  %11772 = vst [vmem:[%s16168_s29 + $0x38] sm:$0xf] %v12067_v59  ;;  %v8332_v51 = vor.u32 %v8331_v61, %v8328_v60  ;;  %v16570_v30 = vld [vmem:[#allocation36_spill] sm:$0xff] }
 0x784   : > { %v10664_v13 = vpop.f32.mrb[30].mxu1  ;;  %11776 = vst [vmem:[%s16168_s29 + $0x48] sm:$0xf] %v12067_v59  ;;  %11780 = vst [vmem:[%s16168_s29 + $0x58] sm:$0xf] %v12067_v59  ;;  %v16571_v29 = vshrl.u32 %v16570_v30, 16 }
 0x785   : > { %v10666_v42 = vpop.f32.mrb[31].mxu1  ;;  %11784 = vst [vmem:[%s16168_s29 + $0x68] sm:$0xf] %v12067_v59  ;;  %11788 = vst [vmem:[%s16168_s29 + $0x78] sm:$0xf] %v12067_v59  ;;  %v16572_v13 = vshll.u32 %v16570_v30, 16 }
 0x786   : > { %11792 = vst [vmem:[%s16168_s29 + $0x88] sm:$0xf] %v12067_v59  ;;  %11796 = vst [vmem:[%s16168_s29 + $0x98] sm:$0xf] %v12067_v59  ;;  %v8337_v7 = vrot.slane %v16571_v29, 3  ;;  %v16591_v60 = vld [vmem:[#allocation47_spill] sm:$0xff] }
 0x787   : > { %10909 = vmatmul.mubr.bf16.gmra.mrb[104].mxu1 %v8216_v31  ;;  %11800 = vst [vmem:[%s16168_s29 + $0xa8] sm:$0xf] %v12067_v59  ;;  %11804 = vst [vmem:[%s16168_s29 + $0xb8] sm:$0xf] %v12067_v59  ;;  %v8340_v42 = vrot.slane %v16572_v13, 4  ;;  %v16573_v31 = vld [vmem:[#allocation41_spill] sm:$0xff] }
 0x788   : > { %10916 = vmatprep.mubr.bf16.mxu1 %v15857_v38  ;;  %11808 = vst [vmem:[%s16168_s29 + $0xc8] sm:$0xf] %v12067_v59  ;;  %11812 = vst [vmem:[%s16168_s29 + $0xd8] sm:$0xf] %v12067_v59  ;;  %v8383_v30 = vshll.u32 %v16277_v39, 16  ;;  %v8595_v13 = vrot.slane %v16277_v39, 4 }
 0x789   : > { %11816 = vst [vmem:[%s16168_s29 + $0xe8] sm:$0xf] %v12067_v59  ;;  %11820 = vst [vmem:[%s16168_s29 + $0xf8] sm:$0xf] %v12067_v59  ;;  %v8341_v52 = vor.u32 %v8340_v42, %v8337_v7  ;;  %v16574_v59 = vld [vmem:[#allocation38_spill] sm:$0xff] }
 0x78a   : > { %v16575_v1 = vshrl.u32 %v16574_v59, 16 }
 0x78b   : > { %v8342_v17 = vsel %vm565_vm1, %v8332_v51, %v8341_v52 }
 0x78f   : > { %10917 = vmatmul.mubr.bf16.gmra.mrb[108].mxu1 %v8225_v4  ;;  %v8346_v4 = vrot.slane %v16575_v1, 3 }
 0x790   : > { %10924 = vmatprep.mubr.bf16.mxu1 %v15866_v3 }
 0x792   : > { %v10677_v23 = vpop.f32.mrb[32].mxu1 }
 0x793   : > { %v10679_v38 = vpop.f32.mrb[33].mxu1  ;;  %v16576_v23 = vshll.u32 %v16574_v59, 16 }
 0x794   : > { %v10680_v3 = vpop.f32.mrb[34].mxu1 }
 0x795   : > { %v10682_v26 = vpop.f32.mrb[35].mxu1  ;;  %v8349_v38 = vrot.slane %v16576_v23, 4  ;;  %v16577_v3 = vld [vmem:[#allocation43_spill] sm:$0xff] }
 0x797   : > { %10925 = vmatmul.mubr.bf16.gmra.mrb[112].mxu1 %v8234_v11  ;;  %v8350_v26 = vor.u32 %v8349_v38, %v8346_v4 }
 0x798   : > { %10932 = vmatprep.mubr.bf16.mxu1 %v15884_v32 }
 0x799   : > { %v8351_v11 = vsel %vm565_vm1, %v8341_v52, %v8350_v26 }
 0x79f   : > { %10933 = vmatmul.mubr.bf16.gmra.mrb[116].mxu1 %v15360_v37 }
 0x7a0   : > { %10940 = vmatprep.mubr.bf16.mxu1 %v15893_v21 }
 0x7a2   : > { %v10693_v27 = vpop.f32.mrb[36].mxu1 }
 0x7a3   : > { %v10695_v62 = vpop.f32.mrb[37].mxu1  ;;  %v16578_v27 = vld [vmem:[#allocation40_spill] sm:$0xff] }
 0x7a4   : > { %v10696_v35 = vpop.f32.mrb[38].mxu1  ;;  %v16579_v62 = vshrl.u32 %v16578_v27, 16 }
 0x7a5   : > { %v10698_v47 = vpop.f32.mrb[39].mxu1 }
 0x7a6   : > { %v8355_v35 = vrot.slane %v16579_v62, 3  ;;  %v16580_v47 = vshll.u32 %v16578_v27, 16  ;;  %v16592_v62 = vld [vmem:[#allocation7_spill] sm:$0xff] }
 0x7a7   : > { %10941 = vmatmul.mubr.bf16.gmra.mrb[120].mxu1 %v15363_v12 }
 0x7a8   : > { %10948 = vmatprep.mubr.bf16.mxu1 %v15902_v53 }
 0x7af   : > { %10949 = vmatmul.mubr.bf16.gmra.mrb[124].mxu1 %v15371_v5 }
 0x7b0   : > { %10956 = vmatprep.mubr.bf16.mxu1 %v15911_v54 }
 0x7b2   : > { %v10709_v40 = vpop.f32.mrb[40].mxu1 }
 0x7b3   : > { %v10711_v58 = vpop.f32.mrb[41].mxu1  ;;  %v8358_v40 = vrot.slane %v16580_v47, 4 }
 0x7b4   : > { %v10712_v55 = vpop.f32.mrb[42].mxu1  ;;  %v16581_v58 = vld [vmem:[#allocation45_spill] sm:$0xff] }
 0x7b5   : > { %v10714_v32 = vpop.f32.mrb[43].mxu1 }
 0x7b6   : > { %v8359_v32 = vor.u32 %v8358_v40, %v8355_v35 }
 0x7b7   : > { %10957 = vmatmul.mubr.bf16.gmra.mrb[128].mxu1 %v15383_v9 }
 0x7b8   : > { %10964 = vmatprep.mubr.bf16.mxu1 %v15920_v28 }
 0x7bf   : > { %10965 = vmatmul.mubr.bf16.gmra.mrb[132].mxu1 %v15388_v22  ;;  %v16559_v22 = vshrl.u32 %v15937_v8, 16 }
 0x7c0   : > { %10972 = vmatprep.mubr.bf16.mxu1 %v15929_v56  ;;  %v16560_v56 = vshll.u32 %v15937_v8, 16 }
 0x7c1   : > { %v8310_v18 = vrot.slane %v16559_v22, 3 }
 0x7c2   : > { %v10725_v37 = vpop.f32.mrb[44].mxu1  ;;  %v8313_v20 = vrot.slane %v16560_v56, 4  ;;  %v16266_v56 = vld [vmem:[%s16383_s4] ss:$0 sm:$0xff] }
 0x7c3   : > { %v10727_v12 = vpop.f32.mrb[45].mxu1 }
 0x7c4   : > { %v10728_v21 = vpop.f32.mrb[46].mxu1 }
 0x7c5   : > { %v10730_v53 = vpop.f32.mrb[47].mxu1 }
 0x7c6   : > { %v8360_v53 = vsel %vm565_vm1, %v8350_v26, %v8359_v32 }
 0x7c7   : > { %10973 = vmatmul.mubr.bf16.gmra.mrb[136].mxu1 %v15393_v0  ;;  %v8314_v0 = vor.u32 %v8313_v20, %v8310_v18  ;;  %v16585_v18 = vld [vmem:[#allocation46_spill] sm:$0xff] }
 0x7c8   : > { %10980 = vmatprep.mubr.bf16.mxu1 %v15942_v2  ;;  %v16561_v2 = vld [vmem:[#allocation15_spill] sm:$0xff] }
 0x7cf   : > { %10981 = vmatmul.mubr.bf16.gmra.mrb[140].mxu1 %v15452_v34  ;;  %v8315_v34 = vsel %vm565_vm1, %v16561_v2, %v8314_v0 }
 0x7d0   : > { %10988 = vmatprep.mubr.bf16.mxu1 %v15955_v15  ;;  %v16563_v15 = vshrl.u32 %v16562_v57, 16 }
 0x7d2   : > { %v10741_v5 = vpop.f32.mrb[48].mxu1  ;;  %v8319_v45 = vrot.slane %v16563_v15, 3  ;;  %v16586_v15 = vld [vmem:[#allocation5_spill] sm:$0xff] }
 0x7d3   : > { %v10743_v9 = vpop.f32.mrb[49].mxu1  ;;  %v16582_v5 = vld [vmem:[#allocation42_spill] sm:$0xff] }
 0x7d4   : > { %v10744_v54 = vpop.f32.mrb[50].mxu1  ;;  %v8323_v8 = vor.u32 %v8322_v19, %v8319_v45  ;;  %v16583_v9 = vshrl.u32 %v16582_v5, 16 }
 0x7d5   : > { %v10746_v28 = vpop.f32.mrb[51].mxu1 }
 0x7d6   : > { %v8333_v49 = vsel %vm565_vm1, %v8323_v8, %v8332_v51  ;;  %v8364_v54 = vrot.slane %v16583_v9, 3  ;;  %v16584_v28 = vshll.u32 %v16582_v5, 16  ;;  %v8694_v9 = vld [vmem:[#allocation2 + $0x108] sm:$0xff] }
 0x7d7   : > { %10989 = vmatmul.mubr.bf16.gmra.mrb[144].mxu1 %v15456_v24 }
 0x7d8   : > { %10996 = vmatprep.mubr.bf16.mxu1 %v15969_v43  ;;  %v8324_v43 = vsel %vm565_vm1, %v8314_v0, %v8323_v8  ;;  %v8367_v22 = vrot.slane %v16584_v28, 4 }
 0x7da   : > { %v8368_v20 = vor.u32 %v8367_v22, %v8364_v54 }
 0x7df   : > { %10997 = vmatmul.mubr.bf16.gmra.mrb[148].mxu1 %v8315_v34 }
 0x7e0   : > { %11004 = vmatprep.mubr.bf16.mxu1 %v16565_v16  ;;  %v8369_v16 = vsel %vm565_vm1, %v8359_v32, %v8368_v20  ;;  %v8502_v32 = vld [vmem:[#allocation2 + $0x120] sm:$0xf] }
 0x7e1   : > { %v8599_v22 = vrot.slane %v8502_v32, 4 }
 0x7e2   : > { %v10757_v50 = vpop.f32.mrb[52].mxu1 }
 0x7e3   : > { %v10759_v48 = vpop.f32.mrb[53].mxu1  ;;  %v16587_v50 = vld [vmem:[#allocation44_spill] sm:$0xff] }
 0x7e4   : > { %v10760_v10 = vpop.f32.mrb[54].mxu1  ;;  %v16588_v8 = vshrl.u32 %v16587_v50, 16 }
 0x7e5   : > { %v10762_v24 = vpop.f32.mrb[55].mxu1  ;;  %v16589_v10 = vshll.u32 %v16587_v50, 16 }
 0x7e6   : > { %v8373_v48 = vrot.slane %v16588_v8, 3 }
 0x7e7   : > { %11005 = vmatmul.mubr.bf16.gmra.mrb[152].mxu1 %v8324_v43  ;;  %v8376_v24 = vrot.slane %v16589_v10, 4  ;;  %v16590_v43 = vld [vmem:[#allocation6_spill] sm:$0xff] }
 0x7e8   : > { %11012 = vmatprep.mubr.bf16.mxu1 %v16569_v36 }
 0x7e9   : > { %v8377_v51 = vor.u32 %v8376_v24, %v8373_v48 }
 0x7ef   : > { %11013 = vmatmul.mubr.bf16.gmra.mrb[156].mxu1 %v8333_v49  ;;  %v8380_v49 = vshrl.u32 %v16277_v39, 16 }
 0x7f0   : > { %11020 = vmatprep.mubr.bf16.mxu1 %v16573_v31 }
 0x7f1   : > { %v8382_v52 = vrot.slane %v8380_v49, 3 }
 0x7f2   : > { %v10773_v41 = vpop.f32.mrb[56].mxu1 }
 0x7f3   : > { %v10775_v44 = vpop.f32.mrb[57].mxu1  ;;  %v8378_v41 = vsel %vm565_vm1, %v8368_v20, %v8377_v51 }
 0x7f4   : > { %v10776_v63 = vpop.f32.mrb[58].mxu1  ;;  %v8385_v44 = vrot.slane %v8383_v30, 4 }
 0x7f5   : > { %v10778_v6 = vpop.f32.mrb[59].mxu1  ;;  %v8596_v63 = vsel %vm992_vm0, %v16054_v46, %v8595_v13 }
 0x7f6   : > { %v13176_v6 = vld [vmem:[#allocation2] sm:$0xff]  ;;  %v8386_v4 = vor.u32 %v8385_v44, %v8382_v52  ;;  %v16595_v52 = vld [vmem:[#allocation10_spill] sm:$0xff] }
 0x7f7   : > { %11021 = vmatmul.mubr.bf16.gmra.mrb[160].mxu1 %v8342_v17  ;;  %v8389_v17 = vshrl.u32 %v13176_v6, 16  ;;  %v8392_v59 = vshll.u32 %v13176_v6, 16  ;;  %v8597_v1 = vrot.slane %v13176_v6, 4 }
 0x7f8   : > { %11028 = vmatprep.mubr.bf16.mxu1 %v16577_v3 }
 0x7f9   : > { %v8394_v27 = vrot.slane %v8392_v59, 4  ;;  %v8598_v46 = vsel %vm992_vm0, %v8595_v13, %v8597_v1  ;;  %v8979_v13 = vrot.slane %v8389_v17, 4 }
 0x7ff   : > { %11029 = vmatmul.mubr.bf16.gmra.mrb[164].mxu1 %v8351_v11  ;;  %v8391_v11 = vrot.slane %v8389_v17, 3 }
 0x800   : > { %11036 = vmatprep.mubr.bf16.mxu1 %v16581_v58  ;;  %v8109_v58 = vld [vmem:[#allocation2 + $0x120] sm:$0xf] }
 0x801   : > { %v8401_v5 = vshll.u32 %v8109_v58, 16 }
 0x802   : > { %v10789_v55 = vpop.f32.mrb[60].mxu1 }
 0x803   : > { %v10791_v37 = vpop.f32.mrb[61].mxu1  ;;  %v8387_v55 = vsel %vm565_vm1, %v8377_v51, %v8386_v4 }
 0x804   : > { %v10792_v12 = vpop.f32.mrb[62].mxu1  ;;  %v16593_v37 = vld [vmem:[#allocation8_spill] sm:$0xff] }
 0x805   : > { %v10794_v21 = vpop.f32.mrb[63].mxu1 }
 0x806   : > { %v8395_v21 = vor.u32 %v8394_v27, %v8391_v11 }
 0x807   : > { %11037 = vmatmul.mubr.bf16.gmra.mrb[168].mxu1 %v8360_v53  ;;  %v8398_v53 = vshrl.u32 %v8109_v58, 16 }
 0x808   : > { %11044 = vmatprep.mubr.bf16.mxu1 %v16585_v18 }
 0x80a   : > { %v10830_v0 = vpop.f32.mrb[64].mxu1 }
 0x80b   : > { %v12548_v2 = vadd.f32 %v16266_v56, %v10830_v0  ;;  %v10832_v34 = vpop.f32.mrb[65].mxu1 }
 0x80c   : > { %v10833_v57 = vpop.f32.mrb[66].mxu1  ;;  %v8962_v34 = vshll.u32 %v8694_v9, 16 }
 0x80d   : > { %v11120_v45 = vadd.f32 %v12548_v2, %v16586_v15  ;;  %v12549_v14 = vadd.f32 %v16266_v56, %v10833_v57  ;;  %v10835_v19 = vpop.f32.mrb[67].mxu1  ;;  %v8959_v2 = vshrl.u32 %v8694_v9, 16  ;;  %v8396_v15 = vsel %vm565_vm1, %v8386_v4, %v8395_v21 }
 0x80e   : > { %v8964_v8 = vrot.slane %v8962_v34, 5 }
 0x80f   : > { %v11123_v33 = vadd.f32 %v12549_v14, %v16590_v43  ;;  %11045 = vmatmul.mubr.bf16.gmra.mrb[172].mxu1 %v8369_v16  ;;  %v11374_v25 = vmax.f32 %v11120_v45, 0.0  ;;  %v8400_v45 = vrot.slane %v8398_v53, 3  ;;  %v8403_v14 = vrot.slane %v8401_v5, 4  ;;  %v16598_v5 = vld [vmem:[#allocation12_spill] sm:$0xff] }
 0x810   : > { %11052 = vmatprep.mubr.bf16.mxu1 %v16591_v60  ;;  %v8600_v16 = vsel %vm992_vm0, %v8597_v1, %v8599_v22  ;;  %v8961_v50 = vrot.slane %v8959_v2, 4 }
 0x811   : > { %v11375_v61 = vmax.f32 %v11123_v33, 0.0  ;;  %v8404_v48 = vor.u32 %v8403_v14, %v8400_v45  ;;  %v16599_v14 = vld [vmem:[#allocation13_spill] sm:$0xff] }
 0x812   : > { %v10838_v36 = vpop.f32.mrb[68].mxu1  ;;  %v8965_v33 = vor.u32 %v8964_v8, %v8961_v50  ;;  %v16600_v8 = vld [vmem:[#allocation14_spill] sm:$0xff] }
 0x813   : > { %v12168_v29 = vpack.c.bf16 %v11375_v61, %v11374_v25  ;;  %v10840_v7 = vpop.f32.mrb[69].mxu1  ;;  %v8405_v60 = vsel %vm565_vm1, %v8395_v21, %v8404_v48  ;;  %v16594_v61 = vld [vmem:[#allocation9_spill] sm:$0xff] }
 0x814   : > { %v10841_v42 = vpop.f32.mrb[70].mxu1  ;;  %v8697_v7 = vld [vmem:[#allocation2 + $0x120] sm:$0x1f] }
 0x815   : > { %12169 = vst [vmem:[%s16168_s29] sm:$0xff] %v12168_v29   ;;  %v10843_v31 = vpop.f32.mrb[71].mxu1  ;;  %v8982_v42 = vrot.slane %v8392_v59, 5  ;;  %v8986_v1 = vshrl.u32 %v8697_v7, 16  ;;  %v8989_v4 = vshll.u32 %v8697_v7, 16 }
 0x816   : > { %v8970_v31 = vrot.slane %v8380_v49, 4 }
 0x817   : > { %11053 = vmatmul.mubr.bf16.gmra.mrb[176].mxu1 %v8378_v41  ;;  %v8973_v41 = vrot.slane %v8383_v30, 5  ;;  %v8983_v17 = vor.u32 %v8982_v42, %v8979_v13  ;;  %v8988_v39 = vrot.slane %v8986_v1, 4  ;;  %v8991_v30 = vrot.slane %v8989_v4, 5  ;;  %v16601_v13 = vld [vmem:[#allocation16_spill] sm:$0xff] }
 0x818   : > { %11060 = vmatprep.mubr.bf16.mxu1 %v8596_v63  ;;  %v16596_v63 = vld [vmem:[#allocation4_spill] sm:$0xff] }
 0x819   : > { %v8966_v6 = vsel %vm1155_vm2, %v16596_v63, %v8965_v33  ;;  %v8974_v59 = vor.u32 %v8973_v41, %v8970_v31 }
 0x81a   : > { %v10846_v23 = vpop.f32.mrb[72].mxu1 }
 0x81b   : > { %v12550_v38 = vadd.f32 %v16266_v56, %v10846_v23  ;;  %v10848_v3 = vpop.f32.mrb[73].mxu1 }
 0x81c   : > { %v10849_v26 = vpop.f32.mrb[74].mxu1 }
 0x81d   : > { %v11136_v35 = vadd.f32 %v12550_v38, %v16592_v62  ;;  %v12551_v47 = vadd.f32 %v16266_v56, %v10849_v26  ;;  %v10851_v40 = vpop.f32.mrb[75].mxu1  ;;  %v8984_v62 = vsel %vm1155_vm2, %v8974_v59, %v8983_v17 }
 0x81f   : > { %v11139_v12 = vadd.f32 %v12551_v47, %v16593_v37  ;;  %11061 = vmatmul.mubr.bf16.gmra.mrb[180].mxu1 %v8387_v55  ;;  %v11378_v54 = vmax.f32 %v11136_v35, 0.0  ;;  %v8975_v35 = vsel %vm1155_vm2, %v8965_v33, %v8974_v59  ;;  %v8992_v47 = vor.u32 %v8991_v30, %v8988_v39  ;;  %v16597_v37 = vld [vmem:[#allocation11_spill] sm:$0xff] }
 0x820   : > { %11068 = vmatprep.mubr.bf16.mxu1 %v8598_v46 }
 0x821   : > { %v11379_v28 = vmax.f32 %v11139_v12, 0.0  ;;  %v8993_v32 = vsel %vm1155_vm2, %v8983_v17, %v8992_v47 }
 0x822   : > { %v10854_v18 = vpop.f32.mrb[76].mxu1 }
 0x823   : > { %v12173_v20 = vpack.c.bf16 %v11379_v28, %v11378_v54  ;;  %v10856_v0 = vpop.f32.mrb[77].mxu1 }
 0x824   : > { %v10857_v57 = vpop.f32.mrb[78].mxu1 }
 0x825   : > { %12245 = vst [vmem:[%s16168_s29 + $0x10] sm:$0xff] %v12173_v20   ;;  %v10859_v19 = vpop.f32.mrb[79].mxu1 }
 0x827   : > { %11069 = vmatmul.mubr.bf16.gmra.mrb[184].mxu1 %v8396_v15 }
 0x828   : > { %11076 = vmatprep.mubr.bf16.mxu1 %v8600_v16 }
 0x82a   : > { %v10862_v10 = vpop.f32.mrb[80].mxu1 }
 0x82b   : > { %v12552_v24 = vadd.f32 %v16266_v56, %v10862_v10  ;;  %v10864_v43 = vpop.f32.mrb[81].mxu1 }
 0x82c   : > { %v10865_v25 = vpop.f32.mrb[82].mxu1 }
 0x82d   : > { %v11152_v36 = vadd.f32 %v12552_v24, %v16594_v61  ;;  %v12553_v51 = vadd.f32 %v16266_v56, %v10865_v25  ;;  %v10867_v29 = vpop.f32.mrb[83].mxu1 }
 0x82f   : > { %v11155_v44 = vadd.f32 %v12553_v51, %v16595_v52  ;;  %11077 = vmatmul.mubr.bf16.gmra.mrb[188].mxu1 %v8405_v60  ;;  %v11382_v23 = vmax.f32 %v11152_v36, 0.0  ;;  %v16602_v52 = vld [vmem:[#allocation17_spill] sm:$0xff] }
 0x830   : > { %12492 = vmatprep.mubr.bf16.mxu1 %v8966_v6 }
 0x831   : > { %v11383_v38 = vmax.f32 %v11155_v44, 0.0 }
 0x832   : > { %v10870_v3 = vpop.f32.mrb[84].mxu1 }
 0x833   : > { %v12178_v26 = vpack.c.bf16 %v11383_v38, %v11382_v23  ;;  %v10872_v49 = vpop.f32.mrb[85].mxu1 }
 0x834   : > { %v10873_v11 = vpop.f32.mrb[86].mxu1 }
 0x835   : > { %12246 = vst [vmem:[%s16168_s29 + $0x20] sm:$0xff] %v12178_v26   ;;  %v10875_v27 = vpop.f32.mrb[87].mxu1  ;;  %v16603_v11 = vld [vmem:[#allocation18_spill] sm:$0xff] }
 0x837   : > { %12493 = vmatmul.mubr.bf16.vlgmr.msra.gmra.mrb[192].mxu1 %v8975_v35 }
 0x838   : > { %12496 = vmatprep.mubr.bf16.mxu1 %v8984_v62  ;;  %v16604_v62 = vld [vmem:[#allocation19_spill] sm:$0xff] }
 0x83a   : > { %v10878_v40 = vpop.f32.mrb[88].mxu1 }
 0x83b   : > { %v12554_v46 = vadd.f32 %v16266_v56, %v10878_v40  ;;  %v10880_v58 = vpop.f32.mrb[89].mxu1 }
 0x83c   : > { %v10881_v55 = vpop.f32.mrb[90].mxu1 }
 0x83d   : > { %v11168_v12 = vadd.f32 %v12554_v46, %v16597_v37  ;;  %v12555_v21 = vadd.f32 %v16266_v56, %v10881_v55  ;;  %v10883_v53 = vpop.f32.mrb[91].mxu1 }
 0x83f   : > { %v11171_v9 = vadd.f32 %v12555_v21, %v16598_v5  ;;  %12497 = vmatmul.mubr.bf16.gmra.mrb[196].mxu1 %v8993_v32  ;;  %v11386_v54 = vmax.f32 %v11168_v12, 0.0 }
 0x841   : > { %v11387_v28 = vmax.f32 %v11171_v9, 0.0  ;;  %v16605_v9 = vld [vmem:[#allocation20_spill] sm:$0xff] }
 0x842   : > { %v10886_v22 = vpop.f32.mrb[92].mxu1 }
 0x843   : > { %v12183_v18 = vpack.c.bf16 %v11387_v28, %v11386_v54  ;;  %v10888_v20 = vpop.f32.mrb[93].mxu1 }
 0x844   : > { %v10889_v0 = vpop.f32.mrb[94].mxu1 }
 0x845   : > { %12247 = vst [vmem:[%s16168_s29 + $0x30] sm:$0xff] %v12183_v18   ;;  %v10891_v2 = vpop.f32.mrb[95].mxu1  ;;  %v16606_v18 = vld [vmem:[#allocation21_spill] sm:$0xff] }
 0x84a   : > { %v10894_v34 = vpop.f32.mrb[96].mxu1 }
 0x84b   : > { %v12556_v57 = vadd.f32 %v16266_v56, %v10894_v34  ;;  %v10896_v15 = vpop.f32.mrb[97].mxu1 }
 0x84c   : > { %v10897_v45 = vpop.f32.mrb[98].mxu1 }
 0x84d   : > { %v11184_v19 = vadd.f32 %v12556_v57, %v16599_v14  ;;  %v12557_v16 = vadd.f32 %v16266_v56, %v10897_v45  ;;  %v10899_v50 = vpop.f32.mrb[99].mxu1 }
 0x84f   : > { %v11187_v48 = vadd.f32 %v12557_v16, %v16600_v8  ;;  %v11390_v10 = vmax.f32 %v11184_v19, 0.0 }
 0x851   : > { %v11391_v24 = vmax.f32 %v11187_v48, 0.0  ;;  %v16607_v48 = vld [vmem:[#allocation22_spill] sm:$0xff] }
 0x852   : > { %v10902_v43 = vpop.f32.mrb[100].mxu1 }
 0x853   : > { %v12188_v33 = vpack.c.bf16 %v11391_v24, %v11390_v10  ;;  %v10904_v60 = vpop.f32.mrb[101].mxu1 }
 0x854   : > { %v10905_v25 = vpop.f32.mrb[102].mxu1 }
 0x855   : > { %12248 = vst [vmem:[%s16168_s29 + $0x40] sm:$0xff] %v12188_v33   ;;  %v10907_v61 = vpop.f32.mrb[103].mxu1  ;;  %v16608_v33 = vld [vmem:[#allocation23_spill] sm:$0xff] }
 0x85a   : > { %v10910_v36 = vpop.f32.mrb[104].mxu1 }
 0x85b   : > { %v12558_v51 = vadd.f32 %v16266_v56, %v10910_v36  ;;  %v10912_v29 = vpop.f32.mrb[105].mxu1 }
 0x85c   : > { %v10913_v7 = vpop.f32.mrb[106].mxu1 }
 0x85d   : > { %v11200_v42 = vadd.f32 %v12558_v51, %v16601_v13  ;;  %v12559_v31 = vadd.f32 %v16266_v56, %v10913_v7  ;;  %v10915_v41 = vpop.f32.mrb[107].mxu1 }
 0x85f   : > { %v11203_v44 = vadd.f32 %v12559_v31, %v16602_v52  ;;  %v11394_v63 = vmax.f32 %v11200_v42, 0.0 }
 0x861   : > { %v11395_v6 = vmax.f32 %v11203_v44, 0.0  ;;  %v16609_v44 = vld [vmem:[#allocation24_spill] sm:$0xff] }
 0x862   : > { %v10918_v1 = vpop.f32.mrb[108].mxu1 }
 0x863   : > { %v12193_v4 = vpack.c.bf16 %v11395_v6, %v11394_v63  ;;  %v10920_v23 = vpop.f32.mrb[109].mxu1 }
 0x864   : > { %v10921_v38 = vpop.f32.mrb[110].mxu1 }
 0x865   : > { %12249 = vst [vmem:[%s16168_s29 + $0x50] sm:$0xff] %v12193_v4   ;;  %v10923_v17 = vpop.f32.mrb[111].mxu1  ;;  %v16610_v4 = vld [vmem:[#allocation25_spill] sm:$0xff] }
 0x86a   : > { %v10926_v59 = vpop.f32.mrb[112].mxu1 }
 0x86b   : > { %v12560_v3 = vadd.f32 %v16266_v56, %v10926_v59  ;;  %v10928_v26 = vpop.f32.mrb[113].mxu1 }
 0x86c   : > { %v10929_v49 = vpop.f32.mrb[114].mxu1 }
 0x86d   : > { %v11216_v39 = vadd.f32 %v12560_v3, %v16603_v11  ;;  %v12561_v30 = vadd.f32 %v16266_v56, %v10929_v49  ;;  %v10931_v27 = vpop.f32.mrb[115].mxu1 }
 0x86f   : > { %v11219_v35 = vadd.f32 %v12561_v30, %v16604_v62  ;;  %v11398_v47 = vmax.f32 %v11216_v39, 0.0 }
 0x871   : > { %v11399_v40 = vmax.f32 %v11219_v35, 0.0  ;;  %v16611_v35 = vld [vmem:[#allocation26_spill] sm:$0xff] }
 0x872   : > { %v10934_v46 = vpop.f32.mrb[116].mxu1 }
 0x873   : > { %v12198_v58 = vpack.c.bf16 %v11399_v40, %v11398_v47  ;;  %v10936_v55 = vpop.f32.mrb[117].mxu1 }
 0x874   : > { %v10937_v32 = vpop.f32.mrb[118].mxu1 }
 0x875   : > { %12250 = vst [vmem:[%s16168_s29 + $0x60] sm:$0xff] %v12198_v58   ;;  %v10939_v37 = vpop.f32.mrb[119].mxu1  ;;  %v16612_v58 = vld [vmem:[#allocation27_spill] sm:$0xff] }
 0x87a   : > { %v10942_v12 = vpop.f32.mrb[120].mxu1 }
 0x87b   : > { %v12562_v21 = vadd.f32 %v16266_v56, %v10942_v12  ;;  %v10944_v53 = vpop.f32.mrb[121].mxu1 }
 0x87c   : > { %v10945_v5 = vpop.f32.mrb[122].mxu1 }
 0x87d   : > { %v11232_v54 = vadd.f32 %v12562_v21, %v16605_v9  ;;  %v12563_v28 = vadd.f32 %v16266_v56, %v10945_v5  ;;  %v10947_v22 = vpop.f32.mrb[123].mxu1 }
 0x87f   : > { %v11235_v20 = vadd.f32 %v12563_v28, %v16606_v18  ;;  %v11402_v0 = vmax.f32 %v11232_v54, 0.0 }
 0x881   : > { %v11403_v2 = vmax.f32 %v11235_v20, 0.0  ;;  %v16613_v20 = vld [vmem:[#allocation28_spill] sm:$0xff] }
 0x882   : > { %v10950_v34 = vpop.f32.mrb[124].mxu1 }
 0x883   : > { %v12203_v57 = vpack.c.bf16 %v11403_v2, %v11402_v0  ;;  %v10952_v15 = vpop.f32.mrb[125].mxu1 }
 0x884   : > { %v10953_v45 = vpop.f32.mrb[126].mxu1 }
 0x885   : > { %12251 = vst [vmem:[%s16168_s29 + $0x70] sm:$0xff] %v12203_v57   ;;  %v10955_v14 = vpop.f32.mrb[127].mxu1  ;;  %v16614_v57 = vld [vmem:[#allocation29_spill] sm:$0xff] }
 0x88a   : > { %v10958_v19 = vpop.f32.mrb[128].mxu1 }
 0x88b   : > { %v12564_v16 = vadd.f32 %v16266_v56, %v10958_v19  ;;  %v10960_v50 = vpop.f32.mrb[129].mxu1 }
 0x88c   : > { %v10961_v8 = vpop.f32.mrb[130].mxu1 }
 0x88d   : > { %v11248_v10 = vadd.f32 %v12564_v16, %v16607_v48  ;;  %v12565_v24 = vadd.f32 %v16266_v56, %v10961_v8  ;;  %v10963_v43 = vpop.f32.mrb[131].mxu1 }
 0x88f   : > { %v11251_v60 = vadd.f32 %v12565_v24, %v16608_v33  ;;  %v11406_v25 = vmax.f32 %v11248_v10, 0.0 }
 0x891   : > { %v11407_v61 = vmax.f32 %v11251_v60, 0.0  ;;  %v16615_v60 = vld [vmem:[#allocation30_spill] sm:$0xff] }
 0x892   : > { %v10966_v36 = vpop.f32.mrb[132].mxu1 }
 0x893   : > { %v12208_v51 = vpack.c.bf16 %v11407_v61, %v11406_v25  ;;  %v10968_v29 = vpop.f32.mrb[133].mxu1 }
 0x894   : > { %v10969_v7 = vpop.f32.mrb[134].mxu1 }
 0x895   : > { %12252 = vst [vmem:[%s16168_s29 + $0x80] sm:$0xff] %v12208_v51   ;;  %v10971_v13 = vpop.f32.mrb[135].mxu1  ;;  %v16616_v51 = vld [vmem:[#allocation31_spill] sm:$0xff] }
 0x89a   : > { %v10974_v42 = vpop.f32.mrb[136].mxu1 }
 0x89b   : > { %v12566_v31 = vadd.f32 %v16266_v56, %v10974_v42  ;;  %v10976_v41 = vpop.f32.mrb[137].mxu1 }
 0x89c   : > { %v10977_v52 = vpop.f32.mrb[138].mxu1 }
 0x89d   : > { %v11264_v63 = vadd.f32 %v12566_v31, %v16609_v44  ;;  %v12567_v6 = vadd.f32 %v16266_v56, %v10977_v52  ;;  %v10979_v1 = vpop.f32.mrb[139].mxu1 }
 0x89f   : > { %v11267_v23 = vadd.f32 %v12567_v6, %v16610_v4  ;;  %v11410_v38 = vmax.f32 %v11264_v63, 0.0 }
 0x8a1   : > { %v11411_v17 = vmax.f32 %v11267_v23, 0.0  ;;  %v16617_v23 = vld [vmem:[#allocation32_spill] sm:$0xff] }
 0x8a2   : > { %v10982_v59 = vpop.f32.mrb[140].mxu1 }
 0x8a3   : > { %v12213_v3 = vpack.c.bf16 %v11411_v17, %v11410_v38  ;;  %v10984_v26 = vpop.f32.mrb[141].mxu1 }
 0x8a4   : > { %v10985_v49 = vpop.f32.mrb[142].mxu1 }
 0x8a5   : > { %12253 = vst [vmem:[%s16168_s29 + $0x90] sm:$0xff] %v12213_v3   ;;  %v10987_v11 = vpop.f32.mrb[143].mxu1  ;;  %v16618_v3 = vld [vmem:[#allocation33_spill] sm:$0xff] }
 0x8aa   : > { %v10990_v39 = vpop.f32.mrb[144].mxu1 }
 0x8ab   : > { %v12568_v30 = vadd.f32 %v16266_v56, %v10990_v39  ;;  %v10992_v27 = vpop.f32.mrb[145].mxu1 }
 0x8ac   : > { %v10993_v62 = vpop.f32.mrb[146].mxu1 }
 0x8ad   : > { %v11280_v47 = vadd.f32 %v12568_v30, %v16611_v35  ;;  %v12569_v40 = vadd.f32 %v16266_v56, %v10993_v62  ;;  %v10995_v46 = vpop.f32.mrb[147].mxu1 }
 0x8af   : > { %v11283_v55 = vadd.f32 %v12569_v40, %v16612_v58  ;;  %v11414_v32 = vmax.f32 %v11280_v47, 0.0 }
 0x8b1   : > { %v11415_v37 = vmax.f32 %v11283_v55, 0.0 }
 0x8b2   : > { %v10998_v12 = vpop.f32.mrb[148].mxu1 }
 0x8b3   : > { %v12218_v21 = vpack.c.bf16 %v11415_v37, %v11414_v32  ;;  %v11000_v53 = vpop.f32.mrb[149].mxu1 }
 0x8b4   : > { %v11001_v5 = vpop.f32.mrb[150].mxu1 }
 0x8b5   : > { %12254 = vst [vmem:[%s16168_s29 + $0xa0] sm:$0xff] %v12218_v21   ;;  %v11003_v9 = vpop.f32.mrb[151].mxu1 }
 0x8ba   : > { %v11006_v54 = vpop.f32.mrb[152].mxu1 }
 0x8bb   : > { %v12570_v28 = vadd.f32 %v16266_v56, %v11006_v54  ;;  %v11008_v22 = vpop.f32.mrb[153].mxu1 }
 0x8bc   : > { %v11009_v18 = vpop.f32.mrb[154].mxu1 }
 0x8bd   : > { %v11296_v0 = vadd.f32 %v12570_v28, %v16613_v20  ;;  %v12571_v2 = vadd.f32 %v16266_v56, %v11009_v18  ;;  %v11011_v34 = vpop.f32.mrb[155].mxu1 }
 0x8bf   : > { %v11299_v15 = vadd.f32 %v12571_v2, %v16614_v57  ;;  %v11418_v45 = vmax.f32 %v11296_v0, 0.0 }
 0x8c1   : > { %v11419_v14 = vmax.f32 %v11299_v15, 0.0 }
 0x8c2   : > { %v11014_v19 = vpop.f32.mrb[156].mxu1 }
 0x8c3   : > { %v12223_v16 = vpack.c.bf16 %v11419_v14, %v11418_v45  ;;  %v11016_v50 = vpop.f32.mrb[157].mxu1 }
 0x8c4   : > { %v11017_v8 = vpop.f32.mrb[158].mxu1 }
 0x8c5   : > { %12255 = vst [vmem:[%s16168_s29 + $0xb0] sm:$0xff] %v12223_v16   ;;  %v11019_v48 = vpop.f32.mrb[159].mxu1 }
 0x8ca   : > { %v11022_v10 = vpop.f32.mrb[160].mxu1 }
 0x8cb   : > { %v12572_v24 = vadd.f32 %v16266_v56, %v11022_v10  ;;  %v11024_v43 = vpop.f32.mrb[161].mxu1 }
 0x8cc   : > { %v11025_v33 = vpop.f32.mrb[162].mxu1 }
 0x8cd   : > { %v11312_v25 = vadd.f32 %v12572_v24, %v16615_v60  ;;  %v12573_v61 = vadd.f32 %v16266_v56, %v11025_v33  ;;  %v11027_v36 = vpop.f32.mrb[163].mxu1 }
 0x8cf   : > { %v11315_v29 = vadd.f32 %v12573_v61, %v16616_v51  ;;  %v11422_v7 = vmax.f32 %v11312_v25, 0.0 }
 0x8d1   : > { %v11423_v13 = vmax.f32 %v11315_v29, 0.0 }
 0x8d2   : > { %v11030_v42 = vpop.f32.mrb[164].mxu1 }
 0x8d3   : > { %v12228_v31 = vpack.c.bf16 %v11423_v13, %v11422_v7  ;;  %v11032_v41 = vpop.f32.mrb[165].mxu1 }
 0x8d4   : > { %v11033_v52 = vpop.f32.mrb[166].mxu1 }
 0x8d5   : > { %12256 = vst [vmem:[%s16168_s29 + $0xc0] sm:$0xff] %v12228_v31   ;;  %v11035_v44 = vpop.f32.mrb[167].mxu1 }
 0x8da   : > { %v11038_v63 = vpop.f32.mrb[168].mxu1 }
 0x8db   : > { %v12574_v6 = vadd.f32 %v16266_v56, %v11038_v63  ;;  %v11040_v1 = vpop.f32.mrb[169].mxu1 }
 0x8dc   : > { %v11041_v4 = vpop.f32.mrb[170].mxu1 }
 0x8dd   : > { %v11328_v38 = vadd.f32 %v12574_v6, %v16617_v23  ;;  %v12575_v17 = vadd.f32 %v16266_v56, %v11041_v4  ;;  %v11043_v59 = vpop.f32.mrb[171].mxu1 }
 0x8df   : > { %v11331_v26 = vadd.f32 %v12575_v17, %v16618_v3  ;;  %v11426_v49 = vmax.f32 %v11328_v38, 0.0 }
 0x8e1   : > { %v11427_v11 = vmax.f32 %v11331_v26, 0.0 }
 0x8e2   : > { %v11046_v39 = vpop.f32.mrb[172].mxu1 }
 0x8e3   : > { %v12233_v30 = vpack.c.bf16 %v11427_v11, %v11426_v49  ;;  %v11048_v27 = vpop.f32.mrb[173].mxu1 }
 0x8e4   : > { %v11049_v62 = vpop.f32.mrb[174].mxu1 }
 0x8e5   : > { %12257 = vst [vmem:[%s16168_s29 + $0xd0] sm:$0xff] %v12233_v30   ;;  %v11051_v35 = vpop.f32.mrb[175].mxu1 }
 0x8ea   : > { %v11054_v47 = vpop.f32.mrb[176].mxu1 }
 0x8eb   : > { %v11056_v40 = vpop.f32.mrb[177].mxu1  ;;  %v12576_v20 = vadd.f32 %v16266_v56, %v11054_v47 }
 0x8ec   : > { %v11057_v46 = vpop.f32.mrb[178].mxu1 }
 0x8ed   : > { %v11059_v58 = vpop.f32.mrb[179].mxu1  ;;  %v12577_v34 = vadd.f32 %v16266_v56, %v11057_v46 }
 0x8f2   : > { %v11062_v55 = vpop.f32.mrb[180].mxu1 }
 0x8f3   : > { %v11064_v32 = vpop.f32.mrb[181].mxu1 }
 0x8f4   : > { %v11065_v37 = vpop.f32.mrb[182].mxu1 }
 0x8f5   : > { %v11067_v12 = vpop.f32.mrb[183].mxu1 }
 0x8fa   : > { %v11070_v21 = vpop.f32.mrb[184].mxu1 }
 0x8fb   : > { %v11072_v53 = vpop.f32.mrb[185].mxu1  ;;  %v12578_v50 = vadd.f32 %v16266_v56, %v11070_v21 }
 0x8fc   : > { %v11073_v5 = vpop.f32.mrb[186].mxu1 }
 0x8fd   : > { %v11075_v9 = vpop.f32.mrb[187].mxu1  ;;  %v12579_v24 = vadd.f32 %v16266_v56, %v11073_v5 }
 0x902   : > { %v11078_v54 = vpop.f32.mrb[188].mxu1 }
 0x903   : > { %v11080_v28 = vpop.f32.mrb[189].mxu1 }
 0x904   : > { %v11081_v22 = vpop.f32.mrb[190].mxu1 }
 0x905   : > { %v11083_v18 = vpop.f32.mrb[191].mxu1 }
 0x90a   : > { %v12494_v0 = vpop.f32.mrb[192].mxu1 }
 0x90b   : > { %v11343_v2 = vpop.f32.mrb[193].mxu1 }
 0x90c   : > { %v11344_v57 = vadd.f32 %v12576_v20, %v11343_v2  ;;  %v12495_v15 = vpop.f32.mrb[194].mxu1 }
 0x90d   : > { %v11346_v45 = vpop.f32.mrb[195].mxu1 }
 0x90e   : > { %v11347_v14 = vadd.f32 %v12577_v34, %v11346_v45  ;;  %v11430_v19 = vmax.f32 %v11344_v57, 0.0 }
 0x910   : > { %v11431_v16 = vmax.f32 %v11347_v14, 0.0 }
 0x912   : > { %v12238_v8 = vpack.c.bf16 %v11431_v16, %v11430_v19  ;;  %v12498_v48 = vpop.f32.mrb[196].mxu1 }
 0x913   : > { %v11359_v10 = vpop.f32.mrb[197].mxu1 }
 0x914   : > { %12258 = vst [vmem:[%s16168_s29 + $0xe0] sm:$0xff] %v12238_v8   ;;  %v11360_v43 = vadd.f32 %v12578_v50, %v11359_v10  ;;  %v12499_v33 = vpop.f32.mrb[198].mxu1 }
 0x915   : > { %v11362_v60 = vpop.f32.mrb[199].mxu1 }
 0x916   : > { %v11363_v25 = vadd.f32 %v12579_v24, %v11362_v60  ;;  %v11434_v61 = vmax.f32 %v11360_v43, 0.0 }
 0x918   : > { %v11435_v36 = vmax.f32 %v11363_v25, 0.0 }
 0x91a   : > { %v12243_v51 = vpack.c.bf16 %v11435_v36, %v11434_v61 }
 0x91c   : > { %12259 = vst [vmem:[%s16168_s29 + $0xf0] sm:$0xff] %v12243_v51  }
 0x91d PF: > { %s15_s18 = sadd.s32 1, %s13183_s18  }
 0x91e   : > { %p12_p4 = scmp.ge.s32.totalorder %s15_s18, 4  }
 0x920   :  { %14 = sbr.rel (!%p12_p4) target bundleno = 1 (0x1), region = 70 }

</bundles_post_ra>
